<compile_context>
chip_gen: v7x
topology: tpu7x:2x2x1
jax: 0.10.0
libtpu: 0.0.40
codegen_flags: <defaults>
</compile_context>

<pallas_src>
import math
import functools

import jax
import jax.numpy as jnp
from jax.experimental import pallas as pl
from jax.experimental.pallas import tpu as pltpu

# ---------------- model hyper-parameters (small, deterministic) ----------------
VOCAB = 16
D_MODEL = 32
D_FF = 64
H = 4
D_K = D_MODEL // H
N_LAYERS = 2
EPS = 1e-6
MAX_LEN = 64
NEG_INF = -1e9


# ------------------------- in-kernel building blocks ---------------------------
def _layer_norm(x2, g_ref, b_ref):
    """Annotated Transformer LayerNorm: unbiased std (ddof=1), (std + eps) denominator."""
    mean = jnp.mean(x2, axis=-1, keepdims=True)
    var = jnp.sum((x2 - mean) ** 2, axis=-1, keepdims=True) / (x2.shape[-1] - 1)
    std = jnp.sqrt(var)
    return g_ref[...] * (x2 - mean) / (std + EPS) + b_ref[...]


def _mha_core(q2, k2, v2, mask3, wo_ref, bo_ref, B, Lq, Lk):
    """Multi-head scaled-dot-product attention, all batch rows in one step.

    q2:(B*Lq,D)  k2,v2:(B*Lk,D)  mask3:(B,1|Lq,Lk)  wo:(D,D)  bo:(1,D)  ->  (B*Lq,D)

    Heads are taken as static lane slices of the 32-wide feature dim (free — D fits one
    (8,128) tile).  The head-concat is folded into the output projection:
        out = sum_h softmax(Qh Kh^T / sqrt(dk)) Vh @ Wo[h*dk:(h+1)*dk, :]
    """
    q3 = q2.reshape(B, Lq, D_MODEL)
    k3 = k2.reshape(B, Lk, D_MODEL)
    v3 = v2.reshape(B, Lk, D_MODEL)
    scale = 1.0 / math.sqrt(D_K)
    kill = (mask3 == 0.0)                                   # hoisted out of the head loop
    acc = jnp.zeros((B * Lq, D_MODEL), jnp.float32)
    for h in range(H):
        sl = slice(h * D_K, (h + 1) * D_K)
        s = jnp.einsum("bqd,bkd->bqk", q3[:, :, sl], k3[:, :, sl],
                       preferred_element_type=jnp.float32) * scale
        s = jnp.where(kill, NEG_INF, s)                     # masked_fill(mask == 0, -1e9)
        s = s - jnp.max(s, axis=-1, keepdims=True)
        e = jnp.exp(s)
        p = e * pl.reciprocal(jnp.sum(e, axis=-1, keepdims=True), approx=True)
        oh = jnp.einsum("bqk,bkd->bqd", p, v3[:, :, sl],
                        preferred_element_type=jnp.float32)
        acc = acc + jnp.dot(oh.reshape(B * Lq, D_K), wo_ref[sl, :],
                            preferred_element_type=jnp.float32)
    return acc + bo_ref[...]


def _self_attention(x2, lp, prefix, mask3, B, L):
    """Fused QKV projection (D, 3D) then batched attention."""
    qkv = jnp.dot(x2, lp[prefix + "wqkv"][...],
                  preferred_element_type=jnp.float32) + lp[prefix + "bqkv"][...]
    q2 = qkv[:, :D_MODEL]
    k2 = qkv[:, D_MODEL:2 * D_MODEL]
    v2 = qkv[:, 2 * D_MODEL:]
    return _mha_core(q2, k2, v2, mask3, lp[prefix + "wo"], lp[prefix + "bo"], B, L, L)


def _cross_attention(x2, mem2, lp, mask3, B, Lq, Lk):
    """Q from decoder stream, fused KV (D, 2D) from encoder memory."""
    q2 = jnp.dot(x2, lp["src_wq"][...],
                 preferred_element_type=jnp.float32) + lp["src_bq"][...]
    kv = jnp.dot(mem2, lp["src_wkv"][...],
                 preferred_element_type=jnp.float32) + lp["src_bkv"][...]
    k2 = kv[:, :D_MODEL]
    v2 = kv[:, D_MODEL:]
    return _mha_core(q2, k2, v2, mask3, lp["src_wo"], lp["src_bo"], B, Lq, Lk)


def _ffn(x2, lp):
    h = jnp.maximum(
        jnp.dot(x2, lp["w1"][...], preferred_element_type=jnp.float32) + lp["b1"][...], 0.0)
    return jnp.dot(h, lp["w2"][...], preferred_element_type=jnp.float32) + lp["b2"][...]


# ------------------------------ the fused kernel --------------------------------
def _encoder_decoder_kernel(*refs, treedef, B, Ls, Lt):
    out_ref = refs[-1]
    src_ref, tgt_ref, smask_ref, tmask_ref = refs[:4]
    # Rebuild the weight pytree as a tree of VMEM refs; each weight is loaded lazily at
    # its (single) use site so live ranges stay short.
    w = jax.tree_util.tree_unflatten(treedef, list(refs[4:-1]))

    smask = smask_ref[...]                        # (B, 1, Ls)   1.0 = attend
    tmask = tmask_ref[...]                        # (B, Lt, Lt)  causal
    x2 = src_ref[...].reshape(B * Ls, D_MODEL)    # embedded + PE source
    y2 = tgt_ref[...].reshape(B * Lt, D_MODEL)    # embedded + PE target

    # ------------------------------- encoder -------------------------------
    for lp in w["enc_layers"]:
        nx = _layer_norm(x2, lp["ln1_g"], lp["ln1_b"])
        x2 = x2 + _self_attention(nx, lp, "", smask, B, Ls)
        nx = _layer_norm(x2, lp["ln2_g"], lp["ln2_b"])
        x2 = x2 + _ffn(nx, lp)
    mem2 = _layer_norm(x2, w["enc_ln_g"], w["enc_ln_b"])

    # ------------------------------- decoder -------------------------------
    for lp in w["dec_layers"]:
        ny = _layer_norm(y2, lp["ln1_g"], lp["ln1_b"])
        y2 = y2 + _self_attention(ny, lp, "self_", tmask, B, Lt)
        ny = _layer_norm(y2, lp["ln2_g"], lp["ln2_b"])
        y2 = y2 + _cross_attention(ny, mem2, lp, smask, B, Lt, Ls)
        ny = _layer_norm(y2, lp["ln3_g"], lp["ln3_b"])
        y2 = y2 + _ffn(ny, lp)
    y2 = _layer_norm(y2, w["dec_ln_g"], w["dec_ln_b"])

    # Single HBM store of the final activations.
    out_ref[...] = y2.reshape(B, Lt, D_MODEL).astype(out_ref.dtype)


# ---------------------------------- wrapper --------------------------------------
def positional_encoding(max_len, d_model):
    pos = jnp.arange(max_len, dtype=jnp.float32)[:, None]
    div = jnp.exp(jnp.arange(0, d_model, 2, dtype=jnp.float32)
                  * -(math.log(10000.0) / d_model))
    pe = jnp.zeros((max_len, d_model), jnp.float32)
    pe = pe.at[:, 0::2].set(jnp.sin(pos * div))
    pe = pe.at[:, 1::2].set(jnp.cos(pos * div))
    return pe


def encoder_decoder_forward(params, src, tgt, src_mask, tgt_mask):
    """EncoderDecoder.forward: decode(encode(src, src_mask), src_mask, tgt, tgt_mask)."""
    B, Ls = src.shape
    _, Lt = tgt.shape
    pe = params["pe"]
    scale = math.sqrt(D_MODEL)
    # Embeddings(x) * sqrt(d_model) + PositionalEncoding (dropout = identity in eval);
    # token gather stays in the wrapper (trivial 2 KB lookup — per perf review).
    src_x = jnp.take(params["src_lut"], src, axis=0) * scale + pe[None, :Ls, :]
    tgt_x = jnp.take(params["tgt_lut"], tgt, axis=0) * scale + pe[None, :Lt, :]

    flat_w, treedef = jax.tree_util.tree_flatten(params["weights"])
    kernel = functools.partial(_encoder_decoder_kernel,
                               treedef=treedef, B=B, Ls=Ls, Lt=Lt)
    # No grid: one kernel invocation; every input (weights + activations + masks) is a
    # whole-array VMEM block.  Total VMEM footprint < 1 MiB — fits v5e/v6e/v7x with margin.
    out = pl.pallas_call(
        kernel,
        out_shape=jax.ShapeDtypeStruct((B, Lt, D_MODEL), jnp.float32),
        compiler_params=pltpu.CompilerParams(vmem_limit_bytes=32 * 1024 * 1024),
    )(src_x.astype(jnp.float32), tgt_x.astype(jnp.float32),
      src_mask.astype(jnp.float32), tgt_mask.astype(jnp.float32), *flat_w)
    return out


# ------------------------------- parameter init ---------------------------------
def _init_linear(key, din, dout):
    k1, k2 = jax.random.split(key)
    lim = 1.0 / math.sqrt(din)
    w = jax.random.uniform(k1, (din, dout), jnp.float32, -lim, lim)
    b = jax.random.uniform(k2, (1, dout), jnp.float32, -lim, lim)
    return w, b


def _init_mha_fused(key):
    kq, kk, kv, ko = jax.random.split(key, 4)
    wq, bq = _init_linear(kq, D_MODEL, D_MODEL)
    wk, bk = _init_linear(kk, D_MODEL, D_MODEL)
    wv, bv = _init_linear(kv, D_MODEL, D_MODEL)
    wo, bo = _init_linear(ko, D_MODEL, D_MODEL)
    return (jnp.concatenate([wq, wk, wv], axis=1),
            jnp.concatenate([bq, bk, bv], axis=1), wo, bo)


def _init_ff(key):
    k1, k2 = jax.random.split(key)
    w1, b1 = _init_linear(k1, D_MODEL, D_FF)
    w2, b2 = _init_linear(k2, D_FF, D_MODEL)
    return {"w1": w1, "b1": b1, "w2": w2, "b2": b2}


def _ln_params():
    return jnp.ones((1, D_MODEL), jnp.float32), jnp.zeros((1, D_MODEL), jnp.float32)


def _init_enc_layer(key):
    k1, k2 = jax.random.split(key)
    wqkv, bqkv, wo, bo = _init_mha_fused(k1)
    p = {"wqkv": wqkv, "bqkv": bqkv, "wo": wo, "bo": bo}
    p.update(_init_ff(k2))
    p["ln1_g"], p["ln1_b"] = _ln_params()
    p["ln2_g"], p["ln2_b"] = _ln_params()
    return p


def _init_dec_layer(key):
    k1, k2, k3 = jax.random.split(key, 3)
    swqkv, sbqkv, swo, sbo = _init_mha_fused(k1)
    cwqkv, cbqkv, cwo, cbo = _init_mha_fused(k2)
    p = {"self_wqkv": swqkv, "self_bqkv": sbqkv, "self_wo": swo, "self_bo": sbo,
         "src_wq": cwqkv[:, :D_MODEL], "src_bq": cbqkv[:, :D_MODEL],
         "src_wkv": cwqkv[:, D_MODEL:], "src_bkv": cbqkv[:, D_MODEL:],
         "src_wo": cwo, "src_bo": cbo}
    p.update(_init_ff(k3))
    p["ln1_g"], p["ln1_b"] = _ln_params()
    p["ln2_g"], p["ln2_b"] = _ln_params()
    p["ln3_g"], p["ln3_b"] = _ln_params()
    return p


def init_params(key):
    ks = jax.random.split(key, 2 * N_LAYERS + 2)
    eg, eb = _ln_params()
    dg, db = _ln_params()
    weights = {
        "enc_layers": [_init_enc_layer(ks[i]) for i in range(N_LAYERS)],
        "dec_layers": [_init_dec_layer(ks[N_LAYERS + i]) for i in range(N_LAYERS)],
        "enc_ln_g": eg, "enc_ln_b": eb,
        "dec_ln_g": dg, "dec_ln_b": db,
    }
    return {
        "weights": weights,
        "src_lut": 0.1 * jax.random.normal(ks[-2], (VOCAB, D_MODEL), jnp.float32),
        "tgt_lut": 0.1 * jax.random.normal(ks[-1], (VOCAB, D_MODEL), jnp.float32),
        "pe": positional_encoding(MAX_LEN, D_MODEL),
    }
    # TODO(synk): generator (final Linear + log_softmax) is constructed in __init__ but is
    # never used by forward(), so it is intentionally not instantiated here.


# ------------------------------------ main ---------------------------------------
if __name__ == "__main__":
    key = jax.random.PRNGKey(0)
    pkey, skey, tkey = jax.random.split(key, 3)

    params = init_params(pkey)

    B, LS, LT = 2, 8, 8
    src = jax.random.randint(skey, (B, LS), 1, VOCAB)            # token ids (no pad)
    tgt = jax.random.randint(tkey, (B, LT), 1, VOCAB)
    src_mask = jnp.ones((B, 1, LS), jnp.float32)                 # (B, 1, Ls)
    subsequent = jnp.tril(jnp.ones((LT, LT), jnp.float32))       # causal mask
    tgt_mask = jnp.broadcast_to(subsequent[None], (B, LT, LT))   # (B, Lt, Lt)

    fwd = jax.jit(encoder_decoder_forward)
    out = jax.block_until_ready(fwd(params, src, tgt, src_mask, tgt_mask))

    assert out.shape == (B, LT, D_MODEL), out.shape
    assert bool(jnp.all(jnp.isfinite(out)))
    print("KERNEL_OK")
</pallas_src>

<mosaic_0001>
module attributes {stable_mosaic.version = 11 : i64} {
  func.func @_encoder_decoder_kernel(%arg0: memref<2x8x32xf32, #tpu.memory_space<vmem>>, %arg1: memref<2x8x32xf32, #tpu.memory_space<vmem>>, %arg2: memref<2x1x8xf32, #tpu.memory_space<vmem>>, %arg3: memref<2x8x8xf32, #tpu.memory_space<vmem>>, %arg4: memref<1x64xf32, #tpu.memory_space<vmem>>, %arg5: memref<1x32xf32, #tpu.memory_space<vmem>>, %arg6: memref<1x32xf32, #tpu.memory_space<vmem>>, %arg7: memref<1x32xf32, #tpu.memory_space<vmem>>, %arg8: memref<1x32xf32, #tpu.memory_space<vmem>>, %arg9: memref<1x32xf32, #tpu.memory_space<vmem>>, %arg10: memref<1x32xf32, #tpu.memory_space<vmem>>, %arg11: memref<1x32xf32, #tpu.memory_space<vmem>>, %arg12: memref<1x32xf32, #tpu.memory_space<vmem>>, %arg13: memref<1x96xf32, #tpu.memory_space<vmem>>, %arg14: memref<32x32xf32, #tpu.memory_space<vmem>>, %arg15: memref<32x96xf32, #tpu.memory_space<vmem>>, %arg16: memref<1x64xf32, #tpu.memory_space<vmem>>, %arg17: memref<1x32xf32, #tpu.memory_space<vmem>>, %arg18: memref<1x32xf32, #tpu.memory_space<vmem>>, %arg19: memref<32x64xf32, #tpu.memory_space<vmem>>, %arg20: memref<32x32xf32, #tpu.memory_space<vmem>>, %arg21: memref<32x32xf32, #tpu.memory_space<vmem>>, %arg22: memref<32x64xf32, #tpu.memory_space<vmem>>, %arg23: memref<64x32xf32, #tpu.memory_space<vmem>>, %arg24: memref<1x64xf32, #tpu.memory_space<vmem>>, %arg25: memref<1x32xf32, #tpu.memory_space<vmem>>, %arg26: memref<1x32xf32, #tpu.memory_space<vmem>>, %arg27: memref<1x32xf32, #tpu.memory_space<vmem>>, %arg28: memref<1x32xf32, #tpu.memory_space<vmem>>, %arg29: memref<1x32xf32, #tpu.memory_space<vmem>>, %arg30: memref<1x32xf32, #tpu.memory_space<vmem>>, %arg31: memref<1x32xf32, #tpu.memory_space<vmem>>, %arg32: memref<1x32xf32, #tpu.memory_space<vmem>>, %arg33: memref<1x96xf32, #tpu.memory_space<vmem>>, %arg34: memref<32x32xf32, #tpu.memory_space<vmem>>, %arg35: memref<32x96xf32, #tpu.memory_space<vmem>>, %arg36: memref<1x64xf32, #tpu.memory_space<vmem>>, %arg37: memref<1x32xf32, #tpu.memory_space<vmem>>, %arg38: memref<1x32xf32, #tpu.memory_space<vmem>>, %arg39: memref<32x64xf32, #tpu.memory_space<vmem>>, %arg40: memref<32x32xf32, #tpu.memory_space<vmem>>, %arg41: memref<32x32xf32, #tpu.memory_space<vmem>>, %arg42: memref<32x64xf32, #tpu.memory_space<vmem>>, %arg43: memref<64x32xf32, #tpu.memory_space<vmem>>, %arg44: memref<1x32xf32, #tpu.memory_space<vmem>>, %arg45: memref<1x32xf32, #tpu.memory_space<vmem>>, %arg46: memref<1x64xf32, #tpu.memory_space<vmem>>, %arg47: memref<1x32xf32, #tpu.memory_space<vmem>>, %arg48: memref<1x32xf32, #tpu.memory_space<vmem>>, %arg49: memref<1x96xf32, #tpu.memory_space<vmem>>, %arg50: memref<1x32xf32, #tpu.memory_space<vmem>>, %arg51: memref<1x32xf32, #tpu.memory_space<vmem>>, %arg52: memref<1x32xf32, #tpu.memory_space<vmem>>, %arg53: memref<1x32xf32, #tpu.memory_space<vmem>>, %arg54: memref<32x64xf32, #tpu.memory_space<vmem>>, %arg55: memref<64x32xf32, #tpu.memory_space<vmem>>, %arg56: memref<32x32xf32, #tpu.memory_space<vmem>>, %arg57: memref<32x96xf32, #tpu.memory_space<vmem>>, %arg58: memref<1x64xf32, #tpu.memory_space<vmem>>, %arg59: memref<1x32xf32, #tpu.memory_space<vmem>>, %arg60: memref<1x32xf32, #tpu.memory_space<vmem>>, %arg61: memref<1x96xf32, #tpu.memory_space<vmem>>, %arg62: memref<1x32xf32, #tpu.memory_space<vmem>>, %arg63: memref<1x32xf32, #tpu.memory_space<vmem>>, %arg64: memref<1x32xf32, #tpu.memory_space<vmem>>, %arg65: memref<1x32xf32, #tpu.memory_space<vmem>>, %arg66: memref<32x64xf32, #tpu.memory_space<vmem>>, %arg67: memref<64x32xf32, #tpu.memory_space<vmem>>, %arg68: memref<32x32xf32, #tpu.memory_space<vmem>>, %arg69: memref<32x96xf32, #tpu.memory_space<vmem>>, %arg70: memref<1x32xf32, #tpu.memory_space<vmem>>, %arg71: memref<1x32xf32, #tpu.memory_space<vmem>>, %arg72: memref<2x8x32xf32, #tpu.memory_space<vmem>>) attributes {dimension_semantics = [], scalar_prefetch = 0 : i64, scratch_operands = 0 : i64, tpu.core_type = #tpu.core_type<tc>} {
    %c0 = arith.constant 0 : index
    %c0_0 = arith.constant 0 : index
    %c0_1 = arith.constant 0 : index
    %0 = vector.load %arg2[%c0, %c0_0, %c0_1] : memref<2x1x8xf32, #tpu.memory_space<vmem>>, vector<2x1x8xf32>
    %c0_2 = arith.constant 0 : index
    %c0_3 = arith.constant 0 : index
    %c0_4 = arith.constant 0 : index
    %1 = vector.load %arg3[%c0_2, %c0_3, %c0_4] : memref<2x8x8xf32, #tpu.memory_space<vmem>>, vector<2x8x8xf32>
    %c0_5 = arith.constant 0 : index
    %c0_6 = arith.constant 0 : index
    %c0_7 = arith.constant 0 : index
    %2 = vector.load %arg0[%c0_5, %c0_6, %c0_7] : memref<2x8x32xf32, #tpu.memory_space<vmem>>, vector<2x8x32xf32>
    %3 = vector.shape_cast %2 : vector<2x8x32xf32> to vector<16x32xf32>
    %c0_8 = arith.constant 0 : index
    %c0_9 = arith.constant 0 : index
    %c0_10 = arith.constant 0 : index
    %4 = vector.load %arg1[%c0_8, %c0_9, %c0_10] : memref<2x8x32xf32, #tpu.memory_space<vmem>>, vector<2x8x32xf32>
    %5 = vector.shape_cast %4 : vector<2x8x32xf32> to vector<16x32xf32>
    %cst = arith.constant dense<0.000000e+00> : vector<16xf32>
    %6 = vector.multi_reduction <add>, %3, %cst [1] : vector<16x32xf32> to vector<16xf32>
    %7 = vector.shape_cast %6 : vector<16xf32> to vector<16x1xf32>
    %cst_11 = arith.constant 3.200000e+01 : f32
    %8 = vector.broadcast %cst_11 : f32 to vector<16x1xf32>
    %9 = arith.divf %7, %8 : vector<16x1xf32>
    %10 = vector.broadcast %9 : vector<16x1xf32> to vector<16x32xf32>
    %11 = arith.subf %3, %10 : vector<16x32xf32>
    %12 = arith.mulf %11, %11 : vector<16x32xf32>
    %cst_12 = arith.constant dense<0.000000e+00> : vector<16xf32>
    %13 = vector.multi_reduction <add>, %12, %cst_12 [1] : vector<16x32xf32> to vector<16xf32>
    %14 = vector.shape_cast %13 : vector<16xf32> to vector<16x1xf32>
    %cst_13 = arith.constant 3.100000e+01 : f32
    %15 = vector.broadcast %cst_13 : f32 to vector<16x1xf32>
    %16 = arith.divf %14, %15 : vector<16x1xf32>
    %17 = math.sqrt %16 : vector<16x1xf32>
    %c0_14 = arith.constant 0 : index
    %c0_15 = arith.constant 0 : index
    %18 = vector.load %arg51[%c0_14, %c0_15] : memref<1x32xf32, #tpu.memory_space<vmem>>, vector<1x32xf32>
    %19 = vector.broadcast %9 : vector<16x1xf32> to vector<16x32xf32>
    %20 = arith.subf %3, %19 : vector<16x32xf32>
    %21 = vector.broadcast %18 : vector<1x32xf32> to vector<16x32xf32>
    %22 = arith.mulf %21, %20 : vector<16x32xf32>
    %cst_16 = arith.constant 9.99999997E-7 : f32
    %23 = vector.broadcast %cst_16 : f32 to vector<16x1xf32>
    %24 = arith.addf %17, %23 : vector<16x1xf32>
    %25 = vector.broadcast %24 : vector<16x1xf32> to vector<16x32xf32>
    %26 = arith.divf %22, %25 : vector<16x32xf32>
    %c0_17 = arith.constant 0 : index
    %c0_18 = arith.constant 0 : index
    %27 = vector.load %arg50[%c0_17, %c0_18] : memref<1x32xf32, #tpu.memory_space<vmem>>, vector<1x32xf32>
    %28 = vector.broadcast %27 : vector<1x32xf32> to vector<16x32xf32>
    %29 = arith.addf %26, %28 : vector<16x32xf32>
    %c0_19 = arith.constant 0 : index
    %c0_20 = arith.constant 0 : index
    %30 = vector.load %arg57[%c0_19, %c0_20] : memref<32x96xf32, #tpu.memory_space<vmem>>, vector<32x96xf32>
    %cst_21 = arith.constant dense<0.000000e+00> : vector<16x96xf32>
    %31 = tpu.matmul %29, %30, %cst_21 {dimension_numbers = #tpu.dot_dimension_numbers<[1], [0], [0], [1], [0, 0, 1, 1], [], []>} : vector<16x32xf32>, vector<32x96xf32>, vector<16x96xf32> -> vector<16x96xf32>
    %c0_22 = arith.constant 0 : index
    %c0_23 = arith.constant 0 : index
    %32 = vector.load %arg49[%c0_22, %c0_23] : memref<1x96xf32, #tpu.memory_space<vmem>>, vector<1x96xf32>
    %33 = vector.broadcast %32 : vector<1x96xf32> to vector<16x96xf32>
    %34 = arith.addf %31, %33 : vector<16x96xf32>
    %35 = vector.extract_strided_slice %34 {offsets = [0, 0], sizes = [16, 32], strides = [1, 1]} : vector<16x96xf32> to vector<16x32xf32>
    %36 = vector.extract_strided_slice %34 {offsets = [0, 32], sizes = [16, 32], strides = [1, 1]} : vector<16x96xf32> to vector<16x32xf32>
    %37 = vector.extract_strided_slice %34 {offsets = [0, 64], sizes = [16, 32], strides = [1, 1]} : vector<16x96xf32> to vector<16x32xf32>
    %38 = vector.shape_cast %35 : vector<16x32xf32> to vector<2x8x32xf32>
    %39 = vector.shape_cast %36 : vector<16x32xf32> to vector<2x8x32xf32>
    %40 = vector.shape_cast %37 : vector<16x32xf32> to vector<2x8x32xf32>
    %cst_24 = arith.constant 0.000000e+00 : f32
    %41 = vector.broadcast %cst_24 : f32 to vector<2x1x8xf32>
    %42 = arith.cmpf oeq, %0, %41 : vector<2x1x8xf32>
    %cst_25 = arith.constant 0.000000e+00 : f32
    %43 = vector.broadcast %cst_25 : f32 to vector<16x32xf32>
    %44 = vector.extract_strided_slice %38 {offsets = [0, 0, 0], sizes = [2, 8, 8], strides = [1, 1, 1]} : vector<2x8x32xf32> to vector<2x8x8xf32>
    %45 = vector.extract_strided_slice %39 {offsets = [0, 0, 0], sizes = [2, 8, 8], strides = [1, 1, 1]} : vector<2x8x32xf32> to vector<2x8x8xf32>
    "tpu.trace_start"() <{level = 10 : i32, message = "bqd,bkd->bqk"}> : () -> ()
    %cst_26 = arith.constant dense<0.000000e+00> : vector<2x8x8xf32>
    %46 = tpu.matmul %44, %45, %cst_26 {dimension_numbers = #tpu.dot_dimension_numbers<[2], [2], [1], [1], [0, 0, 0, 1, 1, 1], [0], [0]>} : vector<2x8x8xf32>, vector<2x8x8xf32>, vector<2x8x8xf32> -> vector<2x8x8xf32>
    "tpu.trace_stop"() : () -> ()
    %cst_27 = arith.constant 0.353553385 : f32
    %47 = vector.broadcast %cst_27 : f32 to vector<2x8x8xf32>
    %48 = arith.mulf %46, %47 : vector<2x8x8xf32>
    %cst_28 = arith.constant -1.000000e+09 : f32
    %49 = vector.shape_cast %42 : vector<2x1x8xi1> to vector<2x1x8xi1>
    %50 = vector.broadcast %49 : vector<2x1x8xi1> to vector<2x8x8xi1>
    %51 = vector.broadcast %cst_28 : f32 to vector<2x8x8xf32>
    %52 = arith.select %50, %51, %48 : vector<2x8x8xi1>, vector<2x8x8xf32>
    %cst_29 = arith.constant dense<0xFF800000> : vector<2x8xf32>
    %53 = vector.multi_reduction <maximumf>, %52, %cst_29 [2] : vector<2x8x8xf32> to vector<2x8xf32>
    %54 = vector.shape_cast %53 : vector<2x8xf32> to vector<2x8x1xf32>
    %55 = vector.broadcast %54 : vector<2x8x1xf32> to vector<2x8x8xf32>
    %56 = arith.subf %52, %55 : vector<2x8x8xf32>
    %57 = math.exp %56 : vector<2x8x8xf32>
    %cst_30 = arith.constant dense<0.000000e+00> : vector<2x8xf32>
    %58 = vector.multi_reduction <add>, %57, %cst_30 [2] : vector<2x8x8xf32> to vector<2x8xf32>
    %59 = vector.shape_cast %58 : vector<2x8xf32> to vector<2x8x1xf32>
    %60 = tpu.reciprocal %59 {approx = true} : vector<2x8x1xf32> -> vector<2x8x1xf32>
    %61 = vector.broadcast %60 : vector<2x8x1xf32> to vector<2x8x8xf32>
    %62 = arith.mulf %57, %61 : vector<2x8x8xf32>
    %63 = vector.extract_strided_slice %40 {offsets = [0, 0, 0], sizes = [2, 8, 8], strides = [1, 1, 1]} : vector<2x8x32xf32> to vector<2x8x8xf32>
    "tpu.trace_start"() <{level = 10 : i32, message = "bqk,bkd->bqd"}> : () -> ()
    %cst_31 = arith.constant dense<0.000000e+00> : vector<2x8x8xf32>
    %64 = tpu.matmul %62, %63, %cst_31 {dimension_numbers = #tpu.dot_dimension_numbers<[2], [1], [1], [2], [0, 0, 0, 1, 1, 2], [0], [0]>} : vector<2x8x8xf32>, vector<2x8x8xf32>, vector<2x8x8xf32> -> vector<2x8x8xf32>
    "tpu.trace_stop"() : () -> ()
    %65 = vector.shape_cast %64 : vector<2x8x8xf32> to vector<16x8xf32>
    %c0_32 = arith.constant 0 : index
    %c0_33 = arith.constant 0 : index
    %66 = vector.load %arg56[%c0_32, %c0_33] : memref<32x32xf32, #tpu.memory_space<vmem>>, vector<8x32xf32>
    %cst_34 = arith.constant dense<0.000000e+00> : vector<16x32xf32>
    %67 = tpu.matmul %65, %66, %cst_34 {dimension_numbers = #tpu.dot_dimension_numbers<[1], [0], [0], [1], [0, 0, 1, 1], [], []>} : vector<16x8xf32>, vector<8x32xf32>, vector<16x32xf32> -> vector<16x32xf32>
    %68 = arith.addf %43, %67 : vector<16x32xf32>
    %69 = vector.extract_strided_slice %38 {offsets = [0, 0, 8], sizes = [2, 8, 8], strides = [1, 1, 1]} : vector<2x8x32xf32> to vector<2x8x8xf32>
    %70 = vector.extract_strided_slice %39 {offsets = [0, 0, 8], sizes = [2, 8, 8], strides = [1, 1, 1]} : vector<2x8x32xf32> to vector<2x8x8xf32>
    "tpu.trace_start"() <{level = 10 : i32, message = "bqd,bkd->bqk"}> : () -> ()
    %cst_35 = arith.constant dense<0.000000e+00> : vector<2x8x8xf32>
    %71 = tpu.matmul %69, %70, %cst_35 {dimension_numbers = #tpu.dot_dimension_numbers<[2], [2], [1], [1], [0, 0, 0, 1, 1, 1], [0], [0]>} : vector<2x8x8xf32>, vector<2x8x8xf32>, vector<2x8x8xf32> -> vector<2x8x8xf32>
    "tpu.trace_stop"() : () -> ()
    %cst_36 = arith.constant 0.353553385 : f32
    %72 = vector.broadcast %cst_36 : f32 to vector<2x8x8xf32>
    %73 = arith.mulf %71, %72 : vector<2x8x8xf32>
    %cst_37 = arith.constant -1.000000e+09 : f32
    %74 = vector.shape_cast %42 : vector<2x1x8xi1> to vector<2x1x8xi1>
    %75 = vector.broadcast %74 : vector<2x1x8xi1> to vector<2x8x8xi1>
    %76 = vector.broadcast %cst_37 : f32 to vector<2x8x8xf32>
    %77 = arith.select %75, %76, %73 : vector<2x8x8xi1>, vector<2x8x8xf32>
    %cst_38 = arith.constant dense<0xFF800000> : vector<2x8xf32>
    %78 = vector.multi_reduction <maximumf>, %77, %cst_38 [2] : vector<2x8x8xf32> to vector<2x8xf32>
    %79 = vector.shape_cast %78 : vector<2x8xf32> to vector<2x8x1xf32>
    %80 = vector.broadcast %79 : vector<2x8x1xf32> to vector<2x8x8xf32>
    %81 = arith.subf %77, %80 : vector<2x8x8xf32>
    %82 = math.exp %81 : vector<2x8x8xf32>
    %cst_39 = arith.constant dense<0.000000e+00> : vector<2x8xf32>
    %83 = vector.multi_reduction <add>, %82, %cst_39 [2] : vector<2x8x8xf32> to vector<2x8xf32>
    %84 = vector.shape_cast %83 : vector<2x8xf32> to vector<2x8x1xf32>
    %85 = tpu.reciprocal %84 {approx = true} : vector<2x8x1xf32> -> vector<2x8x1xf32>
    %86 = vector.broadcast %85 : vector<2x8x1xf32> to vector<2x8x8xf32>
    %87 = arith.mulf %82, %86 : vector<2x8x8xf32>
    %88 = vector.extract_strided_slice %40 {offsets = [0, 0, 8], sizes = [2, 8, 8], strides = [1, 1, 1]} : vector<2x8x32xf32> to vector<2x8x8xf32>
    "tpu.trace_start"() <{level = 10 : i32, message = "bqk,bkd->bqd"}> : () -> ()
    %cst_40 = arith.constant dense<0.000000e+00> : vector<2x8x8xf32>
    %89 = tpu.matmul %87, %88, %cst_40 {dimension_numbers = #tpu.dot_dimension_numbers<[2], [1], [1], [2], [0, 0, 0, 1, 1, 2], [0], [0]>} : vector<2x8x8xf32>, vector<2x8x8xf32>, vector<2x8x8xf32> -> vector<2x8x8xf32>
    "tpu.trace_stop"() : () -> ()
    %90 = vector.shape_cast %89 : vector<2x8x8xf32> to vector<16x8xf32>
    %c8 = arith.constant 8 : index
    %c0_41 = arith.constant 0 : index
    %91 = vector.load %arg56[%c8, %c0_41] : memref<32x32xf32, #tpu.memory_space<vmem>>, vector<8x32xf32>
    %cst_42 = arith.constant dense<0.000000e+00> : vector<16x32xf32>
    %92 = tpu.matmul %90, %91, %cst_42 {dimension_numbers = #tpu.dot_dimension_numbers<[1], [0], [0], [1], [0, 0, 1, 1], [], []>} : vector<16x8xf32>, vector<8x32xf32>, vector<16x32xf32> -> vector<16x32xf32>
    %93 = arith.addf %68, %92 : vector<16x32xf32>
    %94 = vector.extract_strided_slice %38 {offsets = [0, 0, 16], sizes = [2, 8, 8], strides = [1, 1, 1]} : vector<2x8x32xf32> to vector<2x8x8xf32>
    %95 = vector.extract_strided_slice %39 {offsets = [0, 0, 16], sizes = [2, 8, 8], strides = [1, 1, 1]} : vector<2x8x32xf32> to vector<2x8x8xf32>
    "tpu.trace_start"() <{level = 10 : i32, message = "bqd,bkd->bqk"}> : () -> ()
    %cst_43 = arith.constant dense<0.000000e+00> : vector<2x8x8xf32>
    %96 = tpu.matmul %94, %95, %cst_43 {dimension_numbers = #tpu.dot_dimension_numbers<[2], [2], [1], [1], [0, 0, 0, 1, 1, 1], [0], [0]>} : vector<2x8x8xf32>, vector<2x8x8xf32>, vector<2x8x8xf32> -> vector<2x8x8xf32>
    "tpu.trace_stop"() : () -> ()
    %cst_44 = arith.constant 0.353553385 : f32
    %97 = vector.broadcast %cst_44 : f32 to vector<2x8x8xf32>
    %98 = arith.mulf %96, %97 : vector<2x8x8xf32>
    %cst_45 = arith.constant -1.000000e+09 : f32
    %99 = vector.shape_cast %42 : vector<2x1x8xi1> to vector<2x1x8xi1>
    %100 = vector.broadcast %99 : vector<2x1x8xi1> to vector<2x8x8xi1>
    %101 = vector.broadcast %cst_45 : f32 to vector<2x8x8xf32>
    %102 = arith.select %100, %101, %98 : vector<2x8x8xi1>, vector<2x8x8xf32>
    %cst_46 = arith.constant dense<0xFF800000> : vector<2x8xf32>
    %103 = vector.multi_reduction <maximumf>, %102, %cst_46 [2] : vector<2x8x8xf32> to vector<2x8xf32>
    %104 = vector.shape_cast %103 : vector<2x8xf32> to vector<2x8x1xf32>
    %105 = vector.broadcast %104 : vector<2x8x1xf32> to vector<2x8x8xf32>
    %106 = arith.subf %102, %105 : vector<2x8x8xf32>
    %107 = math.exp %106 : vector<2x8x8xf32>
    %cst_47 = arith.constant dense<0.000000e+00> : vector<2x8xf32>
    %108 = vector.multi_reduction <add>, %107, %cst_47 [2] : vector<2x8x8xf32> to vector<2x8xf32>
    %109 = vector.shape_cast %108 : vector<2x8xf32> to vector<2x8x1xf32>
    %110 = tpu.reciprocal %109 {approx = true} : vector<2x8x1xf32> -> vector<2x8x1xf32>
    %111 = vector.broadcast %110 : vector<2x8x1xf32> to vector<2x8x8xf32>
    %112 = arith.mulf %107, %111 : vector<2x8x8xf32>
    %113 = vector.extract_strided_slice %40 {offsets = [0, 0, 16], sizes = [2, 8, 8], strides = [1, 1, 1]} : vector<2x8x32xf32> to vector<2x8x8xf32>
    "tpu.trace_start"() <{level = 10 : i32, message = "bqk,bkd->bqd"}> : () -> ()
    %cst_48 = arith.constant dense<0.000000e+00> : vector<2x8x8xf32>
    %114 = tpu.matmul %112, %113, %cst_48 {dimension_numbers = #tpu.dot_dimension_numbers<[2], [1], [1], [2], [0, 0, 0, 1, 1, 2], [0], [0]>} : vector<2x8x8xf32>, vector<2x8x8xf32>, vector<2x8x8xf32> -> vector<2x8x8xf32>
    "tpu.trace_stop"() : () -> ()
    %115 = vector.shape_cast %114 : vector<2x8x8xf32> to vector<16x8xf32>
    %c16 = arith.constant 16 : index
    %c0_49 = arith.constant 0 : index
    %116 = vector.load %arg56[%c16, %c0_49] : memref<32x32xf32, #tpu.memory_space<vmem>>, vector<8x32xf32>
    %cst_50 = arith.constant dense<0.000000e+00> : vector<16x32xf32>
    %117 = tpu.matmul %115, %116, %cst_50 {dimension_numbers = #tpu.dot_dimension_numbers<[1], [0], [0], [1], [0, 0, 1, 1], [], []>} : vector<16x8xf32>, vector<8x32xf32>, vector<16x32xf32> -> vector<16x32xf32>
    %118 = arith.addf %93, %117 : vector<16x32xf32>
    %119 = vector.extract_strided_slice %38 {offsets = [0, 0, 24], sizes = [2, 8, 8], strides = [1, 1, 1]} : vector<2x8x32xf32> to vector<2x8x8xf32>
    %120 = vector.extract_strided_slice %39 {offsets = [0, 0, 24], sizes = [2, 8, 8], strides = [1, 1, 1]} : vector<2x8x32xf32> to vector<2x8x8xf32>
    "tpu.trace_start"() <{level = 10 : i32, message = "bqd,bkd->bqk"}> : () -> ()
    %cst_51 = arith.constant dense<0.000000e+00> : vector<2x8x8xf32>
    %121 = tpu.matmul %119, %120, %cst_51 {dimension_numbers = #tpu.dot_dimension_numbers<[2], [2], [1], [1], [0, 0, 0, 1, 1, 1], [0], [0]>} : vector<2x8x8xf32>, vector<2x8x8xf32>, vector<2x8x8xf32> -> vector<2x8x8xf32>
    "tpu.trace_stop"() : () -> ()
    %cst_52 = arith.constant 0.353553385 : f32
    %122 = vector.broadcast %cst_52 : f32 to vector<2x8x8xf32>
    %123 = arith.mulf %121, %122 : vector<2x8x8xf32>
    %cst_53 = arith.constant -1.000000e+09 : f32
    %124 = vector.shape_cast %42 : vector<2x1x8xi1> to vector<2x1x8xi1>
    %125 = vector.broadcast %124 : vector<2x1x8xi1> to vector<2x8x8xi1>
    %126 = vector.broadcast %cst_53 : f32 to vector<2x8x8xf32>
    %127 = arith.select %125, %126, %123 : vector<2x8x8xi1>, vector<2x8x8xf32>
    %cst_54 = arith.constant dense<0xFF800000> : vector<2x8xf32>
    %128 = vector.multi_reduction <maximumf>, %127, %cst_54 [2] : vector<2x8x8xf32> to vector<2x8xf32>
    %129 = vector.shape_cast %128 : vector<2x8xf32> to vector<2x8x1xf32>
    %130 = vector.broadcast %129 : vector<2x8x1xf32> to vector<2x8x8xf32>
    %131 = arith.subf %127, %130 : vector<2x8x8xf32>
    %132 = math.exp %131 : vector<2x8x8xf32>
    %cst_55 = arith.constant dense<0.000000e+00> : vector<2x8xf32>
    %133 = vector.multi_reduction <add>, %132, %cst_55 [2] : vector<2x8x8xf32> to vector<2x8xf32>
    %134 = vector.shape_cast %133 : vector<2x8xf32> to vector<2x8x1xf32>
    %135 = tpu.reciprocal %134 {approx = true} : vector<2x8x1xf32> -> vector<2x8x1xf32>
    %136 = vector.broadcast %135 : vector<2x8x1xf32> to vector<2x8x8xf32>
    %137 = arith.mulf %132, %136 : vector<2x8x8xf32>
    %138 = vector.extract_strided_slice %40 {offsets = [0, 0, 24], sizes = [2, 8, 8], strides = [1, 1, 1]} : vector<2x8x32xf32> to vector<2x8x8xf32>
    "tpu.trace_start"() <{level = 10 : i32, message = "bqk,bkd->bqd"}> : () -> ()
    %cst_56 = arith.constant dense<0.000000e+00> : vector<2x8x8xf32>
    %139 = tpu.matmul %137, %138, %cst_56 {dimension_numbers = #tpu.dot_dimension_numbers<[2], [1], [1], [2], [0, 0, 0, 1, 1, 2], [0], [0]>} : vector<2x8x8xf32>, vector<2x8x8xf32>, vector<2x8x8xf32> -> vector<2x8x8xf32>
    "tpu.trace_stop"() : () -> ()
    %140 = vector.shape_cast %139 : vector<2x8x8xf32> to vector<16x8xf32>
    %c24 = arith.constant 24 : index
    %c0_57 = arith.constant 0 : index
    %141 = vector.load %arg56[%c24, %c0_57] : memref<32x32xf32, #tpu.memory_space<vmem>>, vector<8x32xf32>
    %cst_58 = arith.constant dense<0.000000e+00> : vector<16x32xf32>
    %142 = tpu.matmul %140, %141, %cst_58 {dimension_numbers = #tpu.dot_dimension_numbers<[1], [0], [0], [1], [0, 0, 1, 1], [], []>} : vector<16x8xf32>, vector<8x32xf32>, vector<16x32xf32> -> vector<16x32xf32>
    %143 = arith.addf %118, %142 : vector<16x32xf32>
    %c0_59 = arith.constant 0 : index
    %c0_60 = arith.constant 0 : index
    %144 = vector.load %arg48[%c0_59, %c0_60] : memref<1x32xf32, #tpu.memory_space<vmem>>, vector<1x32xf32>
    %145 = vector.broadcast %144 : vector<1x32xf32> to vector<16x32xf32>
    %146 = arith.addf %143, %145 : vector<16x32xf32>
    %147 = arith.addf %3, %146 : vector<16x32xf32>
    %cst_61 = arith.constant dense<0.000000e+00> : vector<16xf32>
    %148 = vector.multi_reduction <add>, %147, %cst_61 [1] : vector<16x32xf32> to vector<16xf32>
    %149 = vector.shape_cast %148 : vector<16xf32> to vector<16x1xf32>
    %cst_62 = arith.constant 3.200000e+01 : f32
    %150 = vector.broadcast %cst_62 : f32 to vector<16x1xf32>
    %151 = arith.divf %149, %150 : vector<16x1xf32>
    %152 = vector.broadcast %151 : vector<16x1xf32> to vector<16x32xf32>
    %153 = arith.subf %147, %152 : vector<16x32xf32>
    %154 = arith.mulf %153, %153 : vector<16x32xf32>
    %cst_63 = arith.constant dense<0.000000e+00> : vector<16xf32>
    %155 = vector.multi_reduction <add>, %154, %cst_63 [1] : vector<16x32xf32> to vector<16xf32>
    %156 = vector.shape_cast %155 : vector<16xf32> to vector<16x1xf32>
    %cst_64 = arith.constant 3.100000e+01 : f32
    %157 = vector.broadcast %cst_64 : f32 to vector<16x1xf32>
    %158 = arith.divf %156, %157 : vector<16x1xf32>
    %159 = math.sqrt %158 : vector<16x1xf32>
    %c0_65 = arith.constant 0 : index
    %c0_66 = arith.constant 0 : index
    %160 = vector.load %arg53[%c0_65, %c0_66] : memref<1x32xf32, #tpu.memory_space<vmem>>, vector<1x32xf32>
    %161 = vector.broadcast %151 : vector<16x1xf32> to vector<16x32xf32>
    %162 = arith.subf %147, %161 : vector<16x32xf32>
    %163 = vector.broadcast %160 : vector<1x32xf32> to vector<16x32xf32>
    %164 = arith.mulf %163, %162 : vector<16x32xf32>
    %cst_67 = arith.constant 9.99999997E-7 : f32
    %165 = vector.broadcast %cst_67 : f32 to vector<16x1xf32>
    %166 = arith.addf %159, %165 : vector<16x1xf32>
    %167 = vector.broadcast %166 : vector<16x1xf32> to vector<16x32xf32>
    %168 = arith.divf %164, %167 : vector<16x32xf32>
    %c0_68 = arith.constant 0 : index
    %c0_69 = arith.constant 0 : index
    %169 = vector.load %arg52[%c0_68, %c0_69] : memref<1x32xf32, #tpu.memory_space<vmem>>, vector<1x32xf32>
    %170 = vector.broadcast %169 : vector<1x32xf32> to vector<16x32xf32>
    %171 = arith.addf %168, %170 : vector<16x32xf32>
    %c0_70 = arith.constant 0 : index
    %c0_71 = arith.constant 0 : index
    %172 = vector.load %arg54[%c0_70, %c0_71] : memref<32x64xf32, #tpu.memory_space<vmem>>, vector<32x64xf32>
    %cst_72 = arith.constant dense<0.000000e+00> : vector<16x64xf32>
    %173 = tpu.matmul %171, %172, %cst_72 {dimension_numbers = #tpu.dot_dimension_numbers<[1], [0], [0], [1], [0, 0, 1, 1], [], []>} : vector<16x32xf32>, vector<32x64xf32>, vector<16x64xf32> -> vector<16x64xf32>
    %c0_73 = arith.constant 0 : index
    %c0_74 = arith.constant 0 : index
    %174 = vector.load %arg46[%c0_73, %c0_74] : memref<1x64xf32, #tpu.memory_space<vmem>>, vector<1x64xf32>
    %175 = vector.broadcast %174 : vector<1x64xf32> to vector<16x64xf32>
    %176 = arith.addf %173, %175 : vector<16x64xf32>
    %cst_75 = arith.constant 0.000000e+00 : f32
    %177 = vector.broadcast %cst_75 : f32 to vector<16x64xf32>
    %178 = arith.maximumf %176, %177 : vector<16x64xf32>
    %c0_76 = arith.constant 0 : index
    %c0_77 = arith.constant 0 : index
    %179 = vector.load %arg55[%c0_76, %c0_77] : memref<64x32xf32, #tpu.memory_space<vmem>>, vector<64x32xf32>
    %cst_78 = arith.constant dense<0.000000e+00> : vector<16x32xf32>
    %180 = tpu.matmul %178, %179, %cst_78 {dimension_numbers = #tpu.dot_dimension_numbers<[1], [0], [0], [1], [0, 0, 1, 1], [], []>} : vector<16x64xf32>, vector<64x32xf32>, vector<16x32xf32> -> vector<16x32xf32>
    %c0_79 = arith.constant 0 : index
    %c0_80 = arith.constant 0 : index
    %181 = vector.load %arg47[%c0_79, %c0_80] : memref<1x32xf32, #tpu.memory_space<vmem>>, vector<1x32xf32>
    %182 = vector.broadcast %181 : vector<1x32xf32> to vector<16x32xf32>
    %183 = arith.addf %180, %182 : vector<16x32xf32>
    %184 = arith.addf %147, %183 : vector<16x32xf32>
    %cst_81 = arith.constant dense<0.000000e+00> : vector<16xf32>
    %185 = vector.multi_reduction <add>, %184, %cst_81 [1] : vector<16x32xf32> to vector<16xf32>
    %186 = vector.shape_cast %185 : vector<16xf32> to vector<16x1xf32>
    %cst_82 = arith.constant 3.200000e+01 : f32
    %187 = vector.broadcast %cst_82 : f32 to vector<16x1xf32>
    %188 = arith.divf %186, %187 : vector<16x1xf32>
    %189 = vector.broadcast %188 : vector<16x1xf32> to vector<16x32xf32>
    %190 = arith.subf %184, %189 : vector<16x32xf32>
    %191 = arith.mulf %190, %190 : vector<16x32xf32>
    %cst_83 = arith.constant dense<0.000000e+00> : vector<16xf32>
    %192 = vector.multi_reduction <add>, %191, %cst_83 [1] : vector<16x32xf32> to vector<16xf32>
    %193 = vector.shape_cast %192 : vector<16xf32> to vector<16x1xf32>
    %cst_84 = arith.constant 3.100000e+01 : f32
    %194 = vector.broadcast %cst_84 : f32 to vector<16x1xf32>
    %195 = arith.divf %193, %194 : vector<16x1xf32>
    %196 = math.sqrt %195 : vector<16x1xf32>
    %c0_85 = arith.constant 0 : index
    %c0_86 = arith.constant 0 : index
    %197 = vector.load %arg63[%c0_85, %c0_86] : memref<1x32xf32, #tpu.memory_space<vmem>>, vector<1x32xf32>
    %198 = vector.broadcast %188 : vector<16x1xf32> to vector<16x32xf32>
    %199 = arith.subf %184, %198 : vector<16x32xf32>
    %200 = vector.broadcast %197 : vector<1x32xf32> to vector<16x32xf32>
    %201 = arith.mulf %200, %199 : vector<16x32xf32>
    %cst_87 = arith.constant 9.99999997E-7 : f32
    %202 = vector.broadcast %cst_87 : f32 to vector<16x1xf32>
    %203 = arith.addf %196, %202 : vector<16x1xf32>
    %204 = vector.broadcast %203 : vector<16x1xf32> to vector<16x32xf32>
    %205 = arith.divf %201, %204 : vector<16x32xf32>
    %c0_88 = arith.constant 0 : index
    %c0_89 = arith.constant 0 : index
    %206 = vector.load %arg62[%c0_88, %c0_89] : memref<1x32xf32, #tpu.memory_space<vmem>>, vector<1x32xf32>
    %207 = vector.broadcast %206 : vector<1x32xf32> to vector<16x32xf32>
    %208 = arith.addf %205, %207 : vector<16x32xf32>
    %c0_90 = arith.constant 0 : index
    %c0_91 = arith.constant 0 : index
    %209 = vector.load %arg69[%c0_90, %c0_91] : memref<32x96xf32, #tpu.memory_space<vmem>>, vector<32x96xf32>
    %cst_92 = arith.constant dense<0.000000e+00> : vector<16x96xf32>
    %210 = tpu.matmul %208, %209, %cst_92 {dimension_numbers = #tpu.dot_dimension_numbers<[1], [0], [0], [1], [0, 0, 1, 1], [], []>} : vector<16x32xf32>, vector<32x96xf32>, vector<16x96xf32> -> vector<16x96xf32>
    %c0_93 = arith.constant 0 : index
    %c0_94 = arith.constant 0 : index
    %211 = vector.load %arg61[%c0_93, %c0_94] : memref<1x96xf32, #tpu.memory_space<vmem>>, vector<1x96xf32>
    %212 = vector.broadcast %211 : vector<1x96xf32> to vector<16x96xf32>
    %213 = arith.addf %210, %212 : vector<16x96xf32>
    %214 = vector.extract_strided_slice %213 {offsets = [0, 0], sizes = [16, 32], strides = [1, 1]} : vector<16x96xf32> to vector<16x32xf32>
    %215 = vector.extract_strided_slice %213 {offsets = [0, 32], sizes = [16, 32], strides = [1, 1]} : vector<16x96xf32> to vector<16x32xf32>
    %216 = vector.extract_strided_slice %213 {offsets = [0, 64], sizes = [16, 32], strides = [1, 1]} : vector<16x96xf32> to vector<16x32xf32>
    %217 = vector.shape_cast %214 : vector<16x32xf32> to vector<2x8x32xf32>
    %218 = vector.shape_cast %215 : vector<16x32xf32> to vector<2x8x32xf32>
    %219 = vector.shape_cast %216 : vector<16x32xf32> to vector<2x8x32xf32>
    %cst_95 = arith.constant 0.000000e+00 : f32
    %220 = vector.broadcast %cst_95 : f32 to vector<2x1x8xf32>
    %221 = arith.cmpf oeq, %0, %220 : vector<2x1x8xf32>
    %cst_96 = arith.constant 0.000000e+00 : f32
    %222 = vector.broadcast %cst_96 : f32 to vector<16x32xf32>
    %223 = vector.extract_strided_slice %217 {offsets = [0, 0, 0], sizes = [2, 8, 8], strides = [1, 1, 1]} : vector<2x8x32xf32> to vector<2x8x8xf32>
    %224 = vector.extract_strided_slice %218 {offsets = [0, 0, 0], sizes = [2, 8, 8], strides = [1, 1, 1]} : vector<2x8x32xf32> to vector<2x8x8xf32>
    "tpu.trace_start"() <{level = 10 : i32, message = "bqd,bkd->bqk"}> : () -> ()
    %cst_97 = arith.constant dense<0.000000e+00> : vector<2x8x8xf32>
    %225 = tpu.matmul %223, %224, %cst_97 {dimension_numbers = #tpu.dot_dimension_numbers<[2], [2], [1], [1], [0, 0, 0, 1, 1, 1], [0], [0]>} : vector<2x8x8xf32>, vector<2x8x8xf32>, vector<2x8x8xf32> -> vector<2x8x8xf32>
    "tpu.trace_stop"() : () -> ()
    %cst_98 = arith.constant 0.353553385 : f32
    %226 = vector.broadcast %cst_98 : f32 to vector<2x8x8xf32>
    %227 = arith.mulf %225, %226 : vector<2x8x8xf32>
    %cst_99 = arith.constant -1.000000e+09 : f32
    %228 = vector.shape_cast %221 : vector<2x1x8xi1> to vector<2x1x8xi1>
    %229 = vector.broadcast %228 : vector<2x1x8xi1> to vector<2x8x8xi1>
    %230 = vector.broadcast %cst_99 : f32 to vector<2x8x8xf32>
    %231 = arith.select %229, %230, %227 : vector<2x8x8xi1>, vector<2x8x8xf32>
    %cst_100 = arith.constant dense<0xFF800000> : vector<2x8xf32>
    %232 = vector.multi_reduction <maximumf>, %231, %cst_100 [2] : vector<2x8x8xf32> to vector<2x8xf32>
    %233 = vector.shape_cast %232 : vector<2x8xf32> to vector<2x8x1xf32>
    %234 = vector.broadcast %233 : vector<2x8x1xf32> to vector<2x8x8xf32>
    %235 = arith.subf %231, %234 : vector<2x8x8xf32>
    %236 = math.exp %235 : vector<2x8x8xf32>
    %cst_101 = arith.constant dense<0.000000e+00> : vector<2x8xf32>
    %237 = vector.multi_reduction <add>, %236, %cst_101 [2] : vector<2x8x8xf32> to vector<2x8xf32>
    %238 = vector.shape_cast %237 : vector<2x8xf32> to vector<2x8x1xf32>
    %239 = tpu.reciprocal %238 {approx = true} : vector<2x8x1xf32> -> vector<2x8x1xf32>
    %240 = vector.broadcast %239 : vector<2x8x1xf32> to vector<2x8x8xf32>
    %241 = arith.mulf %236, %240 : vector<2x8x8xf32>
    %242 = vector.extract_strided_slice %219 {offsets = [0, 0, 0], sizes = [2, 8, 8], strides = [1, 1, 1]} : vector<2x8x32xf32> to vector<2x8x8xf32>
    "tpu.trace_start"() <{level = 10 : i32, message = "bqk,bkd->bqd"}> : () -> ()
    %cst_102 = arith.constant dense<0.000000e+00> : vector<2x8x8xf32>
    %243 = tpu.matmul %241, %242, %cst_102 {dimension_numbers = #tpu.dot_dimension_numbers<[2], [1], [1], [2], [0, 0, 0, 1, 1, 2], [0], [0]>} : vector<2x8x8xf32>, vector<2x8x8xf32>, vector<2x8x8xf32> -> vector<2x8x8xf32>
    "tpu.trace_stop"() : () -> ()
    %244 = vector.shape_cast %243 : vector<2x8x8xf32> to vector<16x8xf32>
    %c0_103 = arith.constant 0 : index
    %c0_104 = arith.constant 0 : index
    %245 = vector.load %arg68[%c0_103, %c0_104] : memref<32x32xf32, #tpu.memory_space<vmem>>, vector<8x32xf32>
    %cst_105 = arith.constant dense<0.000000e+00> : vector<16x32xf32>
    %246 = tpu.matmul %244, %245, %cst_105 {dimension_numbers = #tpu.dot_dimension_numbers<[1], [0], [0], [1], [0, 0, 1, 1], [], []>} : vector<16x8xf32>, vector<8x32xf32>, vector<16x32xf32> -> vector<16x32xf32>
    %247 = arith.addf %222, %246 : vector<16x32xf32>
    %248 = vector.extract_strided_slice %217 {offsets = [0, 0, 8], sizes = [2, 8, 8], strides = [1, 1, 1]} : vector<2x8x32xf32> to vector<2x8x8xf32>
    %249 = vector.extract_strided_slice %218 {offsets = [0, 0, 8], sizes = [2, 8, 8], strides = [1, 1, 1]} : vector<2x8x32xf32> to vector<2x8x8xf32>
    "tpu.trace_start"() <{level = 10 : i32, message = "bqd,bkd->bqk"}> : () -> ()
    %cst_106 = arith.constant dense<0.000000e+00> : vector<2x8x8xf32>
    %250 = tpu.matmul %248, %249, %cst_106 {dimension_numbers = #tpu.dot_dimension_numbers<[2], [2], [1], [1], [0, 0, 0, 1, 1, 1], [0], [0]>} : vector<2x8x8xf32>, vector<2x8x8xf32>, vector<2x8x8xf32> -> vector<2x8x8xf32>
    "tpu.trace_stop"() : () -> ()
    %cst_107 = arith.constant 0.353553385 : f32
    %251 = vector.broadcast %cst_107 : f32 to vector<2x8x8xf32>
    %252 = arith.mulf %250, %251 : vector<2x8x8xf32>
    %cst_108 = arith.constant -1.000000e+09 : f32
    %253 = vector.shape_cast %221 : vector<2x1x8xi1> to vector<2x1x8xi1>
    %254 = vector.broadcast %253 : vector<2x1x8xi1> to vector<2x8x8xi1>
    %255 = vector.broadcast %cst_108 : f32 to vector<2x8x8xf32>
    %256 = arith.select %254, %255, %252 : vector<2x8x8xi1>, vector<2x8x8xf32>
    %cst_109 = arith.constant dense<0xFF800000> : vector<2x8xf32>
    %257 = vector.multi_reduction <maximumf>, %256, %cst_109 [2] : vector<2x8x8xf32> to vector<2x8xf32>
    %258 = vector.shape_cast %257 : vector<2x8xf32> to vector<2x8x1xf32>
    %259 = vector.broadcast %258 : vector<2x8x1xf32> to vector<2x8x8xf32>
    %260 = arith.subf %256, %259 : vector<2x8x8xf32>
    %261 = math.exp %260 : vector<2x8x8xf32>
    %cst_110 = arith.constant dense<0.000000e+00> : vector<2x8xf32>
    %262 = vector.multi_reduction <add>, %261, %cst_110 [2] : vector<2x8x8xf32> to vector<2x8xf32>
    %263 = vector.shape_cast %262 : vector<2x8xf32> to vector<2x8x1xf32>
    %264 = tpu.reciprocal %263 {approx = true} : vector<2x8x1xf32> -> vector<2x8x1xf32>
    %265 = vector.broadcast %264 : vector<2x8x1xf32> to vector<2x8x8xf32>
    %266 = arith.mulf %261, %265 : vector<2x8x8xf32>
    %267 = vector.extract_strided_slice %219 {offsets = [0, 0, 8], sizes = [2, 8, 8], strides = [1, 1, 1]} : vector<2x8x32xf32> to vector<2x8x8xf32>
    "tpu.trace_start"() <{level = 10 : i32, message = "bqk,bkd->bqd"}> : () -> ()
    %cst_111 = arith.constant dense<0.000000e+00> : vector<2x8x8xf32>
    %268 = tpu.matmul %266, %267, %cst_111 {dimension_numbers = #tpu.dot_dimension_numbers<[2], [1], [1], [2], [0, 0, 0, 1, 1, 2], [0], [0]>} : vector<2x8x8xf32>, vector<2x8x8xf32>, vector<2x8x8xf32> -> vector<2x8x8xf32>
    "tpu.trace_stop"() : () -> ()
    %269 = vector.shape_cast %268 : vector<2x8x8xf32> to vector<16x8xf32>
    %c8_112 = arith.constant 8 : index
    %c0_113 = arith.constant 0 : index
    %270 = vector.load %arg68[%c8_112, %c0_113] : memref<32x32xf32, #tpu.memory_space<vmem>>, vector<8x32xf32>
    %cst_114 = arith.constant dense<0.000000e+00> : vector<16x32xf32>
    %271 = tpu.matmul %269, %270, %cst_114 {dimension_numbers = #tpu.dot_dimension_numbers<[1], [0], [0], [1], [0, 0, 1, 1], [], []>} : vector<16x8xf32>, vector<8x32xf32>, vector<16x32xf32> -> vector<16x32xf32>
    %272 = arith.addf %247, %271 : vector<16x32xf32>
    %273 = vector.extract_strided_slice %217 {offsets = [0, 0, 16], sizes = [2, 8, 8], strides = [1, 1, 1]} : vector<2x8x32xf32> to vector<2x8x8xf32>
    %274 = vector.extract_strided_slice %218 {offsets = [0, 0, 16], sizes = [2, 8, 8], strides = [1, 1, 1]} : vector<2x8x32xf32> to vector<2x8x8xf32>
    "tpu.trace_start"() <{level = 10 : i32, message = "bqd,bkd->bqk"}> : () -> ()
    %cst_115 = arith.constant dense<0.000000e+00> : vector<2x8x8xf32>
    %275 = tpu.matmul %273, %274, %cst_115 {dimension_numbers = #tpu.dot_dimension_numbers<[2], [2], [1], [1], [0, 0, 0, 1, 1, 1], [0], [0]>} : vector<2x8x8xf32>, vector<2x8x8xf32>, vector<2x8x8xf32> -> vector<2x8x8xf32>
    "tpu.trace_stop"() : () -> ()
    %cst_116 = arith.constant 0.353553385 : f32
    %276 = vector.broadcast %cst_116 : f32 to vector<2x8x8xf32>
    %277 = arith.mulf %275, %276 : vector<2x8x8xf32>
    %cst_117 = arith.constant -1.000000e+09 : f32
    %278 = vector.shape_cast %221 : vector<2x1x8xi1> to vector<2x1x8xi1>
    %279 = vector.broadcast %278 : vector<2x1x8xi1> to vector<2x8x8xi1>
    %280 = vector.broadcast %cst_117 : f32 to vector<2x8x8xf32>
    %281 = arith.select %279, %280, %277 : vector<2x8x8xi1>, vector<2x8x8xf32>
    %cst_118 = arith.constant dense<0xFF800000> : vector<2x8xf32>
    %282 = vector.multi_reduction <maximumf>, %281, %cst_118 [2] : vector<2x8x8xf32> to vector<2x8xf32>
    %283 = vector.shape_cast %282 : vector<2x8xf32> to vector<2x8x1xf32>
    %284 = vector.broadcast %283 : vector<2x8x1xf32> to vector<2x8x8xf32>
    %285 = arith.subf %281, %284 : vector<2x8x8xf32>
    %286 = math.exp %285 : vector<2x8x8xf32>
    %cst_119 = arith.constant dense<0.000000e+00> : vector<2x8xf32>
    %287 = vector.multi_reduction <add>, %286, %cst_119 [2] : vector<2x8x8xf32> to vector<2x8xf32>
    %288 = vector.shape_cast %287 : vector<2x8xf32> to vector<2x8x1xf32>
    %289 = tpu.reciprocal %288 {approx = true} : vector<2x8x1xf32> -> vector<2x8x1xf32>
    %290 = vector.broadcast %289 : vector<2x8x1xf32> to vector<2x8x8xf32>
    %291 = arith.mulf %286, %290 : vector<2x8x8xf32>
    %292 = vector.extract_strided_slice %219 {offsets = [0, 0, 16], sizes = [2, 8, 8], strides = [1, 1, 1]} : vector<2x8x32xf32> to vector<2x8x8xf32>
    "tpu.trace_start"() <{level = 10 : i32, message = "bqk,bkd->bqd"}> : () -> ()
    %cst_120 = arith.constant dense<0.000000e+00> : vector<2x8x8xf32>
    %293 = tpu.matmul %291, %292, %cst_120 {dimension_numbers = #tpu.dot_dimension_numbers<[2], [1], [1], [2], [0, 0, 0, 1, 1, 2], [0], [0]>} : vector<2x8x8xf32>, vector<2x8x8xf32>, vector<2x8x8xf32> -> vector<2x8x8xf32>
    "tpu.trace_stop"() : () -> ()
    %294 = vector.shape_cast %293 : vector<2x8x8xf32> to vector<16x8xf32>
    %c16_121 = arith.constant 16 : index
    %c0_122 = arith.constant 0 : index
    %295 = vector.load %arg68[%c16_121, %c0_122] : memref<32x32xf32, #tpu.memory_space<vmem>>, vector<8x32xf32>
    %cst_123 = arith.constant dense<0.000000e+00> : vector<16x32xf32>
    %296 = tpu.matmul %294, %295, %cst_123 {dimension_numbers = #tpu.dot_dimension_numbers<[1], [0], [0], [1], [0, 0, 1, 1], [], []>} : vector<16x8xf32>, vector<8x32xf32>, vector<16x32xf32> -> vector<16x32xf32>
    %297 = arith.addf %272, %296 : vector<16x32xf32>
    %298 = vector.extract_strided_slice %217 {offsets = [0, 0, 24], sizes = [2, 8, 8], strides = [1, 1, 1]} : vector<2x8x32xf32> to vector<2x8x8xf32>
    %299 = vector.extract_strided_slice %218 {offsets = [0, 0, 24], sizes = [2, 8, 8], strides = [1, 1, 1]} : vector<2x8x32xf32> to vector<2x8x8xf32>
    "tpu.trace_start"() <{level = 10 : i32, message = "bqd,bkd->bqk"}> : () -> ()
    %cst_124 = arith.constant dense<0.000000e+00> : vector<2x8x8xf32>
    %300 = tpu.matmul %298, %299, %cst_124 {dimension_numbers = #tpu.dot_dimension_numbers<[2], [2], [1], [1], [0, 0, 0, 1, 1, 1], [0], [0]>} : vector<2x8x8xf32>, vector<2x8x8xf32>, vector<2x8x8xf32> -> vector<2x8x8xf32>
    "tpu.trace_stop"() : () -> ()
    %cst_125 = arith.constant 0.353553385 : f32
    %301 = vector.broadcast %cst_125 : f32 to vector<2x8x8xf32>
    %302 = arith.mulf %300, %301 : vector<2x8x8xf32>
    %cst_126 = arith.constant -1.000000e+09 : f32
    %303 = vector.shape_cast %221 : vector<2x1x8xi1> to vector<2x1x8xi1>
    %304 = vector.broadcast %303 : vector<2x1x8xi1> to vector<2x8x8xi1>
    %305 = vector.broadcast %cst_126 : f32 to vector<2x8x8xf32>
    %306 = arith.select %304, %305, %302 : vector<2x8x8xi1>, vector<2x8x8xf32>
    %cst_127 = arith.constant dense<0xFF800000> : vector<2x8xf32>
    %307 = vector.multi_reduction <maximumf>, %306, %cst_127 [2] : vector<2x8x8xf32> to vector<2x8xf32>
    %308 = vector.shape_cast %307 : vector<2x8xf32> to vector<2x8x1xf32>
    %309 = vector.broadcast %308 : vector<2x8x1xf32> to vector<2x8x8xf32>
    %310 = arith.subf %306, %309 : vector<2x8x8xf32>
    %311 = math.exp %310 : vector<2x8x8xf32>
    %cst_128 = arith.constant dense<0.000000e+00> : vector<2x8xf32>
    %312 = vector.multi_reduction <add>, %311, %cst_128 [2] : vector<2x8x8xf32> to vector<2x8xf32>
    %313 = vector.shape_cast %312 : vector<2x8xf32> to vector<2x8x1xf32>
    %314 = tpu.reciprocal %313 {approx = true} : vector<2x8x1xf32> -> vector<2x8x1xf32>
    %315 = vector.broadcast %314 : vector<2x8x1xf32> to vector<2x8x8xf32>
    %316 = arith.mulf %311, %315 : vector<2x8x8xf32>
    %317 = vector.extract_strided_slice %219 {offsets = [0, 0, 24], sizes = [2, 8, 8], strides = [1, 1, 1]} : vector<2x8x32xf32> to vector<2x8x8xf32>
    "tpu.trace_start"() <{level = 10 : i32, message = "bqk,bkd->bqd"}> : () -> ()
    %cst_129 = arith.constant dense<0.000000e+00> : vector<2x8x8xf32>
    %318 = tpu.matmul %316, %317, %cst_129 {dimension_numbers = #tpu.dot_dimension_numbers<[2], [1], [1], [2], [0, 0, 0, 1, 1, 2], [0], [0]>} : vector<2x8x8xf32>, vector<2x8x8xf32>, vector<2x8x8xf32> -> vector<2x8x8xf32>
    "tpu.trace_stop"() : () -> ()
    %319 = vector.shape_cast %318 : vector<2x8x8xf32> to vector<16x8xf32>
    %c24_130 = arith.constant 24 : index
    %c0_131 = arith.constant 0 : index
    %320 = vector.load %arg68[%c24_130, %c0_131] : memref<32x32xf32, #tpu.memory_space<vmem>>, vector<8x32xf32>
    %cst_132 = arith.constant dense<0.000000e+00> : vector<16x32xf32>
    %321 = tpu.matmul %319, %320, %cst_132 {dimension_numbers = #tpu.dot_dimension_numbers<[1], [0], [0], [1], [0, 0, 1, 1], [], []>} : vector<16x8xf32>, vector<8x32xf32>, vector<16x32xf32> -> vector<16x32xf32>
    %322 = arith.addf %297, %321 : vector<16x32xf32>
    %c0_133 = arith.constant 0 : index
    %c0_134 = arith.constant 0 : index
    %323 = vector.load %arg60[%c0_133, %c0_134] : memref<1x32xf32, #tpu.memory_space<vmem>>, vector<1x32xf32>
    %324 = vector.broadcast %323 : vector<1x32xf32> to vector<16x32xf32>
    %325 = arith.addf %322, %324 : vector<16x32xf32>
    %326 = arith.addf %184, %325 : vector<16x32xf32>
    %cst_135 = arith.constant dense<0.000000e+00> : vector<16xf32>
    %327 = vector.multi_reduction <add>, %326, %cst_135 [1] : vector<16x32xf32> to vector<16xf32>
    %328 = vector.shape_cast %327 : vector<16xf32> to vector<16x1xf32>
    %cst_136 = arith.constant 3.200000e+01 : f32
    %329 = vector.broadcast %cst_136 : f32 to vector<16x1xf32>
    %330 = arith.divf %328, %329 : vector<16x1xf32>
    %331 = vector.broadcast %330 : vector<16x1xf32> to vector<16x32xf32>
    %332 = arith.subf %326, %331 : vector<16x32xf32>
    %333 = arith.mulf %332, %332 : vector<16x32xf32>
    %cst_137 = arith.constant dense<0.000000e+00> : vector<16xf32>
    %334 = vector.multi_reduction <add>, %333, %cst_137 [1] : vector<16x32xf32> to vector<16xf32>
    %335 = vector.shape_cast %334 : vector<16xf32> to vector<16x1xf32>
    %cst_138 = arith.constant 3.100000e+01 : f32
    %336 = vector.broadcast %cst_138 : f32 to vector<16x1xf32>
    %337 = arith.divf %335, %336 : vector<16x1xf32>
    %338 = math.sqrt %337 : vector<16x1xf32>
    %c0_139 = arith.constant 0 : index
    %c0_140 = arith.constant 0 : index
    %339 = vector.load %arg65[%c0_139, %c0_140] : memref<1x32xf32, #tpu.memory_space<vmem>>, vector<1x32xf32>
    %340 = vector.broadcast %330 : vector<16x1xf32> to vector<16x32xf32>
    %341 = arith.subf %326, %340 : vector<16x32xf32>
    %342 = vector.broadcast %339 : vector<1x32xf32> to vector<16x32xf32>
    %343 = arith.mulf %342, %341 : vector<16x32xf32>
    %cst_141 = arith.constant 9.99999997E-7 : f32
    %344 = vector.broadcast %cst_141 : f32 to vector<16x1xf32>
    %345 = arith.addf %338, %344 : vector<16x1xf32>
    %346 = vector.broadcast %345 : vector<16x1xf32> to vector<16x32xf32>
    %347 = arith.divf %343, %346 : vector<16x32xf32>
    %c0_142 = arith.constant 0 : index
    %c0_143 = arith.constant 0 : index
    %348 = vector.load %arg64[%c0_142, %c0_143] : memref<1x32xf32, #tpu.memory_space<vmem>>, vector<1x32xf32>
    %349 = vector.broadcast %348 : vector<1x32xf32> to vector<16x32xf32>
    %350 = arith.addf %347, %349 : vector<16x32xf32>
    %c0_144 = arith.constant 0 : index
    %c0_145 = arith.constant 0 : index
    %351 = vector.load %arg66[%c0_144, %c0_145] : memref<32x64xf32, #tpu.memory_space<vmem>>, vector<32x64xf32>
    %cst_146 = arith.constant dense<0.000000e+00> : vector<16x64xf32>
    %352 = tpu.matmul %350, %351, %cst_146 {dimension_numbers = #tpu.dot_dimension_numbers<[1], [0], [0], [1], [0, 0, 1, 1], [], []>} : vector<16x32xf32>, vector<32x64xf32>, vector<16x64xf32> -> vector<16x64xf32>
    %c0_147 = arith.constant 0 : index
    %c0_148 = arith.constant 0 : index
    %353 = vector.load %arg58[%c0_147, %c0_148] : memref<1x64xf32, #tpu.memory_space<vmem>>, vector<1x64xf32>
    %354 = vector.broadcast %353 : vector<1x64xf32> to vector<16x64xf32>
    %355 = arith.addf %352, %354 : vector<16x64xf32>
    %cst_149 = arith.constant 0.000000e+00 : f32
    %356 = vector.broadcast %cst_149 : f32 to vector<16x64xf32>
    %357 = arith.maximumf %355, %356 : vector<16x64xf32>
    %c0_150 = arith.constant 0 : index
    %c0_151 = arith.constant 0 : index
    %358 = vector.load %arg67[%c0_150, %c0_151] : memref<64x32xf32, #tpu.memory_space<vmem>>, vector<64x32xf32>
    %cst_152 = arith.constant dense<0.000000e+00> : vector<16x32xf32>
    %359 = tpu.matmul %357, %358, %cst_152 {dimension_numbers = #tpu.dot_dimension_numbers<[1], [0], [0], [1], [0, 0, 1, 1], [], []>} : vector<16x64xf32>, vector<64x32xf32>, vector<16x32xf32> -> vector<16x32xf32>
    %c0_153 = arith.constant 0 : index
    %c0_154 = arith.constant 0 : index
    %360 = vector.load %arg59[%c0_153, %c0_154] : memref<1x32xf32, #tpu.memory_space<vmem>>, vector<1x32xf32>
    %361 = vector.broadcast %360 : vector<1x32xf32> to vector<16x32xf32>
    %362 = arith.addf %359, %361 : vector<16x32xf32>
    %363 = arith.addf %326, %362 : vector<16x32xf32>
    %cst_155 = arith.constant dense<0.000000e+00> : vector<16xf32>
    %364 = vector.multi_reduction <add>, %363, %cst_155 [1] : vector<16x32xf32> to vector<16xf32>
    %365 = vector.shape_cast %364 : vector<16xf32> to vector<16x1xf32>
    %cst_156 = arith.constant 3.200000e+01 : f32
    %366 = vector.broadcast %cst_156 : f32 to vector<16x1xf32>
    %367 = arith.divf %365, %366 : vector<16x1xf32>
    %368 = vector.broadcast %367 : vector<16x1xf32> to vector<16x32xf32>
    %369 = arith.subf %363, %368 : vector<16x32xf32>
    %370 = arith.mulf %369, %369 : vector<16x32xf32>
    %cst_157 = arith.constant dense<0.000000e+00> : vector<16xf32>
    %371 = vector.multi_reduction <add>, %370, %cst_157 [1] : vector<16x32xf32> to vector<16xf32>
    %372 = vector.shape_cast %371 : vector<16xf32> to vector<16x1xf32>
    %cst_158 = arith.constant 3.100000e+01 : f32
    %373 = vector.broadcast %cst_158 : f32 to vector<16x1xf32>
    %374 = arith.divf %372, %373 : vector<16x1xf32>
    %375 = math.sqrt %374 : vector<16x1xf32>
    %c0_159 = arith.constant 0 : index
    %c0_160 = arith.constant 0 : index
    %376 = vector.load %arg71[%c0_159, %c0_160] : memref<1x32xf32, #tpu.memory_space<vmem>>, vector<1x32xf32>
    %377 = vector.broadcast %367 : vector<16x1xf32> to vector<16x32xf32>
    %378 = arith.subf %363, %377 : vector<16x32xf32>
    %379 = vector.broadcast %376 : vector<1x32xf32> to vector<16x32xf32>
    %380 = arith.mulf %379, %378 : vector<16x32xf32>
    %cst_161 = arith.constant 9.99999997E-7 : f32
    %381 = vector.broadcast %cst_161 : f32 to vector<16x1xf32>
    %382 = arith.addf %375, %381 : vector<16x1xf32>
    %383 = vector.broadcast %382 : vector<16x1xf32> to vector<16x32xf32>
    %384 = arith.divf %380, %383 : vector<16x32xf32>
    %c0_162 = arith.constant 0 : index
    %c0_163 = arith.constant 0 : index
    %385 = vector.load %arg70[%c0_162, %c0_163] : memref<1x32xf32, #tpu.memory_space<vmem>>, vector<1x32xf32>
    %386 = vector.broadcast %385 : vector<1x32xf32> to vector<16x32xf32>
    %387 = arith.addf %384, %386 : vector<16x32xf32>
    %cst_164 = arith.constant dense<0.000000e+00> : vector<16xf32>
    %388 = vector.multi_reduction <add>, %5, %cst_164 [1] : vector<16x32xf32> to vector<16xf32>
    %389 = vector.shape_cast %388 : vector<16xf32> to vector<16x1xf32>
    %cst_165 = arith.constant 3.200000e+01 : f32
    %390 = vector.broadcast %cst_165 : f32 to vector<16x1xf32>
    %391 = arith.divf %389, %390 : vector<16x1xf32>
    %392 = vector.broadcast %391 : vector<16x1xf32> to vector<16x32xf32>
    %393 = arith.subf %5, %392 : vector<16x32xf32>
    %394 = arith.mulf %393, %393 : vector<16x32xf32>
    %cst_166 = arith.constant dense<0.000000e+00> : vector<16xf32>
    %395 = vector.multi_reduction <add>, %394, %cst_166 [1] : vector<16x32xf32> to vector<16xf32>
    %396 = vector.shape_cast %395 : vector<16xf32> to vector<16x1xf32>
    %cst_167 = arith.constant 3.100000e+01 : f32
    %397 = vector.broadcast %cst_167 : f32 to vector<16x1xf32>
    %398 = arith.divf %396, %397 : vector<16x1xf32>
    %399 = math.sqrt %398 : vector<16x1xf32>
    %c0_168 = arith.constant 0 : index
    %c0_169 = arith.constant 0 : index
    %400 = vector.load %arg7[%c0_168, %c0_169] : memref<1x32xf32, #tpu.memory_space<vmem>>, vector<1x32xf32>
    %401 = vector.broadcast %391 : vector<16x1xf32> to vector<16x32xf32>
    %402 = arith.subf %5, %401 : vector<16x32xf32>
    %403 = vector.broadcast %400 : vector<1x32xf32> to vector<16x32xf32>
    %404 = arith.mulf %403, %402 : vector<16x32xf32>
    %cst_170 = arith.constant 9.99999997E-7 : f32
    %405 = vector.broadcast %cst_170 : f32 to vector<16x1xf32>
    %406 = arith.addf %399, %405 : vector<16x1xf32>
    %407 = vector.broadcast %406 : vector<16x1xf32> to vector<16x32xf32>
    %408 = arith.divf %404, %407 : vector<16x32xf32>
    %c0_171 = arith.constant 0 : index
    %c0_172 = arith.constant 0 : index
    %409 = vector.load %arg6[%c0_171, %c0_172] : memref<1x32xf32, #tpu.memory_space<vmem>>, vector<1x32xf32>
    %410 = vector.broadcast %409 : vector<1x32xf32> to vector<16x32xf32>
    %411 = arith.addf %408, %410 : vector<16x32xf32>
    %c0_173 = arith.constant 0 : index
    %c0_174 = arith.constant 0 : index
    %412 = vector.load %arg15[%c0_173, %c0_174] : memref<32x96xf32, #tpu.memory_space<vmem>>, vector<32x96xf32>
    %cst_175 = arith.constant dense<0.000000e+00> : vector<16x96xf32>
    %413 = tpu.matmul %411, %412, %cst_175 {dimension_numbers = #tpu.dot_dimension_numbers<[1], [0], [0], [1], [0, 0, 1, 1], [], []>} : vector<16x32xf32>, vector<32x96xf32>, vector<16x96xf32> -> vector<16x96xf32>
    %c0_176 = arith.constant 0 : index
    %c0_177 = arith.constant 0 : index
    %414 = vector.load %arg13[%c0_176, %c0_177] : memref<1x96xf32, #tpu.memory_space<vmem>>, vector<1x96xf32>
    %415 = vector.broadcast %414 : vector<1x96xf32> to vector<16x96xf32>
    %416 = arith.addf %413, %415 : vector<16x96xf32>
    %417 = vector.extract_strided_slice %416 {offsets = [0, 0], sizes = [16, 32], strides = [1, 1]} : vector<16x96xf32> to vector<16x32xf32>
    %418 = vector.extract_strided_slice %416 {offsets = [0, 32], sizes = [16, 32], strides = [1, 1]} : vector<16x96xf32> to vector<16x32xf32>
    %419 = vector.extract_strided_slice %416 {offsets = [0, 64], sizes = [16, 32], strides = [1, 1]} : vector<16x96xf32> to vector<16x32xf32>
    %420 = vector.shape_cast %417 : vector<16x32xf32> to vector<2x8x32xf32>
    %421 = vector.shape_cast %418 : vector<16x32xf32> to vector<2x8x32xf32>
    %422 = vector.shape_cast %419 : vector<16x32xf32> to vector<2x8x32xf32>
    %cst_178 = arith.constant 0.000000e+00 : f32
    %423 = vector.broadcast %cst_178 : f32 to vector<2x8x8xf32>
    %424 = arith.cmpf oeq, %1, %423 : vector<2x8x8xf32>
    %cst_179 = arith.constant 0.000000e+00 : f32
    %425 = vector.broadcast %cst_179 : f32 to vector<16x32xf32>
    %426 = vector.extract_strided_slice %420 {offsets = [0, 0, 0], sizes = [2, 8, 8], strides = [1, 1, 1]} : vector<2x8x32xf32> to vector<2x8x8xf32>
    %427 = vector.extract_strided_slice %421 {offsets = [0, 0, 0], sizes = [2, 8, 8], strides = [1, 1, 1]} : vector<2x8x32xf32> to vector<2x8x8xf32>
    "tpu.trace_start"() <{level = 10 : i32, message = "bqd,bkd->bqk"}> : () -> ()
    %cst_180 = arith.constant dense<0.000000e+00> : vector<2x8x8xf32>
    %428 = tpu.matmul %426, %427, %cst_180 {dimension_numbers = #tpu.dot_dimension_numbers<[2], [2], [1], [1], [0, 0, 0, 1, 1, 1], [0], [0]>} : vector<2x8x8xf32>, vector<2x8x8xf32>, vector<2x8x8xf32> -> vector<2x8x8xf32>
    "tpu.trace_stop"() : () -> ()
    %cst_181 = arith.constant 0.353553385 : f32
    %429 = vector.broadcast %cst_181 : f32 to vector<2x8x8xf32>
    %430 = arith.mulf %428, %429 : vector<2x8x8xf32>
    %cst_182 = arith.constant -1.000000e+09 : f32
    %431 = vector.broadcast %cst_182 : f32 to vector<2x8x8xf32>
    %432 = arith.select %424, %431, %430 : vector<2x8x8xi1>, vector<2x8x8xf32>
    %cst_183 = arith.constant dense<0xFF800000> : vector<2x8xf32>
    %433 = vector.multi_reduction <maximumf>, %432, %cst_183 [2] : vector<2x8x8xf32> to vector<2x8xf32>
    %434 = vector.shape_cast %433 : vector<2x8xf32> to vector<2x8x1xf32>
    %435 = vector.broadcast %434 : vector<2x8x1xf32> to vector<2x8x8xf32>
    %436 = arith.subf %432, %435 : vector<2x8x8xf32>
    %437 = math.exp %436 : vector<2x8x8xf32>
    %cst_184 = arith.constant dense<0.000000e+00> : vector<2x8xf32>
    %438 = vector.multi_reduction <add>, %437, %cst_184 [2] : vector<2x8x8xf32> to vector<2x8xf32>
    %439 = vector.shape_cast %438 : vector<2x8xf32> to vector<2x8x1xf32>
    %440 = tpu.reciprocal %439 {approx = true} : vector<2x8x1xf32> -> vector<2x8x1xf32>
    %441 = vector.broadcast %440 : vector<2x8x1xf32> to vector<2x8x8xf32>
    %442 = arith.mulf %437, %441 : vector<2x8x8xf32>
    %443 = vector.extract_strided_slice %422 {offsets = [0, 0, 0], sizes = [2, 8, 8], strides = [1, 1, 1]} : vector<2x8x32xf32> to vector<2x8x8xf32>
    "tpu.trace_start"() <{level = 10 : i32, message = "bqk,bkd->bqd"}> : () -> ()
    %cst_185 = arith.constant dense<0.000000e+00> : vector<2x8x8xf32>
    %444 = tpu.matmul %442, %443, %cst_185 {dimension_numbers = #tpu.dot_dimension_numbers<[2], [1], [1], [2], [0, 0, 0, 1, 1, 2], [0], [0]>} : vector<2x8x8xf32>, vector<2x8x8xf32>, vector<2x8x8xf32> -> vector<2x8x8xf32>
    "tpu.trace_stop"() : () -> ()
    %445 = vector.shape_cast %444 : vector<2x8x8xf32> to vector<16x8xf32>
    %c0_186 = arith.constant 0 : index
    %c0_187 = arith.constant 0 : index
    %446 = vector.load %arg14[%c0_186, %c0_187] : memref<32x32xf32, #tpu.memory_space<vmem>>, vector<8x32xf32>
    %cst_188 = arith.constant dense<0.000000e+00> : vector<16x32xf32>
    %447 = tpu.matmul %445, %446, %cst_188 {dimension_numbers = #tpu.dot_dimension_numbers<[1], [0], [0], [1], [0, 0, 1, 1], [], []>} : vector<16x8xf32>, vector<8x32xf32>, vector<16x32xf32> -> vector<16x32xf32>
    %448 = arith.addf %425, %447 : vector<16x32xf32>
    %449 = vector.extract_strided_slice %420 {offsets = [0, 0, 8], sizes = [2, 8, 8], strides = [1, 1, 1]} : vector<2x8x32xf32> to vector<2x8x8xf32>
    %450 = vector.extract_strided_slice %421 {offsets = [0, 0, 8], sizes = [2, 8, 8], strides = [1, 1, 1]} : vector<2x8x32xf32> to vector<2x8x8xf32>
    "tpu.trace_start"() <{level = 10 : i32, message = "bqd,bkd->bqk"}> : () -> ()
    %cst_189 = arith.constant dense<0.000000e+00> : vector<2x8x8xf32>
    %451 = tpu.matmul %449, %450, %cst_189 {dimension_numbers = #tpu.dot_dimension_numbers<[2], [2], [1], [1], [0, 0, 0, 1, 1, 1], [0], [0]>} : vector<2x8x8xf32>, vector<2x8x8xf32>, vector<2x8x8xf32> -> vector<2x8x8xf32>
    "tpu.trace_stop"() : () -> ()
    %cst_190 = arith.constant 0.353553385 : f32
    %452 = vector.broadcast %cst_190 : f32 to vector<2x8x8xf32>
    %453 = arith.mulf %451, %452 : vector<2x8x8xf32>
    %cst_191 = arith.constant -1.000000e+09 : f32
    %454 = vector.broadcast %cst_191 : f32 to vector<2x8x8xf32>
    %455 = arith.select %424, %454, %453 : vector<2x8x8xi1>, vector<2x8x8xf32>
    %cst_192 = arith.constant dense<0xFF800000> : vector<2x8xf32>
    %456 = vector.multi_reduction <maximumf>, %455, %cst_192 [2] : vector<2x8x8xf32> to vector<2x8xf32>
    %457 = vector.shape_cast %456 : vector<2x8xf32> to vector<2x8x1xf32>
    %458 = vector.broadcast %457 : vector<2x8x1xf32> to vector<2x8x8xf32>
    %459 = arith.subf %455, %458 : vector<2x8x8xf32>
    %460 = math.exp %459 : vector<2x8x8xf32>
    %cst_193 = arith.constant dense<0.000000e+00> : vector<2x8xf32>
    %461 = vector.multi_reduction <add>, %460, %cst_193 [2] : vector<2x8x8xf32> to vector<2x8xf32>
    %462 = vector.shape_cast %461 : vector<2x8xf32> to vector<2x8x1xf32>
    %463 = tpu.reciprocal %462 {approx = true} : vector<2x8x1xf32> -> vector<2x8x1xf32>
    %464 = vector.broadcast %463 : vector<2x8x1xf32> to vector<2x8x8xf32>
    %465 = arith.mulf %460, %464 : vector<2x8x8xf32>
    %466 = vector.extract_strided_slice %422 {offsets = [0, 0, 8], sizes = [2, 8, 8], strides = [1, 1, 1]} : vector<2x8x32xf32> to vector<2x8x8xf32>
    "tpu.trace_start"() <{level = 10 : i32, message = "bqk,bkd->bqd"}> : () -> ()
    %cst_194 = arith.constant dense<0.000000e+00> : vector<2x8x8xf32>
    %467 = tpu.matmul %465, %466, %cst_194 {dimension_numbers = #tpu.dot_dimension_numbers<[2], [1], [1], [2], [0, 0, 0, 1, 1, 2], [0], [0]>} : vector<2x8x8xf32>, vector<2x8x8xf32>, vector<2x8x8xf32> -> vector<2x8x8xf32>
    "tpu.trace_stop"() : () -> ()
    %468 = vector.shape_cast %467 : vector<2x8x8xf32> to vector<16x8xf32>
    %c8_195 = arith.constant 8 : index
    %c0_196 = arith.constant 0 : index
    %469 = vector.load %arg14[%c8_195, %c0_196] : memref<32x32xf32, #tpu.memory_space<vmem>>, vector<8x32xf32>
    %cst_197 = arith.constant dense<0.000000e+00> : vector<16x32xf32>
    %470 = tpu.matmul %468, %469, %cst_197 {dimension_numbers = #tpu.dot_dimension_numbers<[1], [0], [0], [1], [0, 0, 1, 1], [], []>} : vector<16x8xf32>, vector<8x32xf32>, vector<16x32xf32> -> vector<16x32xf32>
    %471 = arith.addf %448, %470 : vector<16x32xf32>
    %472 = vector.extract_strided_slice %420 {offsets = [0, 0, 16], sizes = [2, 8, 8], strides = [1, 1, 1]} : vector<2x8x32xf32> to vector<2x8x8xf32>
    %473 = vector.extract_strided_slice %421 {offsets = [0, 0, 16], sizes = [2, 8, 8], strides = [1, 1, 1]} : vector<2x8x32xf32> to vector<2x8x8xf32>
    "tpu.trace_start"() <{level = 10 : i32, message = "bqd,bkd->bqk"}> : () -> ()
    %cst_198 = arith.constant dense<0.000000e+00> : vector<2x8x8xf32>
    %474 = tpu.matmul %472, %473, %cst_198 {dimension_numbers = #tpu.dot_dimension_numbers<[2], [2], [1], [1], [0, 0, 0, 1, 1, 1], [0], [0]>} : vector<2x8x8xf32>, vector<2x8x8xf32>, vector<2x8x8xf32> -> vector<2x8x8xf32>
    "tpu.trace_stop"() : () -> ()
    %cst_199 = arith.constant 0.353553385 : f32
    %475 = vector.broadcast %cst_199 : f32 to vector<2x8x8xf32>
    %476 = arith.mulf %474, %475 : vector<2x8x8xf32>
    %cst_200 = arith.constant -1.000000e+09 : f32
    %477 = vector.broadcast %cst_200 : f32 to vector<2x8x8xf32>
    %478 = arith.select %424, %477, %476 : vector<2x8x8xi1>, vector<2x8x8xf32>
    %cst_201 = arith.constant dense<0xFF800000> : vector<2x8xf32>
    %479 = vector.multi_reduction <maximumf>, %478, %cst_201 [2] : vector<2x8x8xf32> to vector<2x8xf32>
    %480 = vector.shape_cast %479 : vector<2x8xf32> to vector<2x8x1xf32>
    %481 = vector.broadcast %480 : vector<2x8x1xf32> to vector<2x8x8xf32>
    %482 = arith.subf %478, %481 : vector<2x8x8xf32>
    %483 = math.exp %482 : vector<2x8x8xf32>
    %cst_202 = arith.constant dense<0.000000e+00> : vector<2x8xf32>
    %484 = vector.multi_reduction <add>, %483, %cst_202 [2] : vector<2x8x8xf32> to vector<2x8xf32>
    %485 = vector.shape_cast %484 : vector<2x8xf32> to vector<2x8x1xf32>
    %486 = tpu.reciprocal %485 {approx = true} : vector<2x8x1xf32> -> vector<2x8x1xf32>
    %487 = vector.broadcast %486 : vector<2x8x1xf32> to vector<2x8x8xf32>
    %488 = arith.mulf %483, %487 : vector<2x8x8xf32>
    %489 = vector.extract_strided_slice %422 {offsets = [0, 0, 16], sizes = [2, 8, 8], strides = [1, 1, 1]} : vector<2x8x32xf32> to vector<2x8x8xf32>
    "tpu.trace_start"() <{level = 10 : i32, message = "bqk,bkd->bqd"}> : () -> ()
    %cst_203 = arith.constant dense<0.000000e+00> : vector<2x8x8xf32>
    %490 = tpu.matmul %488, %489, %cst_203 {dimension_numbers = #tpu.dot_dimension_numbers<[2], [1], [1], [2], [0, 0, 0, 1, 1, 2], [0], [0]>} : vector<2x8x8xf32>, vector<2x8x8xf32>, vector<2x8x8xf32> -> vector<2x8x8xf32>
    "tpu.trace_stop"() : () -> ()
    %491 = vector.shape_cast %490 : vector<2x8x8xf32> to vector<16x8xf32>
    %c16_204 = arith.constant 16 : index
    %c0_205 = arith.constant 0 : index
    %492 = vector.load %arg14[%c16_204, %c0_205] : memref<32x32xf32, #tpu.memory_space<vmem>>, vector<8x32xf32>
    %cst_206 = arith.constant dense<0.000000e+00> : vector<16x32xf32>
    %493 = tpu.matmul %491, %492, %cst_206 {dimension_numbers = #tpu.dot_dimension_numbers<[1], [0], [0], [1], [0, 0, 1, 1], [], []>} : vector<16x8xf32>, vector<8x32xf32>, vector<16x32xf32> -> vector<16x32xf32>
    %494 = arith.addf %471, %493 : vector<16x32xf32>
    %495 = vector.extract_strided_slice %420 {offsets = [0, 0, 24], sizes = [2, 8, 8], strides = [1, 1, 1]} : vector<2x8x32xf32> to vector<2x8x8xf32>
    %496 = vector.extract_strided_slice %421 {offsets = [0, 0, 24], sizes = [2, 8, 8], strides = [1, 1, 1]} : vector<2x8x32xf32> to vector<2x8x8xf32>
    "tpu.trace_start"() <{level = 10 : i32, message = "bqd,bkd->bqk"}> : () -> ()
    %cst_207 = arith.constant dense<0.000000e+00> : vector<2x8x8xf32>
    %497 = tpu.matmul %495, %496, %cst_207 {dimension_numbers = #tpu.dot_dimension_numbers<[2], [2], [1], [1], [0, 0, 0, 1, 1, 1], [0], [0]>} : vector<2x8x8xf32>, vector<2x8x8xf32>, vector<2x8x8xf32> -> vector<2x8x8xf32>
    "tpu.trace_stop"() : () -> ()
    %cst_208 = arith.constant 0.353553385 : f32
    %498 = vector.broadcast %cst_208 : f32 to vector<2x8x8xf32>
    %499 = arith.mulf %497, %498 : vector<2x8x8xf32>
    %cst_209 = arith.constant -1.000000e+09 : f32
    %500 = vector.broadcast %cst_209 : f32 to vector<2x8x8xf32>
    %501 = arith.select %424, %500, %499 : vector<2x8x8xi1>, vector<2x8x8xf32>
    %cst_210 = arith.constant dense<0xFF800000> : vector<2x8xf32>
    %502 = vector.multi_reduction <maximumf>, %501, %cst_210 [2] : vector<2x8x8xf32> to vector<2x8xf32>
    %503 = vector.shape_cast %502 : vector<2x8xf32> to vector<2x8x1xf32>
    %504 = vector.broadcast %503 : vector<2x8x1xf32> to vector<2x8x8xf32>
    %505 = arith.subf %501, %504 : vector<2x8x8xf32>
    %506 = math.exp %505 : vector<2x8x8xf32>
    %cst_211 = arith.constant dense<0.000000e+00> : vector<2x8xf32>
    %507 = vector.multi_reduction <add>, %506, %cst_211 [2] : vector<2x8x8xf32> to vector<2x8xf32>
    %508 = vector.shape_cast %507 : vector<2x8xf32> to vector<2x8x1xf32>
    %509 = tpu.reciprocal %508 {approx = true} : vector<2x8x1xf32> -> vector<2x8x1xf32>
    %510 = vector.broadcast %509 : vector<2x8x1xf32> to vector<2x8x8xf32>
    %511 = arith.mulf %506, %510 : vector<2x8x8xf32>
    %512 = vector.extract_strided_slice %422 {offsets = [0, 0, 24], sizes = [2, 8, 8], strides = [1, 1, 1]} : vector<2x8x32xf32> to vector<2x8x8xf32>
    "tpu.trace_start"() <{level = 10 : i32, message = "bqk,bkd->bqd"}> : () -> ()
    %cst_212 = arith.constant dense<0.000000e+00> : vector<2x8x8xf32>
    %513 = tpu.matmul %511, %512, %cst_212 {dimension_numbers = #tpu.dot_dimension_numbers<[2], [1], [1], [2], [0, 0, 0, 1, 1, 2], [0], [0]>} : vector<2x8x8xf32>, vector<2x8x8xf32>, vector<2x8x8xf32> -> vector<2x8x8xf32>
    "tpu.trace_stop"() : () -> ()
    %514 = vector.shape_cast %513 : vector<2x8x8xf32> to vector<16x8xf32>
    %c24_213 = arith.constant 24 : index
    %c0_214 = arith.constant 0 : index
    %515 = vector.load %arg14[%c24_213, %c0_214] : memref<32x32xf32, #tpu.memory_space<vmem>>, vector<8x32xf32>
    %cst_215 = arith.constant dense<0.000000e+00> : vector<16x32xf32>
    %516 = tpu.matmul %514, %515, %cst_215 {dimension_numbers = #tpu.dot_dimension_numbers<[1], [0], [0], [1], [0, 0, 1, 1], [], []>} : vector<16x8xf32>, vector<8x32xf32>, vector<16x32xf32> -> vector<16x32xf32>
    %517 = arith.addf %494, %516 : vector<16x32xf32>
    %c0_216 = arith.constant 0 : index
    %c0_217 = arith.constant 0 : index
    %518 = vector.load %arg12[%c0_216, %c0_217] : memref<1x32xf32, #tpu.memory_space<vmem>>, vector<1x32xf32>
    %519 = vector.broadcast %518 : vector<1x32xf32> to vector<16x32xf32>
    %520 = arith.addf %517, %519 : vector<16x32xf32>
    %521 = arith.addf %5, %520 : vector<16x32xf32>
    %cst_218 = arith.constant dense<0.000000e+00> : vector<16xf32>
    %522 = vector.multi_reduction <add>, %521, %cst_218 [1] : vector<16x32xf32> to vector<16xf32>
    %523 = vector.shape_cast %522 : vector<16xf32> to vector<16x1xf32>
    %cst_219 = arith.constant 3.200000e+01 : f32
    %524 = vector.broadcast %cst_219 : f32 to vector<16x1xf32>
    %525 = arith.divf %523, %524 : vector<16x1xf32>
    %526 = vector.broadcast %525 : vector<16x1xf32> to vector<16x32xf32>
    %527 = arith.subf %521, %526 : vector<16x32xf32>
    %528 = arith.mulf %527, %527 : vector<16x32xf32>
    %cst_220 = arith.constant dense<0.000000e+00> : vector<16xf32>
    %529 = vector.multi_reduction <add>, %528, %cst_220 [1] : vector<16x32xf32> to vector<16xf32>
    %530 = vector.shape_cast %529 : vector<16xf32> to vector<16x1xf32>
    %cst_221 = arith.constant 3.100000e+01 : f32
    %531 = vector.broadcast %cst_221 : f32 to vector<16x1xf32>
    %532 = arith.divf %530, %531 : vector<16x1xf32>
    %533 = math.sqrt %532 : vector<16x1xf32>
    %c0_222 = arith.constant 0 : index
    %c0_223 = arith.constant 0 : index
    %534 = vector.load %arg9[%c0_222, %c0_223] : memref<1x32xf32, #tpu.memory_space<vmem>>, vector<1x32xf32>
    %535 = vector.broadcast %525 : vector<16x1xf32> to vector<16x32xf32>
    %536 = arith.subf %521, %535 : vector<16x32xf32>
    %537 = vector.broadcast %534 : vector<1x32xf32> to vector<16x32xf32>
    %538 = arith.mulf %537, %536 : vector<16x32xf32>
    %cst_224 = arith.constant 9.99999997E-7 : f32
    %539 = vector.broadcast %cst_224 : f32 to vector<16x1xf32>
    %540 = arith.addf %533, %539 : vector<16x1xf32>
    %541 = vector.broadcast %540 : vector<16x1xf32> to vector<16x32xf32>
    %542 = arith.divf %538, %541 : vector<16x32xf32>
    %c0_225 = arith.constant 0 : index
    %c0_226 = arith.constant 0 : index
    %543 = vector.load %arg8[%c0_225, %c0_226] : memref<1x32xf32, #tpu.memory_space<vmem>>, vector<1x32xf32>
    %544 = vector.broadcast %543 : vector<1x32xf32> to vector<16x32xf32>
    %545 = arith.addf %542, %544 : vector<16x32xf32>
    %c0_227 = arith.constant 0 : index
    %c0_228 = arith.constant 0 : index
    %546 = vector.load %arg21[%c0_227, %c0_228] : memref<32x32xf32, #tpu.memory_space<vmem>>, vector<32x32xf32>
    %cst_229 = arith.constant dense<0.000000e+00> : vector<16x32xf32>
    %547 = tpu.matmul %545, %546, %cst_229 {dimension_numbers = #tpu.dot_dimension_numbers<[1], [0], [0], [1], [0, 0, 1, 1], [], []>} : vector<16x32xf32>, vector<32x32xf32>, vector<16x32xf32> -> vector<16x32xf32>
    %c0_230 = arith.constant 0 : index
    %c0_231 = arith.constant 0 : index
    %548 = vector.load %arg18[%c0_230, %c0_231] : memref<1x32xf32, #tpu.memory_space<vmem>>, vector<1x32xf32>
    %549 = vector.broadcast %548 : vector<1x32xf32> to vector<16x32xf32>
    %550 = arith.addf %547, %549 : vector<16x32xf32>
    %c0_232 = arith.constant 0 : index
    %c0_233 = arith.constant 0 : index
    %551 = vector.load %arg19[%c0_232, %c0_233] : memref<32x64xf32, #tpu.memory_space<vmem>>, vector<32x64xf32>
    %cst_234 = arith.constant dense<0.000000e+00> : vector<16x64xf32>
    %552 = tpu.matmul %387, %551, %cst_234 {dimension_numbers = #tpu.dot_dimension_numbers<[1], [0], [0], [1], [0, 0, 1, 1], [], []>} : vector<16x32xf32>, vector<32x64xf32>, vector<16x64xf32> -> vector<16x64xf32>
    %c0_235 = arith.constant 0 : index
    %c0_236 = arith.constant 0 : index
    %553 = vector.load %arg16[%c0_235, %c0_236] : memref<1x64xf32, #tpu.memory_space<vmem>>, vector<1x64xf32>
    %554 = vector.broadcast %553 : vector<1x64xf32> to vector<16x64xf32>
    %555 = arith.addf %552, %554 : vector<16x64xf32>
    %556 = vector.extract_strided_slice %555 {offsets = [0, 0], sizes = [16, 32], strides = [1, 1]} : vector<16x64xf32> to vector<16x32xf32>
    %557 = vector.extract_strided_slice %555 {offsets = [0, 32], sizes = [16, 32], strides = [1, 1]} : vector<16x64xf32> to vector<16x32xf32>
    %558 = vector.shape_cast %550 : vector<16x32xf32> to vector<2x8x32xf32>
    %559 = vector.shape_cast %556 : vector<16x32xf32> to vector<2x8x32xf32>
    %560 = vector.shape_cast %557 : vector<16x32xf32> to vector<2x8x32xf32>
    %cst_237 = arith.constant 0.000000e+00 : f32
    %561 = vector.broadcast %cst_237 : f32 to vector<2x1x8xf32>
    %562 = arith.cmpf oeq, %0, %561 : vector<2x1x8xf32>
    %cst_238 = arith.constant 0.000000e+00 : f32
    %563 = vector.broadcast %cst_238 : f32 to vector<16x32xf32>
    %564 = vector.extract_strided_slice %558 {offsets = [0, 0, 0], sizes = [2, 8, 8], strides = [1, 1, 1]} : vector<2x8x32xf32> to vector<2x8x8xf32>
    %565 = vector.extract_strided_slice %559 {offsets = [0, 0, 0], sizes = [2, 8, 8], strides = [1, 1, 1]} : vector<2x8x32xf32> to vector<2x8x8xf32>
    "tpu.trace_start"() <{level = 10 : i32, message = "bqd,bkd->bqk"}> : () -> ()
    %cst_239 = arith.constant dense<0.000000e+00> : vector<2x8x8xf32>
    %566 = tpu.matmul %564, %565, %cst_239 {dimension_numbers = #tpu.dot_dimension_numbers<[2], [2], [1], [1], [0, 0, 0, 1, 1, 1], [0], [0]>} : vector<2x8x8xf32>, vector<2x8x8xf32>, vector<2x8x8xf32> -> vector<2x8x8xf32>
    "tpu.trace_stop"() : () -> ()
    %cst_240 = arith.constant 0.353553385 : f32
    %567 = vector.broadcast %cst_240 : f32 to vector<2x8x8xf32>
    %568 = arith.mulf %566, %567 : vector<2x8x8xf32>
    %cst_241 = arith.constant -1.000000e+09 : f32
    %569 = vector.shape_cast %562 : vector<2x1x8xi1> to vector<2x1x8xi1>
    %570 = vector.broadcast %569 : vector<2x1x8xi1> to vector<2x8x8xi1>
    %571 = vector.broadcast %cst_241 : f32 to vector<2x8x8xf32>
    %572 = arith.select %570, %571, %568 : vector<2x8x8xi1>, vector<2x8x8xf32>
    %cst_242 = arith.constant dense<0xFF800000> : vector<2x8xf32>
    %573 = vector.multi_reduction <maximumf>, %572, %cst_242 [2] : vector<2x8x8xf32> to vector<2x8xf32>
    %574 = vector.shape_cast %573 : vector<2x8xf32> to vector<2x8x1xf32>
    %575 = vector.broadcast %574 : vector<2x8x1xf32> to vector<2x8x8xf32>
    %576 = arith.subf %572, %575 : vector<2x8x8xf32>
    %577 = math.exp %576 : vector<2x8x8xf32>
    %cst_243 = arith.constant dense<0.000000e+00> : vector<2x8xf32>
    %578 = vector.multi_reduction <add>, %577, %cst_243 [2] : vector<2x8x8xf32> to vector<2x8xf32>
    %579 = vector.shape_cast %578 : vector<2x8xf32> to vector<2x8x1xf32>
    %580 = tpu.reciprocal %579 {approx = true} : vector<2x8x1xf32> -> vector<2x8x1xf32>
    %581 = vector.broadcast %580 : vector<2x8x1xf32> to vector<2x8x8xf32>
    %582 = arith.mulf %577, %581 : vector<2x8x8xf32>
    %583 = vector.extract_strided_slice %560 {offsets = [0, 0, 0], sizes = [2, 8, 8], strides = [1, 1, 1]} : vector<2x8x32xf32> to vector<2x8x8xf32>
    "tpu.trace_start"() <{level = 10 : i32, message = "bqk,bkd->bqd"}> : () -> ()
    %cst_244 = arith.constant dense<0.000000e+00> : vector<2x8x8xf32>
    %584 = tpu.matmul %582, %583, %cst_244 {dimension_numbers = #tpu.dot_dimension_numbers<[2], [1], [1], [2], [0, 0, 0, 1, 1, 2], [0], [0]>} : vector<2x8x8xf32>, vector<2x8x8xf32>, vector<2x8x8xf32> -> vector<2x8x8xf32>
    "tpu.trace_stop"() : () -> ()
    %585 = vector.shape_cast %584 : vector<2x8x8xf32> to vector<16x8xf32>
    %c0_245 = arith.constant 0 : index
    %c0_246 = arith.constant 0 : index
    %586 = vector.load %arg20[%c0_245, %c0_246] : memref<32x32xf32, #tpu.memory_space<vmem>>, vector<8x32xf32>
    %cst_247 = arith.constant dense<0.000000e+00> : vector<16x32xf32>
    %587 = tpu.matmul %585, %586, %cst_247 {dimension_numbers = #tpu.dot_dimension_numbers<[1], [0], [0], [1], [0, 0, 1, 1], [], []>} : vector<16x8xf32>, vector<8x32xf32>, vector<16x32xf32> -> vector<16x32xf32>
    %588 = arith.addf %563, %587 : vector<16x32xf32>
    %589 = vector.extract_strided_slice %558 {offsets = [0, 0, 8], sizes = [2, 8, 8], strides = [1, 1, 1]} : vector<2x8x32xf32> to vector<2x8x8xf32>
    %590 = vector.extract_strided_slice %559 {offsets = [0, 0, 8], sizes = [2, 8, 8], strides = [1, 1, 1]} : vector<2x8x32xf32> to vector<2x8x8xf32>
    "tpu.trace_start"() <{level = 10 : i32, message = "bqd,bkd->bqk"}> : () -> ()
    %cst_248 = arith.constant dense<0.000000e+00> : vector<2x8x8xf32>
    %591 = tpu.matmul %589, %590, %cst_248 {dimension_numbers = #tpu.dot_dimension_numbers<[2], [2], [1], [1], [0, 0, 0, 1, 1, 1], [0], [0]>} : vector<2x8x8xf32>, vector<2x8x8xf32>, vector<2x8x8xf32> -> vector<2x8x8xf32>
    "tpu.trace_stop"() : () -> ()
    %cst_249 = arith.constant 0.353553385 : f32
    %592 = vector.broadcast %cst_249 : f32 to vector<2x8x8xf32>
    %593 = arith.mulf %591, %592 : vector<2x8x8xf32>
    %cst_250 = arith.constant -1.000000e+09 : f32
    %594 = vector.shape_cast %562 : vector<2x1x8xi1> to vector<2x1x8xi1>
    %595 = vector.broadcast %594 : vector<2x1x8xi1> to vector<2x8x8xi1>
    %596 = vector.broadcast %cst_250 : f32 to vector<2x8x8xf32>
    %597 = arith.select %595, %596, %593 : vector<2x8x8xi1>, vector<2x8x8xf32>
    %cst_251 = arith.constant dense<0xFF800000> : vector<2x8xf32>
    %598 = vector.multi_reduction <maximumf>, %597, %cst_251 [2] : vector<2x8x8xf32> to vector<2x8xf32>
    %599 = vector.shape_cast %598 : vector<2x8xf32> to vector<2x8x1xf32>
    %600 = vector.broadcast %599 : vector<2x8x1xf32> to vector<2x8x8xf32>
    %601 = arith.subf %597, %600 : vector<2x8x8xf32>
    %602 = math.exp %601 : vector<2x8x8xf32>
    %cst_252 = arith.constant dense<0.000000e+00> : vector<2x8xf32>
    %603 = vector.multi_reduction <add>, %602, %cst_252 [2] : vector<2x8x8xf32> to vector<2x8xf32>
    %604 = vector.shape_cast %603 : vector<2x8xf32> to vector<2x8x1xf32>
    %605 = tpu.reciprocal %604 {approx = true} : vector<2x8x1xf32> -> vector<2x8x1xf32>
    %606 = vector.broadcast %605 : vector<2x8x1xf32> to vector<2x8x8xf32>
    %607 = arith.mulf %602, %606 : vector<2x8x8xf32>
    %608 = vector.extract_strided_slice %560 {offsets = [0, 0, 8], sizes = [2, 8, 8], strides = [1, 1, 1]} : vector<2x8x32xf32> to vector<2x8x8xf32>
    "tpu.trace_start"() <{level = 10 : i32, message = "bqk,bkd->bqd"}> : () -> ()
    %cst_253 = arith.constant dense<0.000000e+00> : vector<2x8x8xf32>
    %609 = tpu.matmul %607, %608, %cst_253 {dimension_numbers = #tpu.dot_dimension_numbers<[2], [1], [1], [2], [0, 0, 0, 1, 1, 2], [0], [0]>} : vector<2x8x8xf32>, vector<2x8x8xf32>, vector<2x8x8xf32> -> vector<2x8x8xf32>
    "tpu.trace_stop"() : () -> ()
    %610 = vector.shape_cast %609 : vector<2x8x8xf32> to vector<16x8xf32>
    %c8_254 = arith.constant 8 : index
    %c0_255 = arith.constant 0 : index
    %611 = vector.load %arg20[%c8_254, %c0_255] : memref<32x32xf32, #tpu.memory_space<vmem>>, vector<8x32xf32>
    %cst_256 = arith.constant dense<0.000000e+00> : vector<16x32xf32>
    %612 = tpu.matmul %610, %611, %cst_256 {dimension_numbers = #tpu.dot_dimension_numbers<[1], [0], [0], [1], [0, 0, 1, 1], [], []>} : vector<16x8xf32>, vector<8x32xf32>, vector<16x32xf32> -> vector<16x32xf32>
    %613 = arith.addf %588, %612 : vector<16x32xf32>
    %614 = vector.extract_strided_slice %558 {offsets = [0, 0, 16], sizes = [2, 8, 8], strides = [1, 1, 1]} : vector<2x8x32xf32> to vector<2x8x8xf32>
    %615 = vector.extract_strided_slice %559 {offsets = [0, 0, 16], sizes = [2, 8, 8], strides = [1, 1, 1]} : vector<2x8x32xf32> to vector<2x8x8xf32>
    "tpu.trace_start"() <{level = 10 : i32, message = "bqd,bkd->bqk"}> : () -> ()
    %cst_257 = arith.constant dense<0.000000e+00> : vector<2x8x8xf32>
    %616 = tpu.matmul %614, %615, %cst_257 {dimension_numbers = #tpu.dot_dimension_numbers<[2], [2], [1], [1], [0, 0, 0, 1, 1, 1], [0], [0]>} : vector<2x8x8xf32>, vector<2x8x8xf32>, vector<2x8x8xf32> -> vector<2x8x8xf32>
    "tpu.trace_stop"() : () -> ()
    %cst_258 = arith.constant 0.353553385 : f32
    %617 = vector.broadcast %cst_258 : f32 to vector<2x8x8xf32>
    %618 = arith.mulf %616, %617 : vector<2x8x8xf32>
    %cst_259 = arith.constant -1.000000e+09 : f32
    %619 = vector.shape_cast %562 : vector<2x1x8xi1> to vector<2x1x8xi1>
    %620 = vector.broadcast %619 : vector<2x1x8xi1> to vector<2x8x8xi1>
    %621 = vector.broadcast %cst_259 : f32 to vector<2x8x8xf32>
    %622 = arith.select %620, %621, %618 : vector<2x8x8xi1>, vector<2x8x8xf32>
    %cst_260 = arith.constant dense<0xFF800000> : vector<2x8xf32>
    %623 = vector.multi_reduction <maximumf>, %622, %cst_260 [2] : vector<2x8x8xf32> to vector<2x8xf32>
    %624 = vector.shape_cast %623 : vector<2x8xf32> to vector<2x8x1xf32>
    %625 = vector.broadcast %624 : vector<2x8x1xf32> to vector<2x8x8xf32>
    %626 = arith.subf %622, %625 : vector<2x8x8xf32>
    %627 = math.exp %626 : vector<2x8x8xf32>
    %cst_261 = arith.constant dense<0.000000e+00> : vector<2x8xf32>
    %628 = vector.multi_reduction <add>, %627, %cst_261 [2] : vector<2x8x8xf32> to vector<2x8xf32>
    %629 = vector.shape_cast %628 : vector<2x8xf32> to vector<2x8x1xf32>
    %630 = tpu.reciprocal %629 {approx = true} : vector<2x8x1xf32> -> vector<2x8x1xf32>
    %631 = vector.broadcast %630 : vector<2x8x1xf32> to vector<2x8x8xf32>
    %632 = arith.mulf %627, %631 : vector<2x8x8xf32>
    %633 = vector.extract_strided_slice %560 {offsets = [0, 0, 16], sizes = [2, 8, 8], strides = [1, 1, 1]} : vector<2x8x32xf32> to vector<2x8x8xf32>
    "tpu.trace_start"() <{level = 10 : i32, message = "bqk,bkd->bqd"}> : () -> ()
    %cst_262 = arith.constant dense<0.000000e+00> : vector<2x8x8xf32>
    %634 = tpu.matmul %632, %633, %cst_262 {dimension_numbers = #tpu.dot_dimension_numbers<[2], [1], [1], [2], [0, 0, 0, 1, 1, 2], [0], [0]>} : vector<2x8x8xf32>, vector<2x8x8xf32>, vector<2x8x8xf32> -> vector<2x8x8xf32>
    "tpu.trace_stop"() : () -> ()
    %635 = vector.shape_cast %634 : vector<2x8x8xf32> to vector<16x8xf32>
    %c16_263 = arith.constant 16 : index
    %c0_264 = arith.constant 0 : index
    %636 = vector.load %arg20[%c16_263, %c0_264] : memref<32x32xf32, #tpu.memory_space<vmem>>, vector<8x32xf32>
    %cst_265 = arith.constant dense<0.000000e+00> : vector<16x32xf32>
    %637 = tpu.matmul %635, %636, %cst_265 {dimension_numbers = #tpu.dot_dimension_numbers<[1], [0], [0], [1], [0, 0, 1, 1], [], []>} : vector<16x8xf32>, vector<8x32xf32>, vector<16x32xf32> -> vector<16x32xf32>
    %638 = arith.addf %613, %637 : vector<16x32xf32>
    %639 = vector.extract_strided_slice %558 {offsets = [0, 0, 24], sizes = [2, 8, 8], strides = [1, 1, 1]} : vector<2x8x32xf32> to vector<2x8x8xf32>
    %640 = vector.extract_strided_slice %559 {offsets = [0, 0, 24], sizes = [2, 8, 8], strides = [1, 1, 1]} : vector<2x8x32xf32> to vector<2x8x8xf32>
    "tpu.trace_start"() <{level = 10 : i32, message = "bqd,bkd->bqk"}> : () -> ()
    %cst_266 = arith.constant dense<0.000000e+00> : vector<2x8x8xf32>
    %641 = tpu.matmul %639, %640, %cst_266 {dimension_numbers = #tpu.dot_dimension_numbers<[2], [2], [1], [1], [0, 0, 0, 1, 1, 1], [0], [0]>} : vector<2x8x8xf32>, vector<2x8x8xf32>, vector<2x8x8xf32> -> vector<2x8x8xf32>
    "tpu.trace_stop"() : () -> ()
    %cst_267 = arith.constant 0.353553385 : f32
    %642 = vector.broadcast %cst_267 : f32 to vector<2x8x8xf32>
    %643 = arith.mulf %641, %642 : vector<2x8x8xf32>
    %cst_268 = arith.constant -1.000000e+09 : f32
    %644 = vector.shape_cast %562 : vector<2x1x8xi1> to vector<2x1x8xi1>
    %645 = vector.broadcast %644 : vector<2x1x8xi1> to vector<2x8x8xi1>
    %646 = vector.broadcast %cst_268 : f32 to vector<2x8x8xf32>
    %647 = arith.select %645, %646, %643 : vector<2x8x8xi1>, vector<2x8x8xf32>
    %cst_269 = arith.constant dense<0xFF800000> : vector<2x8xf32>
    %648 = vector.multi_reduction <maximumf>, %647, %cst_269 [2] : vector<2x8x8xf32> to vector<2x8xf32>
    %649 = vector.shape_cast %648 : vector<2x8xf32> to vector<2x8x1xf32>
    %650 = vector.broadcast %649 : vector<2x8x1xf32> to vector<2x8x8xf32>
    %651 = arith.subf %647, %650 : vector<2x8x8xf32>
    %652 = math.exp %651 : vector<2x8x8xf32>
    %cst_270 = arith.constant dense<0.000000e+00> : vector<2x8xf32>
    %653 = vector.multi_reduction <add>, %652, %cst_270 [2] : vector<2x8x8xf32> to vector<2x8xf32>
    %654 = vector.shape_cast %653 : vector<2x8xf32> to vector<2x8x1xf32>
    %655 = tpu.reciprocal %654 {approx = true} : vector<2x8x1xf32> -> vector<2x8x1xf32>
    %656 = vector.broadcast %655 : vector<2x8x1xf32> to vector<2x8x8xf32>
    %657 = arith.mulf %652, %656 : vector<2x8x8xf32>
    %658 = vector.extract_strided_slice %560 {offsets = [0, 0, 24], sizes = [2, 8, 8], strides = [1, 1, 1]} : vector<2x8x32xf32> to vector<2x8x8xf32>
    "tpu.trace_start"() <{level = 10 : i32, message = "bqk,bkd->bqd"}> : () -> ()
    %cst_271 = arith.constant dense<0.000000e+00> : vector<2x8x8xf32>
    %659 = tpu.matmul %657, %658, %cst_271 {dimension_numbers = #tpu.dot_dimension_numbers<[2], [1], [1], [2], [0, 0, 0, 1, 1, 2], [0], [0]>} : vector<2x8x8xf32>, vector<2x8x8xf32>, vector<2x8x8xf32> -> vector<2x8x8xf32>
    "tpu.trace_stop"() : () -> ()
    %660 = vector.shape_cast %659 : vector<2x8x8xf32> to vector<16x8xf32>
    %c24_272 = arith.constant 24 : index
    %c0_273 = arith.constant 0 : index
    %661 = vector.load %arg20[%c24_272, %c0_273] : memref<32x32xf32, #tpu.memory_space<vmem>>, vector<8x32xf32>
    %cst_274 = arith.constant dense<0.000000e+00> : vector<16x32xf32>
    %662 = tpu.matmul %660, %661, %cst_274 {dimension_numbers = #tpu.dot_dimension_numbers<[1], [0], [0], [1], [0, 0, 1, 1], [], []>} : vector<16x8xf32>, vector<8x32xf32>, vector<16x32xf32> -> vector<16x32xf32>
    %663 = arith.addf %638, %662 : vector<16x32xf32>
    %c0_275 = arith.constant 0 : index
    %c0_276 = arith.constant 0 : index
    %664 = vector.load %arg17[%c0_275, %c0_276] : memref<1x32xf32, #tpu.memory_space<vmem>>, vector<1x32xf32>
    %665 = vector.broadcast %664 : vector<1x32xf32> to vector<16x32xf32>
    %666 = arith.addf %663, %665 : vector<16x32xf32>
    %667 = arith.addf %521, %666 : vector<16x32xf32>
    %cst_277 = arith.constant dense<0.000000e+00> : vector<16xf32>
    %668 = vector.multi_reduction <add>, %667, %cst_277 [1] : vector<16x32xf32> to vector<16xf32>
    %669 = vector.shape_cast %668 : vector<16xf32> to vector<16x1xf32>
    %cst_278 = arith.constant 3.200000e+01 : f32
    %670 = vector.broadcast %cst_278 : f32 to vector<16x1xf32>
    %671 = arith.divf %669, %670 : vector<16x1xf32>
    %672 = vector.broadcast %671 : vector<16x1xf32> to vector<16x32xf32>
    %673 = arith.subf %667, %672 : vector<16x32xf32>
    %674 = arith.mulf %673, %673 : vector<16x32xf32>
    %cst_279 = arith.constant dense<0.000000e+00> : vector<16xf32>
    %675 = vector.multi_reduction <add>, %674, %cst_279 [1] : vector<16x32xf32> to vector<16xf32>
    %676 = vector.shape_cast %675 : vector<16xf32> to vector<16x1xf32>
    %cst_280 = arith.constant 3.100000e+01 : f32
    %677 = vector.broadcast %cst_280 : f32 to vector<16x1xf32>
    %678 = arith.divf %676, %677 : vector<16x1xf32>
    %679 = math.sqrt %678 : vector<16x1xf32>
    %c0_281 = arith.constant 0 : index
    %c0_282 = arith.constant 0 : index
    %680 = vector.load %arg11[%c0_281, %c0_282] : memref<1x32xf32, #tpu.memory_space<vmem>>, vector<1x32xf32>
    %681 = vector.broadcast %671 : vector<16x1xf32> to vector<16x32xf32>
    %682 = arith.subf %667, %681 : vector<16x32xf32>
    %683 = vector.broadcast %680 : vector<1x32xf32> to vector<16x32xf32>
    %684 = arith.mulf %683, %682 : vector<16x32xf32>
    %cst_283 = arith.constant 9.99999997E-7 : f32
    %685 = vector.broadcast %cst_283 : f32 to vector<16x1xf32>
    %686 = arith.addf %679, %685 : vector<16x1xf32>
    %687 = vector.broadcast %686 : vector<16x1xf32> to vector<16x32xf32>
    %688 = arith.divf %684, %687 : vector<16x32xf32>
    %c0_284 = arith.constant 0 : index
    %c0_285 = arith.constant 0 : index
    %689 = vector.load %arg10[%c0_284, %c0_285] : memref<1x32xf32, #tpu.memory_space<vmem>>, vector<1x32xf32>
    %690 = vector.broadcast %689 : vector<1x32xf32> to vector<16x32xf32>
    %691 = arith.addf %688, %690 : vector<16x32xf32>
    %c0_286 = arith.constant 0 : index
    %c0_287 = arith.constant 0 : index
    %692 = vector.load %arg22[%c0_286, %c0_287] : memref<32x64xf32, #tpu.memory_space<vmem>>, vector<32x64xf32>
    %cst_288 = arith.constant dense<0.000000e+00> : vector<16x64xf32>
    %693 = tpu.matmul %691, %692, %cst_288 {dimension_numbers = #tpu.dot_dimension_numbers<[1], [0], [0], [1], [0, 0, 1, 1], [], []>} : vector<16x32xf32>, vector<32x64xf32>, vector<16x64xf32> -> vector<16x64xf32>
    %c0_289 = arith.constant 0 : index
    %c0_290 = arith.constant 0 : index
    %694 = vector.load %arg4[%c0_289, %c0_290] : memref<1x64xf32, #tpu.memory_space<vmem>>, vector<1x64xf32>
    %695 = vector.broadcast %694 : vector<1x64xf32> to vector<16x64xf32>
    %696 = arith.addf %693, %695 : vector<16x64xf32>
    %cst_291 = arith.constant 0.000000e+00 : f32
    %697 = vector.broadcast %cst_291 : f32 to vector<16x64xf32>
    %698 = arith.maximumf %696, %697 : vector<16x64xf32>
    %c0_292 = arith.constant 0 : index
    %c0_293 = arith.constant 0 : index
    %699 = vector.load %arg23[%c0_292, %c0_293] : memref<64x32xf32, #tpu.memory_space<vmem>>, vector<64x32xf32>
    %cst_294 = arith.constant dense<0.000000e+00> : vector<16x32xf32>
    %700 = tpu.matmul %698, %699, %cst_294 {dimension_numbers = #tpu.dot_dimension_numbers<[1], [0], [0], [1], [0, 0, 1, 1], [], []>} : vector<16x64xf32>, vector<64x32xf32>, vector<16x32xf32> -> vector<16x32xf32>
    %c0_295 = arith.constant 0 : index
    %c0_296 = arith.constant 0 : index
    %701 = vector.load %arg5[%c0_295, %c0_296] : memref<1x32xf32, #tpu.memory_space<vmem>>, vector<1x32xf32>
    %702 = vector.broadcast %701 : vector<1x32xf32> to vector<16x32xf32>
    %703 = arith.addf %700, %702 : vector<16x32xf32>
    %704 = arith.addf %667, %703 : vector<16x32xf32>
    %cst_297 = arith.constant dense<0.000000e+00> : vector<16xf32>
    %705 = vector.multi_reduction <add>, %704, %cst_297 [1] : vector<16x32xf32> to vector<16xf32>
    %706 = vector.shape_cast %705 : vector<16xf32> to vector<16x1xf32>
    %cst_298 = arith.constant 3.200000e+01 : f32
    %707 = vector.broadcast %cst_298 : f32 to vector<16x1xf32>
    %708 = arith.divf %706, %707 : vector<16x1xf32>
    %709 = vector.broadcast %708 : vector<16x1xf32> to vector<16x32xf32>
    %710 = arith.subf %704, %709 : vector<16x32xf32>
    %711 = arith.mulf %710, %710 : vector<16x32xf32>
    %cst_299 = arith.constant dense<0.000000e+00> : vector<16xf32>
    %712 = vector.multi_reduction <add>, %711, %cst_299 [1] : vector<16x32xf32> to vector<16xf32>
    %713 = vector.shape_cast %712 : vector<16xf32> to vector<16x1xf32>
    %cst_300 = arith.constant 3.100000e+01 : f32
    %714 = vector.broadcast %cst_300 : f32 to vector<16x1xf32>
    %715 = arith.divf %713, %714 : vector<16x1xf32>
    %716 = math.sqrt %715 : vector<16x1xf32>
    %c0_301 = arith.constant 0 : index
    %c0_302 = arith.constant 0 : index
    %717 = vector.load %arg27[%c0_301, %c0_302] : memref<1x32xf32, #tpu.memory_space<vmem>>, vector<1x32xf32>
    %718 = vector.broadcast %708 : vector<16x1xf32> to vector<16x32xf32>
    %719 = arith.subf %704, %718 : vector<16x32xf32>
    %720 = vector.broadcast %717 : vector<1x32xf32> to vector<16x32xf32>
    %721 = arith.mulf %720, %719 : vector<16x32xf32>
    %cst_303 = arith.constant 9.99999997E-7 : f32
    %722 = vector.broadcast %cst_303 : f32 to vector<16x1xf32>
    %723 = arith.addf %716, %722 : vector<16x1xf32>
    %724 = vector.broadcast %723 : vector<16x1xf32> to vector<16x32xf32>
    %725 = arith.divf %721, %724 : vector<16x32xf32>
    %c0_304 = arith.constant 0 : index
    %c0_305 = arith.constant 0 : index
    %726 = vector.load %arg26[%c0_304, %c0_305] : memref<1x32xf32, #tpu.memory_space<vmem>>, vector<1x32xf32>
    %727 = vector.broadcast %726 : vector<1x32xf32> to vector<16x32xf32>
    %728 = arith.addf %725, %727 : vector<16x32xf32>
    %c0_306 = arith.constant 0 : index
    %c0_307 = arith.constant 0 : index
    %729 = vector.load %arg35[%c0_306, %c0_307] : memref<32x96xf32, #tpu.memory_space<vmem>>, vector<32x96xf32>
    %cst_308 = arith.constant dense<0.000000e+00> : vector<16x96xf32>
    %730 = tpu.matmul %728, %729, %cst_308 {dimension_numbers = #tpu.dot_dimension_numbers<[1], [0], [0], [1], [0, 0, 1, 1], [], []>} : vector<16x32xf32>, vector<32x96xf32>, vector<16x96xf32> -> vector<16x96xf32>
    %c0_309 = arith.constant 0 : index
    %c0_310 = arith.constant 0 : index
    %731 = vector.load %arg33[%c0_309, %c0_310] : memref<1x96xf32, #tpu.memory_space<vmem>>, vector<1x96xf32>
    %732 = vector.broadcast %731 : vector<1x96xf32> to vector<16x96xf32>
    %733 = arith.addf %730, %732 : vector<16x96xf32>
    %734 = vector.extract_strided_slice %733 {offsets = [0, 0], sizes = [16, 32], strides = [1, 1]} : vector<16x96xf32> to vector<16x32xf32>
    %735 = vector.extract_strided_slice %733 {offsets = [0, 32], sizes = [16, 32], strides = [1, 1]} : vector<16x96xf32> to vector<16x32xf32>
    %736 = vector.extract_strided_slice %733 {offsets = [0, 64], sizes = [16, 32], strides = [1, 1]} : vector<16x96xf32> to vector<16x32xf32>
    %737 = vector.shape_cast %734 : vector<16x32xf32> to vector<2x8x32xf32>
    %738 = vector.shape_cast %735 : vector<16x32xf32> to vector<2x8x32xf32>
    %739 = vector.shape_cast %736 : vector<16x32xf32> to vector<2x8x32xf32>
    %cst_311 = arith.constant 0.000000e+00 : f32
    %740 = vector.broadcast %cst_311 : f32 to vector<2x8x8xf32>
    %741 = arith.cmpf oeq, %1, %740 : vector<2x8x8xf32>
    %cst_312 = arith.constant 0.000000e+00 : f32
    %742 = vector.broadcast %cst_312 : f32 to vector<16x32xf32>
    %743 = vector.extract_strided_slice %737 {offsets = [0, 0, 0], sizes = [2, 8, 8], strides = [1, 1, 1]} : vector<2x8x32xf32> to vector<2x8x8xf32>
    %744 = vector.extract_strided_slice %738 {offsets = [0, 0, 0], sizes = [2, 8, 8], strides = [1, 1, 1]} : vector<2x8x32xf32> to vector<2x8x8xf32>
    "tpu.trace_start"() <{level = 10 : i32, message = "bqd,bkd->bqk"}> : () -> ()
    %cst_313 = arith.constant dense<0.000000e+00> : vector<2x8x8xf32>
    %745 = tpu.matmul %743, %744, %cst_313 {dimension_numbers = #tpu.dot_dimension_numbers<[2], [2], [1], [1], [0, 0, 0, 1, 1, 1], [0], [0]>} : vector<2x8x8xf32>, vector<2x8x8xf32>, vector<2x8x8xf32> -> vector<2x8x8xf32>
    "tpu.trace_stop"() : () -> ()
    %cst_314 = arith.constant 0.353553385 : f32
    %746 = vector.broadcast %cst_314 : f32 to vector<2x8x8xf32>
    %747 = arith.mulf %745, %746 : vector<2x8x8xf32>
    %cst_315 = arith.constant -1.000000e+09 : f32
    %748 = vector.broadcast %cst_315 : f32 to vector<2x8x8xf32>
    %749 = arith.select %741, %748, %747 : vector<2x8x8xi1>, vector<2x8x8xf32>
    %cst_316 = arith.constant dense<0xFF800000> : vector<2x8xf32>
    %750 = vector.multi_reduction <maximumf>, %749, %cst_316 [2] : vector<2x8x8xf32> to vector<2x8xf32>
    %751 = vector.shape_cast %750 : vector<2x8xf32> to vector<2x8x1xf32>
    %752 = vector.broadcast %751 : vector<2x8x1xf32> to vector<2x8x8xf32>
    %753 = arith.subf %749, %752 : vector<2x8x8xf32>
    %754 = math.exp %753 : vector<2x8x8xf32>
    %cst_317 = arith.constant dense<0.000000e+00> : vector<2x8xf32>
    %755 = vector.multi_reduction <add>, %754, %cst_317 [2] : vector<2x8x8xf32> to vector<2x8xf32>
    %756 = vector.shape_cast %755 : vector<2x8xf32> to vector<2x8x1xf32>
    %757 = tpu.reciprocal %756 {approx = true} : vector<2x8x1xf32> -> vector<2x8x1xf32>
    %758 = vector.broadcast %757 : vector<2x8x1xf32> to vector<2x8x8xf32>
    %759 = arith.mulf %754, %758 : vector<2x8x8xf32>
    %760 = vector.extract_strided_slice %739 {offsets = [0, 0, 0], sizes = [2, 8, 8], strides = [1, 1, 1]} : vector<2x8x32xf32> to vector<2x8x8xf32>
    "tpu.trace_start"() <{level = 10 : i32, message = "bqk,bkd->bqd"}> : () -> ()
    %cst_318 = arith.constant dense<0.000000e+00> : vector<2x8x8xf32>
    %761 = tpu.matmul %759, %760, %cst_318 {dimension_numbers = #tpu.dot_dimension_numbers<[2], [1], [1], [2], [0, 0, 0, 1, 1, 2], [0], [0]>} : vector<2x8x8xf32>, vector<2x8x8xf32>, vector<2x8x8xf32> -> vector<2x8x8xf32>
    "tpu.trace_stop"() : () -> ()
    %762 = vector.shape_cast %761 : vector<2x8x8xf32> to vector<16x8xf32>
    %c0_319 = arith.constant 0 : index
    %c0_320 = arith.constant 0 : index
    %763 = vector.load %arg34[%c0_319, %c0_320] : memref<32x32xf32, #tpu.memory_space<vmem>>, vector<8x32xf32>
    %cst_321 = arith.constant dense<0.000000e+00> : vector<16x32xf32>
    %764 = tpu.matmul %762, %763, %cst_321 {dimension_numbers = #tpu.dot_dimension_numbers<[1], [0], [0], [1], [0, 0, 1, 1], [], []>} : vector<16x8xf32>, vector<8x32xf32>, vector<16x32xf32> -> vector<16x32xf32>
    %765 = arith.addf %742, %764 : vector<16x32xf32>
    %766 = vector.extract_strided_slice %737 {offsets = [0, 0, 8], sizes = [2, 8, 8], strides = [1, 1, 1]} : vector<2x8x32xf32> to vector<2x8x8xf32>
    %767 = vector.extract_strided_slice %738 {offsets = [0, 0, 8], sizes = [2, 8, 8], strides = [1, 1, 1]} : vector<2x8x32xf32> to vector<2x8x8xf32>
    "tpu.trace_start"() <{level = 10 : i32, message = "bqd,bkd->bqk"}> : () -> ()
    %cst_322 = arith.constant dense<0.000000e+00> : vector<2x8x8xf32>
    %768 = tpu.matmul %766, %767, %cst_322 {dimension_numbers = #tpu.dot_dimension_numbers<[2], [2], [1], [1], [0, 0, 0, 1, 1, 1], [0], [0]>} : vector<2x8x8xf32>, vector<2x8x8xf32>, vector<2x8x8xf32> -> vector<2x8x8xf32>
    "tpu.trace_stop"() : () -> ()
    %cst_323 = arith.constant 0.353553385 : f32
    %769 = vector.broadcast %cst_323 : f32 to vector<2x8x8xf32>
    %770 = arith.mulf %768, %769 : vector<2x8x8xf32>
    %cst_324 = arith.constant -1.000000e+09 : f32
    %771 = vector.broadcast %cst_324 : f32 to vector<2x8x8xf32>
    %772 = arith.select %741, %771, %770 : vector<2x8x8xi1>, vector<2x8x8xf32>
    %cst_325 = arith.constant dense<0xFF800000> : vector<2x8xf32>
    %773 = vector.multi_reduction <maximumf>, %772, %cst_325 [2] : vector<2x8x8xf32> to vector<2x8xf32>
    %774 = vector.shape_cast %773 : vector<2x8xf32> to vector<2x8x1xf32>
    %775 = vector.broadcast %774 : vector<2x8x1xf32> to vector<2x8x8xf32>
    %776 = arith.subf %772, %775 : vector<2x8x8xf32>
    %777 = math.exp %776 : vector<2x8x8xf32>
    %cst_326 = arith.constant dense<0.000000e+00> : vector<2x8xf32>
    %778 = vector.multi_reduction <add>, %777, %cst_326 [2] : vector<2x8x8xf32> to vector<2x8xf32>
    %779 = vector.shape_cast %778 : vector<2x8xf32> to vector<2x8x1xf32>
    %780 = tpu.reciprocal %779 {approx = true} : vector<2x8x1xf32> -> vector<2x8x1xf32>
    %781 = vector.broadcast %780 : vector<2x8x1xf32> to vector<2x8x8xf32>
    %782 = arith.mulf %777, %781 : vector<2x8x8xf32>
    %783 = vector.extract_strided_slice %739 {offsets = [0, 0, 8], sizes = [2, 8, 8], strides = [1, 1, 1]} : vector<2x8x32xf32> to vector<2x8x8xf32>
    "tpu.trace_start"() <{level = 10 : i32, message = "bqk,bkd->bqd"}> : () -> ()
    %cst_327 = arith.constant dense<0.000000e+00> : vector<2x8x8xf32>
    %784 = tpu.matmul %782, %783, %cst_327 {dimension_numbers = #tpu.dot_dimension_numbers<[2], [1], [1], [2], [0, 0, 0, 1, 1, 2], [0], [0]>} : vector<2x8x8xf32>, vector<2x8x8xf32>, vector<2x8x8xf32> -> vector<2x8x8xf32>
    "tpu.trace_stop"() : () -> ()
    %785 = vector.shape_cast %784 : vector<2x8x8xf32> to vector<16x8xf32>
    %c8_328 = arith.constant 8 : index
    %c0_329 = arith.constant 0 : index
    %786 = vector.load %arg34[%c8_328, %c0_329] : memref<32x32xf32, #tpu.memory_space<vmem>>, vector<8x32xf32>
    %cst_330 = arith.constant dense<0.000000e+00> : vector<16x32xf32>
    %787 = tpu.matmul %785, %786, %cst_330 {dimension_numbers = #tpu.dot_dimension_numbers<[1], [0], [0], [1], [0, 0, 1, 1], [], []>} : vector<16x8xf32>, vector<8x32xf32>, vector<16x32xf32> -> vector<16x32xf32>
    %788 = arith.addf %765, %787 : vector<16x32xf32>
    %789 = vector.extract_strided_slice %737 {offsets = [0, 0, 16], sizes = [2, 8, 8], strides = [1, 1, 1]} : vector<2x8x32xf32> to vector<2x8x8xf32>
    %790 = vector.extract_strided_slice %738 {offsets = [0, 0, 16], sizes = [2, 8, 8], strides = [1, 1, 1]} : vector<2x8x32xf32> to vector<2x8x8xf32>
    "tpu.trace_start"() <{level = 10 : i32, message = "bqd,bkd->bqk"}> : () -> ()
    %cst_331 = arith.constant dense<0.000000e+00> : vector<2x8x8xf32>
    %791 = tpu.matmul %789, %790, %cst_331 {dimension_numbers = #tpu.dot_dimension_numbers<[2], [2], [1], [1], [0, 0, 0, 1, 1, 1], [0], [0]>} : vector<2x8x8xf32>, vector<2x8x8xf32>, vector<2x8x8xf32> -> vector<2x8x8xf32>
    "tpu.trace_stop"() : () -> ()
    %cst_332 = arith.constant 0.353553385 : f32
    %792 = vector.broadcast %cst_332 : f32 to vector<2x8x8xf32>
    %793 = arith.mulf %791, %792 : vector<2x8x8xf32>
    %cst_333 = arith.constant -1.000000e+09 : f32
    %794 = vector.broadcast %cst_333 : f32 to vector<2x8x8xf32>
    %795 = arith.select %741, %794, %793 : vector<2x8x8xi1>, vector<2x8x8xf32>
    %cst_334 = arith.constant dense<0xFF800000> : vector<2x8xf32>
    %796 = vector.multi_reduction <maximumf>, %795, %cst_334 [2] : vector<2x8x8xf32> to vector<2x8xf32>
    %797 = vector.shape_cast %796 : vector<2x8xf32> to vector<2x8x1xf32>
    %798 = vector.broadcast %797 : vector<2x8x1xf32> to vector<2x8x8xf32>
    %799 = arith.subf %795, %798 : vector<2x8x8xf32>
    %800 = math.exp %799 : vector<2x8x8xf32>
    %cst_335 = arith.constant dense<0.000000e+00> : vector<2x8xf32>
    %801 = vector.multi_reduction <add>, %800, %cst_335 [2] : vector<2x8x8xf32> to vector<2x8xf32>
    %802 = vector.shape_cast %801 : vector<2x8xf32> to vector<2x8x1xf32>
    %803 = tpu.reciprocal %802 {approx = true} : vector<2x8x1xf32> -> vector<2x8x1xf32>
    %804 = vector.broadcast %803 : vector<2x8x1xf32> to vector<2x8x8xf32>
    %805 = arith.mulf %800, %804 : vector<2x8x8xf32>
    %806 = vector.extract_strided_slice %739 {offsets = [0, 0, 16], sizes = [2, 8, 8], strides = [1, 1, 1]} : vector<2x8x32xf32> to vector<2x8x8xf32>
    "tpu.trace_start"() <{level = 10 : i32, message = "bqk,bkd->bqd"}> : () -> ()
    %cst_336 = arith.constant dense<0.000000e+00> : vector<2x8x8xf32>
    %807 = tpu.matmul %805, %806, %cst_336 {dimension_numbers = #tpu.dot_dimension_numbers<[2], [1], [1], [2], [0, 0, 0, 1, 1, 2], [0], [0]>} : vector<2x8x8xf32>, vector<2x8x8xf32>, vector<2x8x8xf32> -> vector<2x8x8xf32>
    "tpu.trace_stop"() : () -> ()
    %808 = vector.shape_cast %807 : vector<2x8x8xf32> to vector<16x8xf32>
    %c16_337 = arith.constant 16 : index
    %c0_338 = arith.constant 0 : index
    %809 = vector.load %arg34[%c16_337, %c0_338] : memref<32x32xf32, #tpu.memory_space<vmem>>, vector<8x32xf32>
    %cst_339 = arith.constant dense<0.000000e+00> : vector<16x32xf32>
    %810 = tpu.matmul %808, %809, %cst_339 {dimension_numbers = #tpu.dot_dimension_numbers<[1], [0], [0], [1], [0, 0, 1, 1], [], []>} : vector<16x8xf32>, vector<8x32xf32>, vector<16x32xf32> -> vector<16x32xf32>
    %811 = arith.addf %788, %810 : vector<16x32xf32>
    %812 = vector.extract_strided_slice %737 {offsets = [0, 0, 24], sizes = [2, 8, 8], strides = [1, 1, 1]} : vector<2x8x32xf32> to vector<2x8x8xf32>
    %813 = vector.extract_strided_slice %738 {offsets = [0, 0, 24], sizes = [2, 8, 8], strides = [1, 1, 1]} : vector<2x8x32xf32> to vector<2x8x8xf32>
    "tpu.trace_start"() <{level = 10 : i32, message = "bqd,bkd->bqk"}> : () -> ()
    %cst_340 = arith.constant dense<0.000000e+00> : vector<2x8x8xf32>
    %814 = tpu.matmul %812, %813, %cst_340 {dimension_numbers = #tpu.dot_dimension_numbers<[2], [2], [1], [1], [0, 0, 0, 1, 1, 1], [0], [0]>} : vector<2x8x8xf32>, vector<2x8x8xf32>, vector<2x8x8xf32> -> vector<2x8x8xf32>
    "tpu.trace_stop"() : () -> ()
    %cst_341 = arith.constant 0.353553385 : f32
    %815 = vector.broadcast %cst_341 : f32 to vector<2x8x8xf32>
    %816 = arith.mulf %814, %815 : vector<2x8x8xf32>
    %cst_342 = arith.constant -1.000000e+09 : f32
    %817 = vector.broadcast %cst_342 : f32 to vector<2x8x8xf32>
    %818 = arith.select %741, %817, %816 : vector<2x8x8xi1>, vector<2x8x8xf32>
    %cst_343 = arith.constant dense<0xFF800000> : vector<2x8xf32>
    %819 = vector.multi_reduction <maximumf>, %818, %cst_343 [2] : vector<2x8x8xf32> to vector<2x8xf32>
    %820 = vector.shape_cast %819 : vector<2x8xf32> to vector<2x8x1xf32>
    %821 = vector.broadcast %820 : vector<2x8x1xf32> to vector<2x8x8xf32>
    %822 = arith.subf %818, %821 : vector<2x8x8xf32>
    %823 = math.exp %822 : vector<2x8x8xf32>
    %cst_344 = arith.constant dense<0.000000e+00> : vector<2x8xf32>
    %824 = vector.multi_reduction <add>, %823, %cst_344 [2] : vector<2x8x8xf32> to vector<2x8xf32>
    %825 = vector.shape_cast %824 : vector<2x8xf32> to vector<2x8x1xf32>
    %826 = tpu.reciprocal %825 {approx = true} : vector<2x8x1xf32> -> vector<2x8x1xf32>
    %827 = vector.broadcast %826 : vector<2x8x1xf32> to vector<2x8x8xf32>
    %828 = arith.mulf %823, %827 : vector<2x8x8xf32>
    %829 = vector.extract_strided_slice %739 {offsets = [0, 0, 24], sizes = [2, 8, 8], strides = [1, 1, 1]} : vector<2x8x32xf32> to vector<2x8x8xf32>
    "tpu.trace_start"() <{level = 10 : i32, message = "bqk,bkd->bqd"}> : () -> ()
    %cst_345 = arith.constant dense<0.000000e+00> : vector<2x8x8xf32>
    %830 = tpu.matmul %828, %829, %cst_345 {dimension_numbers = #tpu.dot_dimension_numbers<[2], [1], [1], [2], [0, 0, 0, 1, 1, 2], [0], [0]>} : vector<2x8x8xf32>, vector<2x8x8xf32>, vector<2x8x8xf32> -> vector<2x8x8xf32>
    "tpu.trace_stop"() : () -> ()
    %831 = vector.shape_cast %830 : vector<2x8x8xf32> to vector<16x8xf32>
    %c24_346 = arith.constant 24 : index
    %c0_347 = arith.constant 0 : index
    %832 = vector.load %arg34[%c24_346, %c0_347] : memref<32x32xf32, #tpu.memory_space<vmem>>, vector<8x32xf32>
    %cst_348 = arith.constant dense<0.000000e+00> : vector<16x32xf32>
    %833 = tpu.matmul %831, %832, %cst_348 {dimension_numbers = #tpu.dot_dimension_numbers<[1], [0], [0], [1], [0, 0, 1, 1], [], []>} : vector<16x8xf32>, vector<8x32xf32>, vector<16x32xf32> -> vector<16x32xf32>
    %834 = arith.addf %811, %833 : vector<16x32xf32>
    %c0_349 = arith.constant 0 : index
    %c0_350 = arith.constant 0 : index
    %835 = vector.load %arg32[%c0_349, %c0_350] : memref<1x32xf32, #tpu.memory_space<vmem>>, vector<1x32xf32>
    %836 = vector.broadcast %835 : vector<1x32xf32> to vector<16x32xf32>
    %837 = arith.addf %834, %836 : vector<16x32xf32>
    %838 = arith.addf %704, %837 : vector<16x32xf32>
    %cst_351 = arith.constant dense<0.000000e+00> : vector<16xf32>
    %839 = vector.multi_reduction <add>, %838, %cst_351 [1] : vector<16x32xf32> to vector<16xf32>
    %840 = vector.shape_cast %839 : vector<16xf32> to vector<16x1xf32>
    %cst_352 = arith.constant 3.200000e+01 : f32
    %841 = vector.broadcast %cst_352 : f32 to vector<16x1xf32>
    %842 = arith.divf %840, %841 : vector<16x1xf32>
    %843 = vector.broadcast %842 : vector<16x1xf32> to vector<16x32xf32>
    %844 = arith.subf %838, %843 : vector<16x32xf32>
    %845 = arith.mulf %844, %844 : vector<16x32xf32>
    %cst_353 = arith.constant dense<0.000000e+00> : vector<16xf32>
    %846 = vector.multi_reduction <add>, %845, %cst_353 [1] : vector<16x32xf32> to vector<16xf32>
    %847 = vector.shape_cast %846 : vector<16xf32> to vector<16x1xf32>
    %cst_354 = arith.constant 3.100000e+01 : f32
    %848 = vector.broadcast %cst_354 : f32 to vector<16x1xf32>
    %849 = arith.divf %847, %848 : vector<16x1xf32>
    %850 = math.sqrt %849 : vector<16x1xf32>
    %c0_355 = arith.constant 0 : index
    %c0_356 = arith.constant 0 : index
    %851 = vector.load %arg29[%c0_355, %c0_356] : memref<1x32xf32, #tpu.memory_space<vmem>>, vector<1x32xf32>
    %852 = vector.broadcast %842 : vector<16x1xf32> to vector<16x32xf32>
    %853 = arith.subf %838, %852 : vector<16x32xf32>
    %854 = vector.broadcast %851 : vector<1x32xf32> to vector<16x32xf32>
    %855 = arith.mulf %854, %853 : vector<16x32xf32>
    %cst_357 = arith.constant 9.99999997E-7 : f32
    %856 = vector.broadcast %cst_357 : f32 to vector<16x1xf32>
    %857 = arith.addf %850, %856 : vector<16x1xf32>
    %858 = vector.broadcast %857 : vector<16x1xf32> to vector<16x32xf32>
    %859 = arith.divf %855, %858 : vector<16x32xf32>
    %c0_358 = arith.constant 0 : index
    %c0_359 = arith.constant 0 : index
    %860 = vector.load %arg28[%c0_358, %c0_359] : memref<1x32xf32, #tpu.memory_space<vmem>>, vector<1x32xf32>
    %861 = vector.broadcast %860 : vector<1x32xf32> to vector<16x32xf32>
    %862 = arith.addf %859, %861 : vector<16x32xf32>
    %c0_360 = arith.constant 0 : index
    %c0_361 = arith.constant 0 : index
    %863 = vector.load %arg41[%c0_360, %c0_361] : memref<32x32xf32, #tpu.memory_space<vmem>>, vector<32x32xf32>
    %cst_362 = arith.constant dense<0.000000e+00> : vector<16x32xf32>
    %864 = tpu.matmul %862, %863, %cst_362 {dimension_numbers = #tpu.dot_dimension_numbers<[1], [0], [0], [1], [0, 0, 1, 1], [], []>} : vector<16x32xf32>, vector<32x32xf32>, vector<16x32xf32> -> vector<16x32xf32>
    %c0_363 = arith.constant 0 : index
    %c0_364 = arith.constant 0 : index
    %865 = vector.load %arg38[%c0_363, %c0_364] : memref<1x32xf32, #tpu.memory_space<vmem>>, vector<1x32xf32>
    %866 = vector.broadcast %865 : vector<1x32xf32> to vector<16x32xf32>
    %867 = arith.addf %864, %866 : vector<16x32xf32>
    %c0_365 = arith.constant 0 : index
    %c0_366 = arith.constant 0 : index
    %868 = vector.load %arg39[%c0_365, %c0_366] : memref<32x64xf32, #tpu.memory_space<vmem>>, vector<32x64xf32>
    %cst_367 = arith.constant dense<0.000000e+00> : vector<16x64xf32>
    %869 = tpu.matmul %387, %868, %cst_367 {dimension_numbers = #tpu.dot_dimension_numbers<[1], [0], [0], [1], [0, 0, 1, 1], [], []>} : vector<16x32xf32>, vector<32x64xf32>, vector<16x64xf32> -> vector<16x64xf32>
    %c0_368 = arith.constant 0 : index
    %c0_369 = arith.constant 0 : index
    %870 = vector.load %arg36[%c0_368, %c0_369] : memref<1x64xf32, #tpu.memory_space<vmem>>, vector<1x64xf32>
    %871 = vector.broadcast %870 : vector<1x64xf32> to vector<16x64xf32>
    %872 = arith.addf %869, %871 : vector<16x64xf32>
    %873 = vector.extract_strided_slice %872 {offsets = [0, 0], sizes = [16, 32], strides = [1, 1]} : vector<16x64xf32> to vector<16x32xf32>
    %874 = vector.extract_strided_slice %872 {offsets = [0, 32], sizes = [16, 32], strides = [1, 1]} : vector<16x64xf32> to vector<16x32xf32>
    %875 = vector.shape_cast %867 : vector<16x32xf32> to vector<2x8x32xf32>
    %876 = vector.shape_cast %873 : vector<16x32xf32> to vector<2x8x32xf32>
    %877 = vector.shape_cast %874 : vector<16x32xf32> to vector<2x8x32xf32>
    %cst_370 = arith.constant 0.000000e+00 : f32
    %878 = vector.broadcast %cst_370 : f32 to vector<2x1x8xf32>
    %879 = arith.cmpf oeq, %0, %878 : vector<2x1x8xf32>
    %cst_371 = arith.constant 0.000000e+00 : f32
    %880 = vector.broadcast %cst_371 : f32 to vector<16x32xf32>
    %881 = vector.extract_strided_slice %875 {offsets = [0, 0, 0], sizes = [2, 8, 8], strides = [1, 1, 1]} : vector<2x8x32xf32> to vector<2x8x8xf32>
    %882 = vector.extract_strided_slice %876 {offsets = [0, 0, 0], sizes = [2, 8, 8], strides = [1, 1, 1]} : vector<2x8x32xf32> to vector<2x8x8xf32>
    "tpu.trace_start"() <{level = 10 : i32, message = "bqd,bkd->bqk"}> : () -> ()
    %cst_372 = arith.constant dense<0.000000e+00> : vector<2x8x8xf32>
    %883 = tpu.matmul %881, %882, %cst_372 {dimension_numbers = #tpu.dot_dimension_numbers<[2], [2], [1], [1], [0, 0, 0, 1, 1, 1], [0], [0]>} : vector<2x8x8xf32>, vector<2x8x8xf32>, vector<2x8x8xf32> -> vector<2x8x8xf32>
    "tpu.trace_stop"() : () -> ()
    %cst_373 = arith.constant 0.353553385 : f32
    %884 = vector.broadcast %cst_373 : f32 to vector<2x8x8xf32>
    %885 = arith.mulf %883, %884 : vector<2x8x8xf32>
    %cst_374 = arith.constant -1.000000e+09 : f32
    %886 = vector.shape_cast %879 : vector<2x1x8xi1> to vector<2x1x8xi1>
    %887 = vector.broadcast %886 : vector<2x1x8xi1> to vector<2x8x8xi1>
    %888 = vector.broadcast %cst_374 : f32 to vector<2x8x8xf32>
    %889 = arith.select %887, %888, %885 : vector<2x8x8xi1>, vector<2x8x8xf32>
    %cst_375 = arith.constant dense<0xFF800000> : vector<2x8xf32>
    %890 = vector.multi_reduction <maximumf>, %889, %cst_375 [2] : vector<2x8x8xf32> to vector<2x8xf32>
    %891 = vector.shape_cast %890 : vector<2x8xf32> to vector<2x8x1xf32>
    %892 = vector.broadcast %891 : vector<2x8x1xf32> to vector<2x8x8xf32>
    %893 = arith.subf %889, %892 : vector<2x8x8xf32>
    %894 = math.exp %893 : vector<2x8x8xf32>
    %cst_376 = arith.constant dense<0.000000e+00> : vector<2x8xf32>
    %895 = vector.multi_reduction <add>, %894, %cst_376 [2] : vector<2x8x8xf32> to vector<2x8xf32>
    %896 = vector.shape_cast %895 : vector<2x8xf32> to vector<2x8x1xf32>
    %897 = tpu.reciprocal %896 {approx = true} : vector<2x8x1xf32> -> vector<2x8x1xf32>
    %898 = vector.broadcast %897 : vector<2x8x1xf32> to vector<2x8x8xf32>
    %899 = arith.mulf %894, %898 : vector<2x8x8xf32>
    %900 = vector.extract_strided_slice %877 {offsets = [0, 0, 0], sizes = [2, 8, 8], strides = [1, 1, 1]} : vector<2x8x32xf32> to vector<2x8x8xf32>
    "tpu.trace_start"() <{level = 10 : i32, message = "bqk,bkd->bqd"}> : () -> ()
    %cst_377 = arith.constant dense<0.000000e+00> : vector<2x8x8xf32>
    %901 = tpu.matmul %899, %900, %cst_377 {dimension_numbers = #tpu.dot_dimension_numbers<[2], [1], [1], [2], [0, 0, 0, 1, 1, 2], [0], [0]>} : vector<2x8x8xf32>, vector<2x8x8xf32>, vector<2x8x8xf32> -> vector<2x8x8xf32>
    "tpu.trace_stop"() : () -> ()
    %902 = vector.shape_cast %901 : vector<2x8x8xf32> to vector<16x8xf32>
    %c0_378 = arith.constant 0 : index
    %c0_379 = arith.constant 0 : index
    %903 = vector.load %arg40[%c0_378, %c0_379] : memref<32x32xf32, #tpu.memory_space<vmem>>, vector<8x32xf32>
    %cst_380 = arith.constant dense<0.000000e+00> : vector<16x32xf32>
    %904 = tpu.matmul %902, %903, %cst_380 {dimension_numbers = #tpu.dot_dimension_numbers<[1], [0], [0], [1], [0, 0, 1, 1], [], []>} : vector<16x8xf32>, vector<8x32xf32>, vector<16x32xf32> -> vector<16x32xf32>
    %905 = arith.addf %880, %904 : vector<16x32xf32>
    %906 = vector.extract_strided_slice %875 {offsets = [0, 0, 8], sizes = [2, 8, 8], strides = [1, 1, 1]} : vector<2x8x32xf32> to vector<2x8x8xf32>
    %907 = vector.extract_strided_slice %876 {offsets = [0, 0, 8], sizes = [2, 8, 8], strides = [1, 1, 1]} : vector<2x8x32xf32> to vector<2x8x8xf32>
    "tpu.trace_start"() <{level = 10 : i32, message = "bqd,bkd->bqk"}> : () -> ()
    %cst_381 = arith.constant dense<0.000000e+00> : vector<2x8x8xf32>
    %908 = tpu.matmul %906, %907, %cst_381 {dimension_numbers = #tpu.dot_dimension_numbers<[2], [2], [1], [1], [0, 0, 0, 1, 1, 1], [0], [0]>} : vector<2x8x8xf32>, vector<2x8x8xf32>, vector<2x8x8xf32> -> vector<2x8x8xf32>
    "tpu.trace_stop"() : () -> ()
    %cst_382 = arith.constant 0.353553385 : f32
    %909 = vector.broadcast %cst_382 : f32 to vector<2x8x8xf32>
    %910 = arith.mulf %908, %909 : vector<2x8x8xf32>
    %cst_383 = arith.constant -1.000000e+09 : f32
    %911 = vector.shape_cast %879 : vector<2x1x8xi1> to vector<2x1x8xi1>
    %912 = vector.broadcast %911 : vector<2x1x8xi1> to vector<2x8x8xi1>
    %913 = vector.broadcast %cst_383 : f32 to vector<2x8x8xf32>
    %914 = arith.select %912, %913, %910 : vector<2x8x8xi1>, vector<2x8x8xf32>
    %cst_384 = arith.constant dense<0xFF800000> : vector<2x8xf32>
    %915 = vector.multi_reduction <maximumf>, %914, %cst_384 [2] : vector<2x8x8xf32> to vector<2x8xf32>
    %916 = vector.shape_cast %915 : vector<2x8xf32> to vector<2x8x1xf32>
    %917 = vector.broadcast %916 : vector<2x8x1xf32> to vector<2x8x8xf32>
    %918 = arith.subf %914, %917 : vector<2x8x8xf32>
    %919 = math.exp %918 : vector<2x8x8xf32>
    %cst_385 = arith.constant dense<0.000000e+00> : vector<2x8xf32>
    %920 = vector.multi_reduction <add>, %919, %cst_385 [2] : vector<2x8x8xf32> to vector<2x8xf32>
    %921 = vector.shape_cast %920 : vector<2x8xf32> to vector<2x8x1xf32>
    %922 = tpu.reciprocal %921 {approx = true} : vector<2x8x1xf32> -> vector<2x8x1xf32>
    %923 = vector.broadcast %922 : vector<2x8x1xf32> to vector<2x8x8xf32>
    %924 = arith.mulf %919, %923 : vector<2x8x8xf32>
    %925 = vector.extract_strided_slice %877 {offsets = [0, 0, 8], sizes = [2, 8, 8], strides = [1, 1, 1]} : vector<2x8x32xf32> to vector<2x8x8xf32>
    "tpu.trace_start"() <{level = 10 : i32, message = "bqk,bkd->bqd"}> : () -> ()
    %cst_386 = arith.constant dense<0.000000e+00> : vector<2x8x8xf32>
    %926 = tpu.matmul %924, %925, %cst_386 {dimension_numbers = #tpu.dot_dimension_numbers<[2], [1], [1], [2], [0, 0, 0, 1, 1, 2], [0], [0]>} : vector<2x8x8xf32>, vector<2x8x8xf32>, vector<2x8x8xf32> -> vector<2x8x8xf32>
    "tpu.trace_stop"() : () -> ()
    %927 = vector.shape_cast %926 : vector<2x8x8xf32> to vector<16x8xf32>
    %c8_387 = arith.constant 8 : index
    %c0_388 = arith.constant 0 : index
    %928 = vector.load %arg40[%c8_387, %c0_388] : memref<32x32xf32, #tpu.memory_space<vmem>>, vector<8x32xf32>
    %cst_389 = arith.constant dense<0.000000e+00> : vector<16x32xf32>
    %929 = tpu.matmul %927, %928, %cst_389 {dimension_numbers = #tpu.dot_dimension_numbers<[1], [0], [0], [1], [0, 0, 1, 1], [], []>} : vector<16x8xf32>, vector<8x32xf32>, vector<16x32xf32> -> vector<16x32xf32>
    %930 = arith.addf %905, %929 : vector<16x32xf32>
    %931 = vector.extract_strided_slice %875 {offsets = [0, 0, 16], sizes = [2, 8, 8], strides = [1, 1, 1]} : vector<2x8x32xf32> to vector<2x8x8xf32>
    %932 = vector.extract_strided_slice %876 {offsets = [0, 0, 16], sizes = [2, 8, 8], strides = [1, 1, 1]} : vector<2x8x32xf32> to vector<2x8x8xf32>
    "tpu.trace_start"() <{level = 10 : i32, message = "bqd,bkd->bqk"}> : () -> ()
    %cst_390 = arith.constant dense<0.000000e+00> : vector<2x8x8xf32>
    %933 = tpu.matmul %931, %932, %cst_390 {dimension_numbers = #tpu.dot_dimension_numbers<[2], [2], [1], [1], [0, 0, 0, 1, 1, 1], [0], [0]>} : vector<2x8x8xf32>, vector<2x8x8xf32>, vector<2x8x8xf32> -> vector<2x8x8xf32>
    "tpu.trace_stop"() : () -> ()
    %cst_391 = arith.constant 0.353553385 : f32
    %934 = vector.broadcast %cst_391 : f32 to vector<2x8x8xf32>
    %935 = arith.mulf %933, %934 : vector<2x8x8xf32>
    %cst_392 = arith.constant -1.000000e+09 : f32
    %936 = vector.shape_cast %879 : vector<2x1x8xi1> to vector<2x1x8xi1>
    %937 = vector.broadcast %936 : vector<2x1x8xi1> to vector<2x8x8xi1>
    %938 = vector.broadcast %cst_392 : f32 to vector<2x8x8xf32>
    %939 = arith.select %937, %938, %935 : vector<2x8x8xi1>, vector<2x8x8xf32>
    %cst_393 = arith.constant dense<0xFF800000> : vector<2x8xf32>
    %940 = vector.multi_reduction <maximumf>, %939, %cst_393 [2] : vector<2x8x8xf32> to vector<2x8xf32>
    %941 = vector.shape_cast %940 : vector<2x8xf32> to vector<2x8x1xf32>
    %942 = vector.broadcast %941 : vector<2x8x1xf32> to vector<2x8x8xf32>
    %943 = arith.subf %939, %942 : vector<2x8x8xf32>
    %944 = math.exp %943 : vector<2x8x8xf32>
    %cst_394 = arith.constant dense<0.000000e+00> : vector<2x8xf32>
    %945 = vector.multi_reduction <add>, %944, %cst_394 [2] : vector<2x8x8xf32> to vector<2x8xf32>
    %946 = vector.shape_cast %945 : vector<2x8xf32> to vector<2x8x1xf32>
    %947 = tpu.reciprocal %946 {approx = true} : vector<2x8x1xf32> -> vector<2x8x1xf32>
    %948 = vector.broadcast %947 : vector<2x8x1xf32> to vector<2x8x8xf32>
    %949 = arith.mulf %944, %948 : vector<2x8x8xf32>
    %950 = vector.extract_strided_slice %877 {offsets = [0, 0, 16], sizes = [2, 8, 8], strides = [1, 1, 1]} : vector<2x8x32xf32> to vector<2x8x8xf32>
    "tpu.trace_start"() <{level = 10 : i32, message = "bqk,bkd->bqd"}> : () -> ()
    %cst_395 = arith.constant dense<0.000000e+00> : vector<2x8x8xf32>
    %951 = tpu.matmul %949, %950, %cst_395 {dimension_numbers = #tpu.dot_dimension_numbers<[2], [1], [1], [2], [0, 0, 0, 1, 1, 2], [0], [0]>} : vector<2x8x8xf32>, vector<2x8x8xf32>, vector<2x8x8xf32> -> vector<2x8x8xf32>
    "tpu.trace_stop"() : () -> ()
    %952 = vector.shape_cast %951 : vector<2x8x8xf32> to vector<16x8xf32>
    %c16_396 = arith.constant 16 : index
    %c0_397 = arith.constant 0 : index
    %953 = vector.load %arg40[%c16_396, %c0_397] : memref<32x32xf32, #tpu.memory_space<vmem>>, vector<8x32xf32>
    %cst_398 = arith.constant dense<0.000000e+00> : vector<16x32xf32>
    %954 = tpu.matmul %952, %953, %cst_398 {dimension_numbers = #tpu.dot_dimension_numbers<[1], [0], [0], [1], [0, 0, 1, 1], [], []>} : vector<16x8xf32>, vector<8x32xf32>, vector<16x32xf32> -> vector<16x32xf32>
    %955 = arith.addf %930, %954 : vector<16x32xf32>
    %956 = vector.extract_strided_slice %875 {offsets = [0, 0, 24], sizes = [2, 8, 8], strides = [1, 1, 1]} : vector<2x8x32xf32> to vector<2x8x8xf32>
    %957 = vector.extract_strided_slice %876 {offsets = [0, 0, 24], sizes = [2, 8, 8], strides = [1, 1, 1]} : vector<2x8x32xf32> to vector<2x8x8xf32>
    "tpu.trace_start"() <{level = 10 : i32, message = "bqd,bkd->bqk"}> : () -> ()
    %cst_399 = arith.constant dense<0.000000e+00> : vector<2x8x8xf32>
    %958 = tpu.matmul %956, %957, %cst_399 {dimension_numbers = #tpu.dot_dimension_numbers<[2], [2], [1], [1], [0, 0, 0, 1, 1, 1], [0], [0]>} : vector<2x8x8xf32>, vector<2x8x8xf32>, vector<2x8x8xf32> -> vector<2x8x8xf32>
    "tpu.trace_stop"() : () -> ()
    %cst_400 = arith.constant 0.353553385 : f32
    %959 = vector.broadcast %cst_400 : f32 to vector<2x8x8xf32>
    %960 = arith.mulf %958, %959 : vector<2x8x8xf32>
    %cst_401 = arith.constant -1.000000e+09 : f32
    %961 = vector.shape_cast %879 : vector<2x1x8xi1> to vector<2x1x8xi1>
    %962 = vector.broadcast %961 : vector<2x1x8xi1> to vector<2x8x8xi1>
    %963 = vector.broadcast %cst_401 : f32 to vector<2x8x8xf32>
    %964 = arith.select %962, %963, %960 : vector<2x8x8xi1>, vector<2x8x8xf32>
    %cst_402 = arith.constant dense<0xFF800000> : vector<2x8xf32>
    %965 = vector.multi_reduction <maximumf>, %964, %cst_402 [2] : vector<2x8x8xf32> to vector<2x8xf32>
    %966 = vector.shape_cast %965 : vector<2x8xf32> to vector<2x8x1xf32>
    %967 = vector.broadcast %966 : vector<2x8x1xf32> to vector<2x8x8xf32>
    %968 = arith.subf %964, %967 : vector<2x8x8xf32>
    %969 = math.exp %968 : vector<2x8x8xf32>
    %cst_403 = arith.constant dense<0.000000e+00> : vector<2x8xf32>
    %970 = vector.multi_reduction <add>, %969, %cst_403 [2] : vector<2x8x8xf32> to vector<2x8xf32>
    %971 = vector.shape_cast %970 : vector<2x8xf32> to vector<2x8x1xf32>
    %972 = tpu.reciprocal %971 {approx = true} : vector<2x8x1xf32> -> vector<2x8x1xf32>
    %973 = vector.broadcast %972 : vector<2x8x1xf32> to vector<2x8x8xf32>
    %974 = arith.mulf %969, %973 : vector<2x8x8xf32>
    %975 = vector.extract_strided_slice %877 {offsets = [0, 0, 24], sizes = [2, 8, 8], strides = [1, 1, 1]} : vector<2x8x32xf32> to vector<2x8x8xf32>
    "tpu.trace_start"() <{level = 10 : i32, message = "bqk,bkd->bqd"}> : () -> ()
    %cst_404 = arith.constant dense<0.000000e+00> : vector<2x8x8xf32>
    %976 = tpu.matmul %974, %975, %cst_404 {dimension_numbers = #tpu.dot_dimension_numbers<[2], [1], [1], [2], [0, 0, 0, 1, 1, 2], [0], [0]>} : vector<2x8x8xf32>, vector<2x8x8xf32>, vector<2x8x8xf32> -> vector<2x8x8xf32>
    "tpu.trace_stop"() : () -> ()
    %977 = vector.shape_cast %976 : vector<2x8x8xf32> to vector<16x8xf32>
    %c24_405 = arith.constant 24 : index
    %c0_406 = arith.constant 0 : index
    %978 = vector.load %arg40[%c24_405, %c0_406] : memref<32x32xf32, #tpu.memory_space<vmem>>, vector<8x32xf32>
    %cst_407 = arith.constant dense<0.000000e+00> : vector<16x32xf32>
    %979 = tpu.matmul %977, %978, %cst_407 {dimension_numbers = #tpu.dot_dimension_numbers<[1], [0], [0], [1], [0, 0, 1, 1], [], []>} : vector<16x8xf32>, vector<8x32xf32>, vector<16x32xf32> -> vector<16x32xf32>
    %980 = arith.addf %955, %979 : vector<16x32xf32>
    %c0_408 = arith.constant 0 : index
    %c0_409 = arith.constant 0 : index
    %981 = vector.load %arg37[%c0_408, %c0_409] : memref<1x32xf32, #tpu.memory_space<vmem>>, vector<1x32xf32>
    %982 = vector.broadcast %981 : vector<1x32xf32> to vector<16x32xf32>
    %983 = arith.addf %980, %982 : vector<16x32xf32>
    %984 = arith.addf %838, %983 : vector<16x32xf32>
    %cst_410 = arith.constant dense<0.000000e+00> : vector<16xf32>
    %985 = vector.multi_reduction <add>, %984, %cst_410 [1] : vector<16x32xf32> to vector<16xf32>
    %986 = vector.shape_cast %985 : vector<16xf32> to vector<16x1xf32>
    %cst_411 = arith.constant 3.200000e+01 : f32
    %987 = vector.broadcast %cst_411 : f32 to vector<16x1xf32>
    %988 = arith.divf %986, %987 : vector<16x1xf32>
    %989 = vector.broadcast %988 : vector<16x1xf32> to vector<16x32xf32>
    %990 = arith.subf %984, %989 : vector<16x32xf32>
    %991 = arith.mulf %990, %990 : vector<16x32xf32>
    %cst_412 = arith.constant dense<0.000000e+00> : vector<16xf32>
    %992 = vector.multi_reduction <add>, %991, %cst_412 [1] : vector<16x32xf32> to vector<16xf32>
    %993 = vector.shape_cast %992 : vector<16xf32> to vector<16x1xf32>
    %cst_413 = arith.constant 3.100000e+01 : f32
    %994 = vector.broadcast %cst_413 : f32 to vector<16x1xf32>
    %995 = arith.divf %993, %994 : vector<16x1xf32>
    %996 = math.sqrt %995 : vector<16x1xf32>
    %c0_414 = arith.constant 0 : index
    %c0_415 = arith.constant 0 : index
    %997 = vector.load %arg31[%c0_414, %c0_415] : memref<1x32xf32, #tpu.memory_space<vmem>>, vector<1x32xf32>
    %998 = vector.broadcast %988 : vector<16x1xf32> to vector<16x32xf32>
    %999 = arith.subf %984, %998 : vector<16x32xf32>
    %1000 = vector.broadcast %997 : vector<1x32xf32> to vector<16x32xf32>
    %1001 = arith.mulf %1000, %999 : vector<16x32xf32>
    %cst_416 = arith.constant 9.99999997E-7 : f32
    %1002 = vector.broadcast %cst_416 : f32 to vector<16x1xf32>
    %1003 = arith.addf %996, %1002 : vector<16x1xf32>
    %1004 = vector.broadcast %1003 : vector<16x1xf32> to vector<16x32xf32>
    %1005 = arith.divf %1001, %1004 : vector<16x32xf32>
    %c0_417 = arith.constant 0 : index
    %c0_418 = arith.constant 0 : index
    %1006 = vector.load %arg30[%c0_417, %c0_418] : memref<1x32xf32, #tpu.memory_space<vmem>>, vector<1x32xf32>
    %1007 = vector.broadcast %1006 : vector<1x32xf32> to vector<16x32xf32>
    %1008 = arith.addf %1005, %1007 : vector<16x32xf32>
    %c0_419 = arith.constant 0 : index
    %c0_420 = arith.constant 0 : index
    %1009 = vector.load %arg42[%c0_419, %c0_420] : memref<32x64xf32, #tpu.memory_space<vmem>>, vector<32x64xf32>
    %cst_421 = arith.constant dense<0.000000e+00> : vector<16x64xf32>
    %1010 = tpu.matmul %1008, %1009, %cst_421 {dimension_numbers = #tpu.dot_dimension_numbers<[1], [0], [0], [1], [0, 0, 1, 1], [], []>} : vector<16x32xf32>, vector<32x64xf32>, vector<16x64xf32> -> vector<16x64xf32>
    %c0_422 = arith.constant 0 : index
    %c0_423 = arith.constant 0 : index
    %1011 = vector.load %arg24[%c0_422, %c0_423] : memref<1x64xf32, #tpu.memory_space<vmem>>, vector<1x64xf32>
    %1012 = vector.broadcast %1011 : vector<1x64xf32> to vector<16x64xf32>
    %1013 = arith.addf %1010, %1012 : vector<16x64xf32>
    %cst_424 = arith.constant 0.000000e+00 : f32
    %1014 = vector.broadcast %cst_424 : f32 to vector<16x64xf32>
    %1015 = arith.maximumf %1013, %1014 : vector<16x64xf32>
    %c0_425 = arith.constant 0 : index
    %c0_426 = arith.constant 0 : index
    %1016 = vector.load %arg43[%c0_425, %c0_426] : memref<64x32xf32, #tpu.memory_space<vmem>>, vector<64x32xf32>
    %cst_427 = arith.constant dense<0.000000e+00> : vector<16x32xf32>
    %1017 = tpu.matmul %1015, %1016, %cst_427 {dimension_numbers = #tpu.dot_dimension_numbers<[1], [0], [0], [1], [0, 0, 1, 1], [], []>} : vector<16x64xf32>, vector<64x32xf32>, vector<16x32xf32> -> vector<16x32xf32>
    %c0_428 = arith.constant 0 : index
    %c0_429 = arith.constant 0 : index
    %1018 = vector.load %arg25[%c0_428, %c0_429] : memref<1x32xf32, #tpu.memory_space<vmem>>, vector<1x32xf32>
    %1019 = vector.broadcast %1018 : vector<1x32xf32> to vector<16x32xf32>
    %1020 = arith.addf %1017, %1019 : vector<16x32xf32>
    %1021 = arith.addf %984, %1020 : vector<16x32xf32>
    %cst_430 = arith.constant dense<0.000000e+00> : vector<16xf32>
    %1022 = vector.multi_reduction <add>, %1021, %cst_430 [1] : vector<16x32xf32> to vector<16xf32>
    %1023 = vector.shape_cast %1022 : vector<16xf32> to vector<16x1xf32>
    %cst_431 = arith.constant 3.200000e+01 : f32
    %1024 = vector.broadcast %cst_431 : f32 to vector<16x1xf32>
    %1025 = arith.divf %1023, %1024 : vector<16x1xf32>
    %1026 = vector.broadcast %1025 : vector<16x1xf32> to vector<16x32xf32>
    %1027 = arith.subf %1021, %1026 : vector<16x32xf32>
    %1028 = arith.mulf %1027, %1027 : vector<16x32xf32>
    %cst_432 = arith.constant dense<0.000000e+00> : vector<16xf32>
    %1029 = vector.multi_reduction <add>, %1028, %cst_432 [1] : vector<16x32xf32> to vector<16xf32>
    %1030 = vector.shape_cast %1029 : vector<16xf32> to vector<16x1xf32>
    %cst_433 = arith.constant 3.100000e+01 : f32
    %1031 = vector.broadcast %cst_433 : f32 to vector<16x1xf32>
    %1032 = arith.divf %1030, %1031 : vector<16x1xf32>
    %1033 = math.sqrt %1032 : vector<16x1xf32>
    %c0_434 = arith.constant 0 : index
    %c0_435 = arith.constant 0 : index
    %1034 = vector.load %arg45[%c0_434, %c0_435] : memref<1x32xf32, #tpu.memory_space<vmem>>, vector<1x32xf32>
    %1035 = vector.broadcast %1025 : vector<16x1xf32> to vector<16x32xf32>
    %1036 = arith.subf %1021, %1035 : vector<16x32xf32>
    %1037 = vector.broadcast %1034 : vector<1x32xf32> to vector<16x32xf32>
    %1038 = arith.mulf %1037, %1036 : vector<16x32xf32>
    %cst_436 = arith.constant 9.99999997E-7 : f32
    %1039 = vector.broadcast %cst_436 : f32 to vector<16x1xf32>
    %1040 = arith.addf %1033, %1039 : vector<16x1xf32>
    %1041 = vector.broadcast %1040 : vector<16x1xf32> to vector<16x32xf32>
    %1042 = arith.divf %1038, %1041 : vector<16x32xf32>
    %c0_437 = arith.constant 0 : index
    %c0_438 = arith.constant 0 : index
    %1043 = vector.load %arg44[%c0_437, %c0_438] : memref<1x32xf32, #tpu.memory_space<vmem>>, vector<1x32xf32>
    %1044 = vector.broadcast %1043 : vector<1x32xf32> to vector<16x32xf32>
    %1045 = arith.addf %1042, %1044 : vector<16x32xf32>
    %1046 = vector.shape_cast %1045 : vector<16x32xf32> to vector<2x8x32xf32>
    %c0_439 = arith.constant 0 : index
    %c0_440 = arith.constant 0 : index
    %c0_441 = arith.constant 0 : index
    %1047 = vector.load %arg72[%c0_439, %c0_440, %c0_441] : memref<2x8x32xf32, #tpu.memory_space<vmem>>, vector<2x8x32xf32>
    tpu.vector_store %arg72[%c0_439, %c0_440, %c0_441], %1046 {strides = array<i32>} : memref<2x8x32xf32, #tpu.memory_space<vmem>>, vector<2x8x32xf32>,
    return
  }
}

</mosaic_0001>

<bundles_post_ra>
// kernel: encoder_decoder_forward.1
= control target key start
LH: loop header
LB: loop body
LE: loop exit
PB: predicated region body
PF: predicated region fallthrough
CT: control target
= control target key end

     0   :  { %s15907_s6 = smov 1   ;;  %s15908_s10 = smov 2   ;;  %s17928_s0 = inlined_call_operand.smem [shape: u32[73], index: -1, kind: input, shape index: {}] }
   0x1   :  { %s16037_s5 = sld [smem:[%s17928_s0]]   ;;  %s15909_s14 = smov 3  }
   0x2   :  { %s16042_s9 = sld [smem:[%s17928_s0 + %s15907_s6]]   ;;  %s15910_s18 = smov 4  }
   0x3   :  { %s16047_s13 = sld [smem:[%s17928_s0 + %s15908_s10]]   ;;  %s15911_s22 = smov 5  }
   0x4   :  { %s16052_s17 = sld [smem:[%s17928_s0 + %s15909_s14]]   ;;  %s15912_s26 = smov 6  }
   0x5   :  { %s16057_s21 = sld [smem:[%s17928_s0 + %s15910_s18]]   ;;  %s15913_s30 = smov 7  }
   0x6   :  { %s16062_s25 = sld [smem:[%s17928_s0 + %s15911_s22]]   ;;  %s15914_s4 = smov 8  }
   0x7   :  { %17971 = sst [smem:[#allocation72_spill]] %s16037_s5  ;;  %s15915_s10 = smov 9  }
   0x8   :  { %17972 = sst [smem:[#allocation73_spill]] %s16042_s9  ;;  %s15916_s15 = smov 10  }
   0x9   :  { %17973 = sst [smem:[#allocation74_spill]] %s16047_s13  ;;  %s15917_s20 = smov 11  }
   0xa   :  { %17974 = sst [smem:[#allocation75_spill]] %s16052_s17  ;;  %s15919_s1 = smov 13  }
   0xb   :  { %17975 = sst [smem:[#allocation76_spill]] %s16057_s21  ;;  %s15920_s7 = smov 14  }
   0xc   :  { %17976 = sst [smem:[#allocation77_spill]] %s16062_s25  ;;  %s15922_s22 = smov 16  }
   0xd   :  { %s16067_s29 = sld [smem:[%s17928_s0 + %s15912_s26]]   ;;  %s15918_s26 = smov 12  }
   0xe   :  { %s16072_s3 = sld [smem:[%s17928_s0 + %s15913_s30]]   ;;  %s15923_s28 = smov 17  }
   0xf   :  { %s16077_s8 = sld [smem:[%s17928_s0 + %s15914_s4]]  }
  0x10   :  { %s16082_s14 = sld [smem:[%s17928_s0 + %s15915_s10]]  }
  0x11   :  { %s16087_s19 = sld [smem:[%s17928_s0 + %s15916_s15]]   ;;  %s15921_s15 = smov 15  }
  0x12   :  { %s16092_s24 = sld [smem:[%s17928_s0 + %s15917_s20]]  }
  0x13   :  { %17977 = sst [smem:[#allocation78_spill]] %s16067_s29 }
  0x14   :  { %17978 = sst [smem:[#allocation79_spill]] %s16072_s3 }
  0x15   :  { %17979 = sst [smem:[#allocation80_spill]] %s16077_s8 }
  0x16   :  { %17980 = sst [smem:[#allocation81_spill]] %s16082_s14 }
  0x17   :  { %17981 = sst [smem:[#allocation82_spill]] %s16087_s19 }
  0x18   :  { %17982 = sst [smem:[#allocation83_spill]] %s16092_s24 }
  0x19   :  { %s16097_s30 = sld [smem:[%s17928_s0 + %s15918_s26]]  }
  0x1a   :  { %s16102_s6 = sld [smem:[%s17928_s0 + %s15919_s1]]  }
  0x1b   :  { %s16107_s12 = sld [smem:[%s17928_s0 + %s15920_s7]]   ;;  %s15924_s7 = smov 18  }
  0x1c   :  { %s16112_s20 = sld [smem:[%s17928_s0 + %s15921_s15]]   ;;  %s15925_s15 = smov 19  }
  0x1d   :  { %s16117_s27 = sld [smem:[%s17928_s0 + %s15922_s22]]   ;;  %s15926_s22 = smov 20  }
  0x1e   :  { %s16122_s4 = sld [smem:[%s17928_s0 + %s15923_s28]]   ;;  %s15927_s28 = smov 21  }
  0x1f   :  { %17983 = sst [smem:[#allocation84_spill]] %s16097_s30 }
  0x20   :  { %17984 = sst [smem:[#allocation85_spill]] %s16102_s6 }
  0x21   :  { %17985 = sst [smem:[#allocation86_spill]] %s16107_s12 }
  0x22   :  { %17986 = sst [smem:[#allocation87_spill]] %s16112_s20 }
  0x23   :  { %17987 = sst [smem:[#allocation88_spill]] %s16117_s27 }
  0x24   :  { %17988 = sst [smem:[#allocation89_spill]] %s16122_s4 }
  0x25   :  { %s16127_s25 = sld [smem:[%s17928_s0 + %s15924_s7]]   ;;  %s15928_s7 = smov 22  }
  0x26   :  { %s16132_s21 = sld [smem:[%s17928_s0 + %s15925_s15]]   ;;  %s15929_s15 = smov 23  }
  0x27   :  { %s16137_s19 = sld [smem:[%s17928_s0 + %s15926_s22]]   ;;  %s15930_s22 = smov 24  }
  0x28   :  { %s16142_s24 = sld [smem:[%s17928_s0 + %s15927_s28]]   ;;  %s15931_s28 = smov 25  }
  0x29   :  { %s16147_s4 = sld [smem:[%s17928_s0 + %s15928_s7]]   ;;  %s15932_s7 = smov 26  }
  0x2a   :  { %s16162_s27 = sld [smem:[%s17928_s0 + %s15931_s28]]   ;;  %s15935_s28 = smov 29  }
  0x2b   :  { %17989 = sst [smem:[#allocation90_spill]] %s16127_s25 }
  0x2c   :  { %17990 = sst [smem:[#allocation91_spill]] %s16132_s21 }
  0x2d   :  { %17991 = sst [smem:[#allocation92_spill]] %s16137_s19 }
  0x2e   :  { %17992 = sst [smem:[#allocation93_spill]] %s16142_s24 }
  0x2f   :  { %17993 = sst [smem:[#allocation94_spill]] %s16147_s4 }
  0x30   :  { %s16152_s25 = sld [smem:[%s17928_s0 + %s15929_s15]]   ;;  %s15933_s15 = smov 27  }
  0x31   :  { %s16157_s19 = sld [smem:[%s17928_s0 + %s15930_s22]]   ;;  %s15934_s22 = smov 28  }
  0x32   :  { %s16167_s4 = sld [smem:[%s17928_s0 + %s15932_s7]]   ;;  %s15936_s7 = smov 30  }
  0x33   :  { %s16177_s8 = sld [smem:[%s17928_s0 + %s15934_s22]]   ;;  %s15938_s22 = smov 32  }
  0x34   :  { %s16182_s14 = sld [smem:[%s17928_s0 + %s15935_s28]]   ;;  %s15939_s28 = smov 33  }
  0x35   :  { %s16187_s24 = sld [smem:[%s17928_s0 + %s15936_s7]]   ;;  %s15940_s7 = smov 34  }
  0x36   :  { %17994 = sst [smem:[#allocation95_spill]] %s16152_s25 }
  0x37   :  { %17995 = sst [smem:[#allocation96_spill]] %s16157_s19 }
  0x38   :  { %17996 = sst [smem:[#allocation97_spill]] %s16167_s4 }
  0x39   :  { %s16172_s25 = sld [smem:[%s17928_s0 + %s15933_s15]]   ;;  %s15937_s15 = smov 31  }
  0x3a   :  { %17997 = sst [smem:[#allocation98_spill]] %s16177_s8 }
  0x3b   :  { %17998 = sst [smem:[#allocation99_spill]] %s16187_s24 }
  0x3c   :  { %s16192_s21 = sld [smem:[%s17928_s0 + %s15937_s15]]   ;;  %s15941_s15 = smov 35  }
  0x3d   :  { %s16197_s30 = sld [smem:[%s17928_s0 + %s15938_s22]]   ;;  %s15942_s22 = smov 36  }
  0x3e   :  { %s16202_s12 = sld [smem:[%s17928_s0 + %s15939_s28]]   ;;  %s15943_s28 = smov 37  }
  0x3f   :  { %s16207_s17 = sld [smem:[%s17928_s0 + %s15940_s7]]   ;;  %s15944_s7 = smov 38  }
  0x40   :  { %s16212_s6 = sld [smem:[%s17928_s0 + %s15941_s15]]   ;;  %s15945_s15 = smov 39  }
  0x41   :  { %s16217_s29 = sld [smem:[%s17928_s0 + %s15942_s22]]   ;;  %s15946_s22 = smov 40  }
  0x42   :  { %s16222_s3 = sld [smem:[%s17928_s0 + %s15943_s28]]   ;;  %s15947_s28 = smov 41  }
  0x43   :  { %17999 = sst [smem:[#allocation100_spill]] %s16197_s30 }
  0x44   :  { %s16237_s20 = sld [smem:[%s17928_s0 + %s15946_s22]]   ;;  %s15950_s22 = smov 44  }
  0x45   :  { %18000 = sst [smem:[#allocation101_spill]] %s16207_s17 }
  0x46   :  { %18001 = sst [smem:[#allocation102_spill]] %s16212_s6 }
  0x47   :  { %18002 = sst [smem:[#allocation103_spill]] %s16217_s29 }
  0x48   :  { %s16227_s17 = sld [smem:[%s17928_s0 + %s15944_s7]]   ;;  %s15948_s7 = smov 42  }
  0x49   :  { %s16232_s6 = sld [smem:[%s17928_s0 + %s15945_s15]]   ;;  %s15949_s15 = smov 43  }
  0x4a   :  { %18005 = sst [smem:[#allocation106_spill]] %s16237_s20 }
  0x4b   :  { %s16242_s9 = sld [smem:[%s17928_s0 + %s15947_s28]]   ;;  %s15951_s28 = smov 45  }
  0x4c   :  { %s16247_s13 = sld [smem:[%s17928_s0 + %s15948_s7]]   ;;  %s15952_s7 = smov 46  }
  0x4d   :  { %s16257_s20 = sld [smem:[%s17928_s0 + %s15950_s22]]   ;;  %s15954_s22 = smov 48  }
  0x4e   :  { %18003 = sst [smem:[#allocation104_spill]] %s16227_s17 }
  0x4f   :  { %18004 = sst [smem:[#allocation105_spill]] %s16232_s6 }
  0x50   :  { %s16252_s6 = sld [smem:[%s17928_s0 + %s15949_s15]]   ;;  %s15953_s15 = smov 47  }
  0x51   :  { %18006 = sst [smem:[#allocation107_spill]] %s16242_s9 }
  0x52   :  { %18007 = sst [smem:[#allocation108_spill]] %s16247_s13 }
  0x53   :  { %s16262_s9 = sld [smem:[%s17928_s0 + %s15951_s28]]   ;;  %s15955_s28 = smov 49  }
  0x54   :  { %s16267_s13 = sld [smem:[%s17928_s0 + %s15952_s7]]   ;;  %s15956_s7 = smov 50  }
  0x55   :  { %s16277_s5 = sld [smem:[%s17928_s0 + %s15954_s22]]   ;;  %s15958_s22 = smov 52  }
  0x56   :  { %18008 = sst [smem:[#allocation109_spill]] %s16252_s6 }
  0x57   :  { %s16272_s6 = sld [smem:[%s17928_s0 + %s15953_s15]]   ;;  %s15957_s15 = smov 51  }
  0x58   :  { %s16287_s17 = sld [smem:[%s17928_s0 + %s15956_s7]]   ;;  %s15960_s7 = smov 54  }
  0x59   :  { %18009 = sst [smem:[#allocation110_spill]] %s16262_s9 }
  0x5a   :  { %s16282_s9 = sld [smem:[%s17928_s0 + %s15955_s28]]   ;;  %s15959_s28 = smov 53  }
  0x5b   :  { %s16297_s29 = sld [smem:[%s17928_s0 + %s15958_s22]]   ;;  %s15962_s22 = smov 56  }
  0x5c   :  { %s16307_s30 = sld [smem:[%s17928_s0 + %s15960_s7]]   ;;  %s15964_s7 = smov 58  }
  0x5d   :  { %18010 = sst [smem:[#allocation111_spill]] %s16272_s6 }
  0x5e   :  { %s16292_s6 = sld [smem:[%s17928_s0 + %s15957_s15]]   ;;  %s15961_s15 = smov 55  }
  0x5f   :  { %s16317_s24 = sld [smem:[%s17928_s0 + %s15962_s22]]   ;;  %s15966_s22 = smov 60  }
  0x60   :  { %18011 = sst [smem:[#allocation112_spill]] %s16282_s9 }
  0x61   :  { %s16302_s9 = sld [smem:[%s17928_s0 + %s15959_s28]]   ;;  %s15963_s28 = smov 57  }
  0x62   :  { %18014 = sst [smem:[#allocation115_spill]] %s16307_s30 }
  0x63   :  { %s16327_s30 = sld [smem:[%s17928_s0 + %s15964_s7]]   ;;  %s15968_s7 = smov 62  }
  0x64   :  { %18012 = sst [smem:[#allocation113_spill]] %s16292_s6 }
  0x65   :  { %s16312_s6 = sld [smem:[%s17928_s0 + %s15961_s15]]   ;;  %s15965_s15 = smov 59  }
  0x66   :  { %18016 = sst [smem:[#allocation117_spill]] %s16317_s24 }
  0x67   :  { %18013 = sst [smem:[#allocation114_spill]] %s16302_s9 }
  0x68   :  { %s16322_s9 = sld [smem:[%s17928_s0 + %s15963_s28]]   ;;  %s15967_s28 = smov 61  }
  0x69   :  { %s16337_s24 = sld [smem:[%s17928_s0 + %s15966_s22]]   ;;  %s15970_s22 = smov 64  }
  0x6a   :  { %s16347_s8 = sld [smem:[%s17928_s0 + %s15968_s7]]   ;;  %s15972_s7 = smov 66  }
  0x6b   :  { %18015 = sst [smem:[#allocation116_spill]] %s16312_s6 }
  0x6c   :  { %s16332_s6 = sld [smem:[%s17928_s0 + %s15965_s15]]   ;;  %s15969_s15 = smov 63  }
  0x6d   :  { %s16357_s4 = sld [smem:[%s17928_s0 + %s15970_s22]]   ;;  %s15974_s22 = smov 68  }
  0x6e   :  { %18017 = sst [smem:[#allocation118_spill]] %s16322_s9 }
  0x6f   :  { %s16342_s9 = sld [smem:[%s17928_s0 + %s15967_s28]]   ;;  %s15971_s28 = smov 65  }
  0x70   :  { %s16367_s19 = sld [smem:[%s17928_s0 + %s15972_s7]]   ;;  %s15976_s7 = smov 70  }
  0x72   :  { %18018 = sst [smem:[#allocation119_spill]] %s16332_s6 }
  0x73   :  { %s16352_s6 = sld [smem:[%s17928_s0 + %s15969_s15]]   ;;  %s15973_s15 = smov 67  }
  0x74   :  { %18021 = sst [smem:[#allocation122_spill]] %s16357_s4 }
  0x75   :  { %18019 = sst [smem:[#allocation120_spill]] %s16342_s9 }
  0x76   :  { %s16362_s9 = sld [smem:[%s17928_s0 + %s15971_s28]]   ;;  %s15975_s28 = smov 69  }
  0x77   :  { %18023 = sst [smem:[#allocation124_spill]] %s16367_s19 }
  0x78   :  { %s16377_s4 = sld [smem:[%s17928_s0 + %s15974_s22]]   ;;  %s15978_s22 = smov 72  }
  0x79   :  { %18020 = sst [smem:[#allocation121_spill]] %s16352_s6 }
  0x7a   :  { %s16372_s6 = sld [smem:[%s17928_s0 + %s15973_s15]]   ;;  %s15977_s15 = smov 71  }
  0x7b   :  { %s16387_s19 = sld [smem:[%s17928_s0 + %s15976_s7]]  }
  0x7c   :  { %18022 = sst [smem:[#allocation123_spill]] %s16362_s9 }
  0x7d   :  { %s16382_s9 = sld [smem:[%s17928_s0 + %s15975_s28]]  }
  0x7e   :  { %18025 = sst [smem:[#allocation126_spill]] %s16377_s4 }
  0x7f   :  { %s16397_s4 = sld [smem:[%s17928_s0 + %s15978_s22]]  }
  0x80   :  { %18024 = sst [smem:[#allocation125_spill]] %s16372_s6 }
  0x81   :  { %s16392_s6 = sld [smem:[%s17928_s0 + %s15977_s15]]  }
  0x82   :  { %150 = vsyncpa [#allocation3], 0 }
  0x83   :  { %151 = vsyncpa [#allocation6], 0 }
  0x84   :  { %152 = vsyncpa [#allocation9], 0 }
  0x85   :  { %153 = vsyncpa [#allocation12], 0 }
  0x86   :  { %154 = vsyncpa [#allocation15], 0 }
  0x87   :  { %155 = vsyncpa [#allocation18], 0 }
  0x88   :  { %156 = vsyncpa [#allocation21], 0 }
  0x89   :  { %157 = vsyncpa [#allocation24], 0 }
  0x8a   :  { %158 = vsyncpa [#allocation27], 0 }
  0x8b   :  { %159 = vsyncpa [#allocation30], 0 }
  0x8c   :  { %160 = vsyncpa [#allocation33], 0 }
  0x8d   :  { %161 = vsyncpa [#allocation36], 0 }
  0x8e   :  { %162 = vsyncpa [#allocation39], 0 }
  0x8f   :  { %163 = vsyncpa [#allocation42], 0 }
  0x90   :  { %164 = vsyncpa [#allocation45], 0 }
  0x91   :  { %165 = vsyncpa [#allocation48], 0 }
  0x92   :  { %166 = vsyncpa [#allocation51], 0 }
  0x93   :  { %167 = vsyncpa [#allocation4], 0  ;;  %s15979_s0 = smov [#allocation5]   ;;  %s15980_s1 = smov [#allocation8]  }
  0x94   :  { %s232_s28 = sshll.u32 %s15979_s0, 4  ;;  %s252_s2 = sshll.u32 %s15980_s1, 4  ;;  %s233_s28 = int_to_ptr.vmem [resolvable:$true] %s232_s28  ;;  %s253_s2 = int_to_ptr.vmem [resolvable:$true] %s252_s2 }
  0x95   :  { %s15123_s7 = scalar_lea.hbm %s16162_s27, 16 }
  0x96   :  { %p15124_p0 = scmp.ne.s32.totalorder %s16162_s27, %s15123_s7  ;;  %p15127_p1 = scmp.lt.u32.totalorder %s15123_s7, %s16162_s27 }
  0x98   :  { %p15129_p2 = pnand %p15127_p1, %p15124_p0 }
  0x9a   :  { %15132 = shalt.err (!%p15129_p2)
}
  0x9b   :  { %s15133_s10 = scalar_lea.vmem %s233_s28, 16  ;;  %s15137_s11 = scalar_lea.vmem %s233_s28, 32 }
  0x9c   :  { %p15134_p3 = scmp.ne.s32.totalorder %s233_s28, %s15133_s10  ;;  %p15138_p4 = scmp.lt.s32.totalorder %s233_s28, %s233_s28 }
  0x9d   :  { %p15139_p5 = scmp.lt.s32.totalorder %s15137_s11, %s15133_s10 }
  0x9f   :  { %p15140_p6 = por %p15139_p5, %p15138_p4 }
  0xa1   :  { %p15141_p7 = pnand %p15140_p6, %p15134_p3 }
  0xa3   :  { %15144 = shalt.err (!%p15141_p7)
}
  0xa4   :  { %235 = dma.hbm_to_vmem [thread:$0]  %s16162_s27, 16, %s233_s28, [#allocation6]  }
  0xa5   :  { %s15145_s15 = scalar_lea.hbm %s16172_s25, 16 }
  0xa6   :  { %p15146_p8 = scmp.ne.s32.totalorder %s16172_s25, %s15145_s15  ;;  %p15149_p9 = scmp.lt.u32.totalorder %s15145_s15, %s16172_s25 }
  0xa8   :  { %p15151_p10 = pnand %p15149_p9, %p15146_p8 }
  0xaa   :  { %15154 = shalt.err (!%p15151_p10)
}
  0xab   :  { %s15155_s16 = scalar_lea.vmem %s253_s2, 16  ;;  %s15159_s18 = scalar_lea.vmem %s253_s2, 32 }
  0xac   :  { %p15156_p11 = scmp.ne.s32.totalorder %s253_s2, %s15155_s16  ;;  %p15160_p12 = scmp.lt.s32.totalorder %s253_s2, %s253_s2 }
  0xad   :  { %p15161_p13 = scmp.lt.s32.totalorder %s15159_s18, %s15155_s16 }
  0xaf   :  { %p15162_p0 = por %p15161_p13, %p15160_p12 }
  0xb1   :  { %p15163_p1 = pnand %p15162_p0, %p15156_p11 }
  0xb3   :  { %15166 = shalt.err (!%p15163_p1)
}
  0xb4   :  { %255 = dma.hbm_to_vmem [thread:$0]  %s16172_s25, 16, %s253_s2, [#allocation9]  }
  0xb5   :  { %s15981_s22 = smov [#allocation11]   ;;  %s15982_s23 = smov [#allocation14]  }
  0xb6   :  { %s272_s27 = sshll.u32 %s15981_s22, 4  ;;  %s292_s26 = sshll.u32 %s15982_s23, 4  ;;  %s273_s27 = int_to_ptr.vmem [resolvable:$true] %s272_s27  ;;  %s293_s26 = int_to_ptr.vmem [resolvable:$true] %s292_s26 }
  0xb7   :  { %s15167_s0 = scalar_lea.hbm %s16182_s14, 16 }
  0xb8   :  { %p15168_p2 = scmp.ne.s32.totalorder %s16182_s14, %s15167_s0  ;;  %p15171_p3 = scmp.lt.u32.totalorder %s15167_s0, %s16182_s14 }
  0xba   :  { %p15173_p4 = pnand %p15171_p3, %p15168_p2 }
  0xbc   :  { %15176 = shalt.err (!%p15173_p4)
}
  0xbd   :  { %s15177_s28 = scalar_lea.vmem %s273_s27, 16  ;;  %s15181_s1 = scalar_lea.vmem %s273_s27, 32 }
  0xbe   :  { %p15178_p5 = scmp.ne.s32.totalorder %s273_s27, %s15177_s28  ;;  %p15182_p6 = scmp.lt.s32.totalorder %s273_s27, %s273_s27 }
  0xbf   :  { %p15183_p7 = scmp.lt.s32.totalorder %s15181_s1, %s15177_s28 }
  0xc1   :  { %p15184_p8 = por %p15183_p7, %p15182_p6 }
  0xc3   :  { %p15185_p9 = pnand %p15184_p8, %p15178_p5 }
  0xc5   :  { %15188 = shalt.err (!%p15185_p9)
}
  0xc6   :  { %275 = dma.hbm_to_vmem [thread:$0]  %s16182_s14, 16, %s273_s27, [#allocation12]  }
  0xc7   :  { %s15189_s25 = scalar_lea.hbm %s16192_s21, 16 }
  0xc8   :  { %p15190_p10 = scmp.ne.s32.totalorder %s16192_s21, %s15189_s25  ;;  %p15193_p11 = scmp.lt.u32.totalorder %s15189_s25, %s16192_s21 }
  0xca   :  { %p15195_p12 = pnand %p15193_p11, %p15190_p10 }
  0xcc   :  { %15198 = shalt.err (!%p15195_p12)
}
  0xcd   :  { %s15199_s2 = scalar_lea.vmem %s293_s26, 16  ;;  %s15203_s7 = scalar_lea.vmem %s293_s26, 32 }
  0xce   :  { %p15200_p13 = scmp.ne.s32.totalorder %s293_s26, %s15199_s2  ;;  %p15204_p0 = scmp.lt.s32.totalorder %s293_s26, %s293_s26 }
  0xcf   :  { %p15205_p1 = scmp.lt.s32.totalorder %s15203_s7, %s15199_s2 }
  0xd1   :  { %p15206_p2 = por %p15205_p1, %p15204_p0 }
  0xd3   :  { %p15207_p3 = pnand %p15206_p2, %p15200_p13 }
  0xd5   :  { %15210 = shalt.err (!%p15207_p3)
}
  0xd6   :  { %295 = dma.hbm_to_vmem [thread:$0]  %s16192_s21, 16, %s293_s26, [#allocation15]  }
  0xd7   :  { %s15983_s10 = smov [#allocation17]   ;;  %s15984_s11 = smov [#allocation20]  }
  0xd8   :  { %s312_s14 = sshll.u32 %s15983_s10, 4  ;;  %s336_s15 = sshll.u32 %s15984_s11, 4  ;;  %s313_s14 = int_to_ptr.vmem [resolvable:$true] %s312_s14  ;;  %s337_s15 = int_to_ptr.vmem [resolvable:$true] %s336_s15 }
  0xd9   :  { %s15211_s16 = scalar_lea.hbm %s16202_s12, 16 }
  0xda   :  { %p15212_p4 = scmp.ne.s32.totalorder %s16202_s12, %s15211_s16  ;;  %p15215_p5 = scmp.lt.u32.totalorder %s15211_s16, %s16202_s12 }
  0xdc   :  { %p15217_p6 = pnand %p15215_p5, %p15212_p4 }
  0xde   :  { %15220 = shalt.err (!%p15217_p6)
}
  0xdf   :  { %s15221_s18 = scalar_lea.vmem %s313_s14, 16  ;;  %s15225_s22 = scalar_lea.vmem %s313_s14, 32 }
  0xe0   :  { %p15222_p7 = scmp.ne.s32.totalorder %s313_s14, %s15221_s18  ;;  %p15226_p8 = scmp.lt.s32.totalorder %s313_s14, %s313_s14 }
  0xe1   :  { %p15227_p9 = scmp.lt.s32.totalorder %s15225_s22, %s15221_s18 }
  0xe3   :  { %p15228_p10 = por %p15227_p9, %p15226_p8 }
  0xe5   :  { %p15229_p11 = pnand %p15228_p10, %p15222_p7 }
  0xe7   :  { %15232 = shalt.err (!%p15229_p11)
}
  0xe8   :  { %315 = dma.hbm_to_vmem [thread:$0]  %s16202_s12, 16, %s313_s14, [#allocation18]  }
  0xe9   :  { %s15233_s21 = scalar_lea.hbm %s16222_s3, 16 }
  0xea   :  { %p15234_p12 = scmp.ne.s32.totalorder %s16222_s3, %s15233_s21  ;;  %p15237_p13 = scmp.lt.u32.totalorder %s15233_s21, %s16222_s3 }
  0xec   :  { %p15239_p0 = pnand %p15237_p13, %p15234_p12 }
  0xee   :  { %15242 = shalt.err (!%p15239_p0)
}
  0xef   :  { %s15243_s27 = scalar_lea.vmem %s337_s15, 16  ;;  %s15247_s23 = scalar_lea.vmem %s337_s15, 32 }
  0xf0   :  { %p15244_p1 = scmp.ne.s32.totalorder %s337_s15, %s15243_s27  ;;  %p15248_p2 = scmp.lt.s32.totalorder %s337_s15, %s337_s15 }
  0xf1   :  { %p15249_p3 = scmp.lt.s32.totalorder %s15247_s23, %s15243_s27 }
  0xf3   :  { %p15250_p4 = por %p15249_p3, %p15248_p2 }
  0xf5   :  { %p15251_p5 = pnand %p15250_p4, %p15244_p1 }
  0xf7   :  { %15254 = shalt.err (!%p15251_p5)
}
  0xf8   :  { %339 = dma.hbm_to_vmem [thread:$0]  %s16222_s3, 16, %s337_s15, [#allocation21]  }
  0xf9   :  { %s15985_s26 = smov [#allocation23]   ;;  %s15986_s0 = smov [#allocation26]  }
  0xfa   :  { %s366_s12 = sshll.u32 %s15985_s26, 4  ;;  %s386_s28 = sshll.u32 %s15986_s0, 4  ;;  %s367_s12 = int_to_ptr.vmem [resolvable:$true] %s366_s12  ;;  %s387_s28 = int_to_ptr.vmem [resolvable:$true] %s386_s28 }
  0xfb   :  { %s15255_s1 = scalar_lea.hbm %s16257_s20, 16 }
  0xfc   :  { %p15256_p6 = scmp.ne.s32.totalorder %s16257_s20, %s15255_s1  ;;  %p15259_p7 = scmp.lt.u32.totalorder %s15255_s1, %s16257_s20 }
  0xfe   :  { %p15261_p8 = pnand %p15259_p7, %p15256_p6 }
 0x100   :  { %15264 = shalt.err (!%p15261_p8)
}
 0x101   :  { %s15265_s25 = scalar_lea.vmem %s367_s12, 16  ;;  %s15269_s2 = scalar_lea.vmem %s367_s12, 32 }
 0x102   :  { %p15266_p9 = scmp.ne.s32.totalorder %s367_s12, %s15265_s25  ;;  %p15270_p10 = scmp.lt.s32.totalorder %s367_s12, %s367_s12 }
 0x103   :  { %p15271_p11 = scmp.lt.s32.totalorder %s15269_s2, %s15265_s25 }
 0x105   :  { %p15272_p12 = por %p15271_p11, %p15270_p10 }
 0x107   :  { %p15273_p13 = pnand %p15272_p12, %p15266_p9 }
 0x109   :  { %15276 = shalt.err (!%p15273_p13)
}
 0x10a   :  { %369 = dma.hbm_to_vmem [thread:$0]  %s16257_s20, 16, %s367_s12, [#allocation24]  }
 0x10b   :  { %s15277_s3 = scalar_lea.hbm %s16267_s13, 16 }
 0x10c   :  { %p15278_p0 = scmp.ne.s32.totalorder %s16267_s13, %s15277_s3  ;;  %p15281_p1 = scmp.lt.u32.totalorder %s15277_s3, %s16267_s13 }
 0x10e   :  { %p15283_p2 = pnand %p15281_p1, %p15278_p0 }
 0x110   :  { %15286 = shalt.err (!%p15283_p2)
}
 0x111   :  { %s15287_s7 = scalar_lea.vmem %s387_s28, 16  ;;  %s15291_s10 = scalar_lea.vmem %s387_s28, 32 }
 0x112   :  { %p15288_p3 = scmp.ne.s32.totalorder %s387_s28, %s15287_s7  ;;  %p15292_p4 = scmp.lt.s32.totalorder %s387_s28, %s387_s28 }
 0x113   :  { %p15293_p5 = scmp.lt.s32.totalorder %s15291_s10, %s15287_s7 }
 0x115   :  { %p15294_p6 = por %p15293_p5, %p15292_p4 }
 0x117   :  { %p15295_p7 = pnand %p15294_p6, %p15288_p3 }
 0x119   :  { %15298 = shalt.err (!%p15295_p7)
}
 0x11a   :  { %389 = dma.hbm_to_vmem [thread:$0]  %s16267_s13, 16, %s387_s28, [#allocation27]  }
 0x11b   :  { %s15987_s14 = smov [#allocation29]   ;;  %s15988_s11 = smov [#allocation32]  }
 0x11c   :  { %s406_s20 = sshll.u32 %s15987_s14, 4  ;;  %s426_s15 = sshll.u32 %s15988_s11, 4  ;;  %s407_s20 = int_to_ptr.vmem [resolvable:$true] %s406_s20  ;;  %s427_s15 = int_to_ptr.vmem [resolvable:$true] %s426_s15 }
 0x11d   :  { %s15299_s16 = scalar_lea.hbm %s16277_s5, 16 }
 0x11e   :  { %p15300_p8 = scmp.ne.s32.totalorder %s16277_s5, %s15299_s16  ;;  %p15303_p9 = scmp.lt.u32.totalorder %s15299_s16, %s16277_s5 }
 0x120   :  { %p15305_p10 = pnand %p15303_p9, %p15300_p8 }
 0x122   :  { %15308 = shalt.err (!%p15305_p10)
}
 0x123   :  { %s15309_s18 = scalar_lea.vmem %s407_s20, 16  ;;  %s15313_s22 = scalar_lea.vmem %s407_s20, 32 }
 0x124   :  { %p15310_p11 = scmp.ne.s32.totalorder %s407_s20, %s15309_s18  ;;  %p15314_p12 = scmp.lt.s32.totalorder %s407_s20, %s407_s20 }
 0x125   :  { %p15315_p13 = scmp.lt.s32.totalorder %s15313_s22, %s15309_s18 }
 0x127   :  { %p15316_p0 = por %p15315_p13, %p15314_p12 }
 0x129   :  { %p15317_p1 = pnand %p15316_p0, %p15310_p11 }
 0x12b   :  { %15320 = shalt.err (!%p15317_p1)
}
 0x12c   :  { %409 = dma.hbm_to_vmem [thread:$0]  %s16277_s5, 16, %s407_s20, [#allocation30]  }
 0x12d   :  { %s15321_s13 = scalar_lea.hbm %s16287_s17, 16 }
 0x12e   :  { %p15322_p2 = scmp.ne.s32.totalorder %s16287_s17, %s15321_s13  ;;  %p15325_p3 = scmp.lt.u32.totalorder %s15321_s13, %s16287_s17 }
 0x130   :  { %p15327_p4 = pnand %p15325_p3, %p15322_p2 }
 0x132   :  { %15330 = shalt.err (!%p15327_p4)
}
 0x133   :  { %s15331_s21 = scalar_lea.vmem %s427_s15, 16  ;;  %s15335_s27 = scalar_lea.vmem %s427_s15, 32 }
 0x134   :  { %p15332_p5 = scmp.ne.s32.totalorder %s427_s15, %s15331_s21  ;;  %p15336_p6 = scmp.lt.s32.totalorder %s427_s15, %s427_s15 }
 0x135   :  { %p15337_p7 = scmp.lt.s32.totalorder %s15335_s27, %s15331_s21 }
 0x137   :  { %p15338_p8 = por %p15337_p7, %p15336_p6 }
 0x139   :  { %p15339_p9 = pnand %p15338_p8, %p15332_p5 }
 0x13b   :  { %15342 = shalt.err (!%p15339_p9)
}
 0x13c   :  { %429 = dma.hbm_to_vmem [thread:$0]  %s16287_s17, 16, %s427_s15, [#allocation33]  }
 0x13d   :  { %s15989_s23 = smov [#allocation35]   ;;  %s15990_s26 = smov [#allocation38]  }
 0x13e   :  { %s446_s5 = sshll.u32 %s15989_s23, 4  ;;  %s474_s12 = sshll.u32 %s15990_s26, 4  ;;  %s447_s5 = int_to_ptr.vmem [resolvable:$true] %s446_s5  ;;  %s475_s12 = int_to_ptr.vmem [resolvable:$true] %s474_s12 }
 0x13f   :  { %s15343_s0 = scalar_lea.hbm %s16297_s29, 16 }
 0x140   :  { %p15344_p10 = scmp.ne.s32.totalorder %s16297_s29, %s15343_s0  ;;  %p15347_p11 = scmp.lt.u32.totalorder %s15343_s0, %s16297_s29 }
 0x142   :  { %p15349_p12 = pnand %p15347_p11, %p15344_p10 }
 0x144   :  { %15352 = shalt.err (!%p15349_p12)
}
 0x145   :  { %s15353_s28 = scalar_lea.vmem %s447_s5, 16  ;;  %s15357_s1 = scalar_lea.vmem %s447_s5, 32 }
 0x146   :  { %p15354_p13 = scmp.ne.s32.totalorder %s447_s5, %s15353_s28  ;;  %p15358_p0 = scmp.lt.s32.totalorder %s447_s5, %s447_s5 }
 0x147   :  { %p15359_p1 = scmp.lt.s32.totalorder %s15357_s1, %s15353_s28 }
 0x149   :  { %p15360_p2 = por %p15359_p1, %p15358_p0 }
 0x14b   :  { %p15361_p3 = pnand %p15360_p2, %p15354_p13 }
 0x14d   :  { %15364 = shalt.err (!%p15361_p3)
}
 0x14e   :  { %449 = dma.hbm_to_vmem [thread:$0]  %s16297_s29, 16, %s447_s5, [#allocation36]  }
 0x14f   :  { %s15365_s17 = scalar_lea.hbm %s16327_s30, 16 }
 0x150   :  { %p15366_p4 = scmp.ne.s32.totalorder %s16327_s30, %s15365_s17  ;;  %p15369_p5 = scmp.lt.u32.totalorder %s15365_s17, %s16327_s30 }
 0x152   :  { %p15371_p6 = pnand %p15369_p5, %p15366_p4 }
 0x154   :  { %15374 = shalt.err (!%p15371_p6)
}
 0x155   :  { %s15375_s25 = scalar_lea.vmem %s475_s12, 16  ;;  %s15379_s2 = scalar_lea.vmem %s475_s12, 32 }
 0x156   :  { %p15376_p7 = scmp.ne.s32.totalorder %s475_s12, %s15375_s25  ;;  %p15380_p8 = scmp.lt.s32.totalorder %s475_s12, %s475_s12 }
 0x157   :  { %p15381_p9 = scmp.lt.s32.totalorder %s15379_s2, %s15375_s25 }
 0x159   :  { %p15382_p10 = por %p15381_p9, %p15380_p8 }
 0x15b   :  { %p15383_p11 = pnand %p15382_p10, %p15376_p7 }
 0x15d   :  { %15386 = shalt.err (!%p15383_p11)
}
 0x15e   :  { %477 = dma.hbm_to_vmem [thread:$0]  %s16327_s30, 16, %s475_s12, [#allocation39]  }
 0x15f   :  { %s15991_s3 = smov [#allocation41]   ;;  %s15992_s7 = smov [#allocation44]  }
 0x160   :  { %s494_s29 = sshll.u32 %s15991_s3, 4  ;;  %s514_s10 = sshll.u32 %s15992_s7, 4  ;;  %s495_s29 = int_to_ptr.vmem [resolvable:$true] %s494_s29  ;;  %s515_s10 = int_to_ptr.vmem [resolvable:$true] %s514_s10 }
 0x161   :  { %s15387_s14 = scalar_lea.hbm %s16337_s24, 16 }
 0x162   :  { %p15388_p12 = scmp.ne.s32.totalorder %s16337_s24, %s15387_s14  ;;  %p15391_p13 = scmp.lt.u32.totalorder %s15387_s14, %s16337_s24 }
 0x164   :  { %p15393_p0 = pnand %p15391_p13, %p15388_p12 }
 0x166   :  { %15396 = shalt.err (!%p15393_p0)
}
 0x167   :  { %s15397_s20 = scalar_lea.vmem %s495_s29, 16  ;;  %s15401_s11 = scalar_lea.vmem %s495_s29, 32 }
 0x168   :  { %p15398_p1 = scmp.ne.s32.totalorder %s495_s29, %s15397_s20  ;;  %p15402_p2 = scmp.lt.s32.totalorder %s495_s29, %s495_s29 }
 0x169   :  { %p15403_p3 = scmp.lt.s32.totalorder %s15401_s11, %s15397_s20 }
 0x16b   :  { %p15404_p4 = por %p15403_p3, %p15402_p2 }
 0x16d   :  { %p15405_p5 = pnand %p15404_p4, %p15398_p1 }
 0x16f   :  { %15408 = shalt.err (!%p15405_p5)
}
 0x170   :  { %497 = dma.hbm_to_vmem [thread:$0]  %s16337_s24, 16, %s495_s29, [#allocation42]  }
 0x171   :  { %s15409_s30 = scalar_lea.hbm %s16347_s8, 16 }
 0x172   :  { %p15410_p6 = scmp.ne.s32.totalorder %s16347_s8, %s15409_s30  ;;  %p15413_p7 = scmp.lt.u32.totalorder %s15409_s30, %s16347_s8 }
 0x174   :  { %p15415_p8 = pnand %p15413_p7, %p15410_p6 }
 0x176   :  { %15418 = shalt.err (!%p15415_p8)
}
 0x177   :  { %s15419_s15 = scalar_lea.vmem %s515_s10, 16  ;;  %s15423_s16 = scalar_lea.vmem %s515_s10, 32 }
 0x178   :  { %p15420_p9 = scmp.ne.s32.totalorder %s515_s10, %s15419_s15  ;;  %p15424_p10 = scmp.lt.s32.totalorder %s515_s10, %s515_s10 }
 0x179   :  { %p15425_p11 = scmp.lt.s32.totalorder %s15423_s16, %s15419_s15 }
 0x17b   :  { %p15426_p12 = por %p15425_p11, %p15424_p10 }
 0x17d   :  { %p15427_p13 = pnand %p15426_p12, %p15420_p9 }
 0x17f   :  { %15430 = shalt.err (!%p15427_p13)
}
 0x180   :  { %s18026_s18 = sld [smem:[#allocation122_spill]]  ;;  %s15993_s22 = smov [#allocation47]  }
 0x181   :  { %517 = dma.hbm_to_vmem [thread:$0]  %s16347_s8, 16, %s515_s10, [#allocation45]  }
 0x182   :  { %s534_s24 = sshll.u32 %s15993_s22, 4  ;;  %s15994_s13 = smov [#allocation50]   ;;  %s535_s24 = int_to_ptr.vmem [resolvable:$true] %s534_s24 }
 0x183   :  { %s562_s21 = sshll.u32 %s15994_s13, 4  ;;  %s563_s21 = int_to_ptr.vmem [resolvable:$true] %s562_s21 }
 0x186   :  { %s15431_s27 = scalar_lea.hbm %s18026_s18, 16 }
 0x187   :  { %p15432_p0 = scmp.ne.s32.totalorder %s18026_s18, %s15431_s27  ;;  %p15435_p1 = scmp.lt.u32.totalorder %s15431_s27, %s18026_s18 }
 0x189   :  { %p15437_p2 = pnand %p15435_p1, %p15432_p0 }
 0x18b   :  { %15440 = shalt.err (!%p15437_p2)
}
 0x18c   :  { %s15441_s23 = scalar_lea.vmem %s535_s24, 16  ;;  %s15445_s5 = scalar_lea.vmem %s535_s24, 32 }
 0x18d   :  { %p15442_p3 = scmp.ne.s32.totalorder %s535_s24, %s15441_s23  ;;  %p15446_p4 = scmp.lt.s32.totalorder %s535_s24, %s535_s24 }
 0x18e   :  { %p15447_p5 = scmp.lt.s32.totalorder %s15445_s5, %s15441_s23 }
 0x190   :  { %p15448_p6 = por %p15447_p5, %p15446_p4 }
 0x192   :  { %p15449_p7 = pnand %p15448_p6, %p15442_p3 }
 0x194   :  { %15452 = shalt.err (!%p15449_p7)
}
 0x195   :  { %537 = dma.hbm_to_vmem [thread:$0]  %s18026_s18, 16, %s535_s24, [#allocation48]  }
 0x196   :  { %s15453_s8 = scalar_lea.hbm %s16387_s19, 16 }
 0x197   :  { %p15454_p8 = scmp.ne.s32.totalorder %s16387_s19, %s15453_s8  ;;  %p15457_p9 = scmp.lt.u32.totalorder %s15453_s8, %s16387_s19 }
 0x199   :  { %p15459_p10 = pnand %p15457_p9, %p15454_p8 }
 0x19b   :  { %15462 = shalt.err (!%p15459_p10)
}
 0x19c   :  { %s15463_s26 = scalar_lea.vmem %s563_s21, 16  ;;  %s15467_s12 = scalar_lea.vmem %s563_s21, 32 }
 0x19d   :  { %p15464_p11 = scmp.ne.s32.totalorder %s563_s21, %s15463_s26  ;;  %p15468_p12 = scmp.lt.s32.totalorder %s563_s21, %s563_s21 }
 0x19e   :  { %p15469_p13 = scmp.lt.s32.totalorder %s15467_s12, %s15463_s26 }
 0x1a0   :  { %p15470_p0 = por %p15469_p13, %p15468_p12 }
 0x1a2   :  { %p15471_p1 = pnand %p15470_p0, %p15464_p11 }
 0x1a4   :  { %15474 = shalt.err (!%p15471_p1)
}
 0x1a5   :  { %s18027_s0 = sld [smem:[#allocation96_spill]]  ;;  %s15995_s28 = smov [#allocation2]  }
 0x1a6   :  { %565 = dma.hbm_to_vmem [thread:$0]  %s16387_s19, 16, %s563_s21, [#allocation51]  }
 0x1a7   :  { %s222_s1 = sshll.u32 %s15995_s28, 4  ;;  %s15996_s17 = smov [#allocation7]   ;;  %s223_s1 = int_to_ptr.vmem [resolvable:$true] %s222_s1 }
 0x1a8   :  { %s242_s25 = sshll.u32 %s15996_s17, 4  ;;  %s243_s25 = int_to_ptr.vmem [resolvable:$true] %s242_s25 }
 0x1ab   :  { %s15475_s2 = scalar_lea.hbm %s18027_s0, 16 }
 0x1ac   :  { %p15476_p2 = scmp.ne.s32.totalorder %s18027_s0, %s15475_s2  ;;  %p15479_p3 = scmp.lt.u32.totalorder %s15475_s2, %s18027_s0 }
 0x1ae   :  { %p15481_p4 = pnand %p15479_p3, %p15476_p2 }
 0x1b0   :  { %15484 = shalt.err (!%p15481_p4)
}
 0x1b1   :  { %s15485_s3 = scalar_lea.vmem %s223_s1, 16  ;;  %s15489_s29 = scalar_lea.vmem %s223_s1, 32 }
 0x1b2   :  { %p15486_p5 = scmp.ne.s32.totalorder %s223_s1, %s15485_s3  ;;  %p15490_p6 = scmp.lt.s32.totalorder %s223_s1, %s223_s1 }
 0x1b3   :  { %p15491_p7 = scmp.lt.s32.totalorder %s15489_s29, %s15485_s3 }
 0x1b5   :  { %p15492_p8 = por %p15491_p7, %p15490_p6 }
 0x1b7   :  { %p15493_p9 = pnand %p15492_p8, %p15486_p5 }
 0x1b9   :  { %15496 = shalt.err (!%p15493_p9)
}
 0x1ba   :  { %s18028_s19 = sld [smem:[#allocation97_spill]] }
 0x1bb   :  { %225 = dma.hbm_to_vmem [thread:$0]  %s18027_s0, 16, %s223_s1, [#allocation3]  }
 0x1c0   :  { %s15497_s7 = scalar_lea.hbm %s18028_s19, 16 }
 0x1c1   :  { %p15498_p10 = scmp.ne.s32.totalorder %s18028_s19, %s15497_s7  ;;  %p15501_p11 = scmp.lt.u32.totalorder %s15497_s7, %s18028_s19 }
 0x1c3   :  { %p15503_p12 = pnand %p15501_p11, %p15498_p10 }
 0x1c5   :  { %15506 = shalt.err (!%p15503_p12)
}
 0x1c6   :  { %s15507_s10 = scalar_lea.vmem %s243_s25, 16  ;;  %s15511_s14 = scalar_lea.vmem %s243_s25, 32 }
 0x1c7   :  { %p15508_p13 = scmp.ne.s32.totalorder %s243_s25, %s15507_s10  ;;  %p15512_p0 = scmp.lt.s32.totalorder %s243_s25, %s243_s25 }
 0x1c8   :  { %p15513_p1 = scmp.lt.s32.totalorder %s15511_s14, %s15507_s10 }
 0x1ca   :  { %p15514_p2 = por %p15513_p1, %p15512_p0 }
 0x1cc   :  { %p15515_p3 = pnand %p15514_p2, %p15508_p13 }
 0x1ce   :  { %15518 = shalt.err (!%p15515_p3)
}
 0x1cf   :  { %s18029_s20 = sld [smem:[#allocation98_spill]]  ;;  %s15997_s11 = smov [#allocation10]  }
 0x1d0   :  { %245 = dma.hbm_to_vmem [thread:$0]  %s18028_s19, 16, %s243_s25, [#allocation6]  }
 0x1d1   :  { %s262_s30 = sshll.u32 %s15997_s11, 4  ;;  %s15998_s15 = smov [#allocation13]   ;;  %s263_s30 = int_to_ptr.vmem [resolvable:$true] %s262_s30 }
 0x1d2   :  { %s282_s16 = sshll.u32 %s15998_s15, 4  ;;  %s283_s16 = int_to_ptr.vmem [resolvable:$true] %s282_s16 }
 0x1d5   :  { %s15519_s18 = scalar_lea.hbm %s18029_s20, 16 }
 0x1d6   :  { %p15520_p4 = scmp.ne.s32.totalorder %s18029_s20, %s15519_s18  ;;  %p15523_p5 = scmp.lt.u32.totalorder %s15519_s18, %s18029_s20 }
 0x1d8   :  { %p15525_p6 = pnand %p15523_p5, %p15520_p4 }
 0x1da   :  { %15528 = shalt.err (!%p15525_p6)
}
 0x1db   :  { %s15529_s22 = scalar_lea.vmem %s263_s30, 16  ;;  %s15533_s24 = scalar_lea.vmem %s263_s30, 32 }
 0x1dc   :  { %p15530_p7 = scmp.ne.s32.totalorder %s263_s30, %s15529_s22  ;;  %p15534_p8 = scmp.lt.s32.totalorder %s263_s30, %s263_s30 }
 0x1dd   :  { %p15535_p9 = scmp.lt.s32.totalorder %s15533_s24, %s15529_s22 }
 0x1df   :  { %p15536_p10 = por %p15535_p9, %p15534_p8 }
 0x1e1   :  { %p15537_p11 = pnand %p15536_p10, %p15530_p7 }
 0x1e3   :  { %15540 = shalt.err (!%p15537_p11)
}
 0x1e4   :  { %s18030_s13 = sld [smem:[#allocation99_spill]] }
 0x1e5   :  { %265 = dma.hbm_to_vmem [thread:$0]  %s18029_s20, 16, %s263_s30, [#allocation9]  }
 0x1ea   :  { %s15541_s21 = scalar_lea.hbm %s18030_s13, 16 }
 0x1eb   :  { %p15542_p12 = scmp.ne.s32.totalorder %s18030_s13, %s15541_s21  ;;  %p15545_p13 = scmp.lt.u32.totalorder %s15541_s21, %s18030_s13 }
 0x1ed   :  { %p15547_p0 = pnand %p15545_p13, %p15542_p12 }
 0x1ef   :  { %15550 = shalt.err (!%p15547_p0)
}
 0x1f0   :  { %s15551_s27 = scalar_lea.vmem %s283_s16, 16  ;;  %s15555_s23 = scalar_lea.vmem %s283_s16, 32 }
 0x1f1   :  { %p15552_p1 = scmp.ne.s32.totalorder %s283_s16, %s15551_s27  ;;  %p15556_p2 = scmp.lt.s32.totalorder %s283_s16, %s283_s16 }
 0x1f2   :  { %p15557_p3 = scmp.lt.s32.totalorder %s15555_s23, %s15551_s27 }
 0x1f4   :  { %p15558_p4 = por %p15557_p3, %p15556_p2 }
 0x1f6   :  { %p15559_p5 = pnand %p15558_p4, %p15552_p1 }
 0x1f8   :  { %15562 = shalt.err (!%p15559_p5)
}
 0x1f9   :  { %s18031_s5 = sld [smem:[#allocation100_spill]]  ;;  %s15999_s8 = smov [#allocation16]  }
 0x1fa   :  { %285 = dma.hbm_to_vmem [thread:$0]  %s18030_s13, 16, %s283_s16, [#allocation12]  }
 0x1fb   :  { %s302_s26 = sshll.u32 %s15999_s8, 4  ;;  %s16000_s12 = smov [#allocation19]   ;;  %s303_s26 = int_to_ptr.vmem [resolvable:$true] %s302_s26 }
 0x1fc   :  { %s326_s0 = sshll.u32 %s16000_s12, 4  ;;  %s327_s0 = int_to_ptr.vmem [resolvable:$true] %s326_s0 }
 0x1ff   :  { %s15563_s28 = scalar_lea.hbm %s18031_s5, 16 }
 0x200   :  { %p15564_p6 = scmp.ne.s32.totalorder %s18031_s5, %s15563_s28  ;;  %p15567_p7 = scmp.lt.u32.totalorder %s15563_s28, %s18031_s5 }
 0x202   :  { %p15569_p8 = pnand %p15567_p7, %p15564_p6 }
 0x204   :  { %15572 = shalt.err (!%p15569_p8)
}
 0x205   :  { %s15573_s1 = scalar_lea.vmem %s303_s26, 16  ;;  %s15577_s17 = scalar_lea.vmem %s303_s26, 32 }
 0x206   :  { %p15574_p9 = scmp.ne.s32.totalorder %s303_s26, %s15573_s1  ;;  %p15578_p10 = scmp.lt.s32.totalorder %s303_s26, %s303_s26 }
 0x207   :  { %p15579_p11 = scmp.lt.s32.totalorder %s15577_s17, %s15573_s1 }
 0x209   :  { %p15580_p12 = por %p15579_p11, %p15578_p10 }
 0x20b   :  { %p15581_p13 = pnand %p15580_p12, %p15574_p9 }
 0x20d   :  { %15584 = shalt.err (!%p15581_p13)
}
 0x20e   :  { %s18032_s25 = sld [smem:[#allocation103_spill]] }
 0x20f   :  { %305 = dma.hbm_to_vmem [thread:$0]  %s18031_s5, 16, %s303_s26, [#allocation15]  }
 0x214   :  { %s15585_s2 = scalar_lea.hbm %s18032_s25, 16 }
 0x215   :  { %p15586_p0 = scmp.ne.s32.totalorder %s18032_s25, %s15585_s2  ;;  %p15589_p1 = scmp.lt.u32.totalorder %s15585_s2, %s18032_s25 }
 0x217   :  { %p15591_p2 = pnand %p15589_p1, %p15586_p0 }
 0x219   :  { %15594 = shalt.err (!%p15591_p2)
}
 0x21a   :  { %s15595_s3 = scalar_lea.vmem %s327_s0, 16  ;;  %s15599_s29 = scalar_lea.vmem %s327_s0, 32 }
 0x21b   :  { %p15596_p3 = scmp.ne.s32.totalorder %s327_s0, %s15595_s3  ;;  %p15600_p4 = scmp.lt.s32.totalorder %s327_s0, %s327_s0 }
 0x21c   :  { %p15601_p5 = scmp.lt.s32.totalorder %s15599_s29, %s15595_s3 }
 0x21e   :  { %p15602_p6 = por %p15601_p5, %p15600_p4 }
 0x220   :  { %p15603_p7 = pnand %p15602_p6, %p15596_p3 }
 0x222   :  { %15606 = shalt.err (!%p15603_p7)
}
 0x223   :  { %s18033_s19 = sld [smem:[#allocation104_spill]]  ;;  %s16001_s7 = smov [#allocation22]  }
 0x224   :  { %329 = dma.hbm_to_vmem [thread:$0]  %s18032_s25, 16, %s327_s0, [#allocation18]  }
 0x225   :  { %s346_s10 = sshll.u32 %s16001_s7, 4  ;;  %s16002_s14 = smov [#allocation25]   ;;  %s347_s10 = int_to_ptr.vmem [resolvable:$true] %s346_s10 }
 0x226   :  { %s376_s20 = sshll.u32 %s16002_s14, 4  ;;  %s377_s20 = int_to_ptr.vmem [resolvable:$true] %s376_s20 }
 0x229   :  { %s15607_s11 = scalar_lea.hbm %s18033_s19, 16 }
 0x22a   :  { %p15608_p8 = scmp.ne.s32.totalorder %s18033_s19, %s15607_s11  ;;  %p15611_p9 = scmp.lt.u32.totalorder %s15607_s11, %s18033_s19 }
 0x22c   :  { %p15613_p10 = pnand %p15611_p9, %p15608_p8 }
 0x22e   :  { %15616 = shalt.err (!%p15613_p10)
}
 0x22f   :  { %s15617_s30 = scalar_lea.vmem %s347_s10, 16  ;;  %s15621_s15 = scalar_lea.vmem %s347_s10, 32 }
 0x230   :  { %p15618_p11 = scmp.ne.s32.totalorder %s347_s10, %s15617_s30  ;;  %p15622_p12 = scmp.lt.s32.totalorder %s347_s10, %s347_s10 }
 0x231   :  { %p15623_p13 = scmp.lt.s32.totalorder %s15621_s15, %s15617_s30 }
 0x233   :  { %p15624_p0 = por %p15623_p13, %p15622_p12 }
 0x235   :  { %p15625_p1 = pnand %p15624_p0, %p15618_p11 }
 0x237   :  { %15628 = shalt.err (!%p15625_p1)
}
 0x238   :  { %s18034_s16 = sld [smem:[#allocation110_spill]] }
 0x239   :  { %349 = dma.hbm_to_vmem [thread:$0]  %s18033_s19, 16, %s347_s10, [#allocation21]  }
 0x23e   :  { %s15629_s18 = scalar_lea.hbm %s18034_s16, 16 }
 0x23f   :  { %p15630_p2 = scmp.ne.s32.totalorder %s18034_s16, %s15629_s18  ;;  %p15633_p3 = scmp.lt.u32.totalorder %s15629_s18, %s18034_s16 }
 0x241   :  { %p15635_p4 = pnand %p15633_p3, %p15630_p2 }
 0x243   :  { %15638 = shalt.err (!%p15635_p4)
}
 0x244   :  { %s15639_s22 = scalar_lea.vmem %s377_s20, 16  ;;  %s15643_s24 = scalar_lea.vmem %s377_s20, 32 }
 0x245   :  { %p15640_p5 = scmp.ne.s32.totalorder %s377_s20, %s15639_s22  ;;  %p15644_p6 = scmp.lt.s32.totalorder %s377_s20, %s377_s20 }
 0x246   :  { %p15645_p7 = scmp.lt.s32.totalorder %s15643_s24, %s15639_s22 }
 0x248   :  { %p15646_p8 = por %p15645_p7, %p15644_p6 }
 0x24a   :  { %p15647_p9 = pnand %p15646_p8, %p15640_p5 }
 0x24c   :  { %15650 = shalt.err (!%p15647_p9)
}
 0x24d   :  { %s18035_s13 = sld [smem:[#allocation111_spill]]  ;;  %s16003_s21 = smov [#allocation28]  }
 0x24e   :  { %379 = dma.hbm_to_vmem [thread:$0]  %s18034_s16, 16, %s377_s20, [#allocation24]  }
 0x24f   :  { %s396_s27 = sshll.u32 %s16003_s21, 4  ;;  %s16004_s23 = smov [#allocation31]   ;;  %s397_s27 = int_to_ptr.vmem [resolvable:$true] %s396_s27 }
 0x250   :  { %s416_s5 = sshll.u32 %s16004_s23, 4  ;;  %s417_s5 = int_to_ptr.vmem [resolvable:$true] %s416_s5 }
 0x253   :  { %s15651_s8 = scalar_lea.hbm %s18035_s13, 16 }
 0x254   :  { %p15652_p10 = scmp.ne.s32.totalorder %s18035_s13, %s15651_s8  ;;  %p15655_p11 = scmp.lt.u32.totalorder %s15651_s8, %s18035_s13 }
 0x256   :  { %p15657_p12 = pnand %p15655_p11, %p15652_p10 }
 0x258   :  { %15660 = shalt.err (!%p15657_p12)
}
 0x259   :  { %s15661_s26 = scalar_lea.vmem %s397_s27, 16  ;;  %s15665_s12 = scalar_lea.vmem %s397_s27, 32 }
 0x25a   :  { %p15662_p13 = scmp.ne.s32.totalorder %s397_s27, %s15661_s26  ;;  %p15666_p0 = scmp.lt.s32.totalorder %s397_s27, %s397_s27 }
 0x25b   :  { %p15667_p1 = scmp.lt.s32.totalorder %s15665_s12, %s15661_s26 }
 0x25d   :  { %p15668_p2 = por %p15667_p1, %p15666_p0 }
 0x25f   :  { %p15669_p3 = pnand %p15668_p2, %p15662_p13 }
 0x261   :  { %15672 = shalt.err (!%p15669_p3)
}
 0x262   :  { %s18036_s0 = sld [smem:[#allocation112_spill]] }
 0x263   :  { %399 = dma.hbm_to_vmem [thread:$0]  %s18035_s13, 16, %s397_s27, [#allocation27]  }
 0x268   :  { %s15673_s28 = scalar_lea.hbm %s18036_s0, 16 }
 0x269   :  { %p15674_p4 = scmp.ne.s32.totalorder %s18036_s0, %s15673_s28  ;;  %p15677_p5 = scmp.lt.u32.totalorder %s15673_s28, %s18036_s0 }
 0x26b   :  { %p15679_p6 = pnand %p15677_p5, %p15674_p4 }
 0x26d   :  { %15682 = shalt.err (!%p15679_p6)
}
 0x26e   :  { %s15683_s1 = scalar_lea.vmem %s417_s5, 16  ;;  %s15687_s17 = scalar_lea.vmem %s417_s5, 32 }
 0x26f   :  { %p15684_p7 = scmp.ne.s32.totalorder %s417_s5, %s15683_s1  ;;  %p15688_p8 = scmp.lt.s32.totalorder %s417_s5, %s417_s5 }
 0x270   :  { %p15689_p9 = scmp.lt.s32.totalorder %s15687_s17, %s15683_s1 }
 0x272   :  { %p15690_p10 = por %p15689_p9, %p15688_p8 }
 0x274   :  { %p15691_p11 = pnand %p15690_p10, %p15684_p7 }
 0x276   :  { %15694 = shalt.err (!%p15691_p11)
}
 0x277   :  { %s18037_s25 = sld [smem:[#allocation113_spill]]  ;;  %s16005_s2 = smov [#allocation34]  }
 0x278   :  { %419 = dma.hbm_to_vmem [thread:$0]  %s18036_s0, 16, %s417_s5, [#allocation30]  }
 0x279   :  { %s436_s3 = sshll.u32 %s16005_s2, 4  ;;  %s16006_s29 = smov [#allocation37]   ;;  %s437_s3 = int_to_ptr.vmem [resolvable:$true] %s436_s3 }
 0x27a   :  { %s456_s19 = sshll.u32 %s16006_s29, 4  ;;  %s457_s19 = int_to_ptr.vmem [resolvable:$true] %s456_s19 }
 0x27d   :  { %s15695_s7 = scalar_lea.hbm %s18037_s25, 16 }
 0x27e   :  { %p15696_p12 = scmp.ne.s32.totalorder %s18037_s25, %s15695_s7  ;;  %p15699_p13 = scmp.lt.u32.totalorder %s15695_s7, %s18037_s25 }
 0x280   :  { %p15701_p0 = pnand %p15699_p13, %p15696_p12 }
 0x282   :  { %15704 = shalt.err (!%p15701_p0)
}
 0x283   :  { %s15705_s10 = scalar_lea.vmem %s437_s3, 16  ;;  %s15709_s14 = scalar_lea.vmem %s437_s3, 32 }
 0x284   :  { %p15706_p1 = scmp.ne.s32.totalorder %s437_s3, %s15705_s10  ;;  %p15710_p2 = scmp.lt.s32.totalorder %s437_s3, %s437_s3 }
 0x285   :  { %p15711_p3 = scmp.lt.s32.totalorder %s15709_s14, %s15705_s10 }
 0x287   :  { %p15712_p4 = por %p15711_p3, %p15710_p2 }
 0x289   :  { %p15713_p5 = pnand %p15712_p4, %p15706_p1 }
 0x28b   :  { %15716 = shalt.err (!%p15713_p5)
}
 0x28c   :  { %s18038_s20 = sld [smem:[#allocation114_spill]] }
 0x28d   :  { %439 = dma.hbm_to_vmem [thread:$0]  %s18037_s25, 16, %s437_s3, [#allocation33]  }
 0x292   :  { %s15717_s11 = scalar_lea.hbm %s18038_s20, 16 }
 0x293   :  { %p15718_p6 = scmp.ne.s32.totalorder %s18038_s20, %s15717_s11  ;;  %p15721_p7 = scmp.lt.u32.totalorder %s15717_s11, %s18038_s20 }
 0x295   :  { %p15723_p8 = pnand %p15721_p7, %p15718_p6 }
 0x297   :  { %15726 = shalt.err (!%p15723_p8)
}
 0x298   :  { %s15727_s30 = scalar_lea.vmem %s457_s19, 16  ;;  %s15731_s15 = scalar_lea.vmem %s457_s19, 32 }
 0x299   :  { %p15728_p9 = scmp.ne.s32.totalorder %s457_s19, %s15727_s30  ;;  %p15732_p10 = scmp.lt.s32.totalorder %s457_s19, %s457_s19 }
 0x29a   :  { %p15733_p11 = scmp.lt.s32.totalorder %s15731_s15, %s15727_s30 }
 0x29c   :  { %p15734_p12 = por %p15733_p11, %p15732_p10 }
 0x29e   :  { %p15735_p13 = pnand %p15734_p12, %p15728_p9 }
 0x2a0   :  { %15738 = shalt.err (!%p15735_p13)
}
 0x2a1   :  { %s18039_s16 = sld [smem:[#allocation119_spill]]  ;;  %s16007_s18 = smov [#allocation40]  }
 0x2a2   :  { %459 = dma.hbm_to_vmem [thread:$0]  %s18038_s20, 16, %s457_s19, [#allocation36]  }
 0x2a3   :  { %s484_s22 = sshll.u32 %s16007_s18, 4  ;;  %s16008_s24 = smov [#allocation43]   ;;  %s485_s22 = int_to_ptr.vmem [resolvable:$true] %s484_s22 }
 0x2a4   :  { %s504_s13 = sshll.u32 %s16008_s24, 4  ;;  %s505_s13 = int_to_ptr.vmem [resolvable:$true] %s504_s13 }
 0x2a7   :  { %s15739_s21 = scalar_lea.hbm %s18039_s16, 16 }
 0x2a8   :  { %p15740_p0 = scmp.ne.s32.totalorder %s18039_s16, %s15739_s21  ;;  %p15743_p1 = scmp.lt.u32.totalorder %s15739_s21, %s18039_s16 }
 0x2aa   :  { %p15745_p2 = pnand %p15743_p1, %p15740_p0 }
 0x2ac   :  { %15748 = shalt.err (!%p15745_p2)
}
 0x2ad   :  { %s15749_s27 = scalar_lea.vmem %s485_s22, 16  ;;  %s15753_s23 = scalar_lea.vmem %s485_s22, 32 }
 0x2ae   :  { %p15750_p3 = scmp.ne.s32.totalorder %s485_s22, %s15749_s27  ;;  %p15754_p4 = scmp.lt.s32.totalorder %s485_s22, %s485_s22 }
 0x2af   :  { %p15755_p5 = scmp.lt.s32.totalorder %s15753_s23, %s15749_s27 }
 0x2b1   :  { %p15756_p6 = por %p15755_p5, %p15754_p4 }
 0x2b3   :  { %p15757_p7 = pnand %p15756_p6, %p15750_p3 }
 0x2b5   :  { %15760 = shalt.err (!%p15757_p7)
}
 0x2b6   :  { %s18040_s5 = sld [smem:[#allocation120_spill]] }
 0x2b7   :  { %487 = dma.hbm_to_vmem [thread:$0]  %s18039_s16, 16, %s485_s22, [#allocation39]  }
 0x2bc   :  { %s15761_s8 = scalar_lea.hbm %s18040_s5, 16 }
 0x2bd   :  { %p15762_p8 = scmp.ne.s32.totalorder %s18040_s5, %s15761_s8  ;;  %p15765_p9 = scmp.lt.u32.totalorder %s15761_s8, %s18040_s5 }
 0x2bf   :  { %p15767_p10 = pnand %p15765_p9, %p15762_p8 }
 0x2c1   :  { %15770 = shalt.err (!%p15767_p10)
}
 0x2c2   :  { %s15771_s26 = scalar_lea.vmem %s505_s13, 16  ;;  %s15775_s12 = scalar_lea.vmem %s505_s13, 32 }
 0x2c3   :  { %p15772_p11 = scmp.ne.s32.totalorder %s505_s13, %s15771_s26  ;;  %p15776_p12 = scmp.lt.s32.totalorder %s505_s13, %s505_s13 }
 0x2c4   :  { %p15777_p13 = scmp.lt.s32.totalorder %s15775_s12, %s15771_s26 }
 0x2c6   :  { %p15778_p0 = por %p15777_p13, %p15776_p12 }
 0x2c8   :  { %p15779_p1 = pnand %p15778_p0, %p15772_p11 }
 0x2ca   :  { %15782 = shalt.err (!%p15779_p1)
}
 0x2cb   :  { %s18041_s0 = sld [smem:[#allocation121_spill]]  ;;  %s16009_s28 = smov [#allocation46]  }
 0x2cc   :  { %507 = dma.hbm_to_vmem [thread:$0]  %s18040_s5, 16, %s505_s13, [#allocation42]  }
 0x2cd   :  { %s524_s1 = sshll.u32 %s16009_s28, 4  ;;  %s16010_s17 = smov [#allocation49]   ;;  %s525_s1 = int_to_ptr.vmem [resolvable:$true] %s524_s1 }
 0x2ce   :  { %s544_s25 = sshll.u32 %s16010_s17, 4  ;;  %s545_s25 = int_to_ptr.vmem [resolvable:$true] %s544_s25 }
 0x2d1   :  { %s15783_s2 = scalar_lea.hbm %s18041_s0, 16 }
 0x2d2   :  { %p15784_p2 = scmp.ne.s32.totalorder %s18041_s0, %s15783_s2  ;;  %p15787_p3 = scmp.lt.u32.totalorder %s15783_s2, %s18041_s0 }
 0x2d4   :  { %p15789_p4 = pnand %p15787_p3, %p15784_p2 }
 0x2d6   :  { %15792 = shalt.err (!%p15789_p4)
}
 0x2d7   :  { %s15793_s3 = scalar_lea.vmem %s525_s1, 16  ;;  %s15797_s29 = scalar_lea.vmem %s525_s1, 32 }
 0x2d8   :  { %p15794_p5 = scmp.ne.s32.totalorder %s525_s1, %s15793_s3  ;;  %p15798_p6 = scmp.lt.s32.totalorder %s525_s1, %s525_s1 }
 0x2d9   :  { %p15799_p7 = scmp.lt.s32.totalorder %s15797_s29, %s15793_s3 }
 0x2db   :  { %p15800_p8 = por %p15799_p7, %p15798_p6 }
 0x2dd   :  { %p15801_p9 = pnand %p15800_p8, %p15794_p5 }
 0x2df   :  { %15804 = shalt.err (!%p15801_p9)
}
 0x2e0   :  { %s18042_s19 = sld [smem:[#allocation123_spill]] }
 0x2e1   :  { %527 = dma.hbm_to_vmem [thread:$0]  %s18041_s0, 16, %s525_s1, [#allocation45]  }
 0x2e6   :  { %s15805_s7 = scalar_lea.hbm %s18042_s19, 16 }
 0x2e7   :  { %p15806_p10 = scmp.ne.s32.totalorder %s18042_s19, %s15805_s7  ;;  %p15809_p11 = scmp.lt.u32.totalorder %s15805_s7, %s18042_s19 }
 0x2e9   :  { %p15811_p12 = pnand %p15809_p11, %p15806_p10 }
 0x2eb   :  { %15814 = shalt.err (!%p15811_p12)
}
 0x2ec   :  { %s15815_s10 = scalar_lea.vmem %s545_s25, 16  ;;  %s15819_s14 = scalar_lea.vmem %s545_s25, 32 }
 0x2ed   :  { %p15816_p13 = scmp.ne.s32.totalorder %s545_s25, %s15815_s10  ;;  %p15820_p0 = scmp.lt.s32.totalorder %s545_s25, %s545_s25 }
 0x2ee   :  { %p15821_p1 = scmp.lt.s32.totalorder %s15819_s14, %s15815_s10 }
 0x2f0   :  { %p15822_p2 = por %p15821_p1, %p15820_p0 }
 0x2f2   :  { %p15823_p3 = pnand %p15822_p2, %p15816_p13 }
 0x2f4   :  { %15826 = shalt.err (!%p15823_p3)
}
 0x2f5   :  { %547 = dma.hbm_to_vmem [thread:$0]  %s18042_s19, 16, %s545_s25, [#allocation48]  }
 0x2f6   :  { %s16011_s20 = smov [#allocation52]   ;;  %s15827_s30 = scalar_lea.hbm %s16392_s6, 16 }
 0x2f7   :  { %s572_s11 = sshll.u32 %s16011_s20, 4  ;;  %p15828_p4 = scmp.ne.s32.totalorder %s16392_s6, %s15827_s30  ;;  %s573_s11 = int_to_ptr.vmem [resolvable:$true] %s572_s11 }
 0x2f8   :  { %p15831_p5 = scmp.lt.u32.totalorder %s15827_s30, %s16392_s6 }
 0x2fa   :  { %p15833_p6 = pnand %p15831_p5, %p15828_p4 }
 0x2fc   :  { %15836 = shalt.err (!%p15833_p6)
}
 0x2fd   :  { %s15837_s15 = scalar_lea.vmem %s573_s11, 16  ;;  %s15841_s16 = scalar_lea.vmem %s573_s11, 32 }
 0x2fe   :  { %p15838_p7 = scmp.ne.s32.totalorder %s573_s11, %s15837_s15  ;;  %p15842_p8 = scmp.lt.s32.totalorder %s573_s11, %s573_s11 }
 0x2ff   :  { %p15843_p9 = scmp.lt.s32.totalorder %s15841_s16, %s15837_s15 }
 0x301   :  { %p15844_p10 = por %p15843_p9, %p15842_p8 }
 0x303   :  { %p15845_p11 = pnand %p15844_p10, %p15838_p7 }
 0x305   :  { %15848 = shalt.err (!%p15845_p11)
}
 0x306   :  { %575 = dma.hbm_to_vmem [thread:$0]  %s16392_s6, 16, %s573_s11, [#allocation51]  }
 0x307   :  { %15871 = dma.done.wait [#allocation3], 16  }
 0x308   :  { %15872 = vsyncadd [#allocation3], 4294967280 }
 0x309   :  { %15873 = dma.done.wait [#allocation6], 32  }
 0x30a   :  { %15874 = vsyncadd [#allocation6], 4294967264 }
 0x30b   :  { %15875 = dma.done.wait [#allocation9], 32  }
 0x30c   :  { %15876 = vsyncadd [#allocation9], 4294967264 }
 0x30d   :  { %15877 = dma.done.wait [#allocation12], 32  }
 0x30e   :  { %15878 = vsyncadd [#allocation12], 4294967264 }
 0x30f   :  { %15879 = dma.done.wait [#allocation15], 32  }
 0x310   :  { %15880 = vsyncadd [#allocation15], 4294967264 }
 0x311   :  { %15881 = dma.done.wait [#allocation18], 32  }
 0x312   :  { %15882 = vsyncadd [#allocation18], 4294967264 }
 0x313   :  { %15883 = dma.done.wait [#allocation21], 32  }
 0x314   :  { %15884 = vsyncadd [#allocation21], 4294967264 }
 0x315   :  { %15885 = dma.done.wait [#allocation24], 32  }
 0x316   :  { %15886 = vsyncadd [#allocation24], 4294967264 }
 0x317   :  { %15887 = dma.done.wait [#allocation27], 32  }
 0x318   :  { %15888 = vsyncadd [#allocation27], 4294967264 }
 0x319   :  { %15889 = dma.done.wait [#allocation30], 32  }
 0x31a   :  { %15890 = vsyncadd [#allocation30], 4294967264 }
 0x31b   :  { %15891 = dma.done.wait [#allocation33], 32  }
 0x31c   :  { %15892 = vsyncadd [#allocation33], 4294967264 }
 0x31d   :  { %15893 = dma.done.wait [#allocation36], 32  }
 0x31e   :  { %15894 = vsyncadd [#allocation36], 4294967264 }
 0x31f   :  { %15895 = dma.done.wait [#allocation39], 32  }
 0x320   :  { %15896 = vsyncadd [#allocation39], 4294967264 }
 0x321   :  { %15897 = dma.done.wait [#allocation42], 32  }
 0x322   :  { %15898 = vsyncadd [#allocation42], 4294967264 }
 0x323   :  { %15899 = dma.done.wait [#allocation45], 32  }
 0x324   :  { %15900 = vsyncadd [#allocation45], 4294967264 }
 0x325   :  { %15901 = dma.done.wait [#allocation48], 32  }
 0x326   :  { %15902 = vsyncadd [#allocation48], 4294967264 }
 0x327   :  { %15903 = dma.done.wait [#allocation51], 32  }
 0x328   :  { %15904 = vsyncadd [#allocation51], 4294967264  ;;  %s18043_s6 = sld [smem:[#allocation72_spill]]  ;;  %vm683_vm0 = vcmask 261120   ;;  %s18044_s18 = sld [smem:[#allocation118_spill]]  ;;  %v16012_v46 = vmov 0.0   ;;  %v997_v54 = vlaneseq }
 0x329   :  { %v13063_v36 = vld [vmem:[#allocation34] ss:$0 sm:$0xff]  ;;  %v13064_v39 = vld [vmem:[#allocation32] ss:$0 sm:$0xff]  ;;  %13730 = vmatprep.subr.mxu0 %v16012_v46  ;;  %vm16013_vm5 = vmmov 0   ;;  %s18045_s22 = sld [smem:[#allocation74_spill]] }
 0x32a   :  { %13732 = vmatprep.mubr.msk.f32.mxu0 %vm16013_vm5, %v16012_v46  ;;  %v13065_v47 = vld [vmem:[#allocation31] ss:$0 sm:$0xff]  ;;  %s16014_s24 = smov 96   ;;  %vm841_vm6 = vcmask 64512   ;;  %v998_v56 = vshrl.u32 %v997_v54, 7  ;;  %v16015_v57 = vmov 0  }
 0x32b   :  { %s16016_s13 = smov 88   ;;  %s16017_s21 = smov 120   ;;  %vm2695_vm15 = vcmask 523264  }
 0x32c   :  { %v999_v59 = vsub.s32 0, %v998_v56  ;;  %s16018_s27 = smov 80   ;;  %s16019_s23 = smov 64  }
 0x32d   :  { %s16020_s5 = smov 56   ;;  %s16021_s8 = smov 112  }
 0x32e   :  { %v16532_v0 = vld [vmem:[%s18043_s6] sm:$0xff]  ;;  %v16535_v1 = vld [vmem:[%s18043_s6 + $0x8] sm:$0xff]  ;;  %v746_v16 = vld [vmem:[%s18044_s18 + $0x10] sm:$0xff]  ;;  %s16022_s26 = smov 48   ;;  %s16023_s12 = smov 72  }
 0x32f   :  { %v684_v2 = vsel %vm683_vm0, %v16532_v0, 0.0  ;;  %v687_v3 = vsel %vm683_vm0, %v16535_v1, 0.0  ;;  %v744_v14 = vld [vmem:[%s18044_s18] sm:$0xff]  ;;  %v745_v15 = vld [vmem:[%s18044_s18 + $0x8] sm:$0xff]  ;;  %v747_v18 = vld [vmem:[%s18044_s18 + $0x18] sm:$0xff]  ;;  %s16024_s0 = smov 104  }
 0x330   :  { %685 = vadd.xlane.f32.xlu0 %v684_v2  ;;  %v14517_v17 = vpack.c.bf16 %v745_v15, %v744_v14  ;;  %v14521_v19 = vpack.c.bf16 %v747_v18, %v746_v16  ;;  %v676_v55 = vld [vmem:[%s18045_s22 + $0x1] sm:$0x1]  ;;  %s18046_s28 = sld [smem:[#allocation117_spill]]  ;;  %s16025_s1 = smov 40  }
 0x331   :  { %vm837_vm7 = vcmp.eq.f32.partialorder %v676_v55, 0.0  ;;  %s18047_s17 = sld [smem:[#allocation115_spill]]  ;;  %s18048_s25 = sld [smem:[#allocation116_spill]] }
 0x332   :  { %14518 = vmatprep.subr.bf16.mxu1 %v14517_v17  ;;  %v996_v58 = vsel %vm837_vm7, 1, %v16015_v57  ;;  %s18050_s2 = sld [smem:[#allocation73_spill]]  ;;  %s18051_s3 = sld [smem:[#allocation124_spill]] }
 0x333   :  { %14520 = vmatpush3.bf16.msra.mxu1 %v14517_v17  ;;  %v16578_v61 = vrot.slane %v996_v58, %v999_v59  ;;  %s18052_s29 = sld [smem:[#allocation87_spill]]  ;;  %s18053_s19 = sld [smem:[#allocation125_spill]] }
 0x334   :  { %688 = vadd.xlane.f32.xlu0 %v687_v3  ;;  %14522 = vmatprep.subr.bf16.mxu1 %v14521_v19  ;;  %s18054_s7 = sld [smem:[#allocation79_spill]]  ;;  %s18055_s10 = sld [smem:[#allocation78_spill]] }
 0x335   :  { %vm1006_vm8 = vcmp.eq.s32.totalorder %v16578_v61, 1  ;;  %s18056_s14 = sld [smem:[#allocation85_spill]]  ;;  %s18057_s20 = sld [smem:[#allocation75_spill]] }
 0x336   :  { %s18058_s11 = sld [smem:[#allocation86_spill]]  ;;  %s18059_s30 = sld [smem:[#allocation84_spill]] }
 0x337   :  { %14524 = vmatpush3.bf16.msra.mxu1 %v14521_v19  ;;  %s18060_s15 = sld [smem:[#allocation91_spill]]  ;;  %s18061_s16 = sld [smem:[#allocation93_spill]] }
 0x338   :  { %13720 = vmatprep.subr.mxu1 %v16012_v46  ;;  %s18062_s6 = sld [smem:[#allocation81_spill]]  ;;  %s18063_s18 = sld [smem:[#allocation80_spill]] }
 0x3bd   :  { %v686_v4 = vpop.xlane.xlu0 %685 }
 0x3be   :  { %v691_v5 = vmul.f32 0.03125, %v686_v4 }
 0x3c0   :  { %v693_v6 = vsub.f32 %v16532_v0, %v691_v5 }
 0x3c1   :  { %v689_v7 = vpop.xlane.xlu0 %688 }
 0x3c2   :  { %v692_v8 = vmul.f32 0.03125, %v689_v7  ;;  %v695_v9 = vmul.f32 %v693_v6, %v693_v6  ;;  %v727_v37 = vmul.f32 %v13063_v36, %v693_v6  ;;  %v675_v6 = vld [vmem:[%s18045_s22] sm:$0x1]  ;;  %s18064_s22 = sld [smem:[#allocation88_spill]] }
 0x3c3   :  { %vm836_vm9 = vcmp.eq.f32.partialorder %v675_v6, 0.0 }
 0x3c4   :  { %v694_v10 = vsub.f32 %v16535_v1, %v692_v8  ;;  %v697_v11 = vsel %vm683_vm0, %v695_v9, 0.0  ;;  %v995_v7 = vsel %vm836_vm9, 1, %v16015_v57 }
 0x3c5   :  { %698 = vadd.xlane.f32.xlu1 %v697_v11  ;;  %v16589_v8 = vrot.slane %v995_v7, %v999_v59 }
 0x3c6   :  { %v696_v12 = vmul.f32 %v694_v10, %v694_v10  ;;  %v728_v41 = vmul.f32 %v13063_v36, %v694_v10 }
 0x3c7   :  { %vm1005_vm10 = vcmp.eq.s32.totalorder %v16589_v8, 1 }
 0x3c8   :  { %v700_v13 = vsel %vm683_vm0, %v696_v12, 0.0 }
 0x3c9   :  { %701 = vadd.xlane.f32.xlu1 %v700_v13 }
 0x452   :  { %v699_v20 = vpop.xlane.xlu1 %698 }
 0x453   :  { %v704_v21 = vmul.f32 0.032258064, %v699_v20 }
 0x455   :  { %14835 = vrsqrt.f32 %v704_v21  ;;  %vm708_vm1 = vcmp.eq.f32.partialorder %v704_v21, inf  ;;  %v711_v26 = vand.u32 2147483648, %v704_v21  ;;  %vm710_vm2 = vcmp.eq.f32.partialorder %v704_v21, 0.0 }
 0x456   :  { %v702_v22 = vpop.xlane.xlu1 %701 }
 0x457   :  { %v705_v23 = vmul.f32 0.032258064, %v702_v22 }
 0x459   :  { %14837 = vrsqrt.f32 %v705_v23  ;;  %vm715_vm3 = vcmp.eq.f32.partialorder %v705_v23, inf  ;;  %v718_v32 = vand.u32 2147483648, %v705_v23  ;;  %vm717_vm4 = vcmp.eq.f32.partialorder %v705_v23, 0.0 }
 0x45f   :  { %v14836_v24 = vpop.eup %14835 }
 0x460   :  { %v707_v25 = vmul.f32 %v14836_v24, %v704_v21 }
 0x462   :  { %v709_v27 = vsel %vm708_vm1, %v704_v21, %v707_v25 }
 0x463   :  { %v14838_v28 = vpop.eup %14837  ;;  %v712_v29 = vsel %vm710_vm2, %v711_v26, %v709_v27 }
 0x464   :  { %v714_v30 = vmul.f32 %v14838_v28, %v705_v23  ;;  %v729_v31 = vadd.f32 1e-06, %v712_v29 }
 0x466   :  { %v716_v33 = vsel %vm715_vm3, %v705_v23, %v714_v30  ;;  %14839 = vrcp.f32 %v729_v31 }
 0x467   :  { %v719_v34 = vsel %vm717_vm4, %v718_v32, %v716_v33 }
 0x468   :  { %v730_v35 = vadd.f32 1e-06, %v719_v34 }
 0x46a   :  { %14841 = vrcp.f32 %v730_v35 }
 0x470   :  { %v14840_v38 = vpop.eup %14839 }
 0x471   :  { %v732_v40 = vmul.f32 %v14840_v38, %v727_v37 }
 0x473   :  { %v742_v42 = vadd.f32 %v13064_v39, %v732_v40 }
 0x474   :  { %v14842_v43 = vpop.eup %14841 }
 0x475   :  { %v734_v44 = vmul.f32 %v14842_v43, %v728_v41  ;;  %13717 = vmatprep.mubr.msk.f32.mxu1 %vm683_vm0, %v742_v42 }
 0x477   :  { %v743_v45 = vadd.f32 %v13064_v39, %v734_v44 }
 0x479   :  { %13718 = vmatmul.mubr.msk.f32.vlgmr.msra.gmra.mrb[0].mxu1 %vm683_vm0, %v743_v45 }
 0x47a   :  { %13722 = vmatprep.mubr.msk.f32.mxu1 %vm16013_vm5, %v16012_v46 }
 0x54c   :  { %v13719_v48 = vpop.f32.mrb[0].mxu1 }
 0x54d   :  { %v16557_v49 = vadd.f32 %v13719_v48, %v13065_v47  ;;  %v827_v50 = vpop.f32.mrb[1].mxu1 }
 0x54e   :  { %v16559_v51 = vadd.f32 %v13065_v47, %v827_v50 }
 0x54f   :  { %917 = vrot.lane.b32.xlu1 %v16557_v49, %s16014_s24 }
 0x550   :  { %839 = vrot.lane.b32.xlu0 %v16559_v51, %s16014_s24 }
 0x5c1   :  { %v918_v53 = vpop.permute.xlu1 %917 }
 0x5c2   :  { %v840_v52 = vpop.permute.xlu0 %839 }
 0x5c3   :  { %13721 = vmatpush3.xpose.msk.msra.mxu1 %vm841_vm6, %v840_v52 }
 0x5c4   :  { %13725 = vmatprep.subr.mxu1 %v16012_v46 }
 0x5c6   :  { %13723 = vmatmul.mubr.msk.f32.vlgmr.msra.gmra.mrb[2].mxu1 %vm841_vm6, %v16559_v51 }
 0x5c7   :  { %13726 = vmatpush3.xpose.msk.msra.mxu1 %vm841_vm6, %v918_v53  ;;  %13727 = vmatprep.mubr.msk.f32.mxu1 %vm16013_vm5, %v16012_v46 }
 0x5c8   :  { %13735 = vmatprep.subr.mxu1 %v16012_v46 }
 0x5ca   :  { %13728 = vmatmul.mubr.msk.f32.vlgmr.msra.gmra.mrb[4].mxu1 %vm841_vm6, %v16557_v49 }
 0x5cb   :  { %13737 = vmatprep.mubr.msk.f32.mxu1 %vm16013_vm5, %v16012_v46 }
 0x699   :  { %v912_v60 = vpop.f32.mrb[2].mxu1 }
 0x69a   :  { %v13724_v62 = vpop.f32.mrb[3].mxu1  ;;  %v993_v9 = vmul.f32 0.35355338, %v912_v60 }
 0x69c   :  { %v1007_v10 = vsel %vm1005_vm10, -1e+09, %v993_v9 }
 0x69d   :  { %v989_v63 = vpop.f32.mrb[4].mxu1  ;;  %v1009_v11 = vsel %vm841_vm6, %v1007_v10, -inf }
 0x69e   :  { %v994_v2 = vmul.f32 0.35355338, %v989_v63  ;;  %v13729_v3 = vpop.f32.mrb[5].mxu1 }
 0x6a0   :  { %v1008_v4 = vsel %vm1006_vm8, -1e+09, %v994_v2 }
 0x6a1   :  { %v1012_v5 = vsel %vm841_vm6, %v1008_v4, -inf }
 0x6a2   :  { %1013 = vmax.xlane.f32.xlu1 %v1012_v5 }
 0x6b3   :  { %1264 = vrot.lane.b32.xlu1 %v16557_v49, %s16016_s13 }
 0x6b7   :  { %1262 = vrot.lane.b32.xlu1 %v16557_v49, %s16017_s21 }
 0x6db   :  { %1010 = vmax.xlane.f32.xlu1 %v1009_v11 }
 0x6ec   :  { %1186 = vrot.lane.b32.xlu1 %v16559_v51, %s16016_s13 }
 0x6f0   :  { %1184 = vrot.lane.b32.xlu1 %v16559_v51, %s16017_s21 }
 0x6f4   :  { %1683 = vrot.lane.b32.xlu1 %v16559_v51, %s16018_s27 }
 0x72f   :  { %v1014_v12 = vpop.xlane.xlu1 %1013 }
 0x730   :  { %v1016_v13 = vsub.f32 %v1008_v4, %v1014_v12 }
 0x732   :  { %v1019_v14 = vmul.f32 1.442695, %v1016_v13 }
 0x733   :  { %v1265_v17 = vpop.permute.xlu1 %1264 }
 0x734   :  { %14843 = vpow2.f32 %v1019_v14 }
 0x737   :  { %v1263_v18 = vpop.permute.xlu1 %1262 }
 0x73e   :  { %v14844_v15 = vpop.eup %14843 }
 0x73f   :  { %v1024_v16 = vsel %vm841_vm6, %v14844_v15, 0.0 }
 0x740   :  { %1025 = vadd.xlane.f32.xlu0 %v1024_v16 }
 0x756   :  { %1107 = vrot.lane.b32.xlu0 %v16557_v49, %s16019_s23 }
 0x768   :  { %v1011_v19 = vpop.xlane.xlu1 %1010 }
 0x769   :  { %v1015_v20 = vsub.f32 %v1007_v10, %v1011_v19 }
 0x76b   :  { %v1017_v21 = vmul.f32 1.442695, %v1015_v20 }
 0x76c   :  { %v1187_v31 = vpop.permute.xlu1 %1186 }
 0x76d   :  { %14845 = vpow2.f32 %v1017_v21 }
 0x770   :  { %v1185_v33 = vpop.permute.xlu1 %1184 }
 0x774   :  { %v1684_v57 = vpop.permute.xlu1 %1683 }
 0x777   :  { %v14846_v22 = vpop.eup %14845 }
 0x778   :  { %v1021_v23 = vsel %vm841_vm6, %v14846_v22, 0.0 }
 0x779   :  { %1022 = vadd.xlane.f32.xlu0 %v1021_v23 }
 0x78f   :  { %1031 = vrot.lane.b32.xlu0 %v16559_v51, %s16019_s23 }
 0x7cd   :  { %v1026_v24 = vpop.xlane.xlu0 %1025 }
 0x7ce   :  { %14847 = vrcp.f32 %v1026_v24 }
 0x7d1   :  { %v1108_v25 = vpop.permute.xlu0 %1107 }
 0x7d2   :  { %13736 = vmatpush3.msra.mxu1 %v1108_v25 }
 0x7d3   :  { %13745 = vmatprep.subr.mxu1 %v16012_v46 }
 0x7d8   :  { %v14848_v26 = vpop.eup %14847 }
 0x7d9   :  { %v1030_v27 = vmul.f32 %v14848_v26, %v14844_v15  ;;  %v1518_v26 = vld [vmem:[%s18046_s28 + $0x8] sm:$0xff] }
 0x7db   :  { %13738 = vmatmul.mubr.msk.f32.vlgmr.msra.gmra.mrb[6].mxu1 %vm841_vm6, %v1030_v27  ;;  %v1183_v27 = vld [vmem:[%s18046_s28] sm:$0xff] }
 0x7dc   :  { %13746 = vmatpush3.xpose.msk.msra.mxu1 %vm841_vm6, %v1265_v17  ;;  %13747 = vmatprep.mubr.msk.f32.mxu1 %vm16013_vm5, %v16012_v46 }
 0x7dd   :  { %13755 = vmatprep.subr.mxu1 %v16012_v46 }
 0x7df   :  { %13748 = vmatmul.mubr.msk.f32.vlgmr.msra.gmra.mrb[8].mxu1 %vm841_vm6, %v1263_v18 }
 0x7e0   :  { %13757 = vmatprep.mubr.msk.f32.mxu1 %vm16013_vm5, %v16012_v46 }
 0x806   :  { %v1023_v28 = vpop.xlane.xlu0 %1022 }
 0x807   :  { %14849 = vrcp.f32 %v1023_v28 }
 0x80a   :  { %v1032_v29 = vpop.permute.xlu0 %1031 }
 0x80b   :  { %13731 = vmatpush3.msra.mxu0 %v1032_v29 }
 0x80c   :  { %13740 = vmatprep.subr.mxu0 %v16012_v46 }
 0x811   :  { %v14850_v30 = vpop.eup %14849 }
 0x812   :  { %v1029_v32 = vmul.f32 %v14850_v30, %v14846_v22 }
 0x814   :  { %13733 = vmatmul.mubr.msk.f32.vlgmr.msra.gmra.mrb[0].mxu0 %vm841_vm6, %v1029_v32 }
 0x815   :  { %13741 = vmatpush3.xpose.msk.msra.mxu0 %vm841_vm6, %v1187_v31  ;;  %13742 = vmatprep.mubr.msk.f32.mxu0 %vm16013_vm5, %v16012_v46 }
 0x816   :  { %13750 = vmatprep.subr.mxu0 %v16012_v46 }
 0x818   :  { %13743 = vmatmul.mubr.msk.f32.vlgmr.msra.gmra.mrb[2].mxu0 %vm841_vm6, %v1185_v33 }
 0x819   :  { %13752 = vmatprep.mubr.msk.f32.mxu0 %vm16013_vm5, %v16012_v46 }
 0x8ae   :  { %v16625_v34 = vpop.f32.mrb[6].mxu1 }
 0x8af   :  { %v13739_v35 = vpop.f32.mrb[7].mxu1 }
 0x8b2   :  { %v1336_v36 = vpop.f32.mrb[8].mxu1 }
 0x8b3   :  { %v1341_v37 = vmul.f32 0.35355338, %v1336_v36  ;;  %v13749_v38 = vpop.f32.mrb[9].mxu1 }
 0x8b5   :  { %v1343_v39 = vsel %vm1006_vm8, -1e+09, %v1341_v37 }
 0x8b6   :  { %v1347_v40 = vsel %vm841_vm6, %v1343_v39, -inf }
 0x8b7   :  { %1348 = vmax.xlane.f32.xlu0 %v1347_v40 }
 0x8cd   :  { %1442 = vrot.lane.b32.xlu0 %v16557_v49, %s16020_s5 }
 0x8d1   :  { %1681 = vrot.lane.b32.xlu0 %v16559_v51, %s16021_s8 }
 0x8d5   :  { %1759 = vrot.lane.b32.xlu0 %v16557_v49, %s16021_s8 }
 0x8e7   :  { %v16636_v41 = vpop.f32.mrb[0].mxu0 }
 0x8e8   :  { %v13734_v42 = vpop.f32.mrb[1].mxu0 }
 0x8eb   :  { %v1258_v43 = vpop.f32.mrb[2].mxu0 }
 0x8ec   :  { %v13744_v44 = vpop.f32.mrb[3].mxu0  ;;  %v1340_v54 = vmul.f32 0.35355338, %v1258_v43 }
 0x8ed   :  { %v2015_v44 = vld [vmem:[%s18046_s28 + $0x10] sm:$0xff] }
 0x8ee   :  { %v1342_v55 = vsel %vm1005_vm10, -1e+09, %v1340_v54 }
 0x8ef   :  { %v1344_v56 = vsel %vm841_vm6, %v1342_v55, -inf }
 0x944   :  { %v1349_v45 = vpop.xlane.xlu0 %1348 }
 0x945   :  { %v1351_v47 = vsub.f32 %v1343_v39, %v1349_v45 }
 0x947   :  { %v1354_v48 = vmul.f32 1.442695, %v1351_v47 }
 0x948   :  { %v1443_v50 = vpop.permute.xlu0 %1442 }
 0x949   :  { %14851 = vpow2.f32 %v1354_v48  ;;  %13756 = vmatpush3.msra.mxu1 %v1443_v50 }
 0x94a   :  { %13770 = vmatprep.subr.mxu1 %v16012_v46 }
 0x94c   :  { %v1682_v62 = vpop.permute.xlu0 %1681 }
 0x950   :  { %v1760_v2 = vpop.permute.xlu0 %1759 }
 0x953   :  { %v14852_v52 = vpop.eup %14851 }
 0x954   :  { %v1359_v53 = vsel %vm841_vm6, %v14852_v52, 0.0 }
 0x955   :  { %1360 = vadd.xlane.f32.xlu1 %v1359_v53 }
 0x966   :  { %1761 = vrot.lane.b32.xlu1 %v16557_v49, %s16018_s27 }
 0x98a   :  { %1345 = vmax.xlane.f32.xlu1 %v1344_v56 }
 0x9e2   :  { %v1361_v58 = vpop.xlane.xlu1 %1360 }
 0x9e3   :  { %14853 = vrcp.f32 %v1361_v58 }
 0x9e6   :  { %v1762_v63 = vpop.permute.xlu1 %1761 }
 0x9ed   :  { %v14854_v59 = vpop.eup %14853 }
 0x9ee   :  { %v1365_v60 = vmul.f32 %v14854_v59, %v14852_v52 }
 0x9f0   :  { %13758 = vmatmul.mubr.msk.f32.vlgmr.msra.gmra.mrb[10].mxu1 %vm841_vm6, %v1365_v60 }
 0x9f1   :  { %13771 = vmatpush3.xpose.msk.msra.mxu1 %vm841_vm6, %v1684_v57  ;;  %13772 = vmatprep.mubr.msk.f32.mxu1 %vm16013_vm5, %v16012_v46 }
 0x9f2   :  { %13775 = vmatprep.subr.mxu1 %v16012_v46 }
 0x9f4   :  { %13773 = vmatmul.mubr.msk.f32.vlgmr.msra.gmra.mrb[12].mxu1 %vm841_vm6, %v1682_v62 }
 0x9f5   :  { %13776 = vmatpush3.xpose.msk.msra.mxu1 %vm841_vm6, %v1762_v63  ;;  %13777 = vmatprep.mubr.msk.f32.mxu1 %vm16013_vm5, %v16012_v46 }
 0x9f6   :  { %13785 = vmatprep.subr.mxu1 %v16012_v46 }
 0x9f8   :  { %13778 = vmatmul.mubr.msk.f32.vlgmr.msra.gmra.mrb[14].mxu1 %vm841_vm6, %v1760_v2 }
 0x9f9   :  { %13787 = vmatprep.mubr.msk.f32.mxu1 %vm16013_vm5, %v16012_v46 }
 0xa17   :  { %v1346_v3 = vpop.xlane.xlu1 %1345 }
 0xa18   :  { %v1350_v4 = vsub.f32 %v1342_v55, %v1346_v3 }
 0xa1a   :  { %v1352_v5 = vmul.f32 1.442695, %v1350_v4 }
 0xa1c   :  { %14855 = vpow2.f32 %v1352_v5 }
 0xa26   :  { %v14856_v6 = vpop.eup %14855 }
 0xa27   :  { %v1356_v7 = vsel %vm841_vm6, %v14856_v6, 0.0 }
 0xa28   :  { %1357 = vadd.xlane.f32.xlu0 %v1356_v7 }
 0xa3e   :  { %1366 = vrot.lane.b32.xlu0 %v16559_v51, %s16020_s5 }
 0xa42   :  { %1939 = vrot.lane.b32.xlu0 %v16557_v49, %s16022_s26 }
 0xa46   :  { %2101 = vrot.lane.b32.xlu0 %v16559_v51, %s16023_s12 }
 0xa4a   :  { %2179 = vrot.lane.b32.xlu0 %v16557_v49, %s16023_s12 }
 0xa4e   :  { %2099 = vrot.lane.b32.xlu0 %v16559_v51, %s16024_s0 }
 0xab5   :  { %v1358_v9 = vpop.xlane.xlu0 %1357 }
 0xab6   :  { %14857 = vrcp.f32 %v1358_v9 }
 0xab9   :  { %v1367_v10 = vpop.permute.xlu0 %1366 }
 0xaba   :  { %13751 = vmatpush3.msra.mxu0 %v1367_v10 }
 0xabb   :  { %13760 = vmatprep.subr.mxu0 %v1518_v26 }
 0xabd   :  { %v1940_v11 = vpop.permute.xlu0 %1939 }
 0xabe   :  { %13786 = vmatpush3.msra.mxu1 %v1940_v11 }
 0xabf   :  { %13795 = vmatprep.subr.mxu1 %v16012_v46 }
 0xac0   :  { %v14858_v12 = vpop.eup %14857 }
 0xac1   :  { %v1364_v13 = vmul.f32 %v14858_v12, %v14856_v6  ;;  %v2102_v47 = vpop.permute.xlu0 %2101 }
 0xac3   :  { %13753 = vmatmul.mubr.msk.f32.vlgmr.msra.gmra.mrb[4].mxu0 %vm841_vm6, %v1364_v13  ;;  %v1514_v14 = vpop.f32.mrb[10].mxu1 }
 0xac4   :  { %v13759_v15 = vpop.f32.mrb[11].mxu1  ;;  %13761 = vmatpush3.msra.mxu0 %v1518_v26  ;;  %v2433_v26 = vld [vmem:[%s18046_s28 + $0x18] sm:$0xff]  ;;  %s18065_s28 = sld [smem:[#allocation90_spill]] }
 0xac5   :  { %13765 = vmatprep.subr.mxu0 %v1183_v27  ;;  %v2180_v52 = vpop.permute.xlu0 %2179 }
 0xac7   :  { %v1755_v16 = vpop.f32.mrb[12].mxu1 }
 0xac8   :  { %v1837_v17 = vmul.f32 0.35355338, %v1755_v16  ;;  %v13774_v18 = vpop.f32.mrb[13].mxu1 }
 0xac9   :  { %v2100_v53 = vpop.permute.xlu0 %2099 }
 0xaca   :  { %v1839_v19 = vsel %vm1005_vm10, -1e+09, %v1837_v17 }
 0xacb   :  { %v1833_v20 = vpop.f32.mrb[14].mxu1  ;;  %v1841_v21 = vsel %vm841_vm6, %v1839_v19, -inf }
 0xacc   :  { %v1838_v22 = vmul.f32 0.35355338, %v1833_v20  ;;  %1842 = vmax.xlane.f32.xlu1 %v1841_v21  ;;  %v13779_v23 = vpop.f32.mrb[15].mxu1 }
 0xace   :  { %v1840_v24 = vsel %vm1006_vm8, -1e+09, %v1838_v22 }
 0xacf   :  { %v1844_v25 = vsel %vm841_vm6, %v1840_v24, -inf }
 0xad0   :  { %1845 = vmax.xlane.f32.xlu1 %v1844_v25 }
 0xb59   :  { %v1843_v28 = vpop.xlane.xlu1 %1842 }
 0xb5a   :  { %v1847_v29 = vsub.f32 %v1839_v19, %v1843_v28 }
 0xb5c   :  { %v1849_v30 = vmul.f32 1.442695, %v1847_v29 }
 0xb5d   :  { %v1846_v31 = vpop.xlane.xlu1 %1845 }
 0xb5e   :  { %14859 = vpow2.f32 %v1849_v30  ;;  %v1848_v32 = vsub.f32 %v1840_v24, %v1846_v31  ;;  %v13100_v30 = vld [vmem:[#allocation29] ss:$0 sm:$0xff] }
 0xb60   :  { %v1851_v33 = vmul.f32 1.442695, %v1848_v32 }
 0xb62   :  { %14861 = vpow2.f32 %v1851_v33 }
 0xb68   :  { %v14860_v35 = vpop.eup %14859 }
 0xb69   :  { %v1853_v36 = vsel %vm841_vm6, %v14860_v35, 0.0 }
 0xb6a   :  { %1854 = vadd.xlane.f32.xlu1 %v1853_v36 }
 0xb6c   :  { %v14862_v37 = vpop.eup %14861 }
 0xb6d   :  { %v1856_v38 = vsel %vm841_vm6, %v14862_v37, 0.0 }
 0xb6e   :  { %1857 = vadd.xlane.f32.xlu1 %v1856_v38 }
 0xb7f   :  { %1863 = vrot.lane.b32.xlu1 %v16559_v51, %s16022_s26 }
 0xb83   :  { %2177 = vrot.lane.b32.xlu1 %v16557_v49, %s16024_s0 }
 0xb96   :  { %v1438_v39 = vpop.f32.mrb[4].mxu0 }
 0xb97   :  { %v13754_v40 = vpop.f32.mrb[5].mxu0  ;;  %13762 = vmatprep.mubr.msk.f32.mxu0 %vm841_vm6, %v1438_v39 }
 0xb98   :  { %13763 = vmatmul.mubr.msk.f32.vlgmr.msra.gmra.mrb[6].mxu0 %vm841_vm6, %v1514_v14 }
 0xb99   :  { %13767 = vmatprep.mubr.msk.f32.mxu0 %vm841_vm6, %v16636_v41  ;;  %13766 = vmatpush3.msra.mxu0 %v1183_v27 }
 0xb9a   :  { %13780 = vmatprep.subr.mxu0 %v16012_v46 }
 0xba0   :  { %13768 = vmatmul.mubr.msk.f32.vlgmr.msra.gmra.mrb[6].mxu0 %vm841_vm6, %v16625_v34 }
 0xba1   :  { %13782 = vmatprep.mubr.msk.f32.mxu0 %vm16013_vm5, %v16012_v46 }
 0xbf7   :  { %v1855_v42 = vpop.xlane.xlu1 %1854 }
 0xbf8   :  { %14863 = vrcp.f32 %v1855_v42 }
 0xbfb   :  { %v1858_v43 = vpop.xlane.xlu1 %1857 }
 0xbfc   :  { %14865 = vrcp.f32 %v1858_v43 }
 0xbff   :  { %v1864_v45 = vpop.permute.xlu1 %1863 }
 0xc00   :  { %13781 = vmatpush3.msra.mxu0 %v1864_v45 }
 0xc01   :  { %13790 = vmatprep.subr.mxu0 %v2015_v44 }
 0xc02   :  { %v14864_v48 = vpop.eup %14863 }
 0xc03   :  { %v1861_v41 = vmul.f32 %v14864_v48, %v14860_v35  ;;  %v2178_v58 = vpop.permute.xlu1 %2177 }
 0xc05   :  { %13783 = vmatmul.mubr.msk.f32.vlgmr.msra.gmra.mrb[8].mxu0 %vm841_vm6, %v1861_v41 }
 0xc06   :  { %v14866_v50 = vpop.eup %14865  ;;  %13791 = vmatpush3.msra.mxu0 %v2015_v44 }
 0xc07   :  { %v1862_v34 = vmul.f32 %v14866_v50, %v14862_v37  ;;  %13800 = vmatprep.subr.mxu0 %v16012_v46  ;;  %v2586_v50 = vld [vmem:[%s18047_s17] sm:$0xff] }
 0xc09   :  { %13788 = vmatmul.mubr.msk.f32.vlgmr.msra.gmra.mrb[16].mxu1 %vm841_vm6, %v1862_v34  ;;  %v2588_v34 = vld [vmem:[%s18047_s17 + $0x10] sm:$0xff] }
 0xc0a   :  { %13796 = vmatpush3.xpose.msk.msra.mxu1 %vm841_vm6, %v2102_v47  ;;  %13797 = vmatprep.mubr.msk.f32.mxu1 %vm16013_vm5, %v16012_v46 }
 0xc0b   :  { %13805 = vmatprep.subr.mxu1 %v16012_v46 }
 0xc0d   :  { %13798 = vmatmul.mubr.msk.f32.vlgmr.msra.gmra.mrb[18].mxu1 %vm841_vm6, %v2100_v53 }
 0xc0e   :  { %13807 = vmatprep.mubr.msk.f32.mxu1 %vm16013_vm5, %v16012_v46 }
 0xcd8   :  { %v1935_v54 = vpop.f32.mrb[8].mxu0 }
 0xcd9   :  { %v13784_v55 = vpop.f32.mrb[9].mxu0  ;;  %13792 = vmatprep.mubr.msk.f32.mxu0 %vm841_vm6, %v1935_v54  ;;  %v2589_v54 = vld [vmem:[%s18047_s17 + $0x18] sm:$0xff] }
 0xcda   :  { %v14529_v55 = vpack.c.bf16 %v2589_v54, %v2588_v34 }
 0xcdc   :  { %v2011_v56 = vpop.f32.mrb[16].mxu1 }
 0xcdd   :  { %v13789_v57 = vpop.f32.mrb[17].mxu1  ;;  %13793 = vmatmul.mubr.msk.f32.vlgmr.msra.gmra.mrb[6].mxu0 %vm841_vm6, %v2011_v56  ;;  %v2680_v56 = vld [vmem:[%s18048_s25] sm:$0xff] }
 0xcde   :  { %13801 = vmatpush3.xpose.msk.msra.mxu0 %vm841_vm6, %v2180_v52  ;;  %13802 = vmatprep.mubr.msk.f32.mxu0 %vm16013_vm5, %v16012_v46  ;;  %v2587_v52 = vld [vmem:[%s18047_s17 + $0x8] sm:$0xff]  ;;  %s18066_s17 = sld [smem:[#allocation92_spill]] }
 0xcdf   :  { %13810 = vmatprep.subr.mxu0 %v16012_v46  ;;  %v14525_v53 = vpack.c.bf16 %v2587_v52, %v2586_v50  ;;  %v2681_v57 = vld [vmem:[%s18048_s25 + $0x8] sm:$0xff] }
 0xce0   :  { %v2173_v59 = vpop.f32.mrb[18].mxu1 }
 0xce1   :  { %v2255_v60 = vmul.f32 0.35355338, %v2173_v59  ;;  %v13799_v62 = vpop.f32.mrb[19].mxu1  ;;  %13803 = vmatmul.mubr.msk.f32.vlgmr.msra.gmra.mrb[10].mxu0 %vm841_vm6, %v2178_v58  ;;  %v2682_v58 = vld [vmem:[%s18048_s25 + $0x10] sm:$0xff]  ;;  %v14533_v59 = vpack.c.bf16 %v2681_v57, %v2680_v56 }
 0xce2   :  { %13812 = vmatprep.mubr.msk.f32.mxu0 %vm16013_vm5, %v16012_v46 }
 0xce3   :  { %v2257_v63 = vsel %vm1005_vm10, -1e+09, %v2255_v60  ;;  %v2683_v60 = vld [vmem:[%s18048_s25 + $0x18] sm:$0xff] }
 0xce4   :  { %v2259_v2 = vsel %vm841_vm6, %v2257_v63, -inf  ;;  %v14537_v62 = vpack.c.bf16 %v2683_v60, %v2682_v58  ;;  %v2838_v60 = vld [vmem:[%s16382_s9 + $0x8] sm:$0xff] }
 0xce5   :  { %2260 = vmax.xlane.f32.xlu0 %v2259_v2  ;;  %v2685_v2 = vld [vmem:[%s18048_s25 + $0x28] sm:$0xff] }
 0xd72   :  { %v2261_v3 = vpop.xlane.xlu0 %2260 }
 0xd73   :  { %v2265_v4 = vsub.f32 %v2257_v63, %v2261_v3  ;;  %v2684_v63 = vld [vmem:[%s18048_s25 + $0x20] sm:$0xff] }
 0xd74   :  { %v14541_v3 = vpack.c.bf16 %v2685_v2, %v2684_v63  ;;  %v2840_v2 = vld [vmem:[%s16382_s9 + $0x18] sm:$0xff] }
 0xd75   :  { %v2267_v5 = vmul.f32 1.442695, %v2265_v4 }
 0xd77   :  { %14867 = vpow2.f32 %v2267_v5 }
 0xd81   :  { %v14868_v6 = vpop.eup %14867 }
 0xd82   :  { %v2271_v7 = vsel %vm841_vm6, %v14868_v6, 0.0 }
 0xd83   :  { %2272 = vadd.xlane.f32.xlu0 %v2271_v7 }
 0xdb4   :  { %v2251_v9 = vpop.f32.mrb[10].mxu0 }
 0xdb5   :  { %v2256_v10 = vmul.f32 0.35355338, %v2251_v9  ;;  %v13804_v11 = vpop.f32.mrb[11].mxu0 }
 0xdb7   :  { %v2258_v12 = vsel %vm1006_vm8, -1e+09, %v2256_v10 }
 0xdb8   :  { %v2262_v13 = vsel %vm841_vm6, %v2258_v12, -inf }
 0xdb9   :  { %2263 = vmax.xlane.f32.xlu1 %v2262_v13 }
 0xdca   :  { %2357 = vrot.lane.b32.xlu1 %v16557_v49, %s16025_s1 }
 0xe10   :  { %v2273_v20 = vpop.xlane.xlu0 %2272 }
 0xe46   :  { %v2264_v14 = vpop.xlane.xlu1 %2263 }
 0xe47   :  { %v2266_v15 = vsub.f32 %v2258_v12, %v2264_v14 }
 0xe49   :  { %v2269_v16 = vmul.f32 1.442695, %v2266_v15 }
 0xe4a   :  { %v2358_v17 = vpop.permute.xlu1 %2357 }
 0xe4b   :  { %14869 = vpow2.f32 %v2269_v16  ;;  %13811 = vmatpush3.msra.mxu0 %v2358_v17 }
 0xe4c   :  { %14871 = vrcp.f32 %v2273_v20  ;;  %13815 = vmatprep.subr.mxu0 %v2433_v26 }
 0xe55   :  { %v14870_v18 = vpop.eup %14869 }
 0xe56   :  { %v2274_v19 = vsel %vm841_vm6, %v14870_v18, 0.0  ;;  %v14872_v22 = vpop.eup %14871 }
 0xe57   :  { %2275 = vadd.xlane.f32.xlu0 %v2274_v19  ;;  %v2279_v23 = vmul.f32 %v14872_v22, %v14868_v6 }
 0xe6d   :  { %2281 = vrot.lane.b32.xlu0 %v16559_v51, %s16025_s1 }
 0xee4   :  { %v2276_v21 = vpop.xlane.xlu0 %2275 }
 0xee5   :  { %14873 = vrcp.f32 %v2276_v21  ;;  %v13101_v21 = vld [vmem:[#allocation37] ss:$0 sm:$0xff] }
 0xee8   :  { %v2282_v49 = vpop.permute.xlu0 %2281 }
 0xee9   :  { %13806 = vmatpush3.msra.mxu1 %v2282_v49 }
 0xeea   :  { %13808 = vmatmul.mubr.msk.f32.vlgmr.msra.gmra.mrb[20].mxu1 %vm841_vm6, %v2279_v23  ;;  %14526 = vmatprep.subr.bf16.mxu1 %v14525_v53 }
 0xeeb   :  { %14528 = vmatpush3.bf16.msra.mxu1 %v14525_v53 }
 0xeec   :  { %14530 = vmatprep.subr.bf16.mxu1 %v14529_v55 }
 0xeef   :  { %v14874_v24 = vpop.eup %14873  ;;  %14532 = vmatpush3.bf16.msra.mxu1 %v14529_v55 }
 0xef0   :  { %v2280_v25 = vmul.f32 %v14874_v24, %v14870_v18 }
 0xef2   :  { %13813 = vmatmul.mubr.msk.f32.vlgmr.msra.gmra.mrb[12].mxu0 %vm841_vm6, %v2280_v25 }
 0xef3   :  { %13816 = vmatpush3.msra.mxu0 %v2433_v26  ;;  %v13102_v26 = vld [vmem:[#allocation35] ss:$0 sm:$0xff] }
 0xef4   :  { %14534 = vmatprep.subr.bf16.mxu0 %v14533_v59 }
 0xfbd   :  { %v2353_v27 = vpop.f32.mrb[20].mxu1 }
 0xfbe   :  { %v13809_v28 = vpop.f32.mrb[21].mxu1  ;;  %13817 = vmatprep.mubr.msk.f32.mxu0 %vm841_vm6, %v2353_v27 }
 0xfc5   :  { %v2429_v51 = vpop.f32.mrb[12].mxu0 }
 0xfc6   :  { %v13814_v29 = vpop.f32.mrb[13].mxu0  ;;  %13818 = vmatmul.mubr.msk.f32.vlgmr.msra.gmra.mrb[6].mxu0 %vm841_vm6, %v2429_v51 }
 0xfc7   :  { %14536 = vmatpush3.bf16.msra.mxu0 %v14533_v59  ;;  %v2686_v29 = vld [vmem:[%s18048_s25 + $0x30] sm:$0xff]  ;;  %v2837_v59 = vld [vmem:[%s16382_s9] sm:$0xff] }
 0xfc8   :  { %14538 = vmatprep.subr.bf16.mxu0 %v14537_v62  ;;  %v14549_v63 = vpack.c.bf16 %v2838_v60, %v2837_v59 }
 0xfca   :  { %14550 = vmatprep.subr.bf16.mxu1 %v14549_v63 }
 0xfcb   :  { %14540 = vmatpush3.bf16.msra.mxu0 %v14537_v62  ;;  %v2839_v62 = vld [vmem:[%s16382_s9 + $0x10] sm:$0xff]  ;;  %s18049_s9 = sld [smem:[#allocation126_spill]] }
 0xfcc   :  { %14542 = vmatprep.subr.bf16.mxu0 %v14541_v3 }
 0xfcf   :  { %14544 = vmatpush3.bf16.msra.mxu0 %v14541_v3  ;;  %v14553_v3 = vpack.c.bf16 %v2840_v2, %v2839_v62 }
0x1099   :  { %v13819_v31 = vpop.f32.mrb[6].mxu0 }
0x109a   :  { %v2525_v32 = vadd.f32 %v13819_v31, %v13100_v30  ;;  %v2506_v33 = vpop.f32.mrb[7].mxu0 }
0x109b   :  { %v2524_v35 = vadd.f32 %v13100_v30, %v2506_v33  ;;  %v2687_v30 = vld [vmem:[%s18048_s25 + $0x38] sm:$0xff]  ;;  %s18067_s25 = sld [smem:[#allocation89_spill]] }
0x109c   :  { %v16732_v36 = vadd.f32 %v2525_v32, %v16535_v1  ;;  %v14545_v31 = vpack.c.bf16 %v2687_v30, %v2686_v29  ;;  %v13103_v32 = vld [vmem:[#allocation26] ss:$0 sm:$0xff]  ;;  %v13111_v29 = vld [vmem:[#allocation43] ss:$0 sm:$0xff] }
0x109d   :  { %v16735_v37 = vadd.f32 %v2524_v35, %v16532_v0 }
0x109e   :  { %v2531_v38 = vsel %vm683_vm0, %v16732_v36, 0.0  ;;  %14546 = vmatprep.subr.bf16.mxu0 %v14545_v31 }
0x109f   :  { %2532 = vadd.xlane.f32.xlu0 %v2531_v38  ;;  %v2528_v39 = vsel %vm683_vm0, %v16735_v37, 0.0  ;;  %14548 = vmatpush3.bf16.msra.mxu0 %v14545_v31 }
0x10a0   :  { %2529 = vadd.xlane.f32.xlu1 %v2528_v39  ;;  %13871 = vmatprep.subr.mxu0 %v16012_v46 }
0x112c   :  { %v2533_v40 = vpop.xlane.xlu0 %2532 }
0x112d   :  { %v2535_v42 = vmul.f32 0.03125, %v2533_v40  ;;  %v2530_v43 = vpop.xlane.xlu1 %2529 }
0x112e   :  { %v2534_v1 = vmul.f32 0.03125, %v2530_v43  ;;  %v13106_v43 = vld [vmem:[#allocation28] ss:$0 sm:$0xff] }
0x112f   :  { %v2537_v44 = vsub.f32 %v16732_v36, %v2535_v42 }
0x1130   :  { %v2536_v0 = vsub.f32 %v16735_v37, %v2534_v1 }
0x1131   :  { %v2539_v45 = vmul.f32 %v2537_v44, %v2537_v44  ;;  %v2570_v22 = vmul.f32 %v13101_v21, %v2537_v44 }
0x1132   :  { %v2538_v47 = vmul.f32 %v2536_v0, %v2536_v0  ;;  %v2569_v23 = vmul.f32 %v13101_v21, %v2536_v0  ;;  %v13109_v21 = vld [vmem:[#allocation46] ss:$0 sm:$0xff] }
0x1133   :  { %v2543_v48 = vsel %vm683_vm0, %v2539_v45, 0.0 }
0x1134   :  { %2544 = vadd.xlane.f32.xlu1 %v2543_v48  ;;  %v2540_v41 = vsel %vm683_vm0, %v2538_v47, 0.0 }
0x1135   :  { %2541 = vadd.xlane.f32.xlu0 %v2540_v41 }
0x11c1   :  { %v2545_v4 = vpop.xlane.xlu1 %2544 }
0x11c2   :  { %v2547_v5 = vmul.f32 0.032258064, %v2545_v4  ;;  %v2542_v6 = vpop.xlane.xlu0 %2541 }
0x11c3   :  { %v2546_v7 = vmul.f32 0.032258064, %v2542_v6 }
0x11c4   :  { %14875 = vrsqrt.f32 %v2547_v5  ;;  %vm2557_vm11 = vcmp.eq.f32.partialorder %v2547_v5, inf  ;;  %v2560_v12 = vand.u32 2147483648, %v2547_v5  ;;  %vm2559_vm12 = vcmp.eq.f32.partialorder %v2547_v5, 0.0 }
0x11c5   :  { %14877 = vrsqrt.f32 %v2546_v7  ;;  %vm2550_vm13 = vcmp.eq.f32.partialorder %v2546_v7, inf  ;;  %v2553_v15 = vand.u32 2147483648, %v2546_v7  ;;  %vm2552_vm14 = vcmp.eq.f32.partialorder %v2546_v7, 0.0 }
0x11ce   :  { %v14876_v9 = vpop.eup %14875 }
0x11cf   :  { %v14878_v10 = vpop.eup %14877  ;;  %v2556_v11 = vmul.f32 %v14876_v9, %v2547_v5 }
0x11d0   :  { %v2549_v13 = vmul.f32 %v14878_v10, %v2546_v7 }
0x11d1   :  { %v2558_v14 = vsel %vm2557_vm11, %v2547_v5, %v2556_v11 }
0x11d2   :  { %v2561_v16 = vsel %vm2559_vm12, %v2560_v12, %v2558_v14  ;;  %v2551_v17 = vsel %vm2550_vm13, %v2546_v7, %v2549_v13 }
0x11d3   :  { %v2572_v18 = vadd.f32 1e-06, %v2561_v16  ;;  %v2554_v19 = vsel %vm2552_vm14, %v2553_v15, %v2551_v17 }
0x11d4   :  { %v2571_v20 = vadd.f32 1e-06, %v2554_v19 }
0x11d5   :  { %14879 = vrcp.f32 %v2572_v18 }
0x11d6   :  { %14881 = vrcp.f32 %v2571_v20 }
0x11df   :  { %v14880_v49 = vpop.eup %14879 }
0x11e0   :  { %v14882_v24 = vpop.eup %14881  ;;  %v2576_v25 = vmul.f32 %v14880_v49, %v2570_v22 }
0x11e1   :  { %v2574_v27 = vmul.f32 %v14882_v24, %v2569_v23 }
0x11e2   :  { %v2585_v51 = vadd.f32 %v13102_v26, %v2576_v25 }
0x11e3   :  { %v2584_v28 = vadd.f32 %v13102_v26, %v2574_v27  ;;  %v13110_v26 = vld [vmem:[#allocation44] ss:$0 sm:$0xff] }
0x11e5   :  { %13828 = vmatprep.mubr.msk.f32.mxu1 %vm683_vm0, %v2584_v28 }
0x11e6   :  { %13829 = vmatmul.mubr.msk.f32.vlgmr.msra.gmra.mrb[22].mxu1 %vm683_vm0, %v2585_v51 }
0x11e7   :  { %14552 = vmatpush3.bf16.msra.mxu1 %v14549_v63 }
0x11e8   :  { %14554 = vmatprep.subr.bf16.mxu1 %v14553_v3 }
0x11eb   :  { %14556 = vmatpush3.bf16.msra.mxu1 %v14553_v3 }
0x11ec   :  { %13861 = vmatprep.subr.mxu1 %v16012_v46 }
0x12b9   :  { %v13830_v33 = vpop.f32.mrb[22].mxu1 }
0x12ba   :  { %v2675_v35 = vadd.f32 %v13830_v33, %v13103_v32  ;;  %v2669_v38 = vpop.f32.mrb[23].mxu1 }
0x12bb   :  { %v2670_v39 = vadd.f32 %v13103_v32, %v2669_v38 }
0x12bc   :  { %v2679_v42 = vmax.f32 %v2675_v35, 0.0 }
0x12bd   :  { %v2678_v40 = vmax.f32 %v2670_v39, 0.0 }
0x12bf   :  { %13847 = vmatprep.mubr.msk.f32.mxu0 %vm2695_vm15, %v2678_v40 }
0x12c0   :  { %13848 = vmatmul.mubr.msk.f32.vlgmr.msra.gmra.mrb[14].mxu0 %vm2695_vm15, %v2679_v42 }
0x12c1   :  { %13873 = vmatprep.mubr.msk.f32.mxu0 %vm16013_vm5, %v16012_v46 }
0x1393   :  { %v13849_v1 = vpop.f32.mrb[14].mxu0 }
0x1394   :  { %v2774_v44 = vadd.f32 %v13849_v1, %v13106_v43  ;;  %v2768_v0 = vpop.f32.mrb[15].mxu0 }
0x1395   :  { %v2769_v45 = vadd.f32 %v13106_v43, %v2768_v0 }
0x1396   :  { %v16765_v47 = vadd.f32 %v2774_v44, %v16732_v36 }
0x1397   :  { %v16768_v48 = vadd.f32 %v2769_v45, %v16735_v37 }
0x1398   :  { %v2782_v41 = vsel %vm683_vm0, %v16765_v47, 0.0 }
0x1399   :  { %2783 = vadd.xlane.f32.xlu1 %v2782_v41  ;;  %v2779_v50 = vsel %vm683_vm0, %v16768_v48, 0.0 }
0x139a   :  { %2780 = vadd.xlane.f32.xlu0 %v2779_v50 }
0x1426   :  { %v2784_v52 = vpop.xlane.xlu1 %2783 }
0x1427   :  { %v2786_v34 = vmul.f32 0.03125, %v2784_v52  ;;  %v2781_v53 = vpop.xlane.xlu0 %2780 }
0x1428   :  { %v2785_v36 = vmul.f32 0.03125, %v2781_v53 }
0x1429   :  { %v2788_v54 = vsub.f32 %v16765_v47, %v2786_v34 }
0x142a   :  { %v2787_v37 = vsub.f32 %v16768_v48, %v2785_v36 }
0x142b   :  { %v2790_v55 = vmul.f32 %v2788_v54, %v2788_v54  ;;  %v2821_v22 = vmul.f32 %v13109_v21, %v2788_v54 }
0x142c   :  { %v2789_v56 = vmul.f32 %v2787_v37, %v2787_v37  ;;  %v2820_v23 = vmul.f32 %v13109_v21, %v2787_v37 }
0x142d   :  { %v2794_v57 = vsel %vm683_vm0, %v2790_v55, 0.0 }
0x142e   :  { %2795 = vadd.xlane.f32.xlu1 %v2794_v57  ;;  %v2791_v58 = vsel %vm683_vm0, %v2789_v56, 0.0 }
0x142f   :  { %2792 = vadd.xlane.f32.xlu0 %v2791_v58 }
0x14bb   :  { %v2796_v4 = vpop.xlane.xlu1 %2795 }
0x14bc   :  { %v2798_v5 = vmul.f32 0.032258064, %v2796_v4  ;;  %v2793_v6 = vpop.xlane.xlu0 %2792 }
0x14bd   :  { %v2797_v7 = vmul.f32 0.032258064, %v2793_v6 }
0x14be   :  { %14883 = vrsqrt.f32 %v2798_v5  ;;  %vm2808_vm1 = vcmp.eq.f32.partialorder %v2798_v5, inf  ;;  %v2811_v12 = vand.u32 2147483648, %v2798_v5  ;;  %vm2810_vm2 = vcmp.eq.f32.partialorder %v2798_v5, 0.0 }
0x14bf   :  { %14885 = vrsqrt.f32 %v2797_v7  ;;  %vm2801_vm3 = vcmp.eq.f32.partialorder %v2797_v7, inf  ;;  %v2804_v15 = vand.u32 2147483648, %v2797_v7  ;;  %vm2803_vm4 = vcmp.eq.f32.partialorder %v2797_v7, 0.0 }
0x14c8   :  { %v14884_v9 = vpop.eup %14883 }
0x14c9   :  { %v14886_v10 = vpop.eup %14885  ;;  %v2807_v11 = vmul.f32 %v14884_v9, %v2798_v5 }
0x14ca   :  { %v2800_v13 = vmul.f32 %v14886_v10, %v2797_v7 }
0x14cb   :  { %v2809_v14 = vsel %vm2808_vm1, %v2798_v5, %v2807_v11 }
0x14cc   :  { %v2812_v16 = vsel %vm2810_vm2, %v2811_v12, %v2809_v14  ;;  %v2802_v17 = vsel %vm2801_vm3, %v2797_v7, %v2800_v13 }
0x14cd   :  { %v2823_v18 = vadd.f32 1e-06, %v2812_v16  ;;  %v2805_v19 = vsel %vm2803_vm4, %v2804_v15, %v2802_v17 }
0x14ce   :  { %v2822_v20 = vadd.f32 1e-06, %v2805_v19 }
0x14cf   :  { %14887 = vrcp.f32 %v2823_v18 }
0x14d0   :  { %14889 = vrcp.f32 %v2822_v20 }
0x14d9   :  { %v14888_v49 = vpop.eup %14887 }
0x14da   :  { %v14890_v24 = vpop.eup %14889  ;;  %v2827_v25 = vmul.f32 %v14888_v49, %v2821_v22 }
0x14db   :  { %v2825_v27 = vmul.f32 %v14890_v24, %v2820_v23 }
0x14dc   :  { %v2836_v51 = vadd.f32 %v13110_v26, %v2827_v25 }
0x14dd   :  { %v2835_v28 = vadd.f32 %v13110_v26, %v2825_v27 }
0x14df   :  { %13858 = vmatprep.mubr.msk.f32.mxu1 %vm683_vm0, %v2835_v28 }
0x14e0   :  { %13859 = vmatmul.mubr.msk.f32.vlgmr.msra.gmra.mrb[24].mxu1 %vm683_vm0, %v2836_v51 }
0x14e1   :  { %13863 = vmatprep.mubr.msk.f32.mxu1 %vm16013_vm5, %v16012_v46 }
0x15b3   :  { %v13860_v30 = vpop.f32.mrb[24].mxu1 }
0x15b4   :  { %v16787_v31 = vadd.f32 %v13860_v30, %v13111_v29  ;;  %v2920_v32 = vpop.f32.mrb[25].mxu1 }
0x15b5   :  { %v16789_v33 = vadd.f32 %v13111_v29, %v2920_v32 }
0x15b6   :  { %3007 = vrot.lane.b32.xlu1 %v16787_v31, %s16014_s24 }
0x15b7   :  { %2930 = vrot.lane.b32.xlu0 %v16789_v33, %s16014_s24 }
0x1628   :  { %v3008_v38 = vpop.permute.xlu1 %3007 }
0x1629   :  { %v2931_v35 = vpop.permute.xlu0 %2930 }
0x162a   :  { %13862 = vmatpush3.xpose.msk.msra.mxu1 %vm841_vm6, %v2931_v35 }
0x162b   :  { %13866 = vmatprep.subr.mxu1 %v16012_v46 }
0x162d   :  { %13864 = vmatmul.mubr.msk.f32.vlgmr.msra.gmra.mrb[26].mxu1 %vm841_vm6, %v16789_v33 }
0x162e   :  { %13867 = vmatpush3.xpose.msk.msra.mxu1 %vm841_vm6, %v3008_v38  ;;  %13868 = vmatprep.mubr.msk.f32.mxu1 %vm16013_vm5, %v16012_v46 }
0x162f   :  { %13876 = vmatprep.subr.mxu1 %v16012_v46 }
0x1631   :  { %13869 = vmatmul.mubr.msk.f32.vlgmr.msra.gmra.mrb[28].mxu1 %vm841_vm6, %v16787_v31 }
0x1632   :  { %13878 = vmatprep.mubr.msk.f32.mxu1 %vm16013_vm5, %v16012_v46 }
0x1700   :  { %v3002_v39 = vpop.f32.mrb[26].mxu1 }
0x1701   :  { %v13865_v40 = vpop.f32.mrb[27].mxu1  ;;  %v3083_v45 = vmul.f32 0.35355338, %v3002_v39 }
0x1703   :  { %v3085_v41 = vsel %vm1005_vm10, -1e+09, %v3083_v45 }
0x1704   :  { %v3079_v42 = vpop.f32.mrb[28].mxu1  ;;  %v3087_v50 = vsel %vm841_vm6, %v3085_v41, -inf }
0x1705   :  { %v3084_v43 = vmul.f32 0.35355338, %v3079_v42  ;;  %v13870_v1 = vpop.f32.mrb[29].mxu1 }
0x1707   :  { %v3086_v44 = vsel %vm1006_vm8, -1e+09, %v3084_v43 }
0x1708   :  { %v3090_v0 = vsel %vm841_vm6, %v3086_v44, -inf }
0x1709   :  { %3091 = vmax.xlane.f32.xlu1 %v3090_v0 }
0x171a   :  { %3342 = vrot.lane.b32.xlu1 %v16787_v31, %s16016_s13 }
0x171e   :  { %3340 = vrot.lane.b32.xlu1 %v16787_v31, %s16017_s21 }
0x1742   :  { %3088 = vmax.xlane.f32.xlu1 %v3087_v50 }
0x1753   :  { %3264 = vrot.lane.b32.xlu1 %v16789_v33, %s16016_s13 }
0x1757   :  { %3262 = vrot.lane.b32.xlu1 %v16789_v33, %s16017_s21 }
0x175b   :  { %3761 = vrot.lane.b32.xlu1 %v16789_v33, %s16018_s27 }
0x1796   :  { %v3092_v52 = vpop.xlane.xlu1 %3091 }
0x1797   :  { %v3094_v34 = vsub.f32 %v3086_v44, %v3092_v52 }
0x1799   :  { %v3097_v53 = vmul.f32 1.442695, %v3094_v34 }
0x179a   :  { %v3343_v37 = vpop.permute.xlu1 %3342 }
0x179b   :  { %14891 = vpow2.f32 %v3097_v53 }
0x179e   :  { %v3341_v55 = vpop.permute.xlu1 %3340 }
0x17a5   :  { %v14892_v36 = vpop.eup %14891 }
0x17a6   :  { %v3102_v54 = vsel %vm841_vm6, %v14892_v36, 0.0 }
0x17a7   :  { %3103 = vadd.xlane.f32.xlu0 %v3102_v54 }
0x17bd   :  { %3185 = vrot.lane.b32.xlu0 %v16787_v31, %s16019_s23 }
0x17cf   :  { %v3089_v56 = vpop.xlane.xlu1 %3088 }
0x17d0   :  { %v3093_v57 = vsub.f32 %v3085_v41, %v3089_v56 }
0x17d2   :  { %v3095_v58 = vmul.f32 1.442695, %v3093_v57 }
0x17d3   :  { %v3265_v7 = vpop.permute.xlu1 %3264 }
0x17d4   :  { %14893 = vpow2.f32 %v3095_v58 }
0x17d7   :  { %v3263_v10 = vpop.permute.xlu1 %3262 }
0x17db   :  { %v3762_v29 = vpop.permute.xlu1 %3761 }
0x17de   :  { %v14894_v59 = vpop.eup %14893 }
0x17df   :  { %v3099_v60 = vsel %vm841_vm6, %v14894_v59, 0.0 }
0x17e0   :  { %3100 = vadd.xlane.f32.xlu0 %v3099_v60 }
0x17f6   :  { %3109 = vrot.lane.b32.xlu0 %v16789_v33, %s16019_s23 }
0x1834   :  { %v3104_v62 = vpop.xlane.xlu0 %3103 }
0x1835   :  { %14895 = vrcp.f32 %v3104_v62 }
0x1838   :  { %v3186_v63 = vpop.permute.xlu0 %3185 }
0x1839   :  { %13877 = vmatpush3.msra.mxu1 %v3186_v63 }
0x183a   :  { %13886 = vmatprep.subr.mxu1 %v16012_v46 }
0x183f   :  { %v14896_v2 = vpop.eup %14895 }
0x1840   :  { %v3108_v3 = vmul.f32 %v14896_v2, %v14892_v36  ;;  %v3596_v2 = vld [vmem:[%s18049_s9 + $0x8] sm:$0xff] }
0x1842   :  { %13879 = vmatmul.mubr.msk.f32.vlgmr.msra.gmra.mrb[30].mxu1 %vm841_vm6, %v3108_v3  ;;  %v3261_v3 = vld [vmem:[%s18049_s9] sm:$0xff] }
0x1843   :  { %13887 = vmatpush3.xpose.msk.msra.mxu1 %vm841_vm6, %v3343_v37  ;;  %13888 = vmatprep.mubr.msk.f32.mxu1 %vm16013_vm5, %v16012_v46 }
0x1844   :  { %13896 = vmatprep.subr.mxu1 %v16012_v46 }
0x1846   :  { %13889 = vmatmul.mubr.msk.f32.vlgmr.msra.gmra.mrb[32].mxu1 %vm841_vm6, %v3341_v55 }
0x1847   :  { %13898 = vmatprep.mubr.msk.f32.mxu1 %vm16013_vm5, %v16012_v46 }
0x186d   :  { %v3101_v4 = vpop.xlane.xlu0 %3100 }
0x186e   :  { %14897 = vrcp.f32 %v3101_v4 }
0x1871   :  { %v3110_v5 = vpop.permute.xlu0 %3109 }
0x1872   :  { %13872 = vmatpush3.msra.mxu0 %v3110_v5 }
0x1873   :  { %13881 = vmatprep.subr.mxu0 %v16012_v46 }
0x1878   :  { %v14898_v6 = vpop.eup %14897 }
0x1879   :  { %v3107_v9 = vmul.f32 %v14898_v6, %v14894_v59 }
0x187b   :  { %13874 = vmatmul.mubr.msk.f32.vlgmr.msra.gmra.mrb[16].mxu0 %vm841_vm6, %v3107_v9 }
0x187c   :  { %13882 = vmatpush3.xpose.msk.msra.mxu0 %vm841_vm6, %v3265_v7  ;;  %13883 = vmatprep.mubr.msk.f32.mxu0 %vm16013_vm5, %v16012_v46 }
0x187d   :  { %13891 = vmatprep.subr.mxu0 %v16012_v46 }
0x187f   :  { %13884 = vmatmul.mubr.msk.f32.vlgmr.msra.gmra.mrb[18].mxu0 %vm841_vm6, %v3263_v10 }
0x1880   :  { %13893 = vmatprep.mubr.msk.f32.mxu0 %vm16013_vm5, %v16012_v46 }
0x1915   :  { %v16847_v11 = vpop.f32.mrb[30].mxu1 }
0x1916   :  { %v13880_v12 = vpop.f32.mrb[31].mxu1 }
0x1919   :  { %v3414_v13 = vpop.f32.mrb[32].mxu1 }
0x191a   :  { %v3419_v14 = vmul.f32 0.35355338, %v3414_v13  ;;  %v13890_v15 = vpop.f32.mrb[33].mxu1 }
0x191c   :  { %v3421_v16 = vsel %vm1006_vm8, -1e+09, %v3419_v14 }
0x191d   :  { %v3425_v17 = vsel %vm841_vm6, %v3421_v16, -inf }
0x191e   :  { %3426 = vmax.xlane.f32.xlu0 %v3425_v17 }
0x1934   :  { %3520 = vrot.lane.b32.xlu0 %v16787_v31, %s16020_s5 }
0x1938   :  { %3759 = vrot.lane.b32.xlu0 %v16789_v33, %s16021_s8 }
0x193c   :  { %3837 = vrot.lane.b32.xlu0 %v16787_v31, %s16021_s8 }
0x194e   :  { %v16858_v18 = vpop.f32.mrb[16].mxu0 }
0x194f   :  { %v13875_v19 = vpop.f32.mrb[17].mxu0 }
0x1952   :  { %v3336_v20 = vpop.f32.mrb[18].mxu0 }
0x1953   :  { %v13885_v21 = vpop.f32.mrb[19].mxu0  ;;  %v3418_v27 = vmul.f32 0.35355338, %v3336_v20 }
0x1954   :  { %v4093_v21 = vld [vmem:[%s18049_s9 + $0x10] sm:$0xff] }
0x1955   :  { %v3420_v28 = vsel %vm1005_vm10, -1e+09, %v3418_v27 }
0x1956   :  { %v3422_v51 = vsel %vm841_vm6, %v3420_v28, -inf }
0x19ab   :  { %v3427_v22 = vpop.xlane.xlu0 %3426 }
0x19ac   :  { %v3429_v49 = vsub.f32 %v3421_v16, %v3427_v22 }
0x19ae   :  { %v3432_v23 = vmul.f32 1.442695, %v3429_v49 }
0x19af   :  { %v3521_v24 = vpop.permute.xlu0 %3520 }
0x19b0   :  { %14899 = vpow2.f32 %v3432_v23  ;;  %13897 = vmatpush3.msra.mxu1 %v3521_v24 }
0x19b1   :  { %13911 = vmatprep.subr.mxu1 %v16012_v46 }
0x19b3   :  { %v3760_v38 = vpop.permute.xlu0 %3759 }
0x19b7   :  { %v3838_v40 = vpop.permute.xlu0 %3837 }
0x19ba   :  { %v14900_v25 = vpop.eup %14899 }
0x19bb   :  { %v3437_v26 = vsel %vm841_vm6, %v14900_v25, 0.0 }
0x19bc   :  { %3438 = vadd.xlane.f32.xlu1 %v3437_v26 }
0x19cd   :  { %3839 = vrot.lane.b32.xlu1 %v16787_v31, %s16018_s27 }
0x19f1   :  { %3423 = vmax.xlane.f32.xlu1 %v3422_v51 }
0x1a49   :  { %v3439_v30 = vpop.xlane.xlu1 %3438 }
0x1a4a   :  { %14901 = vrcp.f32 %v3439_v30 }
0x1a4d   :  { %v3840_v39 = vpop.permute.xlu1 %3839 }
0x1a54   :  { %v14902_v32 = vpop.eup %14901 }
0x1a55   :  { %v3443_v35 = vmul.f32 %v14902_v32, %v14900_v25 }
0x1a57   :  { %13899 = vmatmul.mubr.msk.f32.vlgmr.msra.gmra.mrb[34].mxu1 %vm841_vm6, %v3443_v35 }
0x1a58   :  { %13912 = vmatpush3.xpose.msk.msra.mxu1 %vm841_vm6, %v3762_v29  ;;  %13913 = vmatprep.mubr.msk.f32.mxu1 %vm16013_vm5, %v16012_v46 }
0x1a59   :  { %13916 = vmatprep.subr.mxu1 %v16012_v46 }
0x1a5b   :  { %13914 = vmatmul.mubr.msk.f32.vlgmr.msra.gmra.mrb[36].mxu1 %vm841_vm6, %v3760_v38 }
0x1a5c   :  { %13917 = vmatpush3.xpose.msk.msra.mxu1 %vm841_vm6, %v3840_v39  ;;  %13918 = vmatprep.mubr.msk.f32.mxu1 %vm16013_vm5, %v16012_v46 }
0x1a5d   :  { %13926 = vmatprep.subr.mxu1 %v16012_v46 }
0x1a5f   :  { %13919 = vmatmul.mubr.msk.f32.vlgmr.msra.gmra.mrb[38].mxu1 %vm841_vm6, %v3838_v40 }
0x1a60   :  { %13928 = vmatprep.mubr.msk.f32.mxu1 %vm16013_vm5, %v16012_v46 }
0x1a7e   :  { %v3424_v42 = vpop.xlane.xlu1 %3423 }
0x1a7f   :  { %v3428_v43 = vsub.f32 %v3420_v28, %v3424_v42 }
0x1a81   :  { %v3430_v1 = vmul.f32 1.442695, %v3428_v43 }
0x1a83   :  { %14903 = vpow2.f32 %v3430_v1 }
0x1a8d   :  { %v14904_v44 = vpop.eup %14903 }
0x1a8e   :  { %v3434_v0 = vsel %vm841_vm6, %v14904_v44, 0.0 }
0x1a8f   :  { %3435 = vadd.xlane.f32.xlu0 %v3434_v0 }
0x1aa5   :  { %3444 = vrot.lane.b32.xlu0 %v16789_v33, %s16020_s5 }
0x1aa9   :  { %4017 = vrot.lane.b32.xlu0 %v16787_v31, %s16022_s26 }
0x1aad   :  { %4179 = vrot.lane.b32.xlu0 %v16789_v33, %s16023_s12 }
0x1ab1   :  { %4257 = vrot.lane.b32.xlu0 %v16787_v31, %s16023_s12 }
0x1ab5   :  { %4177 = vrot.lane.b32.xlu0 %v16789_v33, %s16024_s0 }
0x1b1c   :  { %v3436_v45 = vpop.xlane.xlu0 %3435 }
0x1b1d   :  { %14905 = vrcp.f32 %v3436_v45 }
0x1b20   :  { %v3445_v41 = vpop.permute.xlu0 %3444 }
0x1b21   :  { %13892 = vmatpush3.msra.mxu0 %v3445_v41 }
0x1b22   :  { %13901 = vmatprep.subr.mxu0 %v3596_v2 }
0x1b24   :  { %v4018_v50 = vpop.permute.xlu0 %4017 }
0x1b25   :  { %13927 = vmatpush3.msra.mxu1 %v4018_v50 }
0x1b26   :  { %13936 = vmatprep.subr.mxu1 %v16012_v46 }
0x1b27   :  { %v14906_v52 = vpop.eup %14905 }
0x1b28   :  { %v3442_v34 = vmul.f32 %v14906_v52, %v14904_v44  ;;  %v4180_v49 = vpop.permute.xlu0 %4179 }
0x1b2a   :  { %13894 = vmatmul.mubr.msk.f32.vlgmr.msra.gmra.mrb[20].mxu0 %vm841_vm6, %v3442_v34  ;;  %v3592_v53 = vpop.f32.mrb[34].mxu1 }
0x1b2b   :  { %v13900_v36 = vpop.f32.mrb[35].mxu1  ;;  %13902 = vmatpush3.msra.mxu0 %v3596_v2  ;;  %v4511_v2 = vld [vmem:[%s18049_s9 + $0x18] sm:$0xff]  ;;  %s18068_s9 = sld [smem:[#allocation94_spill]] }
0x1b2c   :  { %13906 = vmatprep.subr.mxu0 %v3261_v3  ;;  %v4258_v25 = vpop.permute.xlu0 %4257 }
0x1b2e   :  { %v3833_v54 = vpop.f32.mrb[36].mxu1 }
0x1b2f   :  { %v3915_v37 = vmul.f32 0.35355338, %v3833_v54  ;;  %v13915_v55 = vpop.f32.mrb[37].mxu1 }
0x1b30   :  { %v4178_v26 = vpop.permute.xlu0 %4177 }
0x1b31   :  { %v3917_v56 = vsel %vm1005_vm10, -1e+09, %v3915_v37 }
0x1b32   :  { %v3911_v57 = vpop.f32.mrb[38].mxu1  ;;  %v3919_v58 = vsel %vm841_vm6, %v3917_v56, -inf }
0x1b33   :  { %v3916_v59 = vmul.f32 0.35355338, %v3911_v57  ;;  %3920 = vmax.xlane.f32.xlu1 %v3919_v58  ;;  %v13920_v60 = vpop.f32.mrb[39].mxu1 }
0x1b35   :  { %v3918_v62 = vsel %vm1006_vm8, -1e+09, %v3916_v59 }
0x1b36   :  { %v3922_v63 = vsel %vm841_vm6, %v3918_v62, -inf }
0x1b37   :  { %3923 = vmax.xlane.f32.xlu1 %v3922_v63 }
0x1bc0   :  { %v3921_v4 = vpop.xlane.xlu1 %3920 }
0x1bc1   :  { %v3925_v5 = vsub.f32 %v3917_v56, %v3921_v4 }
0x1bc3   :  { %v3927_v6 = vmul.f32 1.442695, %v3925_v5 }
0x1bc4   :  { %v3924_v7 = vpop.xlane.xlu1 %3923 }
0x1bc5   :  { %14907 = vpow2.f32 %v3927_v6  ;;  %v3926_v9 = vsub.f32 %v3918_v62, %v3924_v7  ;;  %v13146_v6 = vld [vmem:[#allocation41] ss:$0 sm:$0xff] }
0x1bc7   :  { %v3929_v10 = vmul.f32 1.442695, %v3926_v9 }
0x1bc9   :  { %14909 = vpow2.f32 %v3929_v10 }
0x1bcf   :  { %v14908_v12 = vpop.eup %14907 }
0x1bd0   :  { %v3931_v13 = vsel %vm841_vm6, %v14908_v12, 0.0 }
0x1bd1   :  { %3932 = vadd.xlane.f32.xlu1 %v3931_v13 }
0x1bd3   :  { %v14910_v14 = vpop.eup %14909 }
0x1bd4   :  { %v3934_v15 = vsel %vm841_vm6, %v14910_v14, 0.0 }
0x1bd5   :  { %3935 = vadd.xlane.f32.xlu1 %v3934_v15  ;;  %v16960_v15 = vld [vmem:[%s18050_s2] sm:$0xff] }
0x1be6   :  { %3941 = vrot.lane.b32.xlu1 %v16789_v33, %s16022_s26 }
0x1bea   :  { %4255 = vrot.lane.b32.xlu1 %v16787_v31, %s16024_s0 }
0x1bfd   :  { %v3516_v16 = vpop.f32.mrb[20].mxu0 }
0x1bfe   :  { %v13895_v17 = vpop.f32.mrb[21].mxu0  ;;  %13903 = vmatprep.mubr.msk.f32.mxu0 %vm841_vm6, %v3516_v16 }
0x1bff   :  { %13904 = vmatmul.mubr.msk.f32.vlgmr.msra.gmra.mrb[22].mxu0 %vm841_vm6, %v3592_v53  ;;  %v16965_v17 = vld [vmem:[%s18050_s2 + $0x8] sm:$0xff]  ;;  %s18069_s2 = sld [smem:[#allocation95_spill]] }
0x1c00   :  { %13908 = vmatprep.mubr.msk.f32.mxu0 %vm841_vm6, %v16858_v18  ;;  %13907 = vmatpush3.msra.mxu0 %v3261_v3 }
0x1c01   :  { %13921 = vmatprep.subr.mxu0 %v16012_v46 }
0x1c07   :  { %13909 = vmatmul.mubr.msk.f32.vlgmr.msra.gmra.mrb[22].mxu0 %vm841_vm6, %v16847_v11 }
0x1c08   :  { %13923 = vmatprep.mubr.msk.f32.mxu0 %vm16013_vm5, %v16012_v46 }
0x1c5e   :  { %v3933_v19 = vpop.xlane.xlu1 %3932 }
0x1c5f   :  { %14911 = vrcp.f32 %v3933_v19 }
0x1c62   :  { %v3936_v20 = vpop.xlane.xlu1 %3935 }
0x1c63   :  { %14913 = vrcp.f32 %v3936_v20  ;;  %v4914_v20 = vsel %vm683_vm0, %v16960_v15, 0.0 }
0x1c66   :  { %v3942_v22 = vpop.permute.xlu1 %3941 }
0x1c67   :  { %13922 = vmatpush3.msra.mxu0 %v3942_v22 }
0x1c68   :  { %13931 = vmatprep.subr.mxu0 %v4093_v21 }
0x1c69   :  { %v14912_v23 = vpop.eup %14911 }
0x1c6a   :  { %v3939_v18 = vmul.f32 %v14912_v23, %v14908_v12  ;;  %v4256_v30 = vpop.permute.xlu1 %4255 }
0x1c6c   :  { %13924 = vmatmul.mubr.msk.f32.vlgmr.msra.gmra.mrb[24].mxu0 %vm841_vm6, %v3939_v18 }
0x1c6d   :  { %v14914_v24 = vpop.eup %14913  ;;  %13932 = vmatpush3.msra.mxu0 %v4093_v21 }
0x1c6e   :  { %v3940_v11 = vmul.f32 %v14914_v24, %v14910_v14  ;;  %13941 = vmatprep.subr.mxu0 %v16012_v46 }
0x1c70   :  { %13929 = vmatmul.mubr.msk.f32.vlgmr.msra.gmra.mrb[40].mxu1 %vm841_vm6, %v3940_v11 }
0x1c71   :  { %13937 = vmatpush3.xpose.msk.msra.mxu1 %vm841_vm6, %v4180_v49  ;;  %13938 = vmatprep.mubr.msk.f32.mxu1 %vm16013_vm5, %v16012_v46 }
0x1c72   :  { %13946 = vmatprep.subr.mxu1 %v16012_v46 }
0x1c74   :  { %13939 = vmatmul.mubr.msk.f32.vlgmr.msra.gmra.mrb[42].mxu1 %vm841_vm6, %v4178_v26 }
0x1c75   :  { %13948 = vmatprep.mubr.msk.f32.mxu1 %vm16013_vm5, %v16012_v46 }
0x1d3f   :  { %v4013_v27 = vpop.f32.mrb[24].mxu0 }
0x1d40   :  { %v13925_v28 = vpop.f32.mrb[25].mxu0  ;;  %13933 = vmatprep.mubr.msk.f32.mxu0 %vm841_vm6, %v4013_v27 }
0x1d43   :  { %v4089_v51 = vpop.f32.mrb[40].mxu1 }
0x1d44   :  { %v13930_v29 = vpop.f32.mrb[41].mxu1  ;;  %13934 = vmatmul.mubr.msk.f32.vlgmr.msra.gmra.mrb[22].mxu0 %vm841_vm6, %v4089_v51 }
0x1d45   :  { %13942 = vmatpush3.xpose.msk.msra.mxu0 %vm841_vm6, %v4258_v25  ;;  %13943 = vmatprep.mubr.msk.f32.mxu0 %vm16013_vm5, %v16012_v46 }
0x1d46   :  { %13951 = vmatprep.subr.mxu0 %v16012_v46 }
0x1d47   :  { %v4251_v32 = vpop.f32.mrb[42].mxu1 }
0x1d48   :  { %v4333_v35 = vmul.f32 0.35355338, %v4251_v32  ;;  %v13940_v38 = vpop.f32.mrb[43].mxu1  ;;  %13944 = vmatmul.mubr.msk.f32.vlgmr.msra.gmra.mrb[26].mxu0 %vm841_vm6, %v4256_v30 }
0x1d49   :  { %13953 = vmatprep.mubr.msk.f32.mxu0 %vm16013_vm5, %v16012_v46 }
0x1d4a   :  { %v4335_v39 = vsel %vm1005_vm10, -1e+09, %v4333_v35 }
0x1d4b   :  { %v4337_v40 = vsel %vm841_vm6, %v4335_v39, -inf }
0x1d4c   :  { %4338 = vmax.xlane.f32.xlu0 %v4337_v40 }
0x1dd9   :  { %v4339_v42 = vpop.xlane.xlu0 %4338 }
0x1dda   :  { %v4343_v43 = vsub.f32 %v4335_v39, %v4339_v42  ;;  %v4664_v42 = vld [vmem:[%s18051_s3] sm:$0xff] }
0x1ddc   :  { %v4345_v1 = vmul.f32 1.442695, %v4343_v43  ;;  %v4665_v43 = vld [vmem:[%s18051_s3 + $0x8] sm:$0xff] }
0x1dde   :  { %14915 = vpow2.f32 %v4345_v1  ;;  %v4666_v1 = vld [vmem:[%s18051_s3 + $0x10] sm:$0xff] }
0x1de8   :  { %v14916_v44 = vpop.eup %14915 }
0x1de9   :  { %v4349_v0 = vsel %vm841_vm6, %v14916_v44, 0.0 }
0x1dea   :  { %4350 = vadd.xlane.f32.xlu0 %v4349_v0  ;;  %v4667_v0 = vld [vmem:[%s18051_s3 + $0x18] sm:$0xff]  ;;  %s18070_s3 = sld [smem:[#allocation83_spill]] }
0x1e1b   :  { %v4329_v45 = vpop.f32.mrb[26].mxu0 }
0x1e1c   :  { %v4334_v41 = vmul.f32 0.35355338, %v4329_v45  ;;  %v13945_v50 = vpop.f32.mrb[27].mxu0  ;;  %v14561_v45 = vpack.c.bf16 %v4667_v0, %v4666_v1  ;;  %v13157_v1 = vld [vmem:[%s18054_s7] ss:$0 sm:$0xff]  ;;  %s18073_s7 = sld [smem:[#allocation77_spill]] }
0x1e1d   :  { %v4973_v50 = vld [vmem:[%s18052_s29 + $0x8] sm:$0xff]  ;;  %v13148_v0 = vld [vmem:[#allocation47] ss:$0 sm:$0xff] }
0x1e1e   :  { %v4336_v52 = vsel %vm1006_vm8, -1e+09, %v4334_v41  ;;  %v4972_v41 = vld [vmem:[%s18052_s29] sm:$0xff] }
0x1e1f   :  { %v4340_v34 = vsel %vm841_vm6, %v4336_v52, -inf }
0x1e20   :  { %4341 = vmax.xlane.f32.xlu1 %v4340_v34  ;;  %v4758_v34 = vld [vmem:[%s18053_s19] sm:$0xff] }
0x1e31   :  { %4435 = vrot.lane.b32.xlu1 %v16787_v31, %s16025_s1 }
0x1e77   :  { %v4351_v57 = vpop.xlane.xlu0 %4350 }
0x1ead   :  { %v4342_v53 = vpop.xlane.xlu1 %4341 }
0x1eae   :  { %v4344_v36 = vsub.f32 %v4336_v52, %v4342_v53  ;;  %v17003_v52 = vpack.c.bf16 %v4973_v50, %v4972_v41  ;;  %v4759_v53 = vld [vmem:[%s18053_s19 + $0x8] sm:$0xff]  ;;  %v4974_v41 = vld [vmem:[%s18052_s29 + $0x10] sm:$0xff]  ;;  %v4975_v50 = vld [vmem:[%s18052_s29 + $0x18] sm:$0xff]  ;;  %s18071_s29 = sld [smem:[#allocation82_spill]] }
0x1eb0   :  { %v4347_v54 = vmul.f32 1.442695, %v4344_v36  ;;  %v4760_v36 = vld [vmem:[%s18053_s19 + $0x10] sm:$0xff] }
0x1eb1   :  { %v4436_v37 = vpop.permute.xlu1 %4435 }
0x1eb2   :  { %14917 = vpow2.f32 %v4347_v54  ;;  %13952 = vmatpush3.msra.mxu0 %v4436_v37  ;;  %v14565_v54 = vpack.c.bf16 %v4759_v53, %v4758_v34  ;;  %v4761_v37 = vld [vmem:[%s18053_s19 + $0x18] sm:$0xff] }
0x1eb3   :  { %14919 = vrcp.f32 %v4351_v57  ;;  %13956 = vmatprep.subr.mxu0 %v4511_v2  ;;  %v4763_v57 = vld [vmem:[%s18053_s19 + $0x28] sm:$0xff] }
0x1ebc   :  { %v14918_v55 = vpop.eup %14917 }
0x1ebd   :  { %v4352_v56 = vsel %vm841_vm6, %v14918_v55, 0.0  ;;  %v14920_v59 = vpop.eup %14919 }
0x1ebe   :  { %4353 = vadd.xlane.f32.xlu0 %v4352_v56  ;;  %v4357_v60 = vmul.f32 %v14920_v59, %v14916_v44  ;;  %v14557_v44 = vpack.c.bf16 %v4665_v43, %v4664_v42  ;;  %v4762_v56 = vld [vmem:[%s18053_s19 + $0x20] sm:$0xff] }
0x1ed4   :  { %4359 = vrot.lane.b32.xlu0 %v16789_v33, %s16025_s1 }
0x1f4b   :  { %v4354_v58 = vpop.xlane.xlu0 %4353 }
0x1f4c   :  { %14921 = vrcp.f32 %v4354_v58  ;;  %v14573_v58 = vpack.c.bf16 %v4763_v57, %v4762_v56 }
0x1f4f   :  { %v4360_v31 = vpop.permute.xlu0 %4359 }
0x1f50   :  { %13947 = vmatpush3.msra.mxu1 %v4360_v31 }
0x1f51   :  { %13949 = vmatmul.mubr.msk.f32.vlgmr.msra.gmra.mrb[44].mxu1 %vm841_vm6, %v4357_v60  ;;  %14558 = vmatprep.subr.bf16.mxu1 %v14557_v44 }
0x1f52   :  { %14560 = vmatpush3.bf16.msra.mxu1 %v14557_v44 }
0x1f53   :  { %14562 = vmatprep.subr.bf16.mxu1 %v14561_v45 }
0x1f56   :  { %v14922_v62 = vpop.eup %14921  ;;  %14564 = vmatpush3.bf16.msra.mxu1 %v14561_v45 }
0x1f57   :  { %v4358_v63 = vmul.f32 %v14922_v62, %v14918_v55  ;;  %14582 = vmatprep.subr.bf16.mxu1 %v17003_v52  ;;  %v14569_v55 = vpack.c.bf16 %v4761_v37, %v4760_v36  ;;  %v14585_v37 = vpack.c.bf16 %v4975_v50, %v4974_v41 }
0x1f59   :  { %13954 = vmatmul.mubr.msk.f32.vlgmr.msra.gmra.mrb[28].mxu0 %vm841_vm6, %v4358_v63 }
0x1f5a   :  { %13957 = vmatpush3.msra.mxu0 %v4511_v2 }
0x1f5b   :  { %14566 = vmatprep.subr.bf16.mxu0 %v14565_v54 }
0x2024   :  { %v4431_v33 = vpop.f32.mrb[44].mxu1 }
0x2025   :  { %v13950_v3 = vpop.f32.mrb[45].mxu1  ;;  %13958 = vmatprep.mubr.msk.f32.mxu0 %vm841_vm6, %v4431_v33 }
0x202c   :  { %v4507_v4 = vpop.f32.mrb[28].mxu0 }
0x202d   :  { %v13955_v5 = vpop.f32.mrb[29].mxu0  ;;  %13959 = vmatmul.mubr.msk.f32.vlgmr.msra.gmra.mrb[22].mxu0 %vm841_vm6, %v4507_v4 }
0x202e   :  { %14568 = vmatpush3.bf16.msra.mxu0 %v14565_v54 }
0x202f   :  { %14570 = vmatprep.subr.bf16.mxu0 %v14569_v55 }
0x2032   :  { %14572 = vmatpush3.bf16.msra.mxu0 %v14569_v55  ;;  %v13158_v55 = vld [vmem:[%s18055_s10] ss:$0 sm:$0xff]  ;;  %s18074_s10 = sld [smem:[#allocation102_spill]] }
0x2033   :  { %14574 = vmatprep.subr.bf16.mxu0 %v14573_v58 }
0x2036   :  { %14576 = vmatpush3.bf16.msra.mxu0 %v14573_v58 }
0x2100   :  { %v13960_v7 = vpop.f32.mrb[22].mxu0 }
0x2101   :  { %v4603_v9 = vadd.f32 %v13960_v7, %v13146_v6  ;;  %v4584_v10 = vpop.f32.mrb[23].mxu0 }
0x2102   :  { %v4602_v12 = vadd.f32 %v13146_v6, %v4584_v10 }
0x2103   :  { %v16954_v13 = vadd.f32 %v4603_v9, %v16765_v47  ;;  %v4917_v47 = vsel %vm683_vm0, %v16965_v17, 0.0 }
0x2104   :  { %v16957_v14 = vadd.f32 %v4602_v12, %v16768_v48 }
0x2105   :  { %v4609_v16 = vsel %vm683_vm0, %v16954_v13, 0.0 }
0x2106   :  { %4610 = vadd.xlane.f32.xlu0 %v4609_v16  ;;  %v4606_v19 = vsel %vm683_vm0, %v16957_v14, 0.0 }
0x2107   :  { %4607 = vadd.xlane.f32.xlu1 %v4606_v19 }
0x210a   :  { %4915 = vadd.xlane.f32.xlu0 %v4914_v20 }
0x210b   :  { %4918 = vadd.xlane.f32.xlu1 %v4917_v47 }
0x2193   :  { %v4611_v48 = vpop.xlane.xlu0 %4610 }
0x2194   :  { %v4613_v21 = vmul.f32 0.03125, %v4611_v48  ;;  %v4608_v22 = vpop.xlane.xlu1 %4607 }
0x2195   :  { %v4612_v49 = vmul.f32 0.03125, %v4608_v22 }
0x2196   :  { %v16974_v23 = vsub.f32 %v16954_v13, %v4613_v21 }
0x2197   :  { %v16977_v18 = vsub.f32 %v16957_v14, %v4612_v49  ;;  %v4916_v24 = vpop.xlane.xlu0 %4915 }
0x2198   :  { %v4920_v25 = vmul.f32 0.03125, %v4916_v24  ;;  %v4919_v11 = vpop.xlane.xlu1 %4918  ;;  %v4617_v26 = vmul.f32 %v16974_v23, %v16974_v23 }
0x2199   :  { %v4921_v27 = vmul.f32 0.03125, %v4919_v11  ;;  %v4616_v28 = vmul.f32 %v16977_v18, %v16977_v18 }
0x219a   :  { %v16984_v51 = vsub.f32 %v16960_v15, %v4920_v25  ;;  %v4621_v29 = vsel %vm683_vm0, %v4617_v26, 0.0 }
0x219b   :  { %v16988_v30 = vsub.f32 %v16965_v17, %v4921_v27  ;;  %4622 = vadd.xlane.f32.xlu1 %v4621_v29  ;;  %v4618_v32 = vsel %vm683_vm0, %v4616_v28, 0.0 }
0x219c   :  { %4619 = vadd.xlane.f32.xlu0 %v4618_v32  ;;  %v4924_v35 = vmul.f32 %v16984_v51, %v16984_v51  ;;  %v4955_v34 = vmul.f32 %v13157_v1, %v16984_v51 }
0x219d   :  { %v4925_v38 = vmul.f32 %v16988_v30, %v16988_v30 }
0x219e   :  { %v4926_v39 = vsel %vm683_vm0, %v4924_v35, 0.0 }
0x219f   :  { %v4929_v40 = vsel %vm683_vm0, %v4925_v38, 0.0  ;;  %v13147_v38 = vld [vmem:[#allocation49] ss:$0 sm:$0xff] }
0x21a0   :  { %4927 = vadd.xlane.f32.xlu0 %v4926_v39  ;;  %4930 = vadd.xlane.f32.xlu1 %v4929_v40  ;;  %v4648_v39 = vmul.f32 %v13147_v38, %v16974_v23  ;;  %v4647_v42 = vmul.f32 %v13147_v38, %v16977_v18  ;;  %v4956_v18 = vmul.f32 %v13157_v1, %v16988_v30  ;;  %v4764_v30 = vld [vmem:[%s18053_s19 + $0x30] sm:$0xff] }
0x2228   :  { %v4623_v59 = vpop.xlane.xlu1 %4622 }
0x2229   :  { %v4625_v31 = vmul.f32 0.032258064, %v4623_v59  ;;  %v4620_v60 = vpop.xlane.xlu0 %4619  ;;  %v4765_v59 = vld [vmem:[%s18053_s19 + $0x38] sm:$0xff]  ;;  %s18072_s19 = sld [smem:[#allocation76_spill]] }
0x222a   :  { %v4624_v62 = vmul.f32 0.032258064, %v4620_v60 }
0x222b   :  { %14923 = vrsqrt.f32 %v4625_v31  ;;  %vm4635_vm7 = vcmp.eq.f32.partialorder %v4625_v31, inf  ;;  %v4638_v7 = vand.u32 2147483648, %v4625_v31  ;;  %vm4637_vm9 = vcmp.eq.f32.partialorder %v4625_v31, 0.0 }
0x222c   :  { %14925 = vrsqrt.f32 %v4624_v62  ;;  %vm4628_vm11 = vcmp.eq.f32.partialorder %v4624_v62, inf  ;;  %v4631_v12 = vand.u32 2147483648, %v4624_v62  ;;  %vm4630_vm12 = vcmp.eq.f32.partialorder %v4624_v62, 0.0 }
0x222d   :  { %v4928_v63 = vpop.xlane.xlu0 %4927  ;;  %v4931_v2 = vpop.xlane.xlu1 %4930 }
0x222e   :  { %v4932_v33 = vmul.f32 0.032258064, %v4928_v63  ;;  %v4933_v3 = vmul.f32 0.032258064, %v4931_v2 }
0x2230   :  { %14927 = vrsqrt.f32 %v4932_v33  ;;  %vm4936_vm13 = vcmp.eq.f32.partialorder %v4932_v33, inf  ;;  %vm4938_vm14 = vcmp.eq.f32.partialorder %v4932_v33, 0.0  ;;  %v4939_v24 = vand.u32 2147483648, %v4932_v33 }
0x2231   :  { %14929 = vrsqrt.f32 %v4933_v3  ;;  %vm4943_vm1 = vcmp.eq.f32.partialorder %v4933_v3, inf  ;;  %v4946_v26 = vand.u32 2147483648, %v4933_v3  ;;  %vm4945_vm2 = vcmp.eq.f32.partialorder %v4933_v3, 0.0 }
0x2235   :  { %v14924_v4 = vpop.eup %14923 }
0x2236   :  { %v14926_v5 = vpop.eup %14925  ;;  %v4634_v6 = vmul.f32 %v14924_v4, %v4625_v31  ;;  %v13159_v4 = vld [vmem:[%s18056_s14] ss:$0 sm:$0xff] }
0x2237   :  { %v4627_v9 = vmul.f32 %v14926_v5, %v4624_v62 }
0x2238   :  { %v4636_v10 = vsel %vm4635_vm7, %v4625_v31, %v4634_v6  ;;  %v14577_v31 = vpack.c.bf16 %v4765_v59, %v4764_v30 }
0x2239   :  { %v4639_v16 = vsel %vm4637_vm9, %v4638_v7, %v4636_v10  ;;  %v4629_v19 = vsel %vm4628_vm11, %v4624_v62, %v4627_v9 }
0x223a   :  { %v14928_v20 = vpop.eup %14927  ;;  %v4650_v47 = vadd.f32 1e-06, %v4639_v16  ;;  %v4632_v48 = vsel %vm4630_vm12, %v4631_v12, %v4629_v19  ;;  %14578 = vmatprep.subr.bf16.mxu0 %v14577_v31  ;;  %v17056_v16 = vld [vmem:[#allocation40] ss:$0 sm:$0xff] }
0x223b   :  { %v14930_v21 = vpop.eup %14929  ;;  %v4935_v22 = vmul.f32 %v14928_v20, %v4932_v33  ;;  %v4649_v49 = vadd.f32 1e-06, %v4632_v48  ;;  %14580 = vmatpush3.bf16.msra.mxu0 %v14577_v31 }
0x223c   :  { %v4942_v25 = vmul.f32 %v14930_v21, %v4933_v3  ;;  %14931 = vrcp.f32 %v4650_v47  ;;  %14012 = vmatprep.subr.mxu0 %v16012_v46 }
0x223d   :  { %v4937_v11 = vsel %vm4936_vm13, %v4932_v33, %v4935_v22  ;;  %14933 = vrcp.f32 %v4649_v49  ;;  %v17064_v22 = vld [vmem:[%s18057_s20 + $0x8] sm:$0xff] }
0x223e   :  { %v4944_v27 = vsel %vm4943_vm1, %v4933_v3, %v4942_v25  ;;  %v4940_v28 = vsel %vm4938_vm14, %v4939_v24, %v4937_v11  ;;  %vm5065_vm3 = vcmp.eq.f32.partialorder %v17064_v22, 0.0 }
0x223f   :  { %v4947_v29 = vsel %vm4945_vm2, %v4946_v26, %v4944_v27  ;;  %v4957_v32 = vadd.f32 1e-06, %v4940_v28  ;;  %v17075_v27 = vld [vmem:[%s18057_s20] sm:$0xff] }
0x2240   :  { %v4958_v35 = vadd.f32 1e-06, %v4947_v29  ;;  %vm5064_vm4 = vcmp.eq.f32.partialorder %v17075_v27, 0.0 }
0x2241   :  { %14935 = vrcp.f32 %v4957_v32 }
0x2242   :  { %14937 = vrcp.f32 %v4958_v35 }
0x2246   :  { %v14932_v40 = vpop.eup %14931 }
0x2247   :  { %v14934_v43 = vpop.eup %14933  ;;  %v4654_v44 = vmul.f32 %v14932_v40, %v4648_v39 }
0x2248   :  { %v4652_v45 = vmul.f32 %v14934_v43, %v4647_v42 }
0x2249   :  { %v4663_v54 = vadd.f32 %v13148_v0, %v4654_v44 }
0x224a   :  { %v4662_v53 = vadd.f32 %v13148_v0, %v4652_v45 }
0x224b   :  { %v14936_v36 = vpop.eup %14935 }
0x224c   :  { %v14938_v56 = vpop.eup %14937  ;;  %13969 = vmatprep.mubr.msk.f32.mxu1 %vm683_vm0, %v4662_v53  ;;  %v4960_v23 = vmul.f32 %v14936_v36, %v4955_v34 }
0x224d   :  { %13970 = vmatmul.mubr.msk.f32.vlgmr.msra.gmra.mrb[46].mxu1 %vm683_vm0, %v4663_v54  ;;  %v4962_v51 = vmul.f32 %v14938_v56, %v4956_v18 }
0x224e   :  { %14584 = vmatpush3.bf16.msra.mxu1 %v17003_v52  ;;  %v4970_v57 = vadd.f32 %v13158_v55, %v4960_v23  ;;  %v13149_v52 = vld [vmem:[#allocation38] ss:$0 sm:$0xff] }
0x224f   :  { %14586 = vmatprep.subr.bf16.mxu1 %v14585_v37  ;;  %v4971_v58 = vadd.f32 %v13158_v55, %v4962_v51 }
0x2250   :  { %13999 = vmatprep.mubr.msk.f32.mxu1 %vm683_vm0, %v4970_v57 }
0x2252   :  { %14588 = vmatpush3.bf16.msra.mxu1 %v14585_v37 }
0x2253   :  { %14002 = vmatprep.subr.mxu1 %v16012_v46 }
0x2255   :  { %14000 = vmatmul.mubr.msk.f32.vlgmr.msra.gmra.mrb[48].mxu1 %vm683_vm0, %v4971_v58 }
0x2256   :  { %14004 = vmatprep.mubr.msk.f32.mxu1 %vm16013_vm5, %v16012_v46 }
0x2320   :  { %v13971_v60 = vpop.f32.mrb[46].mxu1 }
0x2321   :  { %v4753_v62 = vadd.f32 %v13971_v60, %v13149_v52  ;;  %v4747_v63 = vpop.f32.mrb[47].mxu1 }
0x2322   :  { %v4748_v2 = vadd.f32 %v13149_v52, %v4747_v63 }
0x2323   :  { %v4757_v3 = vmax.f32 %v4753_v62, 0.0 }
0x2324   :  { %v4756_v33 = vmax.f32 %v4748_v2, 0.0 }
0x2326   :  { %13988 = vmatprep.mubr.msk.f32.mxu0 %vm2695_vm15, %v4756_v33 }
0x2327   :  { %13989 = vmatmul.mubr.msk.f32.vlgmr.msra.gmra.mrb[30].mxu0 %vm2695_vm15, %v4757_v3 }
0x2328   :  { %v14001_v5 = vpop.f32.mrb[48].mxu1  ;;  %14014 = vmatprep.mubr.msk.f32.mxu0 %vm16013_vm5, %v16012_v46 }
0x2329   :  { %v17036_v6 = vadd.f32 %v14001_v5, %v13159_v4  ;;  %v5055_v7 = vpop.f32.mrb[49].mxu1 }
0x232a   :  { %v17038_v9 = vadd.f32 %v13159_v4, %v5055_v7 }
0x232b   :  { %5144 = vrot.lane.b32.xlu1 %v17036_v6, %s16014_s24 }
0x232c   :  { %5067 = vrot.lane.b32.xlu0 %v17038_v9, %s16014_s24 }
0x239d   :  { %v5145_v12 = vpop.permute.xlu1 %5144 }
0x239e   :  { %v5068_v10 = vpop.permute.xlu0 %5067 }
0x239f   :  { %14003 = vmatpush3.xpose.msk.msra.mxu1 %vm841_vm6, %v5068_v10 }
0x23a0   :  { %14007 = vmatprep.subr.mxu1 %v16012_v46 }
0x23a2   :  { %14005 = vmatmul.mubr.msk.f32.vlgmr.msra.gmra.mrb[50].mxu1 %vm841_vm6, %v17038_v9 }
0x23a3   :  { %14008 = vmatpush3.xpose.msk.msra.mxu1 %vm841_vm6, %v5145_v12  ;;  %14009 = vmatprep.mubr.msk.f32.mxu1 %vm16013_vm5, %v16012_v46 }
0x23a4   :  { %14017 = vmatprep.subr.mxu1 %v16012_v46 }
0x23a6   :  { %14010 = vmatmul.mubr.msk.f32.vlgmr.msra.gmra.mrb[52].mxu1 %vm841_vm6, %v17036_v6 }
0x23a7   :  { %14019 = vmatprep.mubr.msk.f32.mxu1 %vm16013_vm5, %v16012_v46 }
0x23fa   :  { %v13990_v19 = vpop.f32.mrb[30].mxu0 }
0x23fb   :  { %v17059_v20 = vadd.f32 %v13990_v19, %v17056_v16  ;;  %v17061_v47 = vpop.f32.mrb[31].mxu0 }
0x2475   :  { %v5139_v48 = vpop.f32.mrb[50].mxu1 }
0x2476   :  { %v14006_v21 = vpop.f32.mrb[51].mxu1  ;;  %v5220_v28 = vmul.f32 0.35355338, %v5139_v48 }
0x2478   :  { %v5222_v29 = vsel %vm5064_vm4, -1e+09, %v5220_v28 }
0x2479   :  { %v5216_v49 = vpop.f32.mrb[52].mxu1  ;;  %v5224_v32 = vsel %vm841_vm6, %v5222_v29, -inf }
0x247a   :  { %v5221_v24 = vmul.f32 0.35355338, %v5216_v49  ;;  %v14011_v25 = vpop.f32.mrb[53].mxu1 }
0x247c   :  { %v5223_v11 = vsel %vm5065_vm3, -1e+09, %v5221_v24 }
0x247d   :  { %v5227_v26 = vsel %vm841_vm6, %v5223_v11, -inf }
0x247e   :  { %5228 = vmax.xlane.f32.xlu1 %v5227_v26 }
0x248f   :  { %5479 = vrot.lane.b32.xlu1 %v17036_v6, %s16016_s13 }
0x2493   :  { %5477 = vrot.lane.b32.xlu1 %v17036_v6, %s16017_s21 }
0x24b7   :  { %5225 = vmax.xlane.f32.xlu1 %v5224_v32 }
0x24c8   :  { %5401 = vrot.lane.b32.xlu1 %v17038_v9, %s16016_s13 }
0x24cc   :  { %5399 = vrot.lane.b32.xlu1 %v17038_v9, %s16017_s21 }
0x24d0   :  { %5898 = vrot.lane.b32.xlu1 %v17038_v9, %s16018_s27 }
0x250b   :  { %v5229_v35 = vpop.xlane.xlu1 %5228 }
0x250c   :  { %v5231_v38 = vsub.f32 %v5223_v11, %v5229_v35 }
0x250e   :  { %v5234_v39 = vmul.f32 1.442695, %v5231_v38 }
0x250f   :  { %v5480_v43 = vpop.permute.xlu1 %5479 }
0x2510   :  { %14939 = vpow2.f32 %v5234_v39 }
0x2513   :  { %v5478_v1 = vpop.permute.xlu1 %5477 }
0x251a   :  { %v14940_v40 = vpop.eup %14939 }
0x251b   :  { %v5239_v42 = vsel %vm841_vm6, %v14940_v40, 0.0 }
0x251c   :  { %5240 = vadd.xlane.f32.xlu0 %v5239_v42 }
0x2532   :  { %5322 = vrot.lane.b32.xlu0 %v17036_v6, %s16019_s23 }
0x2544   :  { %v5226_v44 = vpop.xlane.xlu1 %5225 }
0x2545   :  { %v5230_v0 = vsub.f32 %v5222_v29, %v5226_v44 }
0x2547   :  { %v5232_v45 = vmul.f32 1.442695, %v5230_v0 }
0x2548   :  { %v5402_v23 = vpop.permute.xlu1 %5401 }
0x2549   :  { %14941 = vpow2.f32 %v5232_v45 }
0x254c   :  { %v5400_v57 = vpop.permute.xlu1 %5399 }
0x2550   :  { %v5899_v49 = vpop.permute.xlu1 %5898 }
0x2553   :  { %v14942_v41 = vpop.eup %14941 }
0x2554   :  { %v5236_v50 = vsel %vm841_vm6, %v14942_v41, 0.0 }
0x2555   :  { %5237 = vadd.xlane.f32.xlu0 %v5236_v50 }
0x256b   :  { %5246 = vrot.lane.b32.xlu0 %v17038_v9, %s16019_s23 }
0x25a9   :  { %v5241_v34 = vpop.xlane.xlu0 %5240 }
0x25aa   :  { %14943 = vrcp.f32 %v5241_v34 }
0x25ad   :  { %v5323_v53 = vpop.permute.xlu0 %5322 }
0x25ae   :  { %14018 = vmatpush3.msra.mxu1 %v5323_v53 }
0x25af   :  { %14027 = vmatprep.subr.mxu1 %v16012_v46 }
0x25b4   :  { %v14944_v36 = vpop.eup %14943 }
0x25b5   :  { %v5245_v54 = vmul.f32 %v14944_v36, %v14940_v40 }
0x25b7   :  { %14020 = vmatmul.mubr.msk.f32.vlgmr.msra.gmra.mrb[54].mxu1 %vm841_vm6, %v5245_v54 }
0x25b8   :  { %14028 = vmatpush3.xpose.msk.msra.mxu1 %vm841_vm6, %v5480_v43  ;;  %14029 = vmatprep.mubr.msk.f32.mxu1 %vm16013_vm5, %v16012_v46 }
0x25b9   :  { %14037 = vmatprep.subr.mxu1 %v16012_v46 }
0x25bb   :  { %14030 = vmatmul.mubr.msk.f32.vlgmr.msra.gmra.mrb[56].mxu1 %vm841_vm6, %v5478_v1 }
0x25bc   :  { %14039 = vmatprep.mubr.msk.f32.mxu1 %vm16013_vm5, %v16012_v46 }
0x25e2   :  { %v5238_v37 = vpop.xlane.xlu0 %5237 }
0x25e3   :  { %14945 = vrcp.f32 %v5238_v37 }
0x25e6   :  { %v5247_v55 = vpop.permute.xlu0 %5246 }
0x25e7   :  { %14013 = vmatpush3.msra.mxu0 %v5247_v55 }
0x25e8   :  { %14022 = vmatprep.subr.mxu0 %v16012_v46 }
0x25ed   :  { %v14946_v56 = vpop.eup %14945 }
0x25ee   :  { %v5244_v18 = vmul.f32 %v14946_v56, %v14942_v41 }
0x25f0   :  { %14015 = vmatmul.mubr.msk.f32.vlgmr.msra.gmra.mrb[32].mxu0 %vm841_vm6, %v5244_v18 }
0x25f1   :  { %14023 = vmatpush3.xpose.msk.msra.mxu0 %vm841_vm6, %v5402_v23  ;;  %14024 = vmatprep.mubr.msk.f32.mxu0 %vm16013_vm5, %v16012_v46 }
0x25f2   :  { %14032 = vmatprep.subr.mxu0 %v16012_v46 }
0x25f4   :  { %14025 = vmatmul.mubr.msk.f32.vlgmr.msra.gmra.mrb[34].mxu0 %vm841_vm6, %v5400_v57  ;;  %v5733_v57 = vld [vmem:[%s18058_s11 + $0x8] sm:$0xff] }
0x25f5   :  { %14034 = vmatprep.mubr.msk.f32.mxu0 %vm16013_vm5, %v16012_v46 }
0x268a   :  { %v17111_v51 = vpop.f32.mrb[54].mxu1 }
0x268b   :  { %v14021_v58 = vpop.f32.mrb[55].mxu1 }
0x268c   :  { %v5398_v58 = vld [vmem:[%s18058_s11] sm:$0xff] }
0x268e   :  { %v5551_v30 = vpop.f32.mrb[56].mxu1 }
0x268f   :  { %v5556_v59 = vmul.f32 0.35355338, %v5551_v30  ;;  %v14031_v31 = vpop.f32.mrb[57].mxu1 }
0x2691   :  { %v5558_v52 = vsel %vm5065_vm3, -1e+09, %v5556_v59 }
0x2692   :  { %v5562_v60 = vsel %vm841_vm6, %v5558_v52, -inf }
0x2693   :  { %5563 = vmax.xlane.f32.xlu0 %v5562_v60 }
0x26a9   :  { %5657 = vrot.lane.b32.xlu0 %v17036_v6, %s16020_s5 }
0x26ad   :  { %5896 = vrot.lane.b32.xlu0 %v17038_v9, %s16021_s8 }
0x26b1   :  { %5974 = vrot.lane.b32.xlu0 %v17036_v6, %s16021_s8 }
0x26c3   :  { %v17122_v62 = vpop.f32.mrb[32].mxu0 }
0x26c4   :  { %v14016_v63 = vpop.f32.mrb[33].mxu0 }
0x26c7   :  { %v5473_v2 = vpop.f32.mrb[34].mxu0 }
0x26c8   :  { %v14026_v33 = vpop.f32.mrb[35].mxu0  ;;  %v5555_v19 = vmul.f32 0.35355338, %v5473_v2 }
0x26ca   :  { %v5557_v48 = vsel %vm5064_vm4, -1e+09, %v5555_v19  ;;  %v6230_v19 = vld [vmem:[%s18058_s11 + $0x10] sm:$0xff] }
0x26cb   :  { %v5559_v21 = vsel %vm841_vm6, %v5557_v48, -inf }
0x2720   :  { %v5564_v3 = vpop.xlane.xlu0 %5563 }
0x2721   :  { %v5566_v4 = vsub.f32 %v5558_v52, %v5564_v3 }
0x2723   :  { %v5569_v5 = vmul.f32 1.442695, %v5566_v4 }
0x2724   :  { %v5658_v7 = vpop.permute.xlu0 %5657 }
0x2725   :  { %14947 = vpow2.f32 %v5569_v5  ;;  %14038 = vmatpush3.msra.mxu1 %v5658_v7 }
0x2726   :  { %14052 = vmatprep.subr.mxu1 %v16012_v46 }
0x2728   :  { %v5897_v26 = vpop.permute.xlu0 %5896 }
0x272c   :  { %v5975_v29 = vpop.permute.xlu0 %5974 }
0x272f   :  { %v14948_v10 = vpop.eup %14947 }
0x2730   :  { %v5574_v12 = vsel %vm841_vm6, %v14948_v10, 0.0 }
0x2731   :  { %5575 = vadd.xlane.f32.xlu1 %v5574_v12 }
0x2742   :  { %5976 = vrot.lane.b32.xlu1 %v17036_v6, %s16018_s27 }
0x2766   :  { %5560 = vmax.xlane.f32.xlu1 %v5559_v21 }
0x27be   :  { %v5576_v24 = vpop.xlane.xlu1 %5575 }
0x27bf   :  { %14949 = vrcp.f32 %v5576_v24 }
0x27c2   :  { %v5977_v28 = vpop.permute.xlu1 %5976 }
0x27c9   :  { %v14950_v25 = vpop.eup %14949 }
0x27ca   :  { %v5580_v11 = vmul.f32 %v14950_v25, %v14948_v10 }
0x27cc   :  { %14040 = vmatmul.mubr.msk.f32.vlgmr.msra.gmra.mrb[58].mxu1 %vm841_vm6, %v5580_v11 }
0x27cd   :  { %14053 = vmatpush3.xpose.msk.msra.mxu1 %vm841_vm6, %v5899_v49  ;;  %14054 = vmatprep.mubr.msk.f32.mxu1 %vm16013_vm5, %v16012_v46 }
0x27ce   :  { %14057 = vmatprep.subr.mxu1 %v16012_v46 }
0x27d0   :  { %14055 = vmatmul.mubr.msk.f32.vlgmr.msra.gmra.mrb[60].mxu1 %vm841_vm6, %v5897_v26 }
0x27d1   :  { %14058 = vmatpush3.xpose.msk.msra.mxu1 %vm841_vm6, %v5977_v28  ;;  %14059 = vmatprep.mubr.msk.f32.mxu1 %vm16013_vm5, %v16012_v46 }
0x27d2   :  { %14067 = vmatprep.subr.mxu1 %v16012_v46 }
0x27d4   :  { %14060 = vmatmul.mubr.msk.f32.vlgmr.msra.gmra.mrb[62].mxu1 %vm841_vm6, %v5975_v29 }
0x27d5   :  { %14069 = vmatprep.mubr.msk.f32.mxu1 %vm16013_vm5, %v16012_v46 }
0x27f3   :  { %v5561_v32 = vpop.xlane.xlu1 %5560 }
0x27f4   :  { %v5565_v35 = vsub.f32 %v5557_v48, %v5561_v32 }
0x27f6   :  { %v5567_v38 = vmul.f32 1.442695, %v5565_v35 }
0x27f8   :  { %14951 = vpow2.f32 %v5567_v38 }
0x2802   :  { %v14952_v39 = vpop.eup %14951 }
0x2803   :  { %v5571_v40 = vsel %vm841_vm6, %v14952_v39, 0.0 }
0x2804   :  { %5572 = vadd.xlane.f32.xlu0 %v5571_v40 }
0x281a   :  { %5581 = vrot.lane.b32.xlu0 %v17038_v9, %s16020_s5 }
0x281e   :  { %6154 = vrot.lane.b32.xlu0 %v17036_v6, %s16022_s26 }
0x2822   :  { %6316 = vrot.lane.b32.xlu0 %v17038_v9, %s16023_s12 }
0x2826   :  { %6394 = vrot.lane.b32.xlu0 %v17036_v6, %s16023_s12 }
0x282a   :  { %6314 = vrot.lane.b32.xlu0 %v17038_v9, %s16024_s0 }
0x2891   :  { %v5573_v42 = vpop.xlane.xlu0 %5572 }
0x2892   :  { %14953 = vrcp.f32 %v5573_v42 }
0x2895   :  { %v5582_v43 = vpop.permute.xlu0 %5581 }
0x2896   :  { %14033 = vmatpush3.msra.mxu0 %v5582_v43 }
0x2897   :  { %14042 = vmatprep.subr.mxu0 %v5733_v57 }
0x2899   :  { %v6155_v1 = vpop.permute.xlu0 %6154 }
0x289a   :  { %14068 = vmatpush3.msra.mxu1 %v6155_v1 }
0x289b   :  { %14077 = vmatprep.subr.mxu1 %v16012_v46 }
0x289c   :  { %v14954_v44 = vpop.eup %14953 }
0x289d   :  { %v5579_v0 = vmul.f32 %v14954_v44, %v14952_v39  ;;  %v6317_v21 = vpop.permute.xlu0 %6316 }
0x289f   :  { %14035 = vmatmul.mubr.msk.f32.vlgmr.msra.gmra.mrb[36].mxu0 %vm841_vm6, %v5579_v0  ;;  %v5729_v45 = vpop.f32.mrb[58].mxu1 }
0x28a0   :  { %v14041_v41 = vpop.f32.mrb[59].mxu1  ;;  %14043 = vmatpush3.msra.mxu0 %v5733_v57 }
0x28a1   :  { %14047 = vmatprep.subr.mxu0 %v5398_v58  ;;  %v6395_v25 = vpop.permute.xlu0 %6394 }
0x28a3   :  { %v5970_v50 = vpop.f32.mrb[60].mxu1 }
0x28a4   :  { %v6052_v34 = vmul.f32 0.35355338, %v5970_v50  ;;  %v14056_v53 = vpop.f32.mrb[61].mxu1 }
0x28a5   :  { %v6315_v11 = vpop.permute.xlu0 %6314 }
0x28a6   :  { %v6054_v36 = vsel %vm5064_vm4, -1e+09, %v6052_v34 }
0x28a7   :  { %v6048_v54 = vpop.f32.mrb[62].mxu1  ;;  %v6056_v37 = vsel %vm841_vm6, %v6054_v36, -inf }
0x28a8   :  { %v6053_v55 = vmul.f32 0.35355338, %v6048_v54  ;;  %v14061_v56 = vpop.f32.mrb[63].mxu1  ;;  %6057 = vmax.xlane.f32.xlu1 %v6056_v37  ;;  %v4846_v37 = vadd.f32 %v17056_v16, %v17061_v47 }
0x28aa   :  { %v6055_v23 = vsel %vm5065_vm3, -1e+09, %v6053_v55  ;;  %v4854_v55 = vadd.f32 %v4846_v37, %v16957_v14  ;;  %v4855_v14 = vadd.f32 %v17059_v20, %v16954_v13 }
0x28ab   :  { %v6059_v18 = vsel %vm841_vm6, %v6055_v23, -inf }
0x28ac   :  { %6060 = vmax.xlane.f32.xlu1 %v6059_v18  ;;  %v4856_v56 = vsel %vm683_vm0, %v4854_v55, 0.0 }
0x2935   :  { %v6058_v30 = vpop.xlane.xlu1 %6057 }
0x2936   :  { %v6062_v59 = vsub.f32 %v6054_v36, %v6058_v30 }
0x2938   :  { %v6064_v31 = vmul.f32 1.442695, %v6062_v59 }
0x2939   :  { %v6061_v52 = vpop.xlane.xlu1 %6060 }
0x293a   :  { %14955 = vpow2.f32 %v6064_v31  ;;  %v6063_v60 = vsub.f32 %v6055_v23, %v6061_v52 }
0x293c   :  { %v6066_v63 = vmul.f32 1.442695, %v6063_v60 }
0x293e   :  { %14957 = vpow2.f32 %v6066_v63 }
0x2944   :  { %v14956_v2 = vpop.eup %14955 }
0x2945   :  { %v6068_v33 = vsel %vm841_vm6, %v14956_v2, 0.0 }
0x2946   :  { %6069 = vadd.xlane.f32.xlu1 %v6068_v33 }
0x2948   :  { %v14958_v3 = vpop.eup %14957 }
0x2949   :  { %v6071_v4 = vsel %vm841_vm6, %v14958_v3, 0.0 }
0x294a   :  { %6072 = vadd.xlane.f32.xlu1 %v6071_v4 }
0x295b   :  { %6078 = vrot.lane.b32.xlu1 %v17038_v9, %s16022_s26 }
0x295f   :  { %6392 = vrot.lane.b32.xlu1 %v17036_v6, %s16024_s0 }
0x2972   :  { %v5653_v5 = vpop.f32.mrb[36].mxu0 }
0x2973   :  { %v14036_v7 = vpop.f32.mrb[37].mxu0  ;;  %14044 = vmatprep.mubr.msk.f32.mxu0 %vm841_vm6, %v5653_v5 }
0x2974   :  { %14045 = vmatmul.mubr.msk.f32.vlgmr.msra.gmra.mrb[38].mxu0 %vm841_vm6, %v5729_v45 }
0x2975   :  { %14049 = vmatprep.mubr.msk.f32.mxu0 %vm841_vm6, %v17122_v62  ;;  %14048 = vmatpush3.msra.mxu0 %v5398_v58 }
0x2976   :  { %14062 = vmatprep.subr.mxu0 %v16012_v46 }
0x297c   :  { %14050 = vmatmul.mubr.msk.f32.vlgmr.msra.gmra.mrb[38].mxu0 %vm841_vm6, %v17111_v51 }
0x297d   :  { %14064 = vmatprep.mubr.msk.f32.mxu0 %vm16013_vm5, %v16012_v46 }
0x29d3   :  { %v6070_v10 = vpop.xlane.xlu1 %6069 }
0x29d4   :  { %14959 = vrcp.f32 %v6070_v10 }
0x29d7   :  { %v6073_v12 = vpop.xlane.xlu1 %6072 }
0x29d8   :  { %14961 = vrcp.f32 %v6073_v12  ;;  %v13194_v12 = vld [vmem:[%s18059_s30] ss:$0 sm:$0xff] }
0x29db   :  { %v6079_v48 = vpop.permute.xlu1 %6078 }
0x29dc   :  { %14063 = vmatpush3.msra.mxu0 %v6079_v48 }
0x29dd   :  { %14072 = vmatprep.subr.mxu0 %v6230_v19 }
0x29de   :  { %v14960_v49 = vpop.eup %14959 }
0x29df   :  { %v6076_v62 = vmul.f32 %v14960_v49, %v14956_v2  ;;  %v6393_v35 = vpop.permute.xlu1 %6392  ;;  %v6648_v2 = vld [vmem:[%s18058_s11 + $0x18] sm:$0xff] }
0x29e1   :  { %14065 = vmatmul.mubr.msk.f32.vlgmr.msra.gmra.mrb[40].mxu0 %vm841_vm6, %v6076_v62 }
0x29e2   :  { %v14962_v24 = vpop.eup %14961  ;;  %14073 = vmatpush3.msra.mxu0 %v6230_v19 }
0x29e3   :  { %v6077_v51 = vmul.f32 %v14962_v24, %v14958_v3  ;;  %14082 = vmatprep.subr.mxu0 %v16012_v46 }
0x29e5   :  { %14070 = vmatmul.mubr.msk.f32.vlgmr.msra.gmra.mrb[64].mxu1 %vm841_vm6, %v6077_v51 }
0x29e6   :  { %14078 = vmatpush3.xpose.msk.msra.mxu1 %vm841_vm6, %v6317_v21  ;;  %14079 = vmatprep.mubr.msk.f32.mxu1 %vm16013_vm5, %v16012_v46 }
0x29e7   :  { %14087 = vmatprep.subr.mxu1 %v16012_v46 }
0x29e9   :  { %14080 = vmatmul.mubr.msk.f32.vlgmr.msra.gmra.mrb[66].mxu1 %vm841_vm6, %v6315_v11 }
0x29ea   :  { %14089 = vmatprep.mubr.msk.f32.mxu1 %vm16013_vm5, %v16012_v46 }
0x2ab4   :  { %v6150_v26 = vpop.f32.mrb[40].mxu0 }
0x2ab5   :  { %v14066_v28 = vpop.f32.mrb[41].mxu0  ;;  %14074 = vmatprep.mubr.msk.f32.mxu0 %vm841_vm6, %v6150_v26 }
0x2ab8   :  { %v6226_v29 = vpop.f32.mrb[64].mxu1 }
0x2ab9   :  { %v14071_v32 = vpop.f32.mrb[65].mxu1  ;;  %14075 = vmatmul.mubr.msk.f32.vlgmr.msra.gmra.mrb[38].mxu0 %vm841_vm6, %v6226_v29 }
0x2aba   :  { %14083 = vmatpush3.xpose.msk.msra.mxu0 %vm841_vm6, %v6395_v25  ;;  %14084 = vmatprep.mubr.msk.f32.mxu0 %vm16013_vm5, %v16012_v46  ;;  %v6893_v32 = vld [vmem:[%s18060_s15] sm:$0xff] }
0x2abb   :  { %14092 = vmatprep.subr.mxu0 %v16012_v46 }
0x2abc   :  { %v6388_v38 = vpop.f32.mrb[66].mxu1 }
0x2abd   :  { %v6470_v39 = vmul.f32 0.35355338, %v6388_v38  ;;  %v14081_v40 = vpop.f32.mrb[67].mxu1  ;;  %14085 = vmatmul.mubr.msk.f32.vlgmr.msra.gmra.mrb[42].mxu0 %vm841_vm6, %v6393_v35  ;;  %v6894_v35 = vld [vmem:[%s18060_s15 + $0x8] sm:$0xff]  ;;  %v6895_v38 = vld [vmem:[%s18060_s15 + $0x10] sm:$0xff] }
0x2abe   :  { %14094 = vmatprep.mubr.msk.f32.mxu0 %vm16013_vm5, %v16012_v46  ;;  %v6896_v40 = vld [vmem:[%s18060_s15 + $0x18] sm:$0xff] }
0x2abf   :  { %v6472_v42 = vsel %vm5064_vm4, -1e+09, %v6470_v39  ;;  %v14597_v39 = vpack.c.bf16 %v6894_v35, %v6893_v32 }
0x2ac0   :  { %v6474_v43 = vsel %vm841_vm6, %v6472_v42, -inf }
0x2ac1   :  { %6475 = vmax.xlane.f32.xlu0 %v6474_v43 }
0x2b4e   :  { %v6476_v1 = vpop.xlane.xlu0 %6475 }
0x2b4f   :  { %v6480_v44 = vsub.f32 %v6472_v42, %v6476_v1  ;;  %v14601_v42 = vpack.c.bf16 %v6896_v40, %v6895_v38 }
0x2b51   :  { %v6482_v0 = vmul.f32 1.442695, %v6480_v44 }
0x2b53   :  { %14963 = vpow2.f32 %v6482_v0 }
0x2b5d   :  { %v14964_v45 = vpop.eup %14963 }
0x2b5e   :  { %v6486_v41 = vsel %vm841_vm6, %v14964_v45, 0.0 }
0x2b5f   :  { %6487 = vadd.xlane.f32.xlu0 %v6486_v41 }
0x2b90   :  { %v6466_v50 = vpop.f32.mrb[42].mxu0 }
0x2b91   :  { %v6471_v34 = vmul.f32 0.35355338, %v6466_v50  ;;  %v14086_v53 = vpop.f32.mrb[43].mxu0 }
0x2b93   :  { %v6473_v36 = vsel %vm5065_vm3, -1e+09, %v6471_v34 }
0x2b94   :  { %v6477_v54 = vsel %vm841_vm6, %v6473_v36, -inf }
0x2b95   :  { %6478 = vmax.xlane.f32.xlu1 %v6477_v54 }
0x2ba6   :  { %6572 = vrot.lane.b32.xlu1 %v17036_v6, %s16025_s1  ;;  %v4859_v6 = vsel %vm683_vm0, %v4855_v14, 0.0 }
0x2bca   :  { %4857 = vadd.xlane.f32.xlu1 %v4856_v56 }
0x2bec   :  { %v6488_v16 = vpop.xlane.xlu0 %6487 }
0x2c22   :  { %v6479_v23 = vpop.xlane.xlu1 %6478 }
0x2c23   :  { %v6481_v18 = vsub.f32 %v6473_v36, %v6479_v23 }
0x2c25   :  { %v6484_v57 = vmul.f32 1.442695, %v6481_v18 }
0x2c26   :  { %v6573_v58 = vpop.permute.xlu1 %6572 }
0x2c27   :  { %14965 = vpow2.f32 %v6484_v57  ;;  %14093 = vmatpush3.msra.mxu0 %v6573_v58 }
0x2c28   :  { %14967 = vrcp.f32 %v6488_v16  ;;  %14097 = vmatprep.subr.mxu0 %v6648_v2 }
0x2c31   :  { %v14966_v30 = vpop.eup %14965 }
0x2c32   :  { %v6489_v59 = vsel %vm841_vm6, %v14966_v30, 0.0  ;;  %v14968_v31 = vpop.eup %14967 }
0x2c33   :  { %6490 = vadd.xlane.f32.xlu0 %v6489_v59  ;;  %v6494_v60 = vmul.f32 %v14968_v31, %v14964_v45 }
0x2c49   :  { %6496 = vrot.lane.b32.xlu0 %v17038_v9, %s16025_s1 }
0x2c57   :  { %v4858_v5 = vpop.xlane.xlu1 %4857 }
0x2c58   :  { %v4862_v10 = vmul.f32 0.03125, %v4858_v5 }
0x2c5a   :  { %v17227_v62 = vsub.f32 %v4854_v55, %v4862_v10  ;;  %v6802_v10 = vld [vmem:[%s18061_s16 + $0x8] sm:$0xff] }
0x2c5c   :  { %v4866_v29 = vmul.f32 %v17227_v62, %v17227_v62 }
0x2c68   :  { %4860 = vadd.xlane.f32.xlu0 %v4859_v6 }
0x2cc0   :  { %v6491_v47 = vpop.xlane.xlu0 %6490 }
0x2cc1   :  { %14969 = vrcp.f32 %v6491_v47 }
0x2cc4   :  { %v6497_v52 = vpop.permute.xlu0 %6496 }
0x2cc5   :  { %14088 = vmatpush3.msra.mxu1 %v6497_v52 }
0x2cc6   :  { %14090 = vmatmul.mubr.msk.f32.vlgmr.msra.gmra.mrb[68].mxu1 %vm841_vm6, %v6494_v60  ;;  %v13155_v60 = vld [vmem:[#allocation52] ss:$0 sm:$0xff] }
0x2ccb   :  { %v14970_v63 = vpop.eup %14969 }
0x2ccc   :  { %v6495_v9 = vmul.f32 %v14970_v63, %v14966_v30 }
0x2cce   :  { %14095 = vmatmul.mubr.msk.f32.vlgmr.msra.gmra.mrb[44].mxu0 %vm841_vm6, %v6495_v9 }
0x2ccf   :  { %14098 = vmatpush3.msra.mxu0 %v6648_v2  ;;  %v4897_v2 = vmul.f32 %v13155_v60, %v17227_v62 }
0x2cd0   :  { %14598 = vmatprep.subr.bf16.mxu0 %v14597_v39 }
0x2cf5   :  { %v4861_v4 = vpop.xlane.xlu0 %4860 }
0x2cf6   :  { %v4863_v7 = vmul.f32 0.03125, %v4861_v4 }
0x2cf8   :  { %v17225_v48 = vsub.f32 %v4855_v14, %v4863_v7  ;;  %v6801_v7 = vld [vmem:[%s18061_s16] sm:$0xff] }
0x2cfa   :  { %v4867_v26 = vmul.f32 %v17225_v48, %v17225_v48  ;;  %v4898_v63 = vmul.f32 %v13155_v60, %v17225_v48  ;;  %v6804_v48 = vld [vmem:[%s18061_s16 + $0x18] sm:$0xff] }
0x2d99   :  { %v6568_v13 = vpop.f32.mrb[68].mxu1 }
0x2d9a   :  { %v14091_v20 = vpop.f32.mrb[69].mxu1  ;;  %14099 = vmatprep.mubr.msk.f32.mxu0 %vm841_vm6, %v6568_v13 }
0x2da1   :  { %v6644_v33 = vpop.f32.mrb[44].mxu0 }
0x2da2   :  { %v14096_v3 = vpop.f32.mrb[45].mxu0  ;;  %14100 = vmatmul.mubr.msk.f32.vlgmr.msra.gmra.mrb[38].mxu0 %vm841_vm6, %v6644_v33  ;;  %v13156_v33 = vld [vmem:[#allocation50] ss:$0 sm:$0xff] }
0x2da3   :  { %14600 = vmatpush3.bf16.msra.mxu0 %v14597_v39 }
0x2da4   :  { %14602 = vmatprep.subr.bf16.mxu0 %v14601_v42 }
0x2da7   :  { %14604 = vmatpush3.bf16.msra.mxu0 %v14601_v42 }
0x2da8   :  { %14134 = vmatprep.subr.mxu0 %v16012_v46 }
0x2e75   :  { %v14101_v19 = vpop.f32.mrb[38].mxu0 }
0x2e76   :  { %v6740_v21 = vadd.f32 %v14101_v19, %v13194_v12  ;;  %v6721_v49 = vpop.f32.mrb[39].mxu0  ;;  %v14589_v19 = vpack.c.bf16 %v6802_v10, %v6801_v7 }
0x2e77   :  { %v6739_v24 = vadd.f32 %v13194_v12, %v6721_v49  ;;  %v6803_v12 = vld [vmem:[%s18061_s16 + $0x10] sm:$0xff] }
0x2e78   :  { %v17230_v25 = vadd.f32 %v6740_v21, %v16965_v17  ;;  %v4871_v17 = vsel %vm683_vm0, %v4867_v26, 0.0  ;;  %v14593_v21 = vpack.c.bf16 %v6804_v48, %v6803_v12  ;;  %14590 = vmatprep.subr.bf16.mxu1 %v14589_v19 }
0x2e79   :  { %v17233_v51 = vadd.f32 %v6739_v24, %v16960_v15  ;;  %v4868_v15 = vsel %vm683_vm0, %v4866_v29, 0.0  ;;  %14592 = vmatpush3.bf16.msra.mxu1 %v14589_v19 }
0x2e7a   :  { %v6746_v11 = vsel %vm683_vm0, %v17230_v25, 0.0  ;;  %14594 = vmatprep.subr.bf16.mxu1 %v14593_v21 }
0x2e7b   :  { %6747 = vadd.xlane.f32.xlu1 %v6746_v11  ;;  %v6743_v28 = vsel %vm683_vm0, %v17233_v51, 0.0 }
0x2e7c   :  { %6744 = vadd.xlane.f32.xlu0 %v6743_v28 }
0x2e7d   :  { %14596 = vmatpush3.bf16.msra.mxu1 %v14593_v21 }
0x2e7e   :  { %14124 = vmatprep.subr.mxu1 %v16012_v46 }
0x2e7f   :  { %4872 = vadd.xlane.f32.xlu1 %v4871_v17 }
0x2e80   :  { %4869 = vadd.xlane.f32.xlu0 %v4868_v15 }
0x2f08   :  { %v6748_v43 = vpop.xlane.xlu1 %6747 }
0x2f09   :  { %v6750_v1 = vmul.f32 0.03125, %v6748_v43  ;;  %v6745_v44 = vpop.xlane.xlu0 %6744 }
0x2f0a   :  { %v6749_v0 = vmul.f32 0.03125, %v6745_v44 }
0x2f0b   :  { %v17251_v45 = vsub.f32 %v17230_v25, %v6750_v1  ;;  %v13195_v1 = vld [vmem:[%s18062_s6] ss:$0 sm:$0xff] }
0x2f0c   :  { %v17254_v41 = vsub.f32 %v17233_v51, %v6749_v0  ;;  %v4873_v50 = vpop.xlane.xlu1 %4872 }
0x2f0d   :  { %v4875_v34 = vmul.f32 0.032258064, %v4873_v50  ;;  %v4870_v53 = vpop.xlane.xlu0 %4869  ;;  %v6754_v36 = vmul.f32 %v17251_v45, %v17251_v45  ;;  %v6785_v44 = vmul.f32 %v13195_v1, %v17251_v45 }
0x2f0e   :  { %v4874_v54 = vmul.f32 0.032258064, %v4870_v53  ;;  %v6753_v37 = vmul.f32 %v17254_v41, %v17254_v41  ;;  %v6784_v50 = vmul.f32 %v13195_v1, %v17254_v41 }
0x2f0f   :  { %14971 = vrsqrt.f32 %v4875_v34  ;;  %v6758_v55 = vsel %vm683_vm0, %v6754_v36, 0.0  ;;  %vm4885_vm7 = vcmp.eq.f32.partialorder %v4875_v34, inf  ;;  %v4888_v58 = vand.u32 2147483648, %v4875_v34  ;;  %v13196_v36 = vld [vmem:[%s18063_s18] ss:$0 sm:$0xff] }
0x2f10   :  { %14973 = vrsqrt.f32 %v4874_v54  ;;  %v6755_v56 = vsel %vm683_vm0, %v6753_v37, 0.0  ;;  %6759 = vadd.xlane.f32.xlu1 %v6758_v55  ;;  %vm4887_vm9 = vcmp.eq.f32.partialorder %v4875_v34, 0.0  ;;  %vm4878_vm11 = vcmp.eq.f32.partialorder %v4874_v54, inf }
0x2f11   :  { %6756 = vadd.xlane.f32.xlu0 %v6755_v56  ;;  %v4881_v14 = vand.u32 2147483648, %v4874_v54  ;;  %vm4880_vm12 = vcmp.eq.f32.partialorder %v4874_v54, 0.0  ;;  %v13200_v56 = vld [vmem:[%s18064_s22] ss:$0 sm:$0xff] }
0x2f19   :  { %v14972_v23 = vpop.eup %14971 }
0x2f1a   :  { %v14974_v18 = vpop.eup %14973  ;;  %v4884_v57 = vmul.f32 %v14972_v23, %v4875_v34 }
0x2f1b   :  { %v4877_v30 = vmul.f32 %v14974_v18, %v4874_v54 }
0x2f1c   :  { %v4886_v59 = vsel %vm4885_vm7, %v4875_v34, %v4884_v57  ;;  %v13197_v57 = vld [vmem:[%s18065_s28] ss:$0 sm:$0xff] }
0x2f1d   :  { %v4889_v6 = vsel %vm4887_vm9, %v4888_v58, %v4886_v59  ;;  %v4879_v16 = vsel %vm4878_vm11, %v4874_v54, %v4877_v30 }
0x2f1e   :  { %v4900_v47 = vadd.f32 1e-06, %v4889_v6  ;;  %v4882_v31 = vsel %vm4880_vm12, %v4881_v14, %v4879_v16 }
0x2f1f   :  { %v4899_v52 = vadd.f32 1e-06, %v4882_v31 }
0x2f20   :  { %14975 = vrcp.f32 %v4900_v47 }
0x2f21   :  { %14977 = vrcp.f32 %v4899_v52 }
0x2f2a   :  { %v14976_v9 = vpop.eup %14975 }
0x2f2b   :  { %v14978_v13 = vpop.eup %14977  ;;  %v4904_v20 = vmul.f32 %v14976_v9, %v4898_v63 }
0x2f2c   :  { %v4902_v3 = vmul.f32 %v14978_v13, %v4897_v2 }
0x2f2d   :  { %v17266_v5 = vadd.f32 %v13156_v33, %v4904_v20 }
0x2f2e   :  { %v17264_v4 = vadd.f32 %v13156_v33, %v4902_v3 }
0x2f30   :  { %14121 = vmatprep.mubr.msk.f32.mxu0 %vm683_vm0, %v17264_v4 }
0x2f31   :  { %14122 = vmatmul.mubr.msk.f32.vlgmr.msra.gmra.mrb[46].mxu0 %vm683_vm0, %v17266_v5 }
0x2f32   :  { %14136 = vmatprep.mubr.msk.f32.mxu0 %vm16013_vm5, %v16012_v46 }
0x2f9d   :  { %v6760_v49 = vpop.xlane.xlu1 %6759 }
0x2f9e   :  { %v6757_v62 = vpop.xlane.xlu0 %6756  ;;  %v6762_v24 = vmul.f32 0.032258064, %v6760_v49 }
0x2f9f   :  { %v6761_v11 = vmul.f32 0.032258064, %v6757_v62 }
0x2fa0   :  { %14979 = vrsqrt.f32 %v6762_v24  ;;  %vm6772_vm13 = vcmp.eq.f32.partialorder %v6762_v24, inf  ;;  %v6775_v17 = vand.u32 2147483648, %v6762_v24  ;;  %vm6774_vm14 = vcmp.eq.f32.partialorder %v6762_v24, 0.0 }
0x2fa1   :  { %14981 = vrsqrt.f32 %v6761_v11  ;;  %vm6765_vm1 = vcmp.eq.f32.partialorder %v6761_v11, inf  ;;  %v6768_v35 = vand.u32 2147483648, %v6761_v11  ;;  %vm6767_vm2 = vcmp.eq.f32.partialorder %v6761_v11, 0.0 }
0x2faa   :  { %v14980_v26 = vpop.eup %14979 }
0x2fab   :  { %v14982_v28 = vpop.eup %14981  ;;  %v6771_v29 = vmul.f32 %v14980_v26, %v6762_v24 }
0x2fac   :  { %v6764_v15 = vmul.f32 %v14982_v28, %v6761_v11 }
0x2fad   :  { %v6773_v32 = vsel %vm6772_vm13, %v6762_v24, %v6771_v29 }
0x2fae   :  { %v6776_v38 = vsel %vm6774_vm14, %v6775_v17, %v6773_v32  ;;  %v6766_v39 = vsel %vm6765_vm1, %v6761_v11, %v6764_v15 }
0x2faf   :  { %v6787_v40 = vadd.f32 1e-06, %v6776_v38  ;;  %v6769_v42 = vsel %vm6767_vm2, %v6768_v35, %v6766_v39 }
0x2fb0   :  { %v6786_v43 = vadd.f32 1e-06, %v6769_v42 }
0x2fb1   :  { %14983 = vrcp.f32 %v6787_v40 }
0x2fb2   :  { %14985 = vrcp.f32 %v6786_v43 }
0x2fbb   :  { %v14984_v0 = vpop.eup %14983 }
0x2fbc   :  { %v14986_v34 = vpop.eup %14985  ;;  %v6791_v53 = vmul.f32 %v14984_v0, %v6785_v44 }
0x2fbd   :  { %v6789_v54 = vmul.f32 %v14986_v34, %v6784_v50 }
0x2fbe   :  { %v6800_v55 = vadd.f32 %v13196_v36, %v6791_v53 }
0x2fbf   :  { %v6799_v37 = vadd.f32 %v13196_v36, %v6789_v54 }
0x2fc1   :  { %14110 = vmatprep.mubr.msk.f32.mxu1 %vm683_vm0, %v6799_v37 }
0x2fc2   :  { %14111 = vmatmul.mubr.msk.f32.vlgmr.msra.gmra.mrb[70].mxu1 %vm683_vm0, %v6800_v55 }
0x2fc3   :  { %14126 = vmatprep.mubr.msk.f32.mxu1 %vm16013_vm5, %v16012_v46 }
0x3004   :  { %v14123_v23 = vpop.f32.mrb[46].mxu0 }
0x3005   :  { %v17288_v45 = vadd.f32 %v14123_v23, %v13200_v56  ;;  %v6976_v18 = vpop.f32.mrb[47].mxu0 }
0x3006   :  { %v17290_v41 = vadd.f32 %v13200_v56, %v6976_v18 }
0x3007   :  { %7396 = vrot.lane.b32.xlu1 %v17288_v45, %s16017_s21 }
0x3008   :  { %14125 = vmatpush3.xpose.msk.msra.mxu1 %vm841_vm6, %v17290_v41 }
0x3009   :  { %14129 = vmatprep.subr.mxu1 %v16012_v46 }
0x3079   :  { %v7397_v19 = vpop.permute.xlu1 %7396 }
0x3095   :  { %v14112_v58 = vpop.f32.mrb[70].mxu1 }
0x3096   :  { %v6884_v30 = vpop.f32.mrb[71].mxu1  ;;  %v17306_v14 = vadd.f32 %v14112_v58, %v13197_v57 }
0x3097   :  { %v17298_v59 = vadd.f32 %v13197_v57, %v6884_v30 }
0x3099   :  { %14127 = vmatmul.mubr.msk.f32.vlgmr.msra.gmra.mrb[72].mxu1 %vm841_vm6, %v17298_v59 }
0x309a   :  { %14130 = vmatpush3.xpose.msk.msra.mxu1 %vm841_vm6, %v17288_v45  ;;  %14131 = vmatprep.mubr.msk.f32.mxu1 %vm16013_vm5, %v16012_v46 }
0x309b   :  { %14139 = vmatprep.subr.mxu1 %v16012_v46 }
0x309d   :  { %14132 = vmatmul.mubr.msk.f32.vlgmr.msra.gmra.mrb[74].mxu1 %vm841_vm6, %v17306_v14 }
0x309e   :  { %14141 = vmatprep.mubr.msk.f32.mxu1 %vm16013_vm5, %v16012_v46 }
0x316c   :  { %v7057_v6 = vpop.f32.mrb[72].mxu1 }
0x316d   :  { %v14128_v16 = vpop.f32.mrb[73].mxu1  ;;  %v7137_v7 = vmul.f32 0.35355338, %v7057_v6 }
0x316f   :  { %v7139_v10 = vsel %vm1005_vm10, -1e+09, %v7137_v7 }
0x3170   :  { %v7133_v47 = vpop.f32.mrb[74].mxu1  ;;  %v7141_v12 = vsel %vm841_vm6, %v7139_v10, -inf }
0x3171   :  { %v7138_v31 = vmul.f32 0.35355338, %v7133_v47  ;;  %v14133_v52 = vpop.f32.mrb[75].mxu1 }
0x3173   :  { %v7140_v60 = vsel %vm1006_vm8, -1e+09, %v7138_v31 }
0x3174   :  { %v7144_v63 = vsel %vm841_vm6, %v7140_v60, -inf }
0x3175   :  { %7145 = vmax.xlane.f32.xlu0 %v7144_v63 }
0x318b   :  { %7239 = vrot.lane.b32.xlu0 %v17288_v45, %s16014_s24 }
0x3202   :  { %v7146_v9 = vpop.xlane.xlu0 %7145 }
0x3203   :  { %v7148_v2 = vsub.f32 %v7140_v60, %v7146_v9 }
0x3205   :  { %v7151_v13 = vmul.f32 1.442695, %v7148_v2 }
0x3206   :  { %v7240_v20 = vpop.permute.xlu0 %7239 }
0x3207   :  { %14987 = vpow2.f32 %v7151_v13  ;;  %14140 = vmatpush3.msra.mxu1 %v7240_v20 }
0x3208   :  { %14149 = vmatprep.subr.mxu1 %v16012_v46 }
0x3211   :  { %v14988_v33 = vpop.eup %14987 }
0x3212   :  { %v7156_v3 = vsel %vm841_vm6, %v14988_v33, 0.0 }
0x3213   :  { %7157 = vadd.xlane.f32.xlu1 %v7156_v3 }
0x3224   :  { %7394 = vrot.lane.b32.xlu1 %v17306_v14, %s16017_s21 }
0x3248   :  { %7142 = vmax.xlane.f32.xlu1 %v7141_v12 }
0x3259   :  { %7318 = vrot.lane.b32.xlu1 %v17290_v41, %s16017_s21 }
0x325d   :  { %7316 = vrot.lane.b32.xlu1 %v17298_v59, %s16017_s21 }
0x3261   :  { %7815 = vrot.lane.b32.xlu1 %v17290_v41, %s16021_s8 }
0x32a0   :  { %v7158_v48 = vpop.xlane.xlu1 %7157 }
0x32a1   :  { %14989 = vrcp.f32 %v7158_v48 }
0x32a4   :  { %v7395_v62 = vpop.permute.xlu1 %7394 }
0x32ab   :  { %v14990_v21 = vpop.eup %14989 }
0x32ac   :  { %v7162_v49 = vmul.f32 %v14990_v21, %v14988_v33 }
0x32ae   :  { %14142 = vmatmul.mubr.msk.f32.vlgmr.msra.gmra.mrb[76].mxu1 %vm841_vm6, %v7162_v49 }
0x32af   :  { %14150 = vmatpush3.xpose.msk.msra.mxu1 %vm841_vm6, %v7397_v19  ;;  %14151 = vmatprep.mubr.msk.f32.mxu1 %vm16013_vm5, %v16012_v46 }
0x32b0   :  { %14159 = vmatprep.subr.mxu1 %v16012_v46 }
0x32b2   :  { %14152 = vmatmul.mubr.msk.f32.vlgmr.msra.gmra.mrb[78].mxu1 %vm841_vm6, %v7395_v62 }
0x32b3   :  { %14161 = vmatprep.mubr.msk.f32.mxu1 %vm16013_vm5, %v16012_v46 }
0x32d5   :  { %v7143_v24 = vpop.xlane.xlu1 %7142 }
0x32d6   :  { %v7147_v11 = vsub.f32 %v7139_v10, %v7143_v24 }
0x32d8   :  { %v7149_v26 = vmul.f32 1.442695, %v7147_v11 }
0x32d9   :  { %v7319_v35 = vpop.permute.xlu1 %7318 }
0x32da   :  { %14991 = vpow2.f32 %v7149_v26 }
0x32dd   :  { %v7317_v42 = vpop.permute.xlu1 %7316 }
0x32e1   :  { %v7816_v16 = vpop.permute.xlu1 %7815 }
0x32e4   :  { %v14992_v28 = vpop.eup %14991 }
0x32e5   :  { %v7153_v29 = vsel %vm841_vm6, %v14992_v28, 0.0 }
0x32e6   :  { %7154 = vadd.xlane.f32.xlu0 %v7153_v29 }
0x32fc   :  { %7163 = vrot.lane.b32.xlu0 %v17290_v41, %s16014_s24 }
0x3373   :  { %v7155_v17 = vpop.xlane.xlu0 %7154 }
0x3374   :  { %14993 = vrcp.f32 %v7155_v17 }
0x3377   :  { %v7164_v15 = vpop.permute.xlu0 %7163 }
0x3378   :  { %14135 = vmatpush3.msra.mxu0 %v7164_v15 }
0x3379   :  { %14144 = vmatprep.subr.mxu0 %v16012_v46 }
0x337e   :  { %v14994_v32 = vpop.eup %14993 }
0x337f   :  { %v7161_v38 = vmul.f32 %v14994_v32, %v14992_v28 }
0x3381   :  { %14137 = vmatmul.mubr.msk.f32.vlgmr.msra.gmra.mrb[48].mxu0 %vm841_vm6, %v7161_v38  ;;  %v17344_v39 = vpop.f32.mrb[76].mxu1  ;;  %v7315_v38 = vld [vmem:[%s18066_s17] sm:$0xff] }
0x3382   :  { %14145 = vmatpush3.xpose.msk.msra.mxu0 %vm841_vm6, %v7319_v35  ;;  %v14143_v40 = vpop.f32.mrb[77].mxu1  ;;  %14146 = vmatprep.mubr.msk.f32.mxu0 %vm16013_vm5, %v16012_v46  ;;  %v7650_v35 = vld [vmem:[%s18066_s17 + $0x8] sm:$0xff] }
0x3383   :  { %14154 = vmatprep.subr.mxu0 %v16012_v46 }
0x3385   :  { %14147 = vmatmul.mubr.msk.f32.vlgmr.msra.gmra.mrb[50].mxu0 %vm841_vm6, %v7317_v42  ;;  %v7468_v43 = vpop.f32.mrb[78].mxu1 }
0x3386   :  { %v7473_v1 = vmul.f32 0.35355338, %v7468_v43  ;;  %v14153_v44 = vpop.f32.mrb[79].mxu1  ;;  %14156 = vmatprep.mubr.msk.f32.mxu0 %vm16013_vm5, %v16012_v46 }
0x3388   :  { %v7475_v0 = vsel %vm1006_vm8, -1e+09, %v7473_v1 }
0x3389   :  { %v7479_v50 = vsel %vm841_vm6, %v7475_v0, -inf }
0x338a   :  { %7480 = vmax.xlane.f32.xlu0 %v7479_v50 }
0x33a0   :  { %7574 = vrot.lane.b32.xlu0 %v17288_v45, %s16016_s13 }
0x33a4   :  { %7813 = vrot.lane.b32.xlu0 %v17298_v59, %s16021_s8 }
0x33a8   :  { %7891 = vrot.lane.b32.xlu0 %v17306_v14, %s16021_s8 }
0x3417   :  { %v7481_v34 = vpop.xlane.xlu0 %7480 }
0x3418   :  { %v7483_v53 = vsub.f32 %v7475_v0, %v7481_v34 }
0x341a   :  { %v7486_v36 = vmul.f32 1.442695, %v7483_v53 }
0x341b   :  { %v7575_v54 = vpop.permute.xlu0 %7574 }
0x341c   :  { %14995 = vpow2.f32 %v7486_v36  ;;  %14160 = vmatpush3.msra.mxu1 %v7575_v54 }
0x341d   :  { %14174 = vmatprep.subr.mxu1 %v16012_v46 }
0x341f   :  { %v7814_v60 = vpop.permute.xlu0 %7813 }
0x3423   :  { %v7892_v9 = vpop.permute.xlu0 %7891 }
0x3426   :  { %v14996_v37 = vpop.eup %14995 }
0x3427   :  { %v7491_v55 = vsel %vm841_vm6, %v14996_v37, 0.0 }
0x3428   :  { %7492 = vadd.xlane.f32.xlu1 %v7491_v55 }
0x3439   :  { %7893 = vrot.lane.b32.xlu1 %v17288_v45, %s16021_s8 }
0x3454   :  { %v17366_v56 = vpop.f32.mrb[48].mxu0 }
0x3455   :  { %v14138_v23 = vpop.f32.mrb[49].mxu0 }
0x3456   :  { %v8147_v23 = vld [vmem:[%s18066_s17 + $0x10] sm:$0xff] }
0x3458   :  { %v7390_v18 = vpop.f32.mrb[50].mxu0 }
0x3459   :  { %v7472_v57 = vmul.f32 0.35355338, %v7390_v18  ;;  %v14148_v58 = vpop.f32.mrb[51].mxu0 }
0x345b   :  { %v7474_v30 = vsel %vm1005_vm10, -1e+09, %v7472_v57 }
0x345c   :  { %v7476_v6 = vsel %vm841_vm6, %v7474_v30, -inf }
0x345d   :  { %7477 = vmax.xlane.f32.xlu1 %v7476_v6 }
0x34b5   :  { %v7493_v47 = vpop.xlane.xlu1 %7492 }
0x34b6   :  { %14997 = vrcp.f32 %v7493_v47 }
0x34b9   :  { %v7894_v63 = vpop.permute.xlu1 %7893 }
0x34c0   :  { %v14998_v31 = vpop.eup %14997 }
0x34c1   :  { %v7497_v52 = vmul.f32 %v14998_v31, %v14996_v37 }
0x34c3   :  { %14162 = vmatmul.mubr.msk.f32.vlgmr.msra.gmra.mrb[80].mxu1 %vm841_vm6, %v7497_v52 }
0x34c4   :  { %14175 = vmatpush3.xpose.msk.msra.mxu1 %vm841_vm6, %v7816_v16  ;;  %14176 = vmatprep.mubr.msk.f32.mxu1 %vm16013_vm5, %v16012_v46 }
0x34c5   :  { %14179 = vmatprep.subr.mxu1 %v16012_v46 }
0x34c7   :  { %14177 = vmatmul.mubr.msk.f32.vlgmr.msra.gmra.mrb[82].mxu1 %vm841_vm6, %v7814_v60 }
0x34c8   :  { %14180 = vmatpush3.xpose.msk.msra.mxu1 %vm841_vm6, %v7894_v63  ;;  %14181 = vmatprep.mubr.msk.f32.mxu1 %vm16013_vm5, %v16012_v46 }
0x34c9   :  { %14189 = vmatprep.subr.mxu1 %v16012_v46 }
0x34cb   :  { %14182 = vmatmul.mubr.msk.f32.vlgmr.msra.gmra.mrb[84].mxu1 %vm841_vm6, %v7892_v9 }
0x34cc   :  { %14191 = vmatprep.mubr.msk.f32.mxu1 %vm16013_vm5, %v16012_v46 }
0x34ea   :  { %v7478_v2 = vpop.xlane.xlu1 %7477 }
0x34eb   :  { %v7482_v13 = vsub.f32 %v7474_v30, %v7478_v2 }
0x34ed   :  { %v7484_v20 = vmul.f32 1.442695, %v7482_v13 }
0x34ef   :  { %14999 = vpow2.f32 %v7484_v20 }
0x34f9   :  { %v15000_v33 = vpop.eup %14999 }
0x34fa   :  { %v7488_v3 = vsel %vm841_vm6, %v15000_v33, 0.0 }
0x34fb   :  { %7489 = vadd.xlane.f32.xlu0 %v7488_v3 }
0x3511   :  { %7498 = vrot.lane.b32.xlu0 %v17290_v41, %s16016_s13 }
0x3515   :  { %8071 = vrot.lane.b32.xlu0 %v17288_v45, %s16018_s27 }
0x3519   :  { %8233 = vrot.lane.b32.xlu0 %v17290_v41, %s16024_s0 }
0x351d   :  { %8311 = vrot.lane.b32.xlu0 %v17288_v45, %s16024_s0 }
0x3521   :  { %8231 = vrot.lane.b32.xlu0 %v17298_v59, %s16024_s0 }
0x3588   :  { %v7490_v7 = vpop.xlane.xlu0 %7489 }
0x3589   :  { %15001 = vrcp.f32 %v7490_v7 }
0x358c   :  { %v7499_v10 = vpop.permute.xlu0 %7498 }
0x358d   :  { %14155 = vmatpush3.msra.mxu0 %v7499_v10 }
0x358e   :  { %14164 = vmatprep.subr.mxu0 %v7650_v35 }
0x3590   :  { %v8072_v12 = vpop.permute.xlu0 %8071 }
0x3591   :  { %14190 = vmatpush3.msra.mxu1 %v8072_v12 }
0x3592   :  { %14199 = vmatprep.subr.mxu1 %v16012_v46 }
0x3593   :  { %v15002_v19 = vpop.eup %15001 }
0x3594   :  { %v7496_v48 = vmul.f32 %v15002_v19, %v15000_v33  ;;  %v8234_v57 = vpop.permute.xlu0 %8233 }
0x3596   :  { %14157 = vmatmul.mubr.msk.f32.vlgmr.msra.gmra.mrb[52].mxu0 %vm841_vm6, %v7496_v48  ;;  %v7646_v21 = vpop.f32.mrb[80].mxu1 }
0x3597   :  { %v14163_v49 = vpop.f32.mrb[81].mxu1  ;;  %14165 = vmatpush3.msra.mxu0 %v7650_v35 }
0x3598   :  { %14169 = vmatprep.subr.mxu0 %v7315_v38  ;;  %v8312_v6 = vpop.permute.xlu0 %8311 }
0x359a   :  { %v7887_v62 = vpop.f32.mrb[82].mxu1 }
0x359b   :  { %v7969_v24 = vmul.f32 0.35355338, %v7887_v62  ;;  %v14178_v11 = vpop.f32.mrb[83].mxu1 }
0x359c   :  { %v8232_v16 = vpop.permute.xlu0 %8231 }
0x359d   :  { %v7971_v59 = vsel %vm1005_vm10, -1e+09, %v7969_v24 }
0x359e   :  { %v7965_v26 = vpop.f32.mrb[84].mxu1  ;;  %v7973_v28 = vsel %vm841_vm6, %v7971_v59, -inf }
0x359f   :  { %v7970_v29 = vmul.f32 0.35355338, %v7965_v26  ;;  %7974 = vmax.xlane.f32.xlu1 %v7973_v28  ;;  %v14183_v17 = vpop.f32.mrb[85].mxu1 }
0x35a1   :  { %v7972_v15 = vsel %vm1006_vm8, -1e+09, %v7970_v29 }
0x35a2   :  { %v7976_v32 = vsel %vm841_vm6, %v7972_v15, -inf }
0x35a3   :  { %7977 = vmax.xlane.f32.xlu1 %v7976_v32 }
0x362c   :  { %v7975_v40 = vpop.xlane.xlu1 %7974 }
0x362d   :  { %v7979_v42 = vsub.f32 %v7971_v59, %v7975_v40 }
0x362f   :  { %v7981_v43 = vmul.f32 1.442695, %v7979_v42 }
0x3630   :  { %v7978_v1 = vpop.xlane.xlu1 %7977 }
0x3631   :  { %15003 = vpow2.f32 %v7981_v43  ;;  %v7980_v44 = vsub.f32 %v7972_v15, %v7978_v1  ;;  %v8565_v43 = vld [vmem:[%s18066_s17 + $0x18] sm:$0xff] }
0x3633   :  { %v7983_v0 = vmul.f32 1.442695, %v7980_v44 }
0x3635   :  { %15005 = vpow2.f32 %v7983_v0 }
0x363b   :  { %v15004_v50 = vpop.eup %15003 }
0x363c   :  { %v7985_v34 = vsel %vm841_vm6, %v15004_v50, 0.0 }
0x363d   :  { %7986 = vadd.xlane.f32.xlu1 %v7985_v34 }
0x363f   :  { %v15006_v53 = vpop.eup %15005 }
0x3640   :  { %v7988_v36 = vsel %vm841_vm6, %v15006_v53, 0.0 }
0x3641   :  { %7989 = vadd.xlane.f32.xlu1 %v7988_v36 }
0x3652   :  { %7995 = vrot.lane.b32.xlu1 %v17290_v41, %s16018_s27 }
0x3656   :  { %8309 = vrot.lane.b32.xlu1 %v17306_v14, %s16024_s0 }
0x3669   :  { %v7570_v54 = vpop.f32.mrb[52].mxu0 }
0x366a   :  { %v14158_v37 = vpop.f32.mrb[53].mxu0  ;;  %14166 = vmatprep.mubr.msk.f32.mxu0 %vm841_vm6, %v7570_v54 }
0x366b   :  { %14167 = vmatmul.mubr.msk.f32.vlgmr.msra.gmra.mrb[54].mxu0 %vm841_vm6, %v7646_v21 }
0x366c   :  { %14171 = vmatprep.mubr.msk.f32.mxu0 %vm841_vm6, %v17366_v56  ;;  %14170 = vmatpush3.msra.mxu0 %v7315_v38 }
0x366d   :  { %14184 = vmatprep.subr.mxu0 %v16012_v46 }
0x3673   :  { %14172 = vmatmul.mubr.msk.f32.vlgmr.msra.gmra.mrb[54].mxu0 %vm841_vm6, %v17344_v39 }
0x3674   :  { %14186 = vmatprep.mubr.msk.f32.mxu0 %vm16013_vm5, %v16012_v46 }
0x36ca   :  { %v7987_v55 = vpop.xlane.xlu1 %7986 }
0x36cb   :  { %15007 = vrcp.f32 %v7987_v55 }
0x36ce   :  { %v7990_v14 = vpop.xlane.xlu1 %7989 }
0x36cf   :  { %15009 = vrcp.f32 %v7990_v14 }
0x36d2   :  { %v7996_v18 = vpop.permute.xlu1 %7995 }
0x36d3   :  { %14185 = vmatpush3.msra.mxu0 %v7996_v18 }
0x36d4   :  { %14194 = vmatprep.subr.mxu0 %v8147_v23 }
0x36d5   :  { %v15008_v58 = vpop.eup %15007 }
0x36d6   :  { %v7993_v56 = vmul.f32 %v15008_v58, %v15004_v50  ;;  %v8310_v63 = vpop.permute.xlu1 %8309  ;;  %v13235_v50 = vld [vmem:[%s18067_s25] ss:$0 sm:$0xff] }
0x36d8   :  { %14187 = vmatmul.mubr.msk.f32.vlgmr.msra.gmra.mrb[56].mxu0 %vm841_vm6, %v7993_v56 }
0x36d9   :  { %v15010_v30 = vpop.eup %15009  ;;  %14195 = vmatpush3.msra.mxu0 %v8147_v23 }
0x36da   :  { %v7994_v39 = vmul.f32 %v15010_v30, %v15006_v53  ;;  %14204 = vmatprep.subr.mxu0 %v16012_v46 }
0x36dc   :  { %14192 = vmatmul.mubr.msk.f32.vlgmr.msra.gmra.mrb[86].mxu1 %vm841_vm6, %v7994_v39 }
0x36dd   :  { %14200 = vmatpush3.xpose.msk.msra.mxu1 %vm841_vm6, %v8234_v57  ;;  %14201 = vmatprep.mubr.msk.f32.mxu1 %vm16013_vm5, %v16012_v46 }
0x36de   :  { %14209 = vmatprep.subr.mxu1 %v16012_v46 }
0x36e0   :  { %14202 = vmatmul.mubr.msk.f32.vlgmr.msra.gmra.mrb[88].mxu1 %vm841_vm6, %v8232_v16 }
0x36e1   :  { %14211 = vmatprep.mubr.msk.f32.mxu1 %vm16013_vm5, %v16012_v46 }
0x37ab   :  { %v8067_v47 = vpop.f32.mrb[56].mxu0 }
0x37ac   :  { %v14188_v31 = vpop.f32.mrb[57].mxu0  ;;  %14196 = vmatprep.mubr.msk.f32.mxu0 %vm841_vm6, %v8067_v47  ;;  %v8718_v47 = vld [vmem:[%s18068_s9] sm:$0xff] }
0x37ad   :  { %v8719_v31 = vld [vmem:[%s18068_s9 + $0x8] sm:$0xff] }
0x37af   :  { %v8143_v52 = vpop.f32.mrb[86].mxu1 }
0x37b0   :  { %v14193_v60 = vpop.f32.mrb[87].mxu1  ;;  %14197 = vmatmul.mubr.msk.f32.vlgmr.msra.gmra.mrb[54].mxu0 %vm841_vm6, %v8143_v52  ;;  %v8720_v52 = vld [vmem:[%s18068_s9 + $0x10] sm:$0xff] }
0x37b1   :  { %14205 = vmatpush3.xpose.msk.msra.mxu0 %vm841_vm6, %v8312_v6  ;;  %14206 = vmatprep.mubr.msk.f32.mxu0 %vm16013_vm5, %v16012_v46  ;;  %v14605_v60 = vpack.c.bf16 %v8719_v31, %v8718_v47 }
0x37b2   :  { %14214 = vmatprep.subr.mxu0 %v16012_v46 }
0x37b3   :  { %v8305_v9 = vpop.f32.mrb[88].mxu1 }
0x37b4   :  { %v8387_v2 = vmul.f32 0.35355338, %v8305_v9  ;;  %v14203_v13 = vpop.f32.mrb[89].mxu1  ;;  %14207 = vmatmul.mubr.msk.f32.vlgmr.msra.gmra.mrb[58].mxu0 %vm841_vm6, %v8310_v63  ;;  %v8721_v63 = vld [vmem:[%s18068_s9 + $0x18] sm:$0xff] }
0x37b5   :  { %14216 = vmatprep.mubr.msk.f32.mxu0 %vm16013_vm5, %v16012_v46  ;;  %v14609_v9 = vpack.c.bf16 %v8721_v63, %v8720_v52  ;;  %v8813_v13 = vld [vmem:[%s18069_s2 + $0x8] sm:$0xff] }
0x37b6   :  { %v8389_v20 = vsel %vm1005_vm10, -1e+09, %v8387_v2  ;;  %v8812_v2 = vld [vmem:[%s18069_s2] sm:$0xff] }
0x37b7   :  { %v8391_v33 = vsel %vm841_vm6, %v8389_v20, -inf }
0x37b8   :  { %8392 = vmax.xlane.f32.xlu0 %v8391_v33  ;;  %v14613_v33 = vpack.c.bf16 %v8813_v13, %v8812_v2 }
0x3845   :  { %v8393_v3 = vpop.xlane.xlu0 %8392 }
0x3846   :  { %v8397_v7 = vsub.f32 %v8389_v20, %v8393_v3  ;;  %v8814_v20 = vld [vmem:[%s18069_s2 + $0x10] sm:$0xff]  ;;  %v8815_v3 = vld [vmem:[%s18069_s2 + $0x18] sm:$0xff] }
0x3848   :  { %v8399_v10 = vmul.f32 1.442695, %v8397_v7  ;;  %v14617_v7 = vpack.c.bf16 %v8815_v3, %v8814_v20 }
0x384a   :  { %15011 = vpow2.f32 %v8399_v10  ;;  %v8816_v10 = vld [vmem:[%s18069_s2 + $0x20] sm:$0xff] }
0x3854   :  { %v15012_v12 = vpop.eup %15011 }
0x3855   :  { %v8403_v19 = vsel %vm841_vm6, %v15012_v12, 0.0 }
0x3856   :  { %8404 = vadd.xlane.f32.xlu0 %v8403_v19 }
0x3887   :  { %v8383_v48 = vpop.f32.mrb[58].mxu0 }
0x3888   :  { %v8388_v21 = vmul.f32 0.35355338, %v8383_v48  ;;  %v14208_v49 = vpop.f32.mrb[59].mxu0 }
0x388a   :  { %v8390_v62 = vsel %vm1006_vm8, -1e+09, %v8388_v21 }
0x388b   :  { %v8394_v24 = vsel %vm841_vm6, %v8390_v62, -inf }
0x388c   :  { %8395 = vmax.xlane.f32.xlu1 %v8394_v24 }
0x389d   :  { %8489 = vrot.lane.b32.xlu1 %v17288_v45, %s16023_s12 }
0x38e3   :  { %v8405_v15 = vpop.xlane.xlu0 %8404 }
0x3919   :  { %v8396_v11 = vpop.xlane.xlu1 %8395 }
0x391a   :  { %v8398_v59 = vsub.f32 %v8390_v62, %v8396_v11 }
0x391c   :  { %v8401_v26 = vmul.f32 1.442695, %v8398_v59 }
0x391d   :  { %v8490_v28 = vpop.permute.xlu1 %8489 }
0x391e   :  { %15013 = vpow2.f32 %v8401_v26  ;;  %14215 = vmatpush3.msra.mxu0 %v8490_v28 }
0x391f   :  { %15015 = vrcp.f32 %v8405_v15  ;;  %14219 = vmatprep.subr.mxu0 %v8565_v43 }
0x3928   :  { %v15014_v29 = vpop.eup %15013 }
0x3929   :  { %v8406_v17 = vsel %vm841_vm6, %v15014_v29, 0.0  ;;  %v15016_v35 = vpop.eup %15015 }
0x392a   :  { %8407 = vadd.xlane.f32.xlu0 %v8406_v17  ;;  %v8411_v38 = vmul.f32 %v15016_v35, %v15012_v12  ;;  %v8817_v12 = vld [vmem:[%s18069_s2 + $0x28] sm:$0xff] }
0x392b   :  { %v14621_v19 = vpack.c.bf16 %v8817_v12, %v8816_v10  ;;  %v8968_v12 = vld [vmem:[%s18074_s10] sm:$0xff] }
0x3940   :  { %8413 = vrot.lane.b32.xlu0 %v17290_v41, %s16023_s12 }
0x39b7   :  { %v8408_v32 = vpop.xlane.xlu0 %8407 }
0x39b8   :  { %15017 = vrcp.f32 %v8408_v32 }
0x39bb   :  { %v8414_v45 = vpop.permute.xlu0 %8413 }
0x39bc   :  { %14210 = vmatpush3.msra.mxu1 %v8414_v45 }
0x39bd   :  { %14212 = vmatmul.mubr.msk.f32.vlgmr.msra.gmra.mrb[90].mxu1 %vm841_vm6, %v8411_v38  ;;  %14606 = vmatprep.subr.bf16.mxu1 %v14605_v60 }
0x39be   :  { %14608 = vmatpush3.bf16.msra.mxu1 %v14605_v60 }
0x39bf   :  { %14610 = vmatprep.subr.bf16.mxu1 %v14609_v9 }
0x39c2   :  { %v15018_v40 = vpop.eup %15017  ;;  %14612 = vmatpush3.bf16.msra.mxu1 %v14609_v9 }
0x39c3   :  { %v8412_v42 = vmul.f32 %v15018_v40, %v15014_v29  ;;  %v13236_v40 = vld [vmem:[%s18070_s3] ss:$0 sm:$0xff] }
0x39c5   :  { %14217 = vmatmul.mubr.msk.f32.vlgmr.msra.gmra.mrb[60].mxu0 %vm841_vm6, %v8412_v42 }
0x39c6   :  { %14220 = vmatpush3.msra.mxu0 %v8565_v43 }
0x39c7   :  { %14614 = vmatprep.subr.bf16.mxu0 %v14613_v33 }
0x3a90   :  { %v8485_v1 = vpop.f32.mrb[90].mxu1 }
0x3a91   :  { %v14213_v41 = vpop.f32.mrb[91].mxu1  ;;  %14221 = vmatprep.mubr.msk.f32.mxu0 %vm841_vm6, %v8485_v1 }
0x3a98   :  { %v8561_v44 = vpop.f32.mrb[60].mxu0 }
0x3a99   :  { %v14218_v0 = vpop.f32.mrb[61].mxu0  ;;  %14222 = vmatmul.mubr.msk.f32.vlgmr.msra.gmra.mrb[54].mxu0 %vm841_vm6, %v8561_v44 }
0x3a9a   :  { %14616 = vmatpush3.bf16.msra.mxu0 %v14613_v33  ;;  %v13237_v0 = vld [vmem:[%s18071_s29] ss:$0 sm:$0xff] }
0x3a9b   :  { %14618 = vmatprep.subr.bf16.mxu0 %v14617_v7 }
0x3a9e   :  { %14620 = vmatpush3.bf16.msra.mxu0 %v14617_v7 }
0x3a9f   :  { %14622 = vmatprep.subr.bf16.mxu0 %v14621_v19 }
0x3aa2   :  { %14624 = vmatpush3.bf16.msra.mxu0 %v14621_v19  ;;  %v8969_v19 = vld [vmem:[%s18074_s10 + $0x8] sm:$0xff] }
0x3b6c   :  { %v14223_v34 = vpop.f32.mrb[54].mxu0 }
0x3b6d   :  { %v8657_v53 = vadd.f32 %v14223_v34, %v13235_v50  ;;  %v8638_v36 = vpop.f32.mrb[55].mxu0 }
0x3b6e   :  { %v8656_v54 = vadd.f32 %v13235_v50, %v8638_v36  ;;  %v8818_v36 = vld [vmem:[%s18069_s2 + $0x30] sm:$0xff] }
0x3b6f   :  { %v17459_v37 = vadd.f32 %v8657_v53, %v17230_v25 }
0x3b70   :  { %v17462_v55 = vadd.f32 %v8656_v54, %v17233_v51  ;;  %v8819_v54 = vld [vmem:[%s18069_s2 + $0x38] sm:$0xff] }
0x3b71   :  { %v8663_v14 = vsel %vm683_vm0, %v17459_v37, 0.0 }
0x3b72   :  { %8664 = vadd.xlane.f32.xlu0 %v8663_v14  ;;  %v8660_v23 = vsel %vm683_vm0, %v17462_v55, 0.0  ;;  %v14625_v14 = vpack.c.bf16 %v8819_v54, %v8818_v36  ;;  %v13245_v36 = vld [vmem:[#allocation7] ss:$0 sm:$0xff] }
0x3b73   :  { %8661 = vadd.xlane.f32.xlu1 %v8660_v23  ;;  %v13238_v23 = vld [vmem:[%s18072_s19] ss:$0 sm:$0xff] }
0x3b74   :  { %14626 = vmatprep.subr.bf16.mxu0 %v14625_v14 }
0x3b75   :  { %14628 = vmatpush3.bf16.msra.mxu0 %v14625_v14 }
0x3b76   :  { %14275 = vmatprep.subr.mxu0 %v16012_v46 }
0x3bff   :  { %v8665_v18 = vpop.xlane.xlu0 %8664 }
0x3c00   :  { %v8667_v57 = vmul.f32 0.03125, %v8665_v18  ;;  %v8662_v58 = vpop.xlane.xlu1 %8661 }
0x3c01   :  { %v8666_v25 = vmul.f32 0.03125, %v8662_v58 }
0x3c02   :  { %v8669_v56 = vsub.f32 %v17459_v37, %v8667_v57 }
0x3c03   :  { %v8668_v51 = vsub.f32 %v17462_v55, %v8666_v25 }
0x3c04   :  { %v8671_v30 = vmul.f32 %v8669_v56, %v8669_v56  ;;  %v8702_v42 = vmul.f32 %v13236_v40, %v8669_v56 }
0x3c05   :  { %v8670_v6 = vmul.f32 %v8668_v51, %v8668_v51  ;;  %v8701_v1 = vmul.f32 %v13236_v40, %v8668_v51 }
0x3c06   :  { %v8675_v39 = vsel %vm683_vm0, %v8671_v30, 0.0  ;;  %v13241_v30 = vld [vmem:[%s18073_s7] ss:$0 sm:$0xff] }
0x3c07   :  { %8676 = vadd.xlane.f32.xlu1 %v8675_v39  ;;  %v8672_v16 = vsel %vm683_vm0, %v8670_v6, 0.0 }
0x3c08   :  { %8673 = vadd.xlane.f32.xlu0 %v8672_v16 }
0x3c94   :  { %v8677_v48 = vpop.xlane.xlu1 %8676 }
0x3c95   :  { %v8679_v21 = vmul.f32 0.032258064, %v8677_v48  ;;  %v8674_v49 = vpop.xlane.xlu0 %8673  ;;  %v8970_v48 = vld [vmem:[%s18074_s10 + $0x10] sm:$0xff] }
0x3c96   :  { %v8678_v62 = vmul.f32 0.032258064, %v8674_v49  ;;  %v8971_v49 = vld [vmem:[%s18074_s10 + $0x18] sm:$0xff] }
0x3c97   :  { %15019 = vrsqrt.f32 %v8679_v21  ;;  %vm8689_vm7 = vcmp.eq.f32.partialorder %v8679_v21, inf  ;;  %v8692_v26 = vand.u32 2147483648, %v8679_v21  ;;  %vm8691_vm9 = vcmp.eq.f32.partialorder %v8679_v21, 0.0 }
0x3c98   :  { %15021 = vrsqrt.f32 %v8678_v62  ;;  %vm8682_vm11 = vcmp.eq.f32.partialorder %v8678_v62, inf  ;;  %v8685_v17 = vand.u32 2147483648, %v8678_v62  ;;  %vm8684_vm12 = vcmp.eq.f32.partialorder %v8678_v62, 0.0 }
0x3ca1   :  { %v15020_v24 = vpop.eup %15019 }
0x3ca2   :  { %v15022_v11 = vpop.eup %15021  ;;  %v8688_v59 = vmul.f32 %v15020_v24, %v8679_v21 }
0x3ca3   :  { %v8681_v28 = vmul.f32 %v15022_v11, %v8678_v62 }
0x3ca4   :  { %v8690_v29 = vsel %vm8689_vm7, %v8679_v21, %v8688_v59  ;;  %v14629_v21 = vpack.c.bf16 %v8969_v19, %v8968_v12 }
0x3ca5   :  { %v8693_v15 = vsel %vm8691_vm9, %v8692_v26, %v8690_v29  ;;  %v8683_v32 = vsel %vm8682_vm11, %v8678_v62, %v8681_v28  ;;  %v14633_v62 = vpack.c.bf16 %v8971_v49, %v8970_v48 }
0x3ca6   :  { %v8704_v35 = vadd.f32 1e-06, %v8693_v15  ;;  %v8686_v45 = vsel %vm8684_vm12, %v8685_v17, %v8683_v32  ;;  %14630 = vmatprep.subr.bf16.mxu1 %v14629_v21 }
0x3ca7   :  { %v8703_v38 = vadd.f32 1e-06, %v8686_v45 }
0x3ca8   :  { %15023 = vrcp.f32 %v8704_v35 }
0x3ca9   :  { %15025 = vrcp.f32 %v8703_v38 }
0x3cb2   :  { %v15024_v43 = vpop.eup %15023 }
0x3cb3   :  { %v15026_v41 = vpop.eup %15025  ;;  %v8708_v44 = vmul.f32 %v15024_v43, %v8702_v42 }
0x3cb4   :  { %v8706_v50 = vmul.f32 %v15026_v41, %v8701_v1  ;;  %v13244_v41 = vld [vmem:[#allocation8] ss:$0 sm:$0xff] }
0x3cb5   :  { %v8717_v53 = vadd.f32 %v13237_v0, %v8708_v44 }
0x3cb6   :  { %v8716_v34 = vadd.f32 %v13237_v0, %v8706_v50 }
0x3cb8   :  { %14232 = vmatprep.mubr.msk.f32.mxu1 %vm683_vm0, %v8716_v34 }
0x3cb9   :  { %14233 = vmatmul.mubr.msk.f32.vlgmr.msra.gmra.mrb[92].mxu1 %vm683_vm0, %v8717_v53 }
0x3cba   :  { %14632 = vmatpush3.bf16.msra.mxu1 %v14629_v21 }
0x3cbb   :  { %14634 = vmatprep.subr.bf16.mxu1 %v14633_v62 }
0x3cbe   :  { %14636 = vmatpush3.bf16.msra.mxu1 %v14633_v62 }
0x3cbf   :  { %14265 = vmatprep.subr.mxu1 %v16012_v46 }
0x3d8c   :  { %v14234_v18 = vpop.f32.mrb[92].mxu1 }
0x3d8d   :  { %v8807_v57 = vadd.f32 %v14234_v18, %v13238_v23  ;;  %v8801_v58 = vpop.f32.mrb[93].mxu1  ;;  %v13246_v18 = vld [vmem:[#allocation17] ss:$0 sm:$0xff] }
0x3d8e   :  { %v8802_v25 = vadd.f32 %v13238_v23, %v8801_v58 }
0x3d8f   :  { %v8811_v51 = vmax.f32 %v8807_v57, 0.0 }
0x3d90   :  { %v8810_v56 = vmax.f32 %v8802_v25, 0.0 }
0x3d92   :  { %14251 = vmatprep.mubr.msk.f32.mxu0 %vm2695_vm15, %v8810_v56 }
0x3d93   :  { %14252 = vmatmul.mubr.msk.f32.vlgmr.msra.gmra.mrb[62].mxu0 %vm2695_vm15, %v8811_v51 }
0x3d94   :  { %14277 = vmatprep.mubr.msk.f32.mxu0 %vm16013_vm5, %v16012_v46 }
0x3e66   :  { %v14253_v6 = vpop.f32.mrb[62].mxu0 }
0x3e67   :  { %v8905_v39 = vadd.f32 %v14253_v6, %v13241_v30  ;;  %v8899_v16 = vpop.f32.mrb[63].mxu0 }
0x3e68   :  { %v8900_v47 = vadd.f32 %v13241_v30, %v8899_v16 }
0x3e69   :  { %v17496_v31 = vadd.f32 %v8905_v39, %v17459_v37 }
0x3e6a   :  { %v17499_v52 = vadd.f32 %v8900_v47, %v17462_v55 }
0x3e6b   :  { %v8913_v60 = vsel %vm683_vm0, %v17496_v31, 0.0 }
0x3e6c   :  { %8914 = vadd.xlane.f32.xlu1 %v8913_v60  ;;  %v8910_v63 = vsel %vm683_vm0, %v17499_v52, 0.0 }
0x3e6d   :  { %8911 = vadd.xlane.f32.xlu0 %v8910_v63 }
0x3ef9   :  { %v8915_v9 = vpop.xlane.xlu1 %8914 }
0x3efa   :  { %v8917_v2 = vmul.f32 0.03125, %v8915_v9  ;;  %v8912_v13 = vpop.xlane.xlu0 %8911 }
0x3efb   :  { %v8916_v37 = vmul.f32 0.03125, %v8912_v13 }
0x3efc   :  { %v8919_v20 = vsub.f32 %v17496_v31, %v8917_v2 }
0x3efd   :  { %v8918_v55 = vsub.f32 %v17499_v52, %v8916_v37 }
0x3efe   :  { %v8921_v33 = vmul.f32 %v8919_v20, %v8919_v20  ;;  %v8952_v44 = vmul.f32 %v13244_v41, %v8919_v20 }
0x3eff   :  { %v8920_v3 = vmul.f32 %v8918_v55, %v8918_v55  ;;  %v8951_v50 = vmul.f32 %v13244_v41, %v8918_v55 }
0x3f00   :  { %v8925_v7 = vsel %vm683_vm0, %v8921_v33, 0.0 }
0x3f01   :  { %8926 = vadd.xlane.f32.xlu1 %v8925_v7  ;;  %v8922_v10 = vsel %vm683_vm0, %v8920_v3, 0.0 }
0x3f02   :  { %8923 = vadd.xlane.f32.xlu0 %v8922_v10 }
0x3f8e   :  { %v8927_v24 = vpop.xlane.xlu1 %8926 }
0x3f8f   :  { %v8929_v11 = vmul.f32 0.032258064, %v8927_v24  ;;  %v8924_v59 = vpop.xlane.xlu0 %8923 }
0x3f90   :  { %v8928_v26 = vmul.f32 0.032258064, %v8924_v59 }
0x3f91   :  { %15027 = vrsqrt.f32 %v8929_v11  ;;  %vm8939_vm13 = vcmp.eq.f32.partialorder %v8929_v11, inf  ;;  %v8942_v15 = vand.u32 2147483648, %v8929_v11  ;;  %vm8941_vm14 = vcmp.eq.f32.partialorder %v8929_v11, 0.0 }
0x3f92   :  { %15029 = vrsqrt.f32 %v8928_v26  ;;  %vm8932_vm1 = vcmp.eq.f32.partialorder %v8928_v26, inf  ;;  %v8935_v45 = vand.u32 2147483648, %v8928_v26  ;;  %vm8934_vm2 = vcmp.eq.f32.partialorder %v8928_v26, 0.0 }
0x3f9b   :  { %v15028_v28 = vpop.eup %15027 }
0x3f9c   :  { %v15030_v29 = vpop.eup %15029  ;;  %v8938_v17 = vmul.f32 %v15028_v28, %v8929_v11 }
0x3f9d   :  { %v8931_v32 = vmul.f32 %v15030_v29, %v8928_v26 }
0x3f9e   :  { %v8940_v35 = vsel %vm8939_vm13, %v8929_v11, %v8938_v17 }
0x3f9f   :  { %v8943_v38 = vsel %vm8941_vm14, %v8942_v15, %v8940_v35  ;;  %v8933_v40 = vsel %vm8932_vm1, %v8928_v26, %v8931_v32 }
0x3fa0   :  { %v8954_v42 = vadd.f32 1e-06, %v8943_v38  ;;  %v8936_v43 = vsel %vm8934_vm2, %v8935_v45, %v8933_v40 }
0x3fa1   :  { %v8953_v1 = vadd.f32 1e-06, %v8936_v43 }
0x3fa2   :  { %15031 = vrcp.f32 %v8954_v42 }
0x3fa3   :  { %15033 = vrcp.f32 %v8953_v1 }
0x3fac   :  { %v15032_v0 = vpop.eup %15031 }
0x3fad   :  { %v15034_v34 = vpop.eup %15033  ;;  %v8958_v53 = vmul.f32 %v15032_v0, %v8952_v44 }
0x3fae   :  { %v8956_v54 = vmul.f32 %v15034_v34, %v8951_v50 }
0x3faf   :  { %v8967_v23 = vadd.f32 %v13245_v36, %v8958_v53 }
0x3fb0   :  { %v8966_v14 = vadd.f32 %v13245_v36, %v8956_v54 }
0x3fb2   :  { %14262 = vmatprep.mubr.msk.f32.mxu1 %vm683_vm0, %v8966_v14 }
0x3fb3   :  { %14263 = vmatmul.mubr.msk.f32.vlgmr.msra.gmra.mrb[94].mxu1 %vm683_vm0, %v8967_v23 }
0x3fb4   :  { %14267 = vmatprep.mubr.msk.f32.mxu1 %vm16013_vm5, %v16012_v46 }
0x4086   :  { %v14264_v57 = vpop.f32.mrb[94].mxu1 }
0x4087   :  { %v17518_v58 = vadd.f32 %v14264_v57, %v13246_v18  ;;  %v9051_v25 = vpop.f32.mrb[95].mxu1 }
0x4088   :  { %v17520_v56 = vadd.f32 %v13246_v18, %v9051_v25 }
0x4089   :  { %9138 = vrot.lane.b32.xlu1 %v17518_v58, %s16014_s24 }
0x408a   :  { %9061 = vrot.lane.b32.xlu0 %v17520_v56, %s16014_s24 }
0x40fb   :  { %v9139_v30 = vpop.permute.xlu1 %9138 }
0x40fc   :  { %v9062_v51 = vpop.permute.xlu0 %9061 }
0x40fd   :  { %14266 = vmatpush3.xpose.msk.msra.mxu1 %vm841_vm6, %v9062_v51 }
0x40fe   :  { %14270 = vmatprep.subr.mxu1 %v16012_v46 }
0x4100   :  { %14268 = vmatmul.mubr.msk.f32.vlgmr.msra.gmra.mrb[96].mxu1 %vm841_vm6, %v17520_v56 }
0x4101   :  { %14271 = vmatpush3.xpose.msk.msra.mxu1 %vm841_vm6, %v9139_v30  ;;  %14272 = vmatprep.mubr.msk.f32.mxu1 %vm16013_vm5, %v16012_v46 }
0x4102   :  { %14280 = vmatprep.subr.mxu1 %v16012_v46 }
0x4104   :  { %14273 = vmatmul.mubr.msk.f32.vlgmr.msra.gmra.mrb[98].mxu1 %vm841_vm6, %v17518_v58 }
0x4105   :  { %14282 = vmatprep.mubr.msk.f32.mxu1 %vm16013_vm5, %v16012_v46 }
0x41d3   :  { %v9133_v6 = vpop.f32.mrb[96].mxu1 }
0x41d4   :  { %v14269_v39 = vpop.f32.mrb[97].mxu1  ;;  %v9214_v2 = vmul.f32 0.35355338, %v9133_v6 }
0x41d6   :  { %v9216_v13 = vsel %vm5064_vm4, -1e+09, %v9214_v2 }
0x41d7   :  { %v9210_v16 = vpop.f32.mrb[98].mxu1  ;;  %v9218_v37 = vsel %vm841_vm6, %v9216_v13, -inf }
0x41d8   :  { %v9215_v47 = vmul.f32 0.35355338, %v9210_v16  ;;  %v14274_v60 = vpop.f32.mrb[99].mxu1 }
0x41da   :  { %v9217_v63 = vsel %vm5065_vm3, -1e+09, %v9215_v47 }
0x41db   :  { %v9221_v9 = vsel %vm841_vm6, %v9217_v63, -inf }
0x41dc   :  { %9222 = vmax.xlane.f32.xlu1 %v9221_v9 }
0x41ed   :  { %9473 = vrot.lane.b32.xlu1 %v17518_v58, %s16016_s13 }
0x41f1   :  { %9471 = vrot.lane.b32.xlu1 %v17518_v58, %s16017_s21 }
0x4215   :  { %9219 = vmax.xlane.f32.xlu1 %v9218_v37 }
0x4226   :  { %9395 = vrot.lane.b32.xlu1 %v17520_v56, %s16016_s13 }
0x422a   :  { %9393 = vrot.lane.b32.xlu1 %v17520_v56, %s16017_s21 }
0x422e   :  { %9892 = vrot.lane.b32.xlu1 %v17520_v56, %s16018_s27 }
0x4269   :  { %v9223_v20 = vpop.xlane.xlu1 %9222 }
0x426a   :  { %v9225_v55 = vsub.f32 %v9217_v63, %v9223_v20 }
0x426c   :  { %v9228_v33 = vmul.f32 1.442695, %v9225_v55 }
0x426d   :  { %v9474_v10 = vpop.permute.xlu1 %9473 }
0x426e   :  { %15035 = vpow2.f32 %v9228_v33 }
0x4271   :  { %v9472_v12 = vpop.permute.xlu1 %9471 }
0x4278   :  { %v15036_v3 = vpop.eup %15035 }
0x4279   :  { %v9233_v7 = vsel %vm841_vm6, %v15036_v3, 0.0 }
0x427a   :  { %9234 = vadd.xlane.f32.xlu0 %v9233_v7 }
0x4290   :  { %9316 = vrot.lane.b32.xlu0 %v17518_v58, %s16019_s23 }
0x42a2   :  { %v9220_v19 = vpop.xlane.xlu1 %9219 }
0x42a3   :  { %v9224_v48 = vsub.f32 %v9216_v13, %v9220_v19 }
0x42a5   :  { %v9226_v21 = vmul.f32 1.442695, %v9224_v48 }
0x42a6   :  { %v9396_v15 = vpop.permute.xlu1 %9395 }
0x42a7   :  { %15037 = vpow2.f32 %v9226_v21 }
0x42aa   :  { %v9394_v35 = vpop.permute.xlu1 %9393 }
0x42ae   :  { %v9893_v30 = vpop.permute.xlu1 %9892 }
0x42b1   :  { %v15038_v49 = vpop.eup %15037 }
0x42b2   :  { %v9230_v62 = vsel %vm841_vm6, %v15038_v49, 0.0 }
0x42b3   :  { %9231 = vadd.xlane.f32.xlu0 %v9230_v62 }
0x42c9   :  { %9240 = vrot.lane.b32.xlu0 %v17520_v56, %s16019_s23  ;;  %s18075_s23 = sld [smem:[#allocation101_spill]] }
0x4307   :  { %v9235_v24 = vpop.xlane.xlu0 %9234 }
0x4308   :  { %15039 = vrcp.f32 %v9235_v24 }
0x430b   :  { %v9317_v11 = vpop.permute.xlu0 %9316 }
0x430c   :  { %14281 = vmatpush3.msra.mxu1 %v9317_v11 }
0x430d   :  { %14290 = vmatprep.subr.mxu1 %v16012_v46 }
0x4312   :  { %v15040_v59 = vpop.eup %15039 }
0x4313   :  { %v9239_v26 = vmul.f32 %v15040_v59, %v15036_v3 }
0x4315   :  { %14283 = vmatmul.mubr.msk.f32.vlgmr.msra.gmra.mrb[100].mxu1 %vm841_vm6, %v9239_v26 }
0x4316   :  { %14291 = vmatpush3.xpose.msk.msra.mxu1 %vm841_vm6, %v9474_v10  ;;  %14292 = vmatprep.mubr.msk.f32.mxu1 %vm16013_vm5, %v16012_v46 }
0x4317   :  { %14300 = vmatprep.subr.mxu1 %v16012_v46 }
0x4319   :  { %14293 = vmatmul.mubr.msk.f32.vlgmr.msra.gmra.mrb[102].mxu1 %vm841_vm6, %v9472_v12 }
0x431a   :  { %14302 = vmatprep.mubr.msk.f32.mxu1 %vm16013_vm5, %v16012_v46 }
0x4340   :  { %v9232_v28 = vpop.xlane.xlu0 %9231 }
0x4341   :  { %15041 = vrcp.f32 %v9232_v28 }
0x4344   :  { %v9241_v29 = vpop.permute.xlu0 %9240 }
0x4345   :  { %14276 = vmatpush3.msra.mxu0 %v9241_v29 }
0x4346   :  { %14285 = vmatprep.subr.mxu0 %v16012_v46 }
0x434b   :  { %v15042_v17 = vpop.eup %15041 }
0x434c   :  { %v9238_v32 = vmul.f32 %v15042_v17, %v15038_v49  ;;  %v9727_v17 = vld [vmem:[%s18075_s23 + $0x8] sm:$0xff] }
0x434e   :  { %14278 = vmatmul.mubr.msk.f32.vlgmr.msra.gmra.mrb[64].mxu0 %vm841_vm6, %v9238_v32 }
0x434f   :  { %14286 = vmatpush3.xpose.msk.msra.mxu0 %vm841_vm6, %v9396_v15  ;;  %14287 = vmatprep.mubr.msk.f32.mxu0 %vm16013_vm5, %v16012_v46  ;;  %v9392_v15 = vld [vmem:[%s18075_s23] sm:$0xff] }
0x4350   :  { %14295 = vmatprep.subr.mxu0 %v16012_v46 }
0x4352   :  { %14288 = vmatmul.mubr.msk.f32.vlgmr.msra.gmra.mrb[66].mxu0 %vm841_vm6, %v9394_v35 }
0x4353   :  { %14297 = vmatprep.mubr.msk.f32.mxu0 %vm16013_vm5, %v16012_v46 }
0x43e8   :  { %v17578_v45 = vpop.f32.mrb[100].mxu1 }
0x43e9   :  { %v14284_v38 = vpop.f32.mrb[101].mxu1 }
0x43ec   :  { %v9545_v40 = vpop.f32.mrb[102].mxu1 }
0x43ed   :  { %v9550_v42 = vmul.f32 0.35355338, %v9545_v40  ;;  %v14294_v43 = vpop.f32.mrb[103].mxu1 }
0x43ef   :  { %v9552_v1 = vsel %vm5065_vm3, -1e+09, %v9550_v42 }
0x43f0   :  { %v9556_v41 = vsel %vm841_vm6, %v9552_v1, -inf }
0x43f1   :  { %9557 = vmax.xlane.f32.xlu0 %v9556_v41 }
0x4407   :  { %9651 = vrot.lane.b32.xlu0 %v17518_v58, %s16020_s5 }
0x440b   :  { %9890 = vrot.lane.b32.xlu0 %v17520_v56, %s16021_s8 }
0x440f   :  { %9968 = vrot.lane.b32.xlu0 %v17518_v58, %s16021_s8 }
0x4421   :  { %v17589_v44 = vpop.f32.mrb[64].mxu0 }
0x4422   :  { %v14279_v0 = vpop.f32.mrb[65].mxu0 }
0x4425   :  { %v9467_v50 = vpop.f32.mrb[66].mxu0 }
0x4426   :  { %v14289_v34 = vpop.f32.mrb[67].mxu0  ;;  %v9549_v57 = vmul.f32 0.35355338, %v9467_v50 }
0x4428   :  { %v9551_v25 = vsel %vm5064_vm4, -1e+09, %v9549_v57 }
0x4429   :  { %v9553_v51 = vsel %vm841_vm6, %v9551_v25, -inf }
0x447e   :  { %v9558_v53 = vpop.xlane.xlu0 %9557 }
0x447f   :  { %v9560_v36 = vsub.f32 %v9552_v1, %v9558_v53 }
0x4481   :  { %v9563_v54 = vmul.f32 1.442695, %v9560_v36 }
0x4482   :  { %v9652_v14 = vpop.permute.xlu0 %9651 }
0x4483   :  { %15043 = vpow2.f32 %v9563_v54  ;;  %14301 = vmatpush3.msra.mxu1 %v9652_v14  ;;  %v10224_v14 = vld [vmem:[%s18075_s23 + $0x10] sm:$0xff] }
0x4484   :  { %14315 = vmatprep.subr.mxu1 %v16012_v46 }
0x4486   :  { %v9891_v47 = vpop.permute.xlu0 %9890 }
0x448a   :  { %v9969_v63 = vpop.permute.xlu0 %9968 }
0x448d   :  { %v15044_v23 = vpop.eup %15043 }
0x448e   :  { %v9568_v18 = vsel %vm841_vm6, %v15044_v23, 0.0 }
0x448f   :  { %9569 = vadd.xlane.f32.xlu1 %v9568_v18 }
0x44a0   :  { %9970 = vrot.lane.b32.xlu1 %v17518_v58, %s16018_s27 }
0x44c4   :  { %9554 = vmax.xlane.f32.xlu1 %v9553_v51 }
0x451c   :  { %v9570_v6 = vpop.xlane.xlu1 %9569 }
0x451d   :  { %15045 = vrcp.f32 %v9570_v6 }
0x4520   :  { %v9971_v60 = vpop.permute.xlu1 %9970 }
0x4527   :  { %v15046_v39 = vpop.eup %15045 }
0x4528   :  { %v9574_v16 = vmul.f32 %v15046_v39, %v15044_v23 }
0x452a   :  { %14303 = vmatmul.mubr.msk.f32.vlgmr.msra.gmra.mrb[104].mxu1 %vm841_vm6, %v9574_v16 }
0x452b   :  { %14316 = vmatpush3.xpose.msk.msra.mxu1 %vm841_vm6, %v9893_v30  ;;  %14317 = vmatprep.mubr.msk.f32.mxu1 %vm16013_vm5, %v16012_v46 }
0x452c   :  { %14320 = vmatprep.subr.mxu1 %v16012_v46 }
0x452e   :  { %14318 = vmatmul.mubr.msk.f32.vlgmr.msra.gmra.mrb[106].mxu1 %vm841_vm6, %v9891_v47 }
0x452f   :  { %14321 = vmatpush3.xpose.msk.msra.mxu1 %vm841_vm6, %v9971_v60  ;;  %14322 = vmatprep.mubr.msk.f32.mxu1 %vm16013_vm5, %v16012_v46 }
0x4530   :  { %14330 = vmatprep.subr.mxu1 %v16012_v46 }
0x4532   :  { %14323 = vmatmul.mubr.msk.f32.vlgmr.msra.gmra.mrb[108].mxu1 %vm841_vm6, %v9969_v63 }
0x4533   :  { %14332 = vmatprep.mubr.msk.f32.mxu1 %vm16013_vm5, %v16012_v46 }
0x4551   :  { %v9555_v9 = vpop.xlane.xlu1 %9554 }
0x4552   :  { %v9559_v2 = vsub.f32 %v9551_v25, %v9555_v9 }
0x4554   :  { %v9561_v13 = vmul.f32 1.442695, %v9559_v2 }
0x4556   :  { %15047 = vpow2.f32 %v9561_v13 }
0x4560   :  { %v15048_v37 = vpop.eup %15047 }
0x4561   :  { %v9565_v20 = vsel %vm841_vm6, %v15048_v37, 0.0 }
0x4562   :  { %9566 = vadd.xlane.f32.xlu0 %v9565_v20 }
0x4578   :  { %9575 = vrot.lane.b32.xlu0 %v17520_v56, %s16020_s5  ;;  %s18076_s5 = sld [smem:[#allocation105_spill]] }
0x457c   :  { %10148 = vrot.lane.b32.xlu0 %v17518_v58, %s16022_s26 }
0x4580   :  { %10310 = vrot.lane.b32.xlu0 %v17520_v56, %s16023_s12 }
0x4584   :  { %10388 = vrot.lane.b32.xlu0 %v17518_v58, %s16023_s12 }
0x4588   :  { %10308 = vrot.lane.b32.xlu0 %v17520_v56, %s16024_s0 }
0x45ef   :  { %v9567_v55 = vpop.xlane.xlu0 %9566 }
0x45f0   :  { %15049 = vrcp.f32 %v9567_v55 }
0x45f3   :  { %v9576_v33 = vpop.permute.xlu0 %9575 }
0x45f4   :  { %14296 = vmatpush3.msra.mxu0 %v9576_v33 }
0x45f5   :  { %14305 = vmatprep.subr.mxu0 %v9727_v17 }
0x45f7   :  { %v10149_v3 = vpop.permute.xlu0 %10148 }
0x45f8   :  { %14331 = vmatpush3.msra.mxu1 %v10149_v3 }
0x45f9   :  { %14340 = vmatprep.subr.mxu1 %v16012_v46 }
0x45fa   :  { %v15050_v7 = vpop.eup %15049 }
0x45fb   :  { %v9573_v10 = vmul.f32 %v15050_v7, %v15048_v37  ;;  %v10311_v18 = vpop.permute.xlu0 %10310 }
0x45fd   :  { %14298 = vmatmul.mubr.msk.f32.vlgmr.msra.gmra.mrb[68].mxu0 %vm841_vm6, %v9573_v10  ;;  %v9723_v12 = vpop.f32.mrb[104].mxu1 }
0x45fe   :  { %v14304_v19 = vpop.f32.mrb[105].mxu1  ;;  %14306 = vmatpush3.msra.mxu0 %v9727_v17 }
0x45ff   :  { %14310 = vmatprep.subr.mxu0 %v9392_v15  ;;  %v10389_v51 = vpop.permute.xlu0 %10388 }
0x4601   :  { %v9964_v48 = vpop.f32.mrb[106].mxu1 }
0x4602   :  { %v10046_v21 = vmul.f32 0.35355338, %v9964_v48  ;;  %v14319_v49 = vpop.f32.mrb[107].mxu1 }
0x4603   :  { %v10309_v30 = vpop.permute.xlu0 %10308 }
0x4604   :  { %v10048_v62 = vsel %vm5064_vm4, -1e+09, %v10046_v21 }
0x4605   :  { %v10042_v24 = vpop.f32.mrb[108].mxu1  ;;  %v10050_v11 = vsel %vm841_vm6, %v10048_v62, -inf }
0x4606   :  { %v10047_v59 = vmul.f32 0.35355338, %v10042_v24  ;;  %10051 = vmax.xlane.f32.xlu1 %v10050_v11  ;;  %v14324_v26 = vpop.f32.mrb[109].mxu1 }
0x4608   :  { %v10049_v28 = vsel %vm5065_vm3, -1e+09, %v10047_v59 }
0x4609   :  { %v10053_v29 = vsel %vm841_vm6, %v10049_v28, -inf }
0x460a   :  { %10054 = vmax.xlane.f32.xlu1 %v10053_v29 }
0x4693   :  { %v10052_v32 = vpop.xlane.xlu1 %10051 }
0x4694   :  { %v10056_v35 = vsub.f32 %v10048_v62, %v10052_v32  ;;  %v10642_v32 = vld [vmem:[%s18075_s23 + $0x18] sm:$0xff] }
0x4696   :  { %v10058_v38 = vmul.f32 1.442695, %v10056_v35  ;;  %v10888_v35 = vld [vmem:[%s18076_s5 + $0x8] sm:$0xff] }
0x4697   :  { %v10055_v40 = vpop.xlane.xlu1 %10054 }
0x4698   :  { %15051 = vpow2.f32 %v10058_v38  ;;  %v10057_v42 = vsub.f32 %v10049_v28, %v10055_v40 }
0x469a   :  { %v10060_v43 = vmul.f32 1.442695, %v10057_v42 }
0x469c   :  { %15053 = vpow2.f32 %v10060_v43  ;;  %v10889_v43 = vld [vmem:[%s18076_s5 + $0x10] sm:$0xff] }
0x46a2   :  { %v15052_v1 = vpop.eup %15051 }
0x46a3   :  { %v10062_v41 = vsel %vm841_vm6, %v15052_v1, 0.0 }
0x46a4   :  { %10063 = vadd.xlane.f32.xlu1 %v10062_v41 }
0x46a6   :  { %v15054_v0 = vpop.eup %15053 }
0x46a7   :  { %v10065_v50 = vsel %vm841_vm6, %v15054_v0, 0.0 }
0x46a8   :  { %10066 = vadd.xlane.f32.xlu1 %v10065_v50 }
0x46b9   :  { %10072 = vrot.lane.b32.xlu1 %v17520_v56, %s16022_s26  ;;  %s18077_s26 = sld [smem:[#allocation107_spill]] }
0x46bd   :  { %10386 = vrot.lane.b32.xlu1 %v17518_v58, %s16024_s0 }
0x46d0   :  { %v9647_v34 = vpop.f32.mrb[68].mxu0 }
0x46d1   :  { %v14299_v53 = vpop.f32.mrb[69].mxu0  ;;  %14307 = vmatprep.mubr.msk.f32.mxu0 %vm841_vm6, %v9647_v34  ;;  %v13281_v34 = vld [vmem:[#allocation16] ss:$0 sm:$0xff] }
0x46d2   :  { %14308 = vmatmul.mubr.msk.f32.vlgmr.msra.gmra.mrb[70].mxu0 %vm841_vm6, %v9723_v12 }
0x46d3   :  { %14312 = vmatprep.mubr.msk.f32.mxu0 %vm841_vm6, %v17589_v44  ;;  %14311 = vmatpush3.msra.mxu0 %v9392_v15 }
0x46d4   :  { %14325 = vmatprep.subr.mxu0 %v16012_v46 }
0x46da   :  { %14313 = vmatmul.mubr.msk.f32.vlgmr.msra.gmra.mrb[70].mxu0 %vm841_vm6, %v17578_v45 }
0x46db   :  { %14327 = vmatprep.mubr.msk.f32.mxu0 %vm16013_vm5, %v16012_v46 }
0x4731   :  { %v10064_v36 = vpop.xlane.xlu1 %10063 }
0x4732   :  { %15055 = vrcp.f32 %v10064_v36 }
0x4735   :  { %v10067_v54 = vpop.xlane.xlu1 %10066 }
0x4736   :  { %15057 = vrcp.f32 %v10067_v54 }
0x4739   :  { %v10073_v23 = vpop.permute.xlu1 %10072 }
0x473a   :  { %14326 = vmatpush3.msra.mxu0 %v10073_v23 }
0x473b   :  { %14335 = vmatprep.subr.mxu0 %v10224_v14 }
0x473c   :  { %v15056_v57 = vpop.eup %15055 }
0x473d   :  { %v10070_v44 = vmul.f32 %v15056_v57, %v15052_v1  ;;  %v10387_v60 = vpop.permute.xlu1 %10386  ;;  %v10890_v1 = vld [vmem:[%s18076_s5 + $0x18] sm:$0xff]  ;;  %v13287_v57 = vld [vmem:[#allocation19] ss:$0 sm:$0xff] }
0x473e   :  { %v14649_v41 = vpack.c.bf16 %v10890_v1, %v10889_v43  ;;  %v13284_v43 = vld [vmem:[#allocation22] ss:$0 sm:$0xff] }
0x473f   :  { %14328 = vmatmul.mubr.msk.f32.vlgmr.msra.gmra.mrb[72].mxu0 %vm841_vm6, %v10070_v44 }
0x4740   :  { %v15058_v25 = vpop.eup %15057  ;;  %14336 = vmatpush3.msra.mxu0 %v10224_v14 }
0x4741   :  { %v10071_v45 = vmul.f32 %v15058_v25, %v15054_v0  ;;  %14345 = vmatprep.subr.mxu0 %v16012_v46 }
0x4743   :  { %14333 = vmatmul.mubr.msk.f32.vlgmr.msra.gmra.mrb[110].mxu1 %vm841_vm6, %v10071_v45 }
0x4744   :  { %14341 = vmatpush3.xpose.msk.msra.mxu1 %vm841_vm6, %v10311_v18  ;;  %14342 = vmatprep.mubr.msk.f32.mxu1 %vm16013_vm5, %v16012_v46 }
0x4745   :  { %14350 = vmatprep.subr.mxu1 %v16012_v46 }
0x4747   :  { %14343 = vmatmul.mubr.msk.f32.vlgmr.msra.gmra.mrb[112].mxu1 %vm841_vm6, %v10309_v30 }
0x4748   :  { %14352 = vmatprep.mubr.msk.f32.mxu1 %vm16013_vm5, %v16012_v46 }
0x4812   :  { %v10144_v6 = vpop.f32.mrb[72].mxu0 }
0x4813   :  { %v14329_v39 = vpop.f32.mrb[73].mxu0  ;;  %14337 = vmatprep.mubr.msk.f32.mxu0 %vm841_vm6, %v10144_v6 }
0x4816   :  { %v10220_v16 = vpop.f32.mrb[110].mxu1 }
0x4817   :  { %v14334_v47 = vpop.f32.mrb[111].mxu1  ;;  %14338 = vmatmul.mubr.msk.f32.vlgmr.msra.gmra.mrb[70].mxu0 %vm841_vm6, %v10220_v16 }
0x4818   :  { %14346 = vmatpush3.xpose.msk.msra.mxu0 %vm841_vm6, %v10389_v51  ;;  %14347 = vmatprep.mubr.msk.f32.mxu0 %vm16013_vm5, %v16012_v46 }
0x4819   :  { %14355 = vmatprep.subr.mxu0 %v16012_v46 }
0x481a   :  { %v10382_v63 = vpop.f32.mrb[112].mxu1 }
0x481b   :  { %v10464_v9 = vmul.f32 0.35355338, %v10382_v63  ;;  %v14344_v2 = vpop.f32.mrb[113].mxu1  ;;  %14348 = vmatmul.mubr.msk.f32.vlgmr.msra.gmra.mrb[74].mxu0 %vm841_vm6, %v10387_v60 }
0x481c   :  { %14357 = vmatprep.mubr.msk.f32.mxu0 %vm16013_vm5, %v16012_v46  ;;  %v10795_v2 = vld [vmem:[%s18077_s26] sm:$0xff] }
0x481d   :  { %v10466_v13 = vsel %vm5064_vm4, -1e+09, %v10464_v9 }
0x481e   :  { %v10468_v37 = vsel %vm841_vm6, %v10466_v13, -inf }
0x481f   :  { %10469 = vmax.xlane.f32.xlu0 %v10468_v37  ;;  %v10797_v37 = vld [vmem:[%s18077_s26 + $0x10] sm:$0xff] }
0x48ac   :  { %v10470_v20 = vpop.xlane.xlu0 %10469 }
0x48ad   :  { %v10474_v55 = vsub.f32 %v10466_v13, %v10470_v20  ;;  %v10796_v13 = vld [vmem:[%s18077_s26 + $0x8] sm:$0xff] }
0x48ae   :  { %v14637_v20 = vpack.c.bf16 %v10796_v13, %v10795_v2 }
0x48af   :  { %v10476_v33 = vmul.f32 1.442695, %v10474_v55  ;;  %v10798_v55 = vld [vmem:[%s18077_s26 + $0x18] sm:$0xff] }
0x48b1   :  { %15059 = vpow2.f32 %v10476_v33  ;;  %v14641_v33 = vpack.c.bf16 %v10798_v55, %v10797_v37 }
0x48bb   :  { %v15060_v3 = vpop.eup %15059 }
0x48bc   :  { %v10480_v7 = vsel %vm841_vm6, %v15060_v3, 0.0 }
0x48bd   :  { %10481 = vadd.xlane.f32.xlu0 %v10480_v7 }
0x48ee   :  { %v10460_v10 = vpop.f32.mrb[74].mxu0 }
0x48ef   :  { %v10465_v12 = vmul.f32 0.35355338, %v10460_v10  ;;  %v14349_v19 = vpop.f32.mrb[75].mxu0 }
0x48f1   :  { %v10467_v48 = vsel %vm5065_vm3, -1e+09, %v10465_v12 }
0x48f2   :  { %v10471_v27 = vsel %vm841_vm6, %v10467_v48, -inf }
0x48f3   :  { %10472 = vmax.xlane.f32.xlu1 %v10471_v27 }
0x4904   :  { %10566 = vrot.lane.b32.xlu1 %v17518_v58, %s16025_s1 }
0x494a   :  { %v10482_v22 = vpop.xlane.xlu0 %10481 }
0x4980   :  { %v10473_v21 = vpop.xlane.xlu1 %10472 }
0x4981   :  { %v10475_v49 = vsub.f32 %v10467_v48, %v10473_v21 }
0x4983   :  { %v10478_v62 = vmul.f32 1.442695, %v10475_v49 }
0x4984   :  { %v10567_v24 = vpop.permute.xlu1 %10566 }
0x4985   :  { %15061 = vpow2.f32 %v10478_v62  ;;  %14356 = vmatpush3.msra.mxu0 %v10567_v24 }
0x4986   :  { %15063 = vrcp.f32 %v10482_v22  ;;  %14360 = vmatprep.subr.mxu0 %v10642_v32 }
0x498f   :  { %v15062_v11 = vpop.eup %15061 }
0x4990   :  { %v10483_v59 = vsel %vm841_vm6, %v15062_v11, 0.0  ;;  %v15064_v58 = vpop.eup %15063 }
0x4991   :  { %10484 = vadd.xlane.f32.xlu0 %v10483_v59  ;;  %v10488_v28 = vmul.f32 %v15064_v58, %v15060_v3 }
0x49a7   :  { %10490 = vrot.lane.b32.xlu0 %v17520_v56, %s16025_s1  ;;  %v10887_v56 = vld [vmem:[%s18076_s5] sm:$0xff] }
0x49a8   :  { %v14645_v38 = vpack.c.bf16 %v10888_v35, %v10887_v56  ;;  %v13283_v35 = vld [vmem:[#allocation10] ss:$0 sm:$0xff] }
0x4a1e   :  { %v10485_v26 = vpop.xlane.xlu0 %10484 }
0x4a1f   :  { %15065 = vrcp.f32 %v10485_v26 }
0x4a22   :  { %v10491_v29 = vpop.permute.xlu0 %10490 }
0x4a23   :  { %14351 = vmatpush3.msra.mxu1 %v10491_v29 }
0x4a24   :  { %14353 = vmatmul.mubr.msk.f32.vlgmr.msra.gmra.mrb[114].mxu1 %vm841_vm6, %v10488_v28  ;;  %14638 = vmatprep.subr.bf16.mxu1 %v14637_v20  ;;  %v13282_v28 = vld [vmem:[#allocation11] ss:$0 sm:$0xff] }
0x4a25   :  { %14640 = vmatpush3.bf16.msra.mxu1 %v14637_v20 }
0x4a26   :  { %14642 = vmatprep.subr.bf16.mxu1 %v14641_v33 }
0x4a29   :  { %v15066_v17 = vpop.eup %15065  ;;  %14644 = vmatpush3.bf16.msra.mxu1 %v14641_v33 }
0x4a2a   :  { %v10489_v15 = vmul.f32 %v15066_v17, %v15062_v11  ;;  %14387 = vmatprep.subr.mxu1 %v16012_v46 }
0x4a2c   :  { %14358 = vmatmul.mubr.msk.f32.vlgmr.msra.gmra.mrb[76].mxu0 %vm841_vm6, %v10489_v15 }
0x4a2d   :  { %14361 = vmatpush3.msra.mxu0 %v10642_v32 }
0x4a2e   :  { %14646 = vmatprep.subr.bf16.mxu0 %v14645_v38 }
0x4af7   :  { %v10562_v40 = vpop.f32.mrb[114].mxu1 }
0x4af8   :  { %v14354_v42 = vpop.f32.mrb[115].mxu1  ;;  %14362 = vmatprep.mubr.msk.f32.mxu0 %vm841_vm6, %v10562_v40 }
0x4aff   :  { %v10638_v0 = vpop.f32.mrb[76].mxu0 }
0x4b00   :  { %v14359_v50 = vpop.f32.mrb[77].mxu0  ;;  %14363 = vmatmul.mubr.msk.f32.vlgmr.msra.gmra.mrb[70].mxu0 %vm841_vm6, %v10638_v0 }
0x4b01   :  { %14648 = vmatpush3.bf16.msra.mxu0 %v14645_v38  ;;  %14384 = vmatprep.mubr.msk.f32.mxu0 %vm683_vm0, %v17264_v4 }
0x4b02   :  { %14650 = vmatprep.subr.bf16.mxu0 %v14649_v41 }
0x4b05   :  { %14652 = vmatpush3.bf16.msra.mxu0 %v14649_v41 }
0x4b06   :  { %14397 = vmatprep.subr.mxu0 %v16012_v46 }
0x4b08   :  { %14385 = vmatmul.mubr.msk.f32.vlgmr.msra.gmra.mrb[78].mxu0 %vm683_vm0, %v17266_v5 }
0x4b09   :  { %14399 = vmatprep.mubr.msk.f32.mxu0 %vm16013_vm5, %v16012_v46 }
0x4bd3   :  { %v14364_v53 = vpop.f32.mrb[70].mxu0 }
0x4bd4   :  { %v10734_v36 = vadd.f32 %v14364_v53, %v13281_v34  ;;  %v10715_v54 = vpop.f32.mrb[71].mxu0 }
0x4bd5   :  { %v10733_v14 = vadd.f32 %v13281_v34, %v10715_v54 }
0x4bd6   :  { %v17696_v23 = vadd.f32 %v10734_v36, %v17496_v31 }
0x4bd7   :  { %v17699_v4 = vadd.f32 %v10733_v14, %v17499_v52 }
0x4bd8   :  { %v10740_v18 = vsel %vm683_vm0, %v17696_v23, 0.0 }
0x4bd9   :  { %10741 = vadd.xlane.f32.xlu0 %v10740_v18  ;;  %v10737_v5 = vsel %vm683_vm0, %v17699_v4, 0.0 }
0x4bda   :  { %10738 = vadd.xlane.f32.xlu1 %v10737_v5 }
0x4bdb   :  { %v14386_v44 = vpop.f32.mrb[78].mxu0 }
0x4bdc   :  { %v10964_v25 = vpop.f32.mrb[79].mxu0  ;;  %v17711_v9 = vadd.f32 %v14386_v44, %v13287_v57 }
0x4bdd   :  { %v17705_v51 = vadd.f32 %v13287_v57, %v10964_v25 }
0x4c66   :  { %v10742_v31 = vpop.xlane.xlu0 %10741 }
0x4c67   :  { %v10744_v45 = vmul.f32 0.03125, %v10742_v31  ;;  %v10739_v52 = vpop.xlane.xlu1 %10738 }
0x4c68   :  { %v10743_v30 = vmul.f32 0.03125, %v10739_v52 }
0x4c69   :  { %v10746_v6 = vsub.f32 %v17696_v23, %v10744_v45 }
0x4c6a   :  { %v10745_v39 = vsub.f32 %v17699_v4, %v10743_v30 }
0x4c6b   :  { %v10748_v16 = vmul.f32 %v10746_v6, %v10746_v6  ;;  %v10779_v29 = vmul.f32 %v13282_v28, %v10746_v6 }
0x4c6c   :  { %v10747_v47 = vmul.f32 %v10745_v39, %v10745_v39  ;;  %v10778_v15 = vmul.f32 %v13282_v28, %v10745_v39 }
0x4c6d   :  { %v10752_v60 = vsel %vm683_vm0, %v10748_v16, 0.0 }
0x4c6e   :  { %10753 = vadd.xlane.f32.xlu1 %v10752_v60  ;;  %v10749_v63 = vsel %vm683_vm0, %v10747_v47, 0.0 }
0x4c6f   :  { %10750 = vadd.xlane.f32.xlu0 %v10749_v63 }
0x4c7f   :  { %11384 = vrot.lane.b32.xlu1 %v17711_v9, %s16017_s21 }
0x4cfb   :  { %v10754_v3 = vpop.xlane.xlu1 %10753 }
0x4cfc   :  { %v10756_v7 = vmul.f32 0.032258064, %v10754_v3  ;;  %v10751_v10 = vpop.xlane.xlu0 %10750 }
0x4cfd   :  { %v10755_v12 = vmul.f32 0.032258064, %v10751_v10 }
0x4cfe   :  { %15067 = vrsqrt.f32 %v10756_v7  ;;  %vm10766_vm3 = vcmp.eq.f32.partialorder %v10756_v7, inf  ;;  %v10769_v21 = vand.u32 2147483648, %v10756_v7  ;;  %vm10768_vm4 = vcmp.eq.f32.partialorder %v10756_v7, 0.0 }
0x4cff   :  { %15069 = vrsqrt.f32 %v10755_v12  ;;  %vm10759_vm7 = vcmp.eq.f32.partialorder %v10755_v12, inf  ;;  %v10762_v24 = vand.u32 2147483648, %v10755_v12  ;;  %vm10761_vm9 = vcmp.eq.f32.partialorder %v10755_v12, 0.0  ;;  %v11385_v16 = vpop.permute.xlu1 %11384 }
0x4d08   :  { %v15068_v19 = vpop.eup %15067 }
0x4d09   :  { %v15070_v48 = vpop.eup %15069  ;;  %v10765_v27 = vmul.f32 %v15068_v19, %v10756_v7 }
0x4d0a   :  { %v10758_v49 = vmul.f32 %v15070_v48, %v10755_v12 }
0x4d0b   :  { %v10767_v62 = vsel %vm10766_vm3, %v10756_v7, %v10765_v27 }
0x4d0c   :  { %v10770_v11 = vsel %vm10768_vm4, %v10769_v21, %v10767_v62  ;;  %v10760_v59 = vsel %vm10759_vm7, %v10755_v12, %v10758_v49 }
0x4d0d   :  { %v10781_v22 = vadd.f32 1e-06, %v10770_v11  ;;  %v10763_v26 = vsel %vm10761_vm9, %v10762_v24, %v10760_v59 }
0x4d0e   :  { %v10780_v58 = vadd.f32 1e-06, %v10763_v26 }
0x4d0f   :  { %15071 = vrcp.f32 %v10781_v22 }
0x4d10   :  { %15073 = vrcp.f32 %v10780_v58 }
0x4d19   :  { %v15072_v17 = vpop.eup %15071 }
0x4d1a   :  { %v15074_v32 = vpop.eup %15073  ;;  %v10785_v56 = vmul.f32 %v15072_v17, %v10779_v29 }
0x4d1b   :  { %v10783_v38 = vmul.f32 %v15074_v32, %v10778_v15 }
0x4d1c   :  { %v10794_v42 = vadd.f32 %v13283_v35, %v10785_v56 }
0x4d1d   :  { %v10793_v40 = vadd.f32 %v13283_v35, %v10783_v38 }
0x4d1f   :  { %14373 = vmatprep.mubr.msk.f32.mxu1 %vm683_vm0, %v10793_v40 }
0x4d20   :  { %14374 = vmatmul.mubr.msk.f32.vlgmr.msra.gmra.mrb[116].mxu1 %vm683_vm0, %v10794_v42 }
0x4d21   :  { %14388 = vmatpush3.xpose.msk.msra.mxu1 %vm841_vm6, %v17705_v51  ;;  %14389 = vmatprep.mubr.msk.f32.mxu1 %vm16013_vm5, %v16012_v46 }
0x4d22   :  { %14392 = vmatprep.subr.mxu1 %v16012_v46 }
0x4df3   :  { %v14375_v1 = vpop.f32.mrb[116].mxu1 }
0x4df4   :  { %v10878_v41 = vpop.f32.mrb[117].mxu1  ;;  %v17735_v50 = vadd.f32 %v14375_v1, %v13284_v43 }
0x4df5   :  { %v17727_v0 = vadd.f32 %v13284_v43, %v10878_v41 }
0x4df7   :  { %14390 = vmatmul.mubr.msk.f32.vlgmr.msra.gmra.mrb[118].mxu1 %vm841_vm6, %v17727_v0 }
0x4df8   :  { %14393 = vmatpush3.xpose.msk.msra.mxu1 %vm841_vm6, %v17711_v9  ;;  %14394 = vmatprep.mubr.msk.f32.mxu1 %vm16013_vm5, %v16012_v46 }
0x4df9   :  { %14402 = vmatprep.subr.mxu1 %v16012_v46 }
0x4dfb   :  { %14395 = vmatmul.mubr.msk.f32.vlgmr.msra.gmra.mrb[120].mxu1 %vm841_vm6, %v17735_v50 }
0x4dfc   :  { %14404 = vmatprep.mubr.msk.f32.mxu1 %vm16013_vm5, %v16012_v46 }
0x4eca   :  { %v11045_v34 = vpop.f32.mrb[118].mxu1 }
0x4ecb   :  { %v14391_v53 = vpop.f32.mrb[119].mxu1  ;;  %v11125_v30 = vmul.f32 0.35355338, %v11045_v34 }
0x4ecd   :  { %v11127_v6 = vsel %vm1005_vm10, -1e+09, %v11125_v30 }
0x4ece   :  { %v11121_v36 = vpop.f32.mrb[120].mxu1  ;;  %v11129_v39 = vsel %vm841_vm6, %v11127_v6, -inf }
0x4ecf   :  { %v11126_v54 = vmul.f32 0.35355338, %v11121_v36  ;;  %v14396_v14 = vpop.f32.mrb[121].mxu1 }
0x4ed1   :  { %v11128_v18 = vsel %vm1006_vm8, -1e+09, %v11126_v54 }
0x4ed2   :  { %v11132_v5 = vsel %vm841_vm6, %v11128_v18, -inf }
0x4ed3   :  { %11133 = vmax.xlane.f32.xlu0 %v11132_v5 }
0x4ee9   :  { %11227 = vrot.lane.b32.xlu0 %v17711_v9, %s16014_s24 }
0x4f60   :  { %v11134_v57 = vpop.xlane.xlu0 %11133 }
0x4f61   :  { %v11136_v44 = vsub.f32 %v11128_v18, %v11134_v57 }
0x4f63   :  { %v11139_v25 = vmul.f32 1.442695, %v11136_v44 }
0x4f64   :  { %v11228_v31 = vpop.permute.xlu0 %11227 }
0x4f65   :  { %15075 = vpow2.f32 %v11139_v25  ;;  %14403 = vmatpush3.msra.mxu1 %v11228_v31 }
0x4f66   :  { %14412 = vmatprep.subr.mxu1 %v16012_v46 }
0x4f6f   :  { %v15076_v45 = vpop.eup %15075 }
0x4f70   :  { %v11144_v52 = vsel %vm841_vm6, %v15076_v45, 0.0 }
0x4f71   :  { %11145 = vadd.xlane.f32.xlu1 %v11144_v52 }
0x4f82   :  { %11382 = vrot.lane.b32.xlu1 %v17735_v50, %s16017_s21 }
0x4fa6   :  { %11130 = vmax.xlane.f32.xlu1 %v11129_v39 }
0x4fb7   :  { %11306 = vrot.lane.b32.xlu1 %v17705_v51, %s16017_s21 }
0x4fbb   :  { %11304 = vrot.lane.b32.xlu1 %v17727_v0, %s16017_s21  ;;  %s18080_s21 = sld [smem:[#allocation109_spill]] }
0x4fbf   :  { %11803 = vrot.lane.b32.xlu1 %v17705_v51, %s16021_s8 }
0x4ffe   :  { %v11146_v47 = vpop.xlane.xlu1 %11145 }
0x4fff   :  { %15077 = vrcp.f32 %v11146_v47 }
0x5002   :  { %v11383_v2 = vpop.permute.xlu1 %11382 }
0x5009   :  { %v15078_v60 = vpop.eup %15077 }
0x500a   :  { %v11150_v63 = vmul.f32 %v15078_v60, %v15076_v45 }
0x500c   :  { %14405 = vmatmul.mubr.msk.f32.vlgmr.msra.gmra.mrb[122].mxu1 %vm841_vm6, %v11150_v63 }
0x500d   :  { %14413 = vmatpush3.xpose.msk.msra.mxu1 %vm841_vm6, %v11385_v16  ;;  %14414 = vmatprep.mubr.msk.f32.mxu1 %vm16013_vm5, %v16012_v46 }
0x500e   :  { %14422 = vmatprep.subr.mxu1 %v16012_v46 }
0x5010   :  { %14415 = vmatmul.mubr.msk.f32.vlgmr.msra.gmra.mrb[124].mxu1 %vm841_vm6, %v11383_v2 }
0x5011   :  { %14424 = vmatprep.mubr.msk.f32.mxu1 %vm16013_vm5, %v16012_v46 }
0x5033   :  { %v11131_v13 = vpop.xlane.xlu1 %11130 }
0x5034   :  { %v11135_v37 = vsub.f32 %v11127_v6, %v11131_v13 }
0x5036   :  { %v11137_v20 = vmul.f32 1.442695, %v11135_v37 }
0x5037   :  { %v11307_v12 = vpop.permute.xlu1 %11306 }
0x5038   :  { %15079 = vpow2.f32 %v11137_v20 }
0x503b   :  { %v11305_v21 = vpop.permute.xlu1 %11304 }
0x503f   :  { %v11804_v43 = vpop.permute.xlu1 %11803 }
0x5042   :  { %v15080_v55 = vpop.eup %15079 }
0x5043   :  { %v11141_v33 = vsel %vm841_vm6, %v15080_v55, 0.0 }
0x5044   :  { %11142 = vadd.xlane.f32.xlu0 %v11141_v33 }
0x505a   :  { %11151 = vrot.lane.b32.xlu0 %v17705_v51, %s16014_s24  ;;  %s18078_s24 = sld [smem:[#allocation106_spill]] }
0x5060   :  { %v11638_v33 = vld [vmem:[%s18078_s24 + $0x8] sm:$0xff] }
0x50d1   :  { %v11143_v3 = vpop.xlane.xlu0 %11142 }
0x50d2   :  { %15081 = vrcp.f32 %v11143_v3  ;;  %v11303_v3 = vld [vmem:[%s18078_s24] sm:$0xff] }
0x50d5   :  { %v11152_v7 = vpop.permute.xlu0 %11151 }
0x50d6   :  { %14398 = vmatpush3.msra.mxu0 %v11152_v7 }
0x50d7   :  { %14407 = vmatprep.subr.mxu0 %v16012_v46 }
0x50dc   :  { %v15082_v10 = vpop.eup %15081 }
0x50dd   :  { %v11149_v19 = vmul.f32 %v15082_v10, %v15080_v55 }
0x50df   :  { %14400 = vmatmul.mubr.msk.f32.vlgmr.msra.gmra.mrb[80].mxu0 %vm841_vm6, %v11149_v19  ;;  %v17773_v48 = vpop.f32.mrb[122].mxu1 }
0x50e0   :  { %14408 = vmatpush3.xpose.msk.msra.mxu0 %vm841_vm6, %v11307_v12  ;;  %v14406_v27 = vpop.f32.mrb[123].mxu1  ;;  %14409 = vmatprep.mubr.msk.f32.mxu0 %vm16013_vm5, %v16012_v46 }
0x50e1   :  { %14417 = vmatprep.subr.mxu0 %v16012_v46 }
0x50e3   :  { %14410 = vmatmul.mubr.msk.f32.vlgmr.msra.gmra.mrb[82].mxu0 %vm841_vm6, %v11305_v21  ;;  %v11456_v49 = vpop.f32.mrb[124].mxu1 }
0x50e4   :  { %v11461_v62 = vmul.f32 0.35355338, %v11456_v49  ;;  %v14416_v24 = vpop.f32.mrb[125].mxu1  ;;  %14419 = vmatprep.mubr.msk.f32.mxu0 %vm16013_vm5, %v16012_v46 }
0x50e6   :  { %v11463_v11 = vsel %vm1006_vm8, -1e+09, %v11461_v62 }
0x50e7   :  { %v11467_v59 = vsel %vm841_vm6, %v11463_v11, -inf }
0x50e8   :  { %11468 = vmax.xlane.f32.xlu0 %v11467_v59 }
0x50fe   :  { %11562 = vrot.lane.b32.xlu0 %v17711_v9, %s16016_s13 }
0x5102   :  { %11801 = vrot.lane.b32.xlu0 %v17727_v0, %s16021_s8 }
0x5106   :  { %11879 = vrot.lane.b32.xlu0 %v17735_v50, %s16021_s8 }
0x5175   :  { %v11469_v22 = vpop.xlane.xlu0 %11468 }
0x5176   :  { %v11471_v26 = vsub.f32 %v11463_v11, %v11469_v22 }
0x5178   :  { %v11474_v58 = vmul.f32 1.442695, %v11471_v26 }
0x5179   :  { %v11563_v28 = vpop.permute.xlu0 %11562 }
0x517a   :  { %15083 = vpow2.f32 %v11474_v58  ;;  %14423 = vmatpush3.msra.mxu1 %v11563_v28  ;;  %v12135_v58 = vld [vmem:[%s18078_s24 + $0x10] sm:$0xff] }
0x517b   :  { %14437 = vmatprep.subr.mxu1 %v16012_v46 }
0x517d   :  { %v11802_v53 = vpop.permute.xlu0 %11801 }
0x5181   :  { %v11880_v54 = vpop.permute.xlu0 %11879 }
0x5184   :  { %v15084_v29 = vpop.eup %15083 }
0x5185   :  { %v11479_v17 = vsel %vm841_vm6, %v15084_v29, 0.0 }
0x5186   :  { %11480 = vadd.xlane.f32.xlu1 %v11479_v17 }
0x5197   :  { %11881 = vrot.lane.b32.xlu1 %v17711_v9, %s16021_s8 }
0x51b2   :  { %v17795_v15 = vpop.f32.mrb[80].mxu0 }
0x51b3   :  { %v14401_v32 = vpop.f32.mrb[81].mxu0 }
0x51b6   :  { %v11378_v56 = vpop.f32.mrb[82].mxu0 }
0x51b7   :  { %v11460_v35 = vmul.f32 0.35355338, %v11378_v56  ;;  %v14411_v38 = vpop.f32.mrb[83].mxu0 }
0x51b9   :  { %v11462_v40 = vsel %vm1005_vm10, -1e+09, %v11460_v35 }
0x51ba   :  { %v11464_v42 = vsel %vm841_vm6, %v11462_v40, -inf }
0x51bb   :  { %11465 = vmax.xlane.f32.xlu1 %v11464_v42 }
0x5213   :  { %v11481_v1 = vpop.xlane.xlu1 %11480 }
0x5214   :  { %15085 = vrcp.f32 %v11481_v1 }
0x5217   :  { %v11882_v36 = vpop.permute.xlu1 %11881 }
0x521e   :  { %v15086_v41 = vpop.eup %15085 }
0x521f   :  { %v11485_v34 = vmul.f32 %v15086_v41, %v15084_v29 }
0x5221   :  { %14425 = vmatmul.mubr.msk.f32.vlgmr.msra.gmra.mrb[126].mxu1 %vm841_vm6, %v11485_v34 }
0x5222   :  { %14438 = vmatpush3.xpose.msk.msra.mxu1 %vm841_vm6, %v11804_v43  ;;  %14439 = vmatprep.mubr.msk.f32.mxu1 %vm16013_vm5, %v16012_v46 }
0x5223   :  { %14442 = vmatprep.subr.mxu1 %v16012_v46 }
0x5225   :  { %14440 = vmatmul.mubr.msk.f32.vlgmr.msra.gmra.mrb[128].mxu1 %vm841_vm6, %v11802_v53 }
0x5226   :  { %14443 = vmatpush3.xpose.msk.msra.mxu1 %vm841_vm6, %v11882_v36  ;;  %14444 = vmatprep.mubr.msk.f32.mxu1 %vm16013_vm5, %v16012_v46 }
0x5227   :  { %14452 = vmatprep.subr.mxu1 %v16012_v46 }
0x5229   :  { %14445 = vmatmul.mubr.msk.f32.vlgmr.msra.gmra.mrb[130].mxu1 %vm841_vm6, %v11880_v54 }
0x522a   :  { %14454 = vmatprep.mubr.msk.f32.mxu1 %vm16013_vm5, %v16012_v46 }
0x5248   :  { %v11466_v14 = vpop.xlane.xlu1 %11465 }
0x5249   :  { %v11470_v18 = vsub.f32 %v11462_v40, %v11466_v14 }
0x524b   :  { %v11472_v5 = vmul.f32 1.442695, %v11470_v18 }
0x524d   :  { %15087 = vpow2.f32 %v11472_v5 }
0x5257   :  { %v15088_v57 = vpop.eup %15087 }
0x5258   :  { %v11476_v44 = vsel %vm841_vm6, %v15088_v57, 0.0 }
0x5259   :  { %11477 = vadd.xlane.f32.xlu0 %v11476_v44 }
0x526f   :  { %11486 = vrot.lane.b32.xlu0 %v17705_v51, %s16016_s13  ;;  %s18079_s13 = sld [smem:[#allocation108_spill]] }
0x5273   :  { %12059 = vrot.lane.b32.xlu0 %v17711_v9, %s16018_s27 }
0x5277   :  { %12221 = vrot.lane.b32.xlu0 %v17705_v51, %s16024_s0 }
0x527b   :  { %12299 = vrot.lane.b32.xlu0 %v17711_v9, %s16024_s0 }
0x527f   :  { %12219 = vrot.lane.b32.xlu0 %v17727_v0, %s16024_s0 }
0x52e6   :  { %v11478_v25 = vpop.xlane.xlu0 %11477 }
0x52e7   :  { %15089 = vrcp.f32 %v11478_v25 }
0x52ea   :  { %v11487_v31 = vpop.permute.xlu0 %11486 }
0x52eb   :  { %14418 = vmatpush3.msra.mxu0 %v11487_v31 }
0x52ec   :  { %14427 = vmatprep.subr.mxu0 %v11638_v33 }
0x52ee   :  { %v12060_v45 = vpop.permute.xlu0 %12059 }
0x52ef   :  { %14453 = vmatpush3.msra.mxu1 %v12060_v45 }
0x52f0   :  { %14462 = vmatprep.subr.mxu1 %v16012_v46 }
0x52f1   :  { %v15090_v52 = vpop.eup %15089 }
0x52f2   :  { %v11484_v30 = vmul.f32 %v15090_v52, %v15088_v57  ;;  %v12222_v29 = vpop.permute.xlu0 %12221 }
0x52f4   :  { %14420 = vmatmul.mubr.msk.f32.vlgmr.msra.gmra.mrb[84].mxu0 %vm841_vm6, %v11484_v30  ;;  %v11634_v6 = vpop.f32.mrb[126].mxu1 }
0x52f5   :  { %v14426_v39 = vpop.f32.mrb[127].mxu1  ;;  %14428 = vmatpush3.msra.mxu0 %v11638_v33 }
0x52f6   :  { %14432 = vmatprep.subr.mxu0 %v11303_v3  ;;  %v12300_v56 = vpop.permute.xlu0 %12299 }
0x52f8   :  { %v11875_v16 = vpop.f32.mrb[128].mxu1 }
0x52f9   :  { %v11957_v47 = vmul.f32 0.35355338, %v11875_v16  ;;  %v14441_v60 = vpop.f32.mrb[129].mxu1 }
0x52fa   :  { %v12220_v35 = vpop.permute.xlu0 %12219 }
0x52fb   :  { %v11959_v0 = vsel %vm1005_vm10, -1e+09, %v11957_v47 }
0x52fc   :  { %v11953_v63 = vpop.f32.mrb[130].mxu1  ;;  %v11961_v2 = vsel %vm841_vm6, %v11959_v0, -inf }
0x52fd   :  { %v11958_v13 = vmul.f32 0.35355338, %v11953_v63  ;;  %11962 = vmax.xlane.f32.xlu1 %v11961_v2  ;;  %v14446_v37 = vpop.f32.mrb[131].mxu1 }
0x52fe   :  { %v12553_v37 = vld [vmem:[%s18078_s24 + $0x18] sm:$0xff] }
0x52ff   :  { %v11960_v20 = vsel %vm1006_vm8, -1e+09, %v11958_v13 }
0x5300   :  { %v11964_v55 = vsel %vm841_vm6, %v11960_v20, -inf }
0x5301   :  { %11965 = vmax.xlane.f32.xlu1 %v11964_v55 }
0x538a   :  { %v11963_v7 = vpop.xlane.xlu1 %11962 }
0x538b   :  { %v11967_v10 = vsub.f32 %v11959_v0, %v11963_v7 }
0x538d   :  { %v11969_v12 = vmul.f32 1.442695, %v11967_v10 }
0x538e   :  { %v11966_v19 = vpop.xlane.xlu1 %11965 }
0x538f   :  { %15091 = vpow2.f32 %v11969_v12  ;;  %v11968_v27 = vsub.f32 %v11960_v20, %v11966_v19 }
0x5391   :  { %v11971_v21 = vmul.f32 1.442695, %v11968_v27 }
0x5393   :  { %15093 = vpow2.f32 %v11971_v21 }
0x5399   :  { %v15092_v49 = vpop.eup %15091 }
0x539a   :  { %v11973_v62 = vsel %vm841_vm6, %v15092_v49, 0.0 }
0x539b   :  { %11974 = vadd.xlane.f32.xlu1 %v11973_v62 }
0x539d   :  { %v15094_v24 = vpop.eup %15093 }
0x539e   :  { %v11976_v11 = vsel %vm841_vm6, %v15094_v24, 0.0 }
0x539f   :  { %11977 = vadd.xlane.f32.xlu1 %v11976_v11 }
0x53b0   :  { %11983 = vrot.lane.b32.xlu1 %v17705_v51, %s16018_s27  ;;  %s16026_s27 = smov [#allocation53]  }
0x53b1   :  { %s12963_s8 = sshll.u32 %s16026_s27, 4  ;;  %s12964_s8 = int_to_ptr.vmem [resolvable:$true] %s12963_s8 }
0x53b2   :  { %p15854_p13 = scmp.lt.s32.totalorder %s12964_s8, %s12964_s8 }
0x53b4   :  { %12297 = vrot.lane.b32.xlu1 %v17735_v50, %s16024_s0 }
0x53c7   :  { %v11558_v59 = vpop.f32.mrb[84].mxu0 }
0x53c8   :  { %v14421_v22 = vpop.f32.mrb[85].mxu0  ;;  %14429 = vmatprep.mubr.msk.f32.mxu0 %vm841_vm6, %v11558_v59 }
0x53c9   :  { %14430 = vmatmul.mubr.msk.f32.vlgmr.msra.gmra.mrb[86].mxu0 %vm841_vm6, %v11634_v6 }
0x53ca   :  { %14434 = vmatprep.mubr.msk.f32.mxu0 %vm841_vm6, %v17795_v15  ;;  %14433 = vmatpush3.msra.mxu0 %v11303_v3  ;;  %v13322_v3 = vld [vmem:[#allocation20] ss:$0 sm:$0xff] }
0x53cb   :  { %14447 = vmatprep.subr.mxu0 %v16012_v46 }
0x53d1   :  { %14435 = vmatmul.mubr.msk.f32.vlgmr.msra.gmra.mrb[86].mxu0 %vm841_vm6, %v17773_v48 }
0x53d2   :  { %14449 = vmatprep.mubr.msk.f32.mxu0 %vm16013_vm5, %v16012_v46 }
0x5428   :  { %v11975_v26 = vpop.xlane.xlu1 %11974 }
0x5429   :  { %15095 = vrcp.f32 %v11975_v26 }
0x542c   :  { %v11978_v50 = vpop.xlane.xlu1 %11977 }
0x542d   :  { %15097 = vrcp.f32 %v11978_v50 }
0x5430   :  { %v11984_v28 = vpop.permute.xlu1 %11983 }
0x5431   :  { %14448 = vmatpush3.msra.mxu0 %v11984_v28 }
0x5432   :  { %14457 = vmatprep.subr.mxu0 %v12135_v58 }
0x5433   :  { %v15096_v17 = vpop.eup %15095 }
0x5434   :  { %v11981_v15 = vmul.f32 %v15096_v17, %v15092_v49  ;;  %v12298_v1 = vpop.permute.xlu1 %12297  ;;  %v12707_v17 = vld [vmem:[%s18079_s13 + $0x8] sm:$0xff] }
0x5436   :  { %14450 = vmatmul.mubr.msk.f32.vlgmr.msra.gmra.mrb[88].mxu0 %vm841_vm6, %v11981_v15  ;;  %v12708_v15 = vld [vmem:[%s18079_s13 + $0x10] sm:$0xff] }
0x5437   :  { %v15098_v32 = vpop.eup %15097  ;;  %14458 = vmatpush3.msra.mxu0 %v12135_v58 }
0x5438   :  { %v11982_v48 = vmul.f32 %v15098_v32, %v15094_v24  ;;  %14467 = vmatprep.subr.mxu0 %v16012_v46 }
0x543a   :  { %14455 = vmatmul.mubr.msk.f32.vlgmr.msra.gmra.mrb[132].mxu1 %vm841_vm6, %v11982_v48 }
0x543b   :  { %14463 = vmatpush3.xpose.msk.msra.mxu1 %vm841_vm6, %v12222_v29  ;;  %14464 = vmatprep.mubr.msk.f32.mxu1 %vm16013_vm5, %v16012_v46  ;;  %v12706_v29 = vld [vmem:[%s18079_s13] sm:$0xff] }
0x543c   :  { %14472 = vmatprep.subr.mxu1 %v16012_v46  ;;  %v14653_v32 = vpack.c.bf16 %v12707_v17, %v12706_v29 }
0x543e   :  { %14465 = vmatmul.mubr.msk.f32.vlgmr.msra.gmra.mrb[134].mxu1 %vm841_vm6, %v12220_v35  ;;  %v12800_v35 = vld [vmem:[%s18080_s21] sm:$0xff] }
0x543f   :  { %14474 = vmatprep.mubr.msk.f32.mxu1 %vm16013_vm5, %v16012_v46 }
0x5509   :  { %v12055_v38 = vpop.f32.mrb[88].mxu0 }
0x550a   :  { %v14451_v40 = vpop.f32.mrb[89].mxu0  ;;  %14459 = vmatprep.mubr.msk.f32.mxu0 %vm841_vm6, %v12055_v38  ;;  %v12801_v38 = vld [vmem:[%s18080_s21 + $0x8] sm:$0xff] }
0x550b   :  { %v12802_v40 = vld [vmem:[%s18080_s21 + $0x10] sm:$0xff] }
0x550d   :  { %v12131_v42 = vpop.f32.mrb[132].mxu1 }
0x550e   :  { %v14456_v43 = vpop.f32.mrb[133].mxu1  ;;  %14460 = vmatmul.mubr.msk.f32.vlgmr.msra.gmra.mrb[86].mxu0 %vm841_vm6, %v12131_v42  ;;  %v14661_v42 = vpack.c.bf16 %v12801_v38, %v12800_v35 }
0x550f   :  { %14468 = vmatpush3.xpose.msk.msra.mxu0 %vm841_vm6, %v12300_v56  ;;  %14469 = vmatprep.mubr.msk.f32.mxu0 %vm16013_vm5, %v16012_v46  ;;  %v12709_v56 = vld [vmem:[%s18079_s13 + $0x18] sm:$0xff] }
0x5510   :  { %14477 = vmatprep.subr.mxu0 %v16012_v46  ;;  %v14657_v48 = vpack.c.bf16 %v12709_v56, %v12708_v15  ;;  %v12803_v43 = vld [vmem:[%s18080_s21 + $0x18] sm:$0xff] }
0x5511   :  { %v12293_v41 = vpop.f32.mrb[134].mxu1 }
0x5512   :  { %v12375_v34 = vmul.f32 0.35355338, %v12293_v41  ;;  %v14466_v53 = vpop.f32.mrb[135].mxu1  ;;  %14470 = vmatmul.mubr.msk.f32.vlgmr.msra.gmra.mrb[90].mxu0 %vm841_vm6, %v12298_v1  ;;  %v14665_v1 = vpack.c.bf16 %v12803_v43, %v12802_v40  ;;  %v12804_v41 = vld [vmem:[%s18080_s21 + $0x20] sm:$0xff] }
0x5513   :  { %14479 = vmatprep.mubr.msk.f32.mxu0 %vm16013_vm5, %v16012_v46 }
0x5514   :  { %v12377_v36 = vsel %vm1005_vm10, -1e+09, %v12375_v34  ;;  %v12805_v34 = vld [vmem:[%s18080_s21 + $0x28] sm:$0xff] }
0x5515   :  { %v12379_v54 = vsel %vm841_vm6, %v12377_v36, -inf  ;;  %v14669_v53 = vpack.c.bf16 %v12805_v34, %v12804_v41 }
0x5516   :  { %12380 = vmax.xlane.f32.xlu0 %v12379_v54 }
0x55a3   :  { %v12381_v14 = vpop.xlane.xlu0 %12380 }
0x55a4   :  { %v12385_v18 = vsub.f32 %v12377_v36, %v12381_v14 }
0x55a6   :  { %v12387_v5 = vmul.f32 1.442695, %v12385_v18 }
0x55a8   :  { %15099 = vpow2.f32 %v12387_v5 }
0x55b2   :  { %v15100_v57 = vpop.eup %15099 }
0x55b3   :  { %v12391_v44 = vsel %vm841_vm6, %v15100_v57, 0.0 }
0x55b4   :  { %12392 = vadd.xlane.f32.xlu0 %v12391_v44 }
0x55e5   :  { %v12371_v25 = vpop.f32.mrb[90].mxu0 }
0x55e6   :  { %v12376_v31 = vmul.f32 0.35355338, %v12371_v25  ;;  %v14471_v45 = vpop.f32.mrb[91].mxu0 }
0x55e8   :  { %v12378_v46 = vsel %vm1006_vm8, -1e+09, %v12376_v31 }
0x55e9   :  { %v12382_v8 = vsel %vm841_vm6, %v12378_v46, -inf }
0x55ea   :  { %12383 = vmax.xlane.f32.xlu1 %v12382_v8 }
0x55fb   :  { %12477 = vrot.lane.b32.xlu1 %v17711_v9, %s16023_s12 }
0x5641   :  { %v12393_v61 = vpop.xlane.xlu0 %12392 }
0x5677   :  { %v12384_v52 = vpop.xlane.xlu1 %12383 }
0x5678   :  { %v12386_v30 = vsub.f32 %v12378_v46, %v12384_v52 }
0x567a   :  { %v12389_v6 = vmul.f32 1.442695, %v12386_v30 }
0x567b   :  { %v12478_v39 = vpop.permute.xlu1 %12477 }
0x567c   :  { %15101 = vpow2.f32 %v12389_v6  ;;  %14478 = vmatpush3.msra.mxu0 %v12478_v39 }
0x567d   :  { %15103 = vrcp.f32 %v12393_v61  ;;  %14482 = vmatprep.subr.mxu0 %v12553_v37 }
0x5686   :  { %v15102_v16 = vpop.eup %15101 }
0x5687   :  { %v12394_v47 = vsel %vm841_vm6, %v15102_v16, 0.0  ;;  %v15104_v0 = vpop.eup %15103 }
0x5688   :  { %12395 = vadd.xlane.f32.xlu0 %v12394_v47  ;;  %v12399_v9 = vmul.f32 %v15104_v0, %v15100_v57 }
0x569e   :  { %12401 = vrot.lane.b32.xlu0 %v17705_v51, %s16023_s12  ;;  %s15849_s12 = scalar_lea.vmem %s12964_s8, 256 }
0x569f   :  { %p15850_p12 = scmp.ne.s32.totalorder %s12964_s8, %s15849_s12  ;;  %p15855_p0 = scmp.lt.s32.totalorder %s15849_s12, %s15849_s12 }
0x56a1   :  { %p15856_p1 = por %p15855_p0, %p15854_p13 }
0x56a3   :  { %p15857_p2 = pnand %p15856_p1, %p15850_p12 }
0x5715   :  { %v12396_v60 = vpop.xlane.xlu0 %12395 }
0x5716   :  { %15105 = vrcp.f32 %v12396_v60 }
0x5719   :  { %v12402_v63 = vpop.permute.xlu0 %12401 }
0x571a   :  { %14473 = vmatpush3.msra.mxu1 %v12402_v63  ;;  %v13324_v63 = vld [vmem:[#allocation13] ss:$0 sm:$0xff] }
0x571b   :  { %14475 = vmatmul.mubr.msk.f32.vlgmr.msra.gmra.mrb[136].mxu1 %vm841_vm6, %v12399_v9  ;;  %14654 = vmatprep.subr.bf16.mxu1 %v14653_v32 }
0x571c   :  { %14656 = vmatpush3.bf16.msra.mxu1 %v14653_v32 }
0x571d   :  { %14658 = vmatprep.subr.bf16.mxu1 %v14657_v48 }
0x5720   :  { %v15106_v2 = vpop.eup %15105  ;;  %14660 = vmatpush3.bf16.msra.mxu1 %v14657_v48 }
0x5721   :  { %v12400_v13 = vmul.f32 %v15106_v2, %v15102_v16  ;;  %v13323_v16 = vld [vmem:[#allocation14] ss:$0 sm:$0xff] }
0x5723   :  { %14480 = vmatmul.mubr.msk.f32.vlgmr.msra.gmra.mrb[92].mxu0 %vm841_vm6, %v12400_v13 }
0x5724   :  { %14483 = vmatpush3.msra.mxu0 %v12553_v37 }
0x5725   :  { %14662 = vmatprep.subr.bf16.mxu0 %v14661_v42 }
0x57ee   :  { %v12473_v20 = vpop.f32.mrb[136].mxu1 }
0x57ef   :  { %v14476_v55 = vpop.f32.mrb[137].mxu1  ;;  %14484 = vmatprep.mubr.msk.f32.mxu0 %vm841_vm6, %v12473_v20  ;;  %v12806_v20 = vld [vmem:[%s18080_s21 + $0x30] sm:$0xff] }
0x57f0   :  { %v12807_v55 = vld [vmem:[%s18080_s21 + $0x38] sm:$0xff] }
0x57f6   :  { %v12549_v51 = vpop.f32.mrb[92].mxu0 }
0x57f7   :  { %v14481_v33 = vpop.f32.mrb[93].mxu0  ;;  %14485 = vmatmul.mubr.msk.f32.vlgmr.msra.gmra.mrb[86].mxu0 %vm841_vm6, %v12549_v51  ;;  %v14673_v51 = vpack.c.bf16 %v12807_v55, %v12806_v20 }
0x57f8   :  { %14664 = vmatpush3.bf16.msra.mxu0 %v14661_v42  ;;  %v13325_v33 = vld [vmem:[#allocation2] ss:$0 sm:$0xff] }
0x57f9   :  { %14666 = vmatprep.subr.bf16.mxu0 %v14665_v1 }
0x57fc   :  { %14668 = vmatpush3.bf16.msra.mxu0 %v14665_v1 }
0x57fd   :  { %14670 = vmatprep.subr.bf16.mxu0 %v14669_v53 }
0x5800   :  { %14672 = vmatpush3.bf16.msra.mxu0 %v14669_v53 }
0x5801   :  { %14674 = vmatprep.subr.bf16.mxu0 %v14673_v51 }
0x5804   :  { %14676 = vmatpush3.bf16.msra.mxu0 %v14673_v51 }
0x58ca   :  { %v14486_v7 = vpop.f32.mrb[86].mxu0 }
0x58cb   :  { %v12645_v10 = vadd.f32 %v14486_v7, %v13322_v3  ;;  %v12626_v12 = vpop.f32.mrb[87].mxu0 }
0x58cc   :  { %v12644_v19 = vadd.f32 %v13322_v3, %v12626_v12 }
0x58cd   :  { %v17887_v27 = vadd.f32 %v12645_v10, %v17696_v23 }
0x58ce   :  { %v17890_v21 = vadd.f32 %v12644_v19, %v17699_v4 }
0x58cf   :  { %v12651_v49 = vsel %vm683_vm0, %v17887_v27, 0.0 }
0x58d0   :  { %12652 = vadd.xlane.f32.xlu0 %v12651_v49  ;;  %v12648_v62 = vsel %vm683_vm0, %v17890_v21, 0.0 }
0x58d1   :  { %12649 = vadd.xlane.f32.xlu1 %v12648_v62  ;;  %v13328_v62 = vld [vmem:[#allocation5] ss:$0 sm:$0xff] }
0x595d   :  { %v12653_v24 = vpop.xlane.xlu0 %12652 }
0x595e   :  { %v12655_v11 = vmul.f32 0.03125, %v12653_v24  ;;  %v12650_v59 = vpop.xlane.xlu1 %12649 }
0x595f   :  { %v12654_v23 = vmul.f32 0.03125, %v12650_v59 }
0x5960   :  { %v12657_v22 = vsub.f32 %v17887_v27, %v12655_v11 }
0x5961   :  { %v12656_v4 = vsub.f32 %v17890_v21, %v12654_v23 }
0x5962   :  { %v12659_v26 = vmul.f32 %v12657_v22, %v12657_v22  ;;  %v12690_v47 = vmul.f32 %v13323_v16, %v12657_v22 }
0x5963   :  { %v12658_v50 = vmul.f32 %v12656_v4, %v12656_v4  ;;  %v12689_v60 = vmul.f32 %v13323_v16, %v12656_v4 }
0x5964   :  { %v12663_v58 = vsel %vm683_vm0, %v12659_v26, 0.0 }
0x5965   :  { %12664 = vadd.xlane.f32.xlu1 %v12663_v58  ;;  %v12660_v28 = vsel %vm683_vm0, %v12658_v50, 0.0 }
0x5966   :  { %12661 = vadd.xlane.f32.xlu0 %v12660_v28 }
0x59f2   :  { %v12665_v36 = vpop.xlane.xlu1 %12664 }
0x59f3   :  { %v12667_v54 = vmul.f32 0.032258064, %v12665_v36  ;;  %v12662_v14 = vpop.xlane.xlu0 %12661 }
0x59f4   :  { %v12666_v18 = vmul.f32 0.032258064, %v12662_v14 }
0x59f5   :  { %15107 = vrsqrt.f32 %v12667_v54  ;;  %vm12677_vm5 = vcmp.eq.f32.partialorder %v12667_v54, inf  ;;  %v12680_v25 = vand.u32 2147483648, %v12667_v54  ;;  %vm12679_vm6 = vcmp.eq.f32.partialorder %v12667_v54, 0.0 }
0x59f6   :  { %15109 = vrsqrt.f32 %v12666_v18  ;;  %vm12670_vm8 = vcmp.eq.f32.partialorder %v12666_v18, inf  ;;  %v12673_v46 = vand.u32 2147483648, %v12666_v18  ;;  %vm12672_vm10 = vcmp.eq.f32.partialorder %v12666_v18, 0.0 }
0x59ff   :  { %v15108_v5 = vpop.eup %15107 }
0x5a00   :  { %v15110_v57 = vpop.eup %15109  ;;  %v12676_v44 = vmul.f32 %v15108_v5, %v12667_v54 }
0x5a01   :  { %v12669_v31 = vmul.f32 %v15110_v57, %v12666_v18 }
0x5a02   :  { %v12678_v45 = vsel %vm12677_vm5, %v12667_v54, %v12676_v44 }
0x5a03   :  { %v12681_v8 = vsel %vm12679_vm6, %v12680_v25, %v12678_v45  ;;  %v12671_v52 = vsel %vm12670_vm8, %v12666_v18, %v12669_v31  ;;  %v13331_v25 = vld [vmem:[#allocation25] ss:$0 sm:$0xff] }
0x5a04   :  { %v12692_v30 = vadd.f32 1e-06, %v12681_v8  ;;  %v12674_v6 = vsel %vm12672_vm10, %v12673_v46, %v12671_v52  ;;  %v13332_v8 = vld [vmem:[#allocation23] ss:$0 sm:$0xff] }
0x5a05   :  { %v12691_v39 = vadd.f32 1e-06, %v12674_v6 }
0x5a06   :  { %15111 = vrcp.f32 %v12692_v30 }
0x5a07   :  { %15113 = vrcp.f32 %v12691_v39 }
0x5a10   :  { %v15112_v61 = vpop.eup %15111 }
0x5a11   :  { %v15114_v0 = vpop.eup %15113  ;;  %v12696_v9 = vmul.f32 %v15112_v61, %v12690_v47 }
0x5a12   :  { %v12694_v2 = vmul.f32 %v15114_v0, %v12689_v60 }
0x5a13   :  { %v12705_v37 = vadd.f32 %v13324_v63, %v12696_v9 }
0x5a14   :  { %v12704_v13 = vadd.f32 %v13324_v63, %v12694_v2 }
0x5a16   :  { %14495 = vmatprep.mubr.msk.f32.mxu1 %vm683_vm0, %v12704_v13 }
0x5a17   :  { %14496 = vmatmul.mubr.msk.f32.vlgmr.msra.gmra.mrb[138].mxu1 %vm683_vm0, %v12705_v37 }
0x5aea   :  { %v14497_v3 = vpop.f32.mrb[138].mxu1 }
0x5aeb   :  { %v12795_v7 = vadd.f32 %v14497_v3, %v13325_v33  ;;  %v12789_v10 = vpop.f32.mrb[139].mxu1 }
0x5aec   :  { %v12790_v12 = vadd.f32 %v13325_v33, %v12789_v10 }
0x5aed   :  { %v12799_v49 = vmax.f32 %v12795_v7, 0.0 }
0x5aee   :  { %v12798_v19 = vmax.f32 %v12790_v12, 0.0 }
0x5af0   :  { %14514 = vmatprep.mubr.msk.f32.mxu0 %vm2695_vm15, %v12798_v19 }
0x5af1   :  { %14515 = vmatmul.mubr.msk.f32.vlgmr.msra.gmra.mrb[94].mxu0 %vm2695_vm15, %v12799_v49 }
0x5bc4   :  { %v14516_v24 = vpop.f32.mrb[94].mxu0 }
0x5bc5   :  { %v12893_v11 = vadd.f32 %v14516_v24, %v13328_v62  ;;  %v12887_v59 = vpop.f32.mrb[95].mxu0 }
0x5bc6   :  { %v12888_v23 = vadd.f32 %v13328_v62, %v12887_v59 }
0x5bc7   :  { %v12897_v22 = vadd.f32 %v12893_v11, %v17887_v27 }
0x5bc8   :  { %v12896_v4 = vadd.f32 %v12888_v23, %v17890_v21 }
0x5bc9   :  { %v12901_v26 = vsel %vm683_vm0, %v12897_v22, 0.0 }
0x5bca   :  { %12902 = vadd.xlane.f32.xlu1 %v12901_v26  ;;  %v12898_v50 = vsel %vm683_vm0, %v12896_v4, 0.0 }
0x5bcb   :  { %12899 = vadd.xlane.f32.xlu0 %v12898_v50 }
0x5c57   :  { %v12903_v58 = vpop.xlane.xlu1 %12902 }
0x5c58   :  { %v12905_v28 = vmul.f32 0.03125, %v12903_v58  ;;  %v12900_v29 = vpop.xlane.xlu0 %12899 }
0x5c59   :  { %v12904_v17 = vmul.f32 0.03125, %v12900_v29 }
0x5c5a   :  { %v12907_v15 = vsub.f32 %v12897_v22, %v12905_v28 }
0x5c5b   :  { %v12906_v32 = vsub.f32 %v12896_v4, %v12904_v17 }
0x5c5c   :  { %v12909_v56 = vmul.f32 %v12907_v15, %v12907_v15  ;;  %v12940_v31 = vmul.f32 %v13331_v25, %v12907_v15 }
0x5c5d   :  { %v12908_v48 = vmul.f32 %v12906_v32, %v12906_v32  ;;  %v12939_v46 = vmul.f32 %v13331_v25, %v12906_v32 }
0x5c5e   :  { %v12913_v35 = vsel %vm683_vm0, %v12909_v56, 0.0 }
0x5c5f   :  { %12914 = vadd.xlane.f32.xlu1 %v12913_v35  ;;  %v12910_v27 = vsel %vm683_vm0, %v12908_v48, 0.0 }
0x5c60   :  { %12911 = vadd.xlane.f32.xlu0 %v12910_v27 }
0x5cec   :  { %v12915_v21 = vpop.xlane.xlu1 %12914 }
0x5ced   :  { %v12917_v38 = vmul.f32 0.032258064, %v12915_v21  ;;  %v12912_v40 = vpop.xlane.xlu0 %12911 }
0x5cee   :  { %v12916_v42 = vmul.f32 0.032258064, %v12912_v40 }
0x5cef   :  { %15115 = vrsqrt.f32 %v12917_v38  ;;  %vm12927_vm15 = vcmp.eq.f32.partialorder %v12917_v38, inf  ;;  %v12930_v34 = vand.u32 2147483648, %v12917_v38  ;;  %vm12929_vm11 = vcmp.eq.f32.partialorder %v12917_v38, 0.0 }
0x5cf0   :  { %15117 = vrsqrt.f32 %v12916_v42  ;;  %vm12920_vm12 = vcmp.eq.f32.partialorder %v12916_v42, inf  ;;  %v12923_v54 = vand.u32 2147483648, %v12916_v42  ;;  %vm12922_vm13 = vcmp.eq.f32.partialorder %v12916_v42, 0.0 }
0x5cf9   :  { %v15116_v43 = vpop.eup %15115 }
0x5cfa   :  { %v15118_v1 = vpop.eup %15117  ;;  %v12926_v41 = vmul.f32 %v15116_v43, %v12917_v38 }
0x5cfb   :  { %v12919_v53 = vmul.f32 %v15118_v1, %v12916_v42 }
0x5cfc   :  { %v12928_v36 = vsel %vm12927_vm15, %v12917_v38, %v12926_v41 }
0x5cfd   :  { %v12931_v14 = vsel %vm12929_vm11, %v12930_v34, %v12928_v36  ;;  %v12921_v18 = vsel %vm12920_vm12, %v12916_v42, %v12919_v53 }
0x5cfe   :  { %v12942_v5 = vadd.f32 1e-06, %v12931_v14  ;;  %v12924_v57 = vsel %vm12922_vm13, %v12923_v54, %v12921_v18 }
0x5cff   :  { %v12941_v44 = vadd.f32 1e-06, %v12924_v57 }
0x5d00   :  { %15119 = vrcp.f32 %v12942_v5 }
0x5d01   :  { %15121 = vrcp.f32 %v12941_v44 }
0x5d0a   :  { %v15120_v45 = vpop.eup %15119 }
0x5d0b   :  { %v15122_v52 = vpop.eup %15121  ;;  %v12946_v30 = vmul.f32 %v15120_v45, %v12940_v31 }
0x5d0c   :  { %v12944_v6 = vmul.f32 %v15122_v52, %v12939_v46 }
0x5d0d   :  { %v12955_v39 = vadd.f32 %v13332_v8, %v12946_v30 }
0x5d0e   :  { %v12954_v16 = vadd.f32 %v13332_v8, %v12944_v6 }
0x5d0f   :  { %12957 = vst.msk [vmem:[#allocation53 + $0x8] sm:$0xff] %vm683_vm0, %v12955_v39 }
0x5d10   :  { %12956 = vst.msk [vmem:[#allocation53] sm:$0xff] %vm683_vm0, %v12954_v16 }
0x5d11   :  { %15860 = shalt.err (!%p15857_p2)
}
0x5d12   :  { %s15861_s0 = scalar_lea.hbm %s16397_s4, 256 }
0x5d13   :  { %p15862_p3 = scmp.ne.s32.totalorder %s16397_s4, %s15861_s0  ;;  %p15865_p4 = scmp.lt.u32.totalorder %s15861_s0, %s16397_s4 }
0x5d15   :  { %p15867_p5 = pnand %p15865_p4, %p15862_p3 }
0x5d17   :  { %15870 = shalt.err (!%p15867_p5)
}
0x5d18   :  { %s16027_s1 = smov 128   ;;  %s16028_s14 = smov 8  }
0x5d19   :  { %12969 = dma.vmem_to_hbm [thread:$0]  %s12964_s8, 256, %s16397_s4, [#allocation4], %s16027_s1, %s16027_s1, %s16028_s14  }
0x5d1a   :  { %15905 = dma.done.wait [#allocation4], 256  }
0x5d1b   :  { %15906 = vsyncadd [#allocation4], 4294967040 }
0x5d1c   :  { %12973 = vsyncpa [#allocation3], 1 }
0x5d1d   :  { %12974 = vsyncpa [#allocation6], 1 }
0x5d1e   :  { %12975 = vsyncpa [#allocation9], 1 }
0x5d1f   :  { %12976 = vsyncpa [#allocation12], 1 }
0x5d20   :  { %12977 = vsyncpa [#allocation15], 1 }
0x5d21   :  { %12978 = vsyncpa [#allocation18], 1 }
0x5d22   :  { %12979 = vsyncpa [#allocation21], 1 }
0x5d23   :  { %12980 = vsyncpa [#allocation24], 1 }
0x5d24   :  { %12981 = vsyncpa [#allocation27], 1 }
0x5d25   :  { %12982 = vsyncpa [#allocation30], 1 }
0x5d26   :  { %12983 = vsyncpa [#allocation33], 1 }
0x5d27   :  { %12984 = vsyncpa [#allocation36], 1 }
0x5d28   :  { %12985 = vsyncpa [#allocation39], 1 }
0x5d29   :  { %12986 = vsyncpa [#allocation42], 1 }
0x5d2a   :  { %12987 = vsyncpa [#allocation45], 1 }
0x5d2b   :  { %12988 = vsyncpa [#allocation48], 1 }
0x5d2c   :  { %12989 = vsyncpa [#allocation51], 1 }
0x5d2d   :  { %12990 = vsyncpa [#allocation4], 1 }

</bundles_post_ra>
